<compile_context>
chip_gen: v6e
topology: v6e:2x2x1
jax: 0.10.0
libtpu: 0.0.40
codegen_flags: <defaults>
</compile_context>

<pallas_src>
import functools
import numpy as np

import jax
import jax.numpy as jnp
from jax.experimental import pallas as pl
from jax.experimental.pallas import tpu as pltpu

# ---------------- model config (scaled-down convnext_base, num_classes=10) ----------------
NUM_CLASSES = 10
IMG = 16
IN_CH = 3
PATCH = 4                 # stem conv kernel/stride
DIMS = (32, 64)           # stage widths (base: 128, 256, 512, 1024)
DEPTHS = (2, 2)           # blocks per stage (base: 3, 3, 27, 3)
LN_EPS = 1e-6
LAYER_SCALE_INIT = 1e-6
_NBLK = 9                 # refs per CNBlock
_NPAD = 128               # lane-dense logits padding


# ---------------------------------- in-kernel helpers ----------------------------------
def _mm(x, w, b=None):
    # MXU matmul: activations cast to bf16 (weights already bf16), f32 accumulation.
    y = jnp.dot(x.astype(jnp.bfloat16), w, preferred_element_type=jnp.float32)
    return y if b is None else y + b


def _ln(x, g, b, eps=LN_EPS):
    # LayerNorm over the channel (last) dim; statistics kept in f32.
    x = x.astype(jnp.float32)
    mu = jnp.mean(x, axis=-1, keepdims=True)
    xc = x - mu
    var = jnp.mean(xc * xc, axis=-1, keepdims=True)
    return xc * jax.lax.rsqrt(var + eps) * g + b


def _erf(x):
    # Abramowitz & Stegun 7.1.26 rational approximation (|err| < 1.5e-7).
    # The divide is pushed onto the EUP slot via pl.reciprocal(approx=True).
    a1, a2, a3, a4, a5 = 0.254829592, -0.284496736, 1.421413741, -1.453152027, 1.061405429
    p = 0.3275911
    ax = jnp.abs(x)
    t = pl.reciprocal(1.0 + p * ax, approx=True)
    poly = ((((a5 * t + a4) * t + a3) * t + a2) * t + a1) * t
    y = 1.0 - poly * jnp.exp(-ax * ax)
    return jnp.where(x >= 0, y, -y)


def _gelu(x):
    # nn.GELU default (erf-based), evaluated fully in-kernel.
    return 0.5 * x * (1.0 + _erf(x * 0.7071067811865476))


def _col_masks(S, W):
    """Per horizontal-tap validity for the flattened-row dw-conv.

    Returns a length-7 list; entry dw is 'skip' (tap never valid), 'none' (always valid)
    or a [S, 1] f32 mask built from an in-kernel iota (computed once per kernel body).
    """
    assert W & (W - 1) == 0, "W must be a power of two"
    wcol_np = np.arange(S) % W
    r = jax.lax.broadcasted_iota(jnp.int32, (S, 1), 0)
    wcol = r & (W - 1)                      # r % W (W is a power of two)
    masks = []
    for dw in range(7):
        ow = dw - 3
        valid = (wcol_np + ow >= 0) & (wcol_np + ow < W)
        if not valid.any():
            masks.append('skip')
        elif valid.all():
            masks.append('none')
        else:
            masks.append(((wcol + ow >= 0) & (wcol + ow < W)).astype(jnp.float32))
    return masks


def _dwconv7x7(t, kern_ref, bias, pad_ref, col_masks, S, W):
    """Depthwise 7x7 conv (padding=3) on a flattened [S, C] token slab.

    pad_ref is a VMEM scratch of shape [S + 2*(3*W+3), C] whose halo borders are zero; each
    tap (dh, dw) is a constant row shift of the padded slab.  The horizontal-wrap mask is
    applied ONCE per dw (on the dh-summed partial), and the 7 per-dw partials are independent
    accumulator chains (ILP) summed at the end.
    """
    M = 3 * W + 3
    pad_ref[M:M + S, :] = t
    partials = []
    for dw in range(7):
        cm = col_masks[dw]
        if isinstance(cm, str) and cm == 'skip':
            continue
        part = None
        for dh in range(7):
            shift = (dh - 3) * W + (dw - 3)
            i = dh * 7 + dw
            # NOTE: kern_ref[pl.ds(i, S, stride=0), :] would move this [1,C]->[S,C] broadcast
            # into the vld slot; kept as a [1,C] slice for lowering robustness at these shapes.
            term = pad_ref[M + shift:M + shift + S, :] * kern_ref[i:i + 1, :]
            part = term if part is None else part + term
        if not isinstance(cm, str):
            part = part * cm                 # one mask multiply per dw (was one per tap)
        partials.append(part)
    acc = partials[0]
    for q in partials[1:]:
        acc = acc + q
    return acc + bias


def _cn_block(t, p, pad_ref, col_masks, S, W):
    # torchvision CNBlock: dwconv -> LN -> fc1 -> GELU -> fc2 -> layer_scale; residual add.
    # (Stochastic depth and dropout are identity at inference.)
    dw_k, dw_b, ln_g, ln_b, w1, b1, w2, b2, gamma = p
    y = _dwconv7x7(t, dw_k, dw_b[...], pad_ref, col_masks, S, W)
    y = _ln(y, ln_g[...], ln_b[...])
    y = _gelu(_mm(y, w1[...], b1[...]))
    y = _mm(y, w2[...], b2[...])
    return t + gamma[...] * y


# ---------------------------------- fused forward kernel ----------------------------------
def _convnext_kernel(*refs, nimg, H0, W0, H1, W1, d0, d1):
    C0, C1 = DIMS
    S0, S1 = H0 * W0, H1 * W1
    M0, M1 = 3 * W0 + 3, 3 * W1 + 3

    x_ref = refs[0]
    stem_w, stem_b, stem_g, stem_beta = refs[1:5]
    i = 5
    blk0 = refs[i:i + d0 * _NBLK]; i += d0 * _NBLK
    ds_g, ds_b, rsel, ds_w, ds_bias = refs[i:i + 5]; i += 5
    blk1 = refs[i:i + d1 * _NBLK]; i += d1 * _NBLK
    fn_g, fn_b, head_w, head_b = refs[i:i + 4]; i += 4
    o_ref = refs[i]
    pad0 = refs[i + 1]
    pad1 = refs[i + 2]

    masks0 = _col_masks(S0, W0)
    masks1 = _col_masks(S1, W1)

    # Zero only the halo borders of the dw-conv scratch (the interior is rewritten every block).
    pad0[0:M0, :] = jnp.zeros((M0, C0), jnp.float32)
    pad0[M0 + S0:M0 + S0 + M0, :] = jnp.zeros((M0, C0), jnp.float32)
    pad1[0:M1, :] = jnp.zeros((M1, C1), jnp.float32)
    pad1[M1 + S1:M1 + S1 + M1, :] = jnp.zeros((M1, C1), jnp.float32)

    logits_rows = []
    for img in range(nimg):
        # ---- stem: Conv2d(3, C0, k=4, s=4) as a patch matmul, then LayerNorm2d ----
        t = _mm(x_ref[0, img], stem_w[...], stem_b[...])     # patches already bf16
        t = _ln(t, stem_g[...], stem_beta[...])

        # ---- stage 0 ----
        for bi in range(d0):
            t = _cn_block(t, blk0[bi * _NBLK:(bi + 1) * _NBLK], pad0, masks0, S0, W0)

        # ---- downsample: LayerNorm2d + Conv2d(C0, C1, k=2, s=2) ----
        # The 2x2/s=2 regroup is done in-kernel: for each (kh, kw) chunk j, matmul the whole
        # slab against that weight chunk, then pick the stride-2 rows with a constant 0/1
        # selection matrix (exact, f32).  Equivalent to the regroup+matmul reference path.
        t = _ln(t, ds_g[...], ds_b[...])
        t_bf = t.astype(jnp.bfloat16)
        t1 = None
        for j in range(4):                                   # j = kh*2 + kw
            yj = jnp.dot(t_bf, ds_w[j * C0:(j + 1) * C0, :],
                         preferred_element_type=jnp.float32)            # [S0, C1]
            sj = jnp.dot(rsel[j], yj, preferred_element_type=jnp.float32)  # [S1, C1]
            t1 = sj if t1 is None else t1 + sj
        t1 = t1 + ds_bias[...]

        # ---- stage 1 ----
        for bi in range(d1):
            t1 = _cn_block(t1, blk1[bi * _NBLK:(bi + 1) * _NBLK], pad1, masks1, S1, W1)

        # ---- head: AdaptiveAvgPool2d(1) -> LayerNorm2d -> Flatten -> Linear (f32) ----
        pooled = jnp.mean(t1, axis=0, keepdims=True)         # [1, C1]
        pooled = _ln(pooled, fn_g[...], fn_b[...])
        logits = jnp.dot(pooled, head_w[...], preferred_element_type=jnp.float32) + head_b[...]
        logits_rows.append(logits)

    # Lane-dense (128-wide) store; wrapper slices the first NUM_CLASSES columns.
    o_ref[0] = jnp.concatenate(logits_rows, axis=0).astype(o_ref.dtype)


# ---------------------------------- pallas_call wrapper ----------------------------------
def _const_spec(a):
    nd = a.ndim
    return pl.BlockSpec(a.shape, lambda s, _nd=nd: (0,) * _nd)


def _block_args(blk):
    return [blk['dw_k'], blk['dw_b'], blk['ln_g'], blk['ln_b'],
            blk['fc1_w'], blk['fc1_b'], blk['fc2_w'], blk['fc2_b'], blk['gamma']]


def prepare_params(params):
    """One-time wrapper-side prep: bf16 matmul weights, lane-padded head, regroup selector."""
    C0, C1 = DIMS
    bf = lambda a: a.astype(jnp.bfloat16)
    H0 = W0 = IMG // PATCH
    H1, W1 = H0 // 2, W0 // 2
    S0, S1 = H0 * W0, H1 * W1

    # Constant 0/1 selection matrices for the 2x2/s=2 downsample (j = kh*2 + kw).
    rsel = np.zeros((4, S1, S0), np.float32)
    for kh in range(2):
        for kw in range(2):
            j = kh * 2 + kw
            for h2 in range(H1):
                for w2 in range(W1):
                    rsel[j, h2 * W1 + w2, (2 * h2 + kh) * W0 + (2 * w2 + kw)] = 1.0

    head_w = jnp.zeros((C1, _NPAD), jnp.float32).at[:, :NUM_CLASSES].set(params['head']['w'])
    head_b = jnp.zeros((1, _NPAD), jnp.float32).at[:, :NUM_CLASSES].set(params['head']['b'])

    def prep_block(blk):
        b = dict(blk)
        b['fc1_w'] = bf(blk['fc1_w'])
        b['fc2_w'] = bf(blk['fc2_w'])
        return b

    return {
        'stem_w': bf(params['stem']['w']), 'stem_b': params['stem']['b'],
        'stem_g': params['stem']['g'], 'stem_beta': params['stem']['beta'],
        'stage0': [prep_block(b) for b in params['stage0']],
        'ds_g': params['ds']['g'], 'ds_b': params['ds']['b'],
        'rsel': jnp.asarray(rsel),
        'ds_w': bf(params['ds']['w']), 'ds_bias': params['ds']['bias'],
        'stage1': [prep_block(b) for b in params['stage1']],
        'fn_g': params['final_norm']['g'], 'fn_b': params['final_norm']['b'],
        'head_w': head_w, 'head_b': head_b,
    }


def convnext_forward(prep, x_nchw):
    B, Cin, Hi, Wi = x_nchw.shape
    P = PATCH
    H0, W0 = Hi // P, Wi // P
    S0, K0 = H0 * W0, Cin * P * P
    H1, W1 = H0 // 2, W0 // 2
    S1 = H1 * W1
    C0, C1 = DIMS
    d0, d1 = DEPTHS
    assert prep['rsel'].shape == (4, S1, S0)

    # Exactly 2 parallel grid steps (one per v7x TensorCore); batch halves folded per step.
    nsteps = 2 if (B >= 2 and B % 2 == 0) else 1
    nimg = B // nsteps

    # Stem Conv2d(k=4, s=4) == non-overlapping patch unfold (c, kh, kw order), pre-cast to bf16.
    patches = (x_nchw.reshape(B, Cin, H0, P, W0, P)
               .transpose(0, 2, 4, 1, 3, 5)
               .reshape(nsteps, nimg, S0, K0)
               .astype(jnp.bfloat16))

    args = [patches, prep['stem_w'], prep['stem_b'], prep['stem_g'], prep['stem_beta']]
    for blk in prep['stage0']:
        args += _block_args(blk)
    args += [prep['ds_g'], prep['ds_b'], prep['rsel'], prep['ds_w'], prep['ds_bias']]
    for blk in prep['stage1']:
        args += _block_args(blk)
    args += [prep['fn_g'], prep['fn_b'], prep['head_w'], prep['head_b']]

    in_specs = [pl.BlockSpec((1, nimg, S0, K0), lambda s: (s, 0, 0, 0))]
    in_specs += [_const_spec(a) for a in args[1:]]

    M0, M1 = 3 * W0 + 3, 3 * W1 + 3
    out = pl.pallas_call(
        functools.partial(_convnext_kernel,
                          nimg=nimg, H0=H0, W0=W0, H1=H1, W1=W1, d0=d0, d1=d1),
        out_shape=jax.ShapeDtypeStruct((nsteps, nimg, _NPAD), jnp.float32),
        grid=(nsteps,),
        in_specs=in_specs,
        out_specs=pl.BlockSpec((1, nimg, _NPAD), lambda s: (s, 0, 0)),
        scratch_shapes=[pltpu.VMEM((S0 + 2 * M0, C0), jnp.float32),
                        pltpu.VMEM((S1 + 2 * M1, C1), jnp.float32)],
        compiler_params=pltpu.CompilerParams(dimension_semantics=("parallel",)),
    )(*args)
    return out.reshape(B, _NPAD)[:, :NUM_CLASSES]


# --------------------------------- parameter init ----------------------------------
def init_params(key):
    keys = iter(jax.random.split(key, 64))

    def nrm(shape, scale=0.02):
        return scale * jax.random.normal(next(keys), shape, dtype=jnp.float32)

    def zeros(s):
        return jnp.zeros(s, jnp.float32)

    def ones(s):
        return jnp.ones(s, jnp.float32)

    def block(dim):
        return {
            'dw_k': nrm((49, dim)),                 # depthwise 7x7 kernel, rows in (dh, dw) order
            'dw_b': zeros((1, dim)),
            'ln_g': ones((1, dim)), 'ln_b': zeros((1, dim)),
            'fc1_w': nrm((dim, 4 * dim)), 'fc1_b': zeros((1, 4 * dim)),
            'fc2_w': nrm((4 * dim, dim)), 'fc2_b': zeros((1, dim)),
            'gamma': jnp.full((1, dim), LAYER_SCALE_INIT, jnp.float32),
        }

    C0, C1 = DIMS
    return {
        'stem': {'w': nrm((IN_CH * PATCH * PATCH, C0)), 'b': zeros((1, C0)),
                 'g': ones((1, C0)), 'beta': zeros((1, C0))},
        'stage0': [block(C0) for _ in range(DEPTHS[0])],
        'ds': {'g': ones((1, C0)), 'b': zeros((1, C0)),               # downsample LayerNorm2d
               'w': nrm((4 * C0, C1)), 'bias': zeros((1, C1))},       # 2x2/s2 conv, rows (kh,kw,c)
        'stage1': [block(C1) for _ in range(DEPTHS[1])],
        'final_norm': {'g': ones((1, C1)), 'b': zeros((1, C1))},
        'head': {'w': nrm((C1, NUM_CLASSES)), 'b': zeros((1, NUM_CLASSES))},
    }


if __name__ == "__main__":
    key = jax.random.PRNGKey(0)
    pkey, xkey = jax.random.split(key)
    params = init_params(pkey)
    prep = prepare_params(params)                                        # one-time bf16/pad prep
    x = jax.random.normal(xkey, (2, IN_CH, IMG, IMG), dtype=jnp.float32)  # NCHW like PyTorch

    fwd = jax.jit(convnext_forward)
    logits = jax.block_until_ready(fwd(prep, x))

    assert logits.shape == (2, NUM_CLASSES)
    assert bool(jnp.all(jnp.isfinite(logits)))
    print("KERNEL_OK")
</pallas_src>

<mosaic_0001>
module attributes {stable_mosaic.version = 11 : i64} {
  func.func @_convnext_kernel(%arg0: i32, %arg1: memref<1x1x16x48xbf16, #tpu.memory_space<vmem>>, %arg2: memref<48x32xbf16, #tpu.memory_space<vmem>>, %arg3: memref<1x32xf32, #tpu.memory_space<vmem>>, %arg4: memref<1x32xf32, #tpu.memory_space<vmem>>, %arg5: memref<1x32xf32, #tpu.memory_space<vmem>>, %arg6: memref<49x32xf32, #tpu.memory_space<vmem>>, %arg7: memref<1x32xf32, #tpu.memory_space<vmem>>, %arg8: memref<1x32xf32, #tpu.memory_space<vmem>>, %arg9: memref<1x32xf32, #tpu.memory_space<vmem>>, %arg10: memref<32x128xbf16, #tpu.memory_space<vmem>>, %arg11: memref<1x128xf32, #tpu.memory_space<vmem>>, %arg12: memref<128x32xbf16, #tpu.memory_space<vmem>>, %arg13: memref<1x32xf32, #tpu.memory_space<vmem>>, %arg14: memref<1x32xf32, #tpu.memory_space<vmem>>, %arg15: memref<49x32xf32, #tpu.memory_space<vmem>>, %arg16: memref<1x32xf32, #tpu.memory_space<vmem>>, %arg17: memref<1x32xf32, #tpu.memory_space<vmem>>, %arg18: memref<1x32xf32, #tpu.memory_space<vmem>>, %arg19: memref<32x128xbf16, #tpu.memory_space<vmem>>, %arg20: memref<1x128xf32, #tpu.memory_space<vmem>>, %arg21: memref<128x32xbf16, #tpu.memory_space<vmem>>, %arg22: memref<1x32xf32, #tpu.memory_space<vmem>>, %arg23: memref<1x32xf32, #tpu.memory_space<vmem>>, %arg24: memref<1x32xf32, #tpu.memory_space<vmem>>, %arg25: memref<1x32xf32, #tpu.memory_space<vmem>>, %arg26: memref<4x4x16xf32, #tpu.memory_space<vmem>>, %arg27: memref<128x64xbf16, #tpu.memory_space<vmem>>, %arg28: memref<1x64xf32, #tpu.memory_space<vmem>>, %arg29: memref<49x64xf32, #tpu.memory_space<vmem>>, %arg30: memref<1x64xf32, #tpu.memory_space<vmem>>, %arg31: memref<1x64xf32, #tpu.memory_space<vmem>>, %arg32: memref<1x64xf32, #tpu.memory_space<vmem>>, %arg33: memref<64x256xbf16, #tpu.memory_space<vmem>>, %arg34: memref<1x256xf32, #tpu.memory_space<vmem>>, %arg35: memref<256x64xbf16, #tpu.memory_space<vmem>>, %arg36: memref<1x64xf32, #tpu.memory_space<vmem>>, %arg37: memref<1x64xf32, #tpu.memory_space<vmem>>, %arg38: memref<49x64xf32, #tpu.memory_space<vmem>>, %arg39: memref<1x64xf32, #tpu.memory_space<vmem>>, %arg40: memref<1x64xf32, #tpu.memory_space<vmem>>, %arg41: memref<1x64xf32, #tpu.memory_space<vmem>>, %arg42: memref<64x256xbf16, #tpu.memory_space<vmem>>, %arg43: memref<1x256xf32, #tpu.memory_space<vmem>>, %arg44: memref<256x64xbf16, #tpu.memory_space<vmem>>, %arg45: memref<1x64xf32, #tpu.memory_space<vmem>>, %arg46: memref<1x64xf32, #tpu.memory_space<vmem>>, %arg47: memref<1x64xf32, #tpu.memory_space<vmem>>, %arg48: memref<1x64xf32, #tpu.memory_space<vmem>>, %arg49: memref<64x128xf32, #tpu.memory_space<vmem>>, %arg50: memref<1x128xf32, #tpu.memory_space<vmem>>, %arg51: memref<1x1x128xf32, #tpu.memory_space<vmem>>, %arg52: memref<46x32xf32, #tpu.memory_space<vmem>>, %arg53: memref<22x64xf32, #tpu.memory_space<vmem>>) attributes {dimension_semantics = [#tpu.dimension_semantics<parallel>], iteration_bounds = array<i64: 2>, scalar_prefetch = 0 : i64, scratch_operands = 2 : i64, tpu.core_type = #tpu.core_type<tc>, window_params = [{transform_indices = @transform_0, window_bounds = array<i64: 1, 1, 16, 48>}, {pipeline_mode = #tpu.pipeline_mode<synchronous>, transform_indices = @transform_1, window_bounds = array<i64: 48, 32>}, {pipeline_mode = #tpu.pipeline_mode<synchronous>, transform_indices = @transform_2, window_bounds = array<i64: 1, 32>}, {pipeline_mode = #tpu.pipeline_mode<synchronous>, transform_indices = @transform_3, window_bounds = array<i64: 1, 32>}, {pipeline_mode = #tpu.pipeline_mode<synchronous>, transform_indices = @transform_4, window_bounds = array<i64: 1, 32>}, {pipeline_mode = #tpu.pipeline_mode<synchronous>, transform_indices = @transform_5, window_bounds = array<i64: 49, 32>}, {pipeline_mode = #tpu.pipeline_mode<synchronous>, transform_indices = @transform_6, window_bounds = array<i64: 1, 32>}, {pipeline_mode = #tpu.pipeline_mode<synchronous>, transform_indices = @transform_7, window_bounds = array<i64: 1, 32>}, {pipeline_mode = #tpu.pipeline_mode<synchronous>, transform_indices = @transform_8, window_bounds = array<i64: 1, 32>}, {pipeline_mode = #tpu.pipeline_mode<synchronous>, transform_indices = @transform_9, window_bounds = array<i64: 32, 128>}, {pipeline_mode = #tpu.pipeline_mode<synchronous>, transform_indices = @transform_10, window_bounds = array<i64: 1, 128>}, {pipeline_mode = #tpu.pipeline_mode<synchronous>, transform_indices = @transform_11, window_bounds = array<i64: 128, 32>}, {pipeline_mode = #tpu.pipeline_mode<synchronous>, transform_indices = @transform_12, window_bounds = array<i64: 1, 32>}, {pipeline_mode = #tpu.pipeline_mode<synchronous>, transform_indices = @transform_13, window_bounds = array<i64: 1, 32>}, {pipeline_mode = #tpu.pipeline_mode<synchronous>, transform_indices = @transform_14, window_bounds = array<i64: 49, 32>}, {pipeline_mode = #tpu.pipeline_mode<synchronous>, transform_indices = @transform_15, window_bounds = array<i64: 1, 32>}, {pipeline_mode = #tpu.pipeline_mode<synchronous>, transform_indices = @transform_16, window_bounds = array<i64: 1, 32>}, {pipeline_mode = #tpu.pipeline_mode<synchronous>, transform_indices = @transform_17, window_bounds = array<i64: 1, 32>}, {pipeline_mode = #tpu.pipeline_mode<synchronous>, transform_indices = @transform_18, window_bounds = array<i64: 32, 128>}, {pipeline_mode = #tpu.pipeline_mode<synchronous>, transform_indices = @transform_19, window_bounds = array<i64: 1, 128>}, {pipeline_mode = #tpu.pipeline_mode<synchronous>, transform_indices = @transform_20, window_bounds = array<i64: 128, 32>}, {pipeline_mode = #tpu.pipeline_mode<synchronous>, transform_indices = @transform_21, window_bounds = array<i64: 1, 32>}, {pipeline_mode = #tpu.pipeline_mode<synchronous>, transform_indices = @transform_22, window_bounds = array<i64: 1, 32>}, {pipeline_mode = #tpu.pipeline_mode<synchronous>, transform_indices = @transform_23, window_bounds = array<i64: 1, 32>}, {pipeline_mode = #tpu.pipeline_mode<synchronous>, transform_indices = @transform_24, window_bounds = array<i64: 1, 32>}, {pipeline_mode = #tpu.pipeline_mode<synchronous>, transform_indices = @transform_25, window_bounds = array<i64: 4, 4, 16>}, {pipeline_mode = #tpu.pipeline_mode<synchronous>, transform_indices = @transform_26, window_bounds = array<i64: 128, 64>}, {pipeline_mode = #tpu.pipeline_mode<synchronous>, transform_indices = @transform_27, window_bounds = array<i64: 1, 64>}, {pipeline_mode = #tpu.pipeline_mode<synchronous>, transform_indices = @transform_28, window_bounds = array<i64: 49, 64>}, {pipeline_mode = #tpu.pipeline_mode<synchronous>, transform_indices = @transform_29, window_bounds = array<i64: 1, 64>}, {pipeline_mode = #tpu.pipeline_mode<synchronous>, transform_indices = @transform_30, window_bounds = array<i64: 1, 64>}, {pipeline_mode = #tpu.pipeline_mode<synchronous>, transform_indices = @transform_31, window_bounds = array<i64: 1, 64>}, {pipeline_mode = #tpu.pipeline_mode<synchronous>, transform_indices = @transform_32, window_bounds = array<i64: 64, 256>}, {pipeline_mode = #tpu.pipeline_mode<synchronous>, transform_indices = @transform_33, window_bounds = array<i64: 1, 256>}, {pipeline_mode = #tpu.pipeline_mode<synchronous>, transform_indices = @transform_34, window_bounds = array<i64: 256, 64>}, {pipeline_mode = #tpu.pipeline_mode<synchronous>, transform_indices = @transform_35, window_bounds = array<i64: 1, 64>}, {pipeline_mode = #tpu.pipeline_mode<synchronous>, transform_indices = @transform_36, window_bounds = array<i64: 1, 64>}, {pipeline_mode = #tpu.pipeline_mode<synchronous>, transform_indices = @transform_37, window_bounds = array<i64: 49, 64>}, {pipeline_mode = #tpu.pipeline_mode<synchronous>, transform_indices = @transform_38, window_bounds = array<i64: 1, 64>}, {pipeline_mode = #tpu.pipeline_mode<synchronous>, transform_indices = @transform_39, window_bounds = array<i64: 1, 64>}, {pipeline_mode = #tpu.pipeline_mode<synchronous>, transform_indices = @transform_40, window_bounds = array<i64: 1, 64>}, {pipeline_mode = #tpu.pipeline_mode<synchronous>, transform_indices = @transform_41, window_bounds = array<i64: 64, 256>}, {pipeline_mode = #tpu.pipeline_mode<synchronous>, transform_indices = @transform_42, window_bounds = array<i64: 1, 256>}, {pipeline_mode = #tpu.pipeline_mode<synchronous>, transform_indices = @transform_43, window_bounds = array<i64: 256, 64>}, {pipeline_mode = #tpu.pipeline_mode<synchronous>, transform_indices = @transform_44, window_bounds = array<i64: 1, 64>}, {pipeline_mode = #tpu.pipeline_mode<synchronous>, transform_indices = @transform_45, window_bounds = array<i64: 1, 64>}, {pipeline_mode = #tpu.pipeline_mode<synchronous>, transform_indices = @transform_46, window_bounds = array<i64: 1, 64>}, {pipeline_mode = #tpu.pipeline_mode<synchronous>, transform_indices = @transform_47, window_bounds = array<i64: 1, 64>}, {pipeline_mode = #tpu.pipeline_mode<synchronous>, transform_indices = @transform_48, window_bounds = array<i64: 64, 128>}, {pipeline_mode = #tpu.pipeline_mode<synchronous>, transform_indices = @transform_49, window_bounds = array<i64: 1, 128>}, {transform_indices = @transform_50, window_bounds = array<i64: 1, 1, 128>}]} {
    %0 = tpu.iota {dimensions = array<i32: 0>} : vector<16x1xi32>
    %c3_i32 = arith.constant 3 : i32
    %1 = vector.broadcast %c3_i32 : i32 to vector<16x1xi32>
    %2 = arith.andi %0, %1 : vector<16x1xi32>
    %c-3_i32 = arith.constant -3 : i32
    %3 = vector.broadcast %c-3_i32 : i32 to vector<16x1xi32>
    %4 = arith.addi %2, %3 : vector<16x1xi32>
    %c0_i32 = arith.constant 0 : i32
    %5 = vector.broadcast %c0_i32 : i32 to vector<16x1xi32>
    %6 = arith.cmpi sge, %4, %5 : vector<16x1xi32>
    %c-3_i32_0 = arith.constant -3 : i32
    %7 = vector.broadcast %c-3_i32_0 : i32 to vector<16x1xi32>
    %8 = arith.addi %2, %7 : vector<16x1xi32>
    %c4_i32 = arith.constant 4 : i32
    %9 = vector.broadcast %c4_i32 : i32 to vector<16x1xi32>
    %10 = arith.cmpi slt, %8, %9 : vector<16x1xi32>
    %11 = arith.andi %6, %10 : vector<16x1xi1>
    %12 = arith.extui %11 : vector<16x1xi1> to vector<16x1xi32>
    %13 = arith.sitofp %12 : vector<16x1xi32> to vector<16x1xf32>
    %c-2_i32 = arith.constant -2 : i32
    %14 = vector.broadcast %c-2_i32 : i32 to vector<16x1xi32>
    %15 = arith.addi %2, %14 : vector<16x1xi32>
    %c0_i32_1 = arith.constant 0 : i32
    %16 = vector.broadcast %c0_i32_1 : i32 to vector<16x1xi32>
    %17 = arith.cmpi sge, %15, %16 : vector<16x1xi32>
    %c-2_i32_2 = arith.constant -2 : i32
    %18 = vector.broadcast %c-2_i32_2 : i32 to vector<16x1xi32>
    %19 = arith.addi %2, %18 : vector<16x1xi32>
    %c4_i32_3 = arith.constant 4 : i32
    %20 = vector.broadcast %c4_i32_3 : i32 to vector<16x1xi32>
    %21 = arith.cmpi slt, %19, %20 : vector<16x1xi32>
    %22 = arith.andi %17, %21 : vector<16x1xi1>
    %23 = arith.extui %22 : vector<16x1xi1> to vector<16x1xi32>
    %24 = arith.sitofp %23 : vector<16x1xi32> to vector<16x1xf32>
    %c-1_i32 = arith.constant -1 : i32
    %25 = vector.broadcast %c-1_i32 : i32 to vector<16x1xi32>
    %26 = arith.addi %2, %25 : vector<16x1xi32>
    %c0_i32_4 = arith.constant 0 : i32
    %27 = vector.broadcast %c0_i32_4 : i32 to vector<16x1xi32>
    %28 = arith.cmpi sge, %26, %27 : vector<16x1xi32>
    %c-1_i32_5 = arith.constant -1 : i32
    %29 = vector.broadcast %c-1_i32_5 : i32 to vector<16x1xi32>
    %30 = arith.addi %2, %29 : vector<16x1xi32>
    %c4_i32_6 = arith.constant 4 : i32
    %31 = vector.broadcast %c4_i32_6 : i32 to vector<16x1xi32>
    %32 = arith.cmpi slt, %30, %31 : vector<16x1xi32>
    %33 = arith.andi %28, %32 : vector<16x1xi1>
    %34 = arith.extui %33 : vector<16x1xi1> to vector<16x1xi32>
    %35 = arith.sitofp %34 : vector<16x1xi32> to vector<16x1xf32>
    %c1_i32 = arith.constant 1 : i32
    %36 = vector.broadcast %c1_i32 : i32 to vector<16x1xi32>
    %37 = arith.addi %2, %36 : vector<16x1xi32>
    %c0_i32_7 = arith.constant 0 : i32
    %38 = vector.broadcast %c0_i32_7 : i32 to vector<16x1xi32>
    %39 = arith.cmpi sge, %37, %38 : vector<16x1xi32>
    %c1_i32_8 = arith.constant 1 : i32
    %40 = vector.broadcast %c1_i32_8 : i32 to vector<16x1xi32>
    %41 = arith.addi %2, %40 : vector<16x1xi32>
    %c4_i32_9 = arith.constant 4 : i32
    %42 = vector.broadcast %c4_i32_9 : i32 to vector<16x1xi32>
    %43 = arith.cmpi slt, %41, %42 : vector<16x1xi32>
    %44 = arith.andi %39, %43 : vector<16x1xi1>
    %45 = arith.extui %44 : vector<16x1xi1> to vector<16x1xi32>
    %46 = arith.sitofp %45 : vector<16x1xi32> to vector<16x1xf32>
    %c2_i32 = arith.constant 2 : i32
    %47 = vector.broadcast %c2_i32 : i32 to vector<16x1xi32>
    %48 = arith.addi %2, %47 : vector<16x1xi32>
    %c0_i32_10 = arith.constant 0 : i32
    %49 = vector.broadcast %c0_i32_10 : i32 to vector<16x1xi32>
    %50 = arith.cmpi sge, %48, %49 : vector<16x1xi32>
    %c2_i32_11 = arith.constant 2 : i32
    %51 = vector.broadcast %c2_i32_11 : i32 to vector<16x1xi32>
    %52 = arith.addi %2, %51 : vector<16x1xi32>
    %c4_i32_12 = arith.constant 4 : i32
    %53 = vector.broadcast %c4_i32_12 : i32 to vector<16x1xi32>
    %54 = arith.cmpi slt, %52, %53 : vector<16x1xi32>
    %55 = arith.andi %50, %54 : vector<16x1xi1>
    %56 = arith.extui %55 : vector<16x1xi1> to vector<16x1xi32>
    %57 = arith.sitofp %56 : vector<16x1xi32> to vector<16x1xf32>
    %c3_i32_13 = arith.constant 3 : i32
    %58 = vector.broadcast %c3_i32_13 : i32 to vector<16x1xi32>
    %59 = arith.addi %2, %58 : vector<16x1xi32>
    %c0_i32_14 = arith.constant 0 : i32
    %60 = vector.broadcast %c0_i32_14 : i32 to vector<16x1xi32>
    %61 = arith.cmpi sge, %59, %60 : vector<16x1xi32>
    %c3_i32_15 = arith.constant 3 : i32
    %62 = vector.broadcast %c3_i32_15 : i32 to vector<16x1xi32>
    %63 = arith.addi %2, %62 : vector<16x1xi32>
    %c4_i32_16 = arith.constant 4 : i32
    %64 = vector.broadcast %c4_i32_16 : i32 to vector<16x1xi32>
    %65 = arith.cmpi slt, %63, %64 : vector<16x1xi32>
    %66 = arith.andi %61, %65 : vector<16x1xi1>
    %67 = arith.extui %66 : vector<16x1xi1> to vector<16x1xi32>
    %68 = arith.sitofp %67 : vector<16x1xi32> to vector<16x1xf32>
    %69 = tpu.iota {dimensions = array<i32: 0>} : vector<4x1xi32>
    %c1_i32_17 = arith.constant 1 : i32
    %70 = vector.broadcast %c1_i32_17 : i32 to vector<4x1xi32>
    %71 = arith.andi %69, %70 : vector<4x1xi32>
    %c-1_i32_18 = arith.constant -1 : i32
    %72 = vector.broadcast %c-1_i32_18 : i32 to vector<4x1xi32>
    %73 = arith.addi %71, %72 : vector<4x1xi32>
    %c0_i32_19 = arith.constant 0 : i32
    %74 = vector.broadcast %c0_i32_19 : i32 to vector<4x1xi32>
    %75 = arith.cmpi sge, %73, %74 : vector<4x1xi32>
    %c-1_i32_20 = arith.constant -1 : i32
    %76 = vector.broadcast %c-1_i32_20 : i32 to vector<4x1xi32>
    %77 = arith.addi %71, %76 : vector<4x1xi32>
    %c2_i32_21 = arith.constant 2 : i32
    %78 = vector.broadcast %c2_i32_21 : i32 to vector<4x1xi32>
    %79 = arith.cmpi slt, %77, %78 : vector<4x1xi32>
    %80 = arith.andi %75, %79 : vector<4x1xi1>
    %81 = arith.extui %80 : vector<4x1xi1> to vector<4x1xi32>
    %82 = arith.sitofp %81 : vector<4x1xi32> to vector<4x1xf32>
    %c1_i32_22 = arith.constant 1 : i32
    %83 = vector.broadcast %c1_i32_22 : i32 to vector<4x1xi32>
    %84 = arith.addi %71, %83 : vector<4x1xi32>
    %c0_i32_23 = arith.constant 0 : i32
    %85 = vector.broadcast %c0_i32_23 : i32 to vector<4x1xi32>
    %86 = arith.cmpi sge, %84, %85 : vector<4x1xi32>
    %c1_i32_24 = arith.constant 1 : i32
    %87 = vector.broadcast %c1_i32_24 : i32 to vector<4x1xi32>
    %88 = arith.addi %71, %87 : vector<4x1xi32>
    %c2_i32_25 = arith.constant 2 : i32
    %89 = vector.broadcast %c2_i32_25 : i32 to vector<4x1xi32>
    %90 = arith.cmpi slt, %88, %89 : vector<4x1xi32>
    %91 = arith.andi %86, %90 : vector<4x1xi1>
    %92 = arith.extui %91 : vector<4x1xi1> to vector<4x1xi32>
    %93 = arith.sitofp %92 : vector<4x1xi32> to vector<4x1xf32>
    %cst = arith.constant 0.000000e+00 : f32
    %94 = vector.broadcast %cst : f32 to vector<15x32xf32>
    %c0 = arith.constant 0 : index
    %c0_26 = arith.constant 0 : index
    %95 = vector.load %arg52[%c0, %c0_26] : memref<46x32xf32, #tpu.memory_space<vmem>>, vector<15x32xf32>
    tpu.vector_store %arg52[%c0, %c0_26], %94 {strides = array<i32>} : memref<46x32xf32, #tpu.memory_space<vmem>>, vector<15x32xf32>,
    %cst_27 = arith.constant 0.000000e+00 : f32
    %96 = vector.broadcast %cst_27 : f32 to vector<15x32xf32>
    %c31 = arith.constant 31 : index
    %c0_28 = arith.constant 0 : index
    %97 = vector.load %arg52[%c31, %c0_28] : memref<46x32xf32, #tpu.memory_space<vmem>>, vector<15x32xf32>
    tpu.vector_store %arg52[%c31, %c0_28], %96 {strides = array<i32>} : memref<46x32xf32, #tpu.memory_space<vmem>>, vector<15x32xf32>,
    %cst_29 = arith.constant 0.000000e+00 : f32
    %98 = vector.broadcast %cst_29 : f32 to vector<9x64xf32>
    %c0_30 = arith.constant 0 : index
    %c0_31 = arith.constant 0 : index
    %99 = vector.load %arg53[%c0_30, %c0_31] : memref<22x64xf32, #tpu.memory_space<vmem>>, vector<9x64xf32>
    tpu.vector_store %arg53[%c0_30, %c0_31], %98 {strides = array<i32>} : memref<22x64xf32, #tpu.memory_space<vmem>>, vector<9x64xf32>,
    %cst_32 = arith.constant 0.000000e+00 : f32
    %100 = vector.broadcast %cst_32 : f32 to vector<9x64xf32>
    %c13 = arith.constant 13 : index
    %c0_33 = arith.constant 0 : index
    %101 = vector.load %arg53[%c13, %c0_33] : memref<22x64xf32, #tpu.memory_space<vmem>>, vector<9x64xf32>
    tpu.vector_store %arg53[%c13, %c0_33], %100 {strides = array<i32>} : memref<22x64xf32, #tpu.memory_space<vmem>>, vector<9x64xf32>,
    %c0_34 = arith.constant 0 : index
    %c0_35 = arith.constant 0 : index
    %c0_36 = arith.constant 0 : index
    %c0_37 = arith.constant 0 : index
    %102 = vector.load %arg1[%c0_34, %c0_35, %c0_36, %c0_37] : memref<1x1x16x48xbf16, #tpu.memory_space<vmem>>, vector<1x1x16x48xbf16>
    %103 = vector.shape_cast %102 : vector<1x1x16x48xbf16> to vector<16x48xbf16>
    %c0_38 = arith.constant 0 : index
    %c0_39 = arith.constant 0 : index
    %104 = vector.load %arg2[%c0_38, %c0_39] : memref<48x32xbf16, #tpu.memory_space<vmem>>, vector<48x32xbf16>
    %c0_40 = arith.constant 0 : index
    %c0_41 = arith.constant 0 : index
    %105 = vector.load %arg3[%c0_40, %c0_41] : memref<1x32xf32, #tpu.memory_space<vmem>>, vector<1x32xf32>
    %cst_42 = arith.constant dense<0.000000e+00> : vector<16x32xf32>
    %106 = tpu.matmul %103, %104, %cst_42 {dimension_numbers = #tpu.dot_dimension_numbers<[1], [0], [0], [1], [0, 0, 1, 1], [], []>} : vector<16x48xbf16>, vector<48x32xbf16>, vector<16x32xf32> -> vector<16x32xf32>
    %107 = vector.broadcast %105 : vector<1x32xf32> to vector<16x32xf32>
    %108 = arith.addf %106, %107 : vector<16x32xf32>
    %c0_43 = arith.constant 0 : index
    %c0_44 = arith.constant 0 : index
    %109 = vector.load %arg4[%c0_43, %c0_44] : memref<1x32xf32, #tpu.memory_space<vmem>>, vector<1x32xf32>
    %c0_45 = arith.constant 0 : index
    %c0_46 = arith.constant 0 : index
    %110 = vector.load %arg5[%c0_45, %c0_46] : memref<1x32xf32, #tpu.memory_space<vmem>>, vector<1x32xf32>
    %cst_47 = arith.constant dense<0.000000e+00> : vector<16xf32>
    %111 = vector.multi_reduction <add>, %108, %cst_47 [1] : vector<16x32xf32> to vector<16xf32>
    %112 = vector.shape_cast %111 : vector<16xf32> to vector<16x1xf32>
    %cst_48 = arith.constant 3.200000e+01 : f32
    %113 = vector.broadcast %cst_48 : f32 to vector<16x1xf32>
    %114 = arith.divf %112, %113 : vector<16x1xf32>
    %115 = vector.broadcast %114 : vector<16x1xf32> to vector<16x32xf32>
    %116 = arith.subf %108, %115 : vector<16x32xf32>
    %117 = arith.mulf %116, %116 : vector<16x32xf32>
    %cst_49 = arith.constant dense<0.000000e+00> : vector<16xf32>
    %118 = vector.multi_reduction <add>, %117, %cst_49 [1] : vector<16x32xf32> to vector<16xf32>
    %119 = vector.shape_cast %118 : vector<16xf32> to vector<16x1xf32>
    %cst_50 = arith.constant 3.200000e+01 : f32
    %120 = vector.broadcast %cst_50 : f32 to vector<16x1xf32>
    %121 = arith.divf %119, %120 : vector<16x1xf32>
    %cst_51 = arith.constant 9.99999997E-7 : f32
    %122 = vector.broadcast %cst_51 : f32 to vector<16x1xf32>
    %123 = arith.addf %121, %122 : vector<16x1xf32>
    %124 = math.rsqrt %123 : vector<16x1xf32>
    %125 = vector.broadcast %124 : vector<16x1xf32> to vector<16x32xf32>
    %126 = arith.mulf %116, %125 : vector<16x32xf32>
    %127 = vector.broadcast %109 : vector<1x32xf32> to vector<16x32xf32>
    %128 = arith.mulf %126, %127 : vector<16x32xf32>
    %129 = vector.broadcast %110 : vector<1x32xf32> to vector<16x32xf32>
    %130 = arith.addf %128, %129 : vector<16x32xf32>
    %c0_52 = arith.constant 0 : index
    %c0_53 = arith.constant 0 : index
    %131 = vector.load %arg7[%c0_52, %c0_53] : memref<1x32xf32, #tpu.memory_space<vmem>>, vector<1x32xf32>
    %c15 = arith.constant 15 : index
    %c0_54 = arith.constant 0 : index
    %132 = vector.load %arg52[%c15, %c0_54] : memref<46x32xf32, #tpu.memory_space<vmem>>, vector<16x32xf32>
    tpu.vector_store %arg52[%c15, %c0_54], %130 {strides = array<i32>} : memref<46x32xf32, #tpu.memory_space<vmem>>, vector<16x32xf32>,
    %c0_55 = arith.constant 0 : index
    %c0_56 = arith.constant 0 : index
    %133 = vector.load %arg52[%c0_55, %c0_56] : memref<46x32xf32, #tpu.memory_space<vmem>>, vector<16x32xf32>
    %c0_57 = arith.constant 0 : index
    %c0_58 = arith.constant 0 : index
    %134 = vector.load %arg6[%c0_57, %c0_58] : memref<49x32xf32, #tpu.memory_space<vmem>>, vector<1x32xf32>
    %135 = vector.broadcast %134 : vector<1x32xf32> to vector<16x32xf32>
    %136 = arith.mulf %133, %135 : vector<16x32xf32>
    %c4 = arith.constant 4 : index
    %c0_59 = arith.constant 0 : index
    %137 = vector.load %arg52[%c4, %c0_59] : memref<46x32xf32, #tpu.memory_space<vmem>>, vector<16x32xf32>
    %c7 = arith.constant 7 : index
    %c0_60 = arith.constant 0 : index
    %138 = vector.load %arg6[%c7, %c0_60] : memref<49x32xf32, #tpu.memory_space<vmem>>, vector<1x32xf32>
    %139 = vector.broadcast %138 : vector<1x32xf32> to vector<16x32xf32>
    %140 = arith.mulf %137, %139 : vector<16x32xf32>
    %141 = arith.addf %136, %140 : vector<16x32xf32>
    %c8 = arith.constant 8 : index
    %c0_61 = arith.constant 0 : index
    %142 = vector.load %arg52[%c8, %c0_61] : memref<46x32xf32, #tpu.memory_space<vmem>>, vector<16x32xf32>
    %c14 = arith.constant 14 : index
    %c0_62 = arith.constant 0 : index
    %143 = vector.load %arg6[%c14, %c0_62] : memref<49x32xf32, #tpu.memory_space<vmem>>, vector<1x32xf32>
    %144 = vector.broadcast %143 : vector<1x32xf32> to vector<16x32xf32>
    %145 = arith.mulf %142, %144 : vector<16x32xf32>
    %146 = arith.addf %141, %145 : vector<16x32xf32>
    %c12 = arith.constant 12 : index
    %c0_63 = arith.constant 0 : index
    %147 = vector.load %arg52[%c12, %c0_63] : memref<46x32xf32, #tpu.memory_space<vmem>>, vector<16x32xf32>
    %c21 = arith.constant 21 : index
    %c0_64 = arith.constant 0 : index
    %148 = vector.load %arg6[%c21, %c0_64] : memref<49x32xf32, #tpu.memory_space<vmem>>, vector<1x32xf32>
    %149 = vector.broadcast %148 : vector<1x32xf32> to vector<16x32xf32>
    %150 = arith.mulf %147, %149 : vector<16x32xf32>
    %151 = arith.addf %146, %150 : vector<16x32xf32>
    %c16 = arith.constant 16 : index
    %c0_65 = arith.constant 0 : index
    %152 = vector.load %arg52[%c16, %c0_65] : memref<46x32xf32, #tpu.memory_space<vmem>>, vector<16x32xf32>
    %c28 = arith.constant 28 : index
    %c0_66 = arith.constant 0 : index
    %153 = vector.load %arg6[%c28, %c0_66] : memref<49x32xf32, #tpu.memory_space<vmem>>, vector<1x32xf32>
    %154 = vector.broadcast %153 : vector<1x32xf32> to vector<16x32xf32>
    %155 = arith.mulf %152, %154 : vector<16x32xf32>
    %156 = arith.addf %151, %155 : vector<16x32xf32>
    %c20 = arith.constant 20 : index
    %c0_67 = arith.constant 0 : index
    %157 = vector.load %arg52[%c20, %c0_67] : memref<46x32xf32, #tpu.memory_space<vmem>>, vector<16x32xf32>
    %c35 = arith.constant 35 : index
    %c0_68 = arith.constant 0 : index
    %158 = vector.load %arg6[%c35, %c0_68] : memref<49x32xf32, #tpu.memory_space<vmem>>, vector<1x32xf32>
    %159 = vector.broadcast %158 : vector<1x32xf32> to vector<16x32xf32>
    %160 = arith.mulf %157, %159 : vector<16x32xf32>
    %161 = arith.addf %156, %160 : vector<16x32xf32>
    %c24 = arith.constant 24 : index
    %c0_69 = arith.constant 0 : index
    %162 = vector.load %arg52[%c24, %c0_69] : memref<46x32xf32, #tpu.memory_space<vmem>>, vector<16x32xf32>
    %c42 = arith.constant 42 : index
    %c0_70 = arith.constant 0 : index
    %163 = vector.load %arg6[%c42, %c0_70] : memref<49x32xf32, #tpu.memory_space<vmem>>, vector<1x32xf32>
    %164 = vector.broadcast %163 : vector<1x32xf32> to vector<16x32xf32>
    %165 = arith.mulf %162, %164 : vector<16x32xf32>
    %166 = arith.addf %161, %165 : vector<16x32xf32>
    %167 = vector.broadcast %13 : vector<16x1xf32> to vector<16x32xf32>
    %168 = arith.mulf %166, %167 : vector<16x32xf32>
    %c1 = arith.constant 1 : index
    %c0_71 = arith.constant 0 : index
    %169 = vector.load %arg52[%c1, %c0_71] : memref<46x32xf32, #tpu.memory_space<vmem>>, vector<16x32xf32>
    %c1_72 = arith.constant 1 : index
    %c0_73 = arith.constant 0 : index
    %170 = vector.load %arg6[%c1_72, %c0_73] : memref<49x32xf32, #tpu.memory_space<vmem>>, vector<1x32xf32>
    %171 = vector.broadcast %170 : vector<1x32xf32> to vector<16x32xf32>
    %172 = arith.mulf %169, %171 : vector<16x32xf32>
    %c5 = arith.constant 5 : index
    %c0_74 = arith.constant 0 : index
    %173 = vector.load %arg52[%c5, %c0_74] : memref<46x32xf32, #tpu.memory_space<vmem>>, vector<16x32xf32>
    %c8_75 = arith.constant 8 : index
    %c0_76 = arith.constant 0 : index
    %174 = vector.load %arg6[%c8_75, %c0_76] : memref<49x32xf32, #tpu.memory_space<vmem>>, vector<1x32xf32>
    %175 = vector.broadcast %174 : vector<1x32xf32> to vector<16x32xf32>
    %176 = arith.mulf %173, %175 : vector<16x32xf32>
    %177 = arith.addf %172, %176 : vector<16x32xf32>
    %c9 = arith.constant 9 : index
    %c0_77 = arith.constant 0 : index
    %178 = vector.load %arg52[%c9, %c0_77] : memref<46x32xf32, #tpu.memory_space<vmem>>, vector<16x32xf32>
    %c15_78 = arith.constant 15 : index
    %c0_79 = arith.constant 0 : index
    %179 = vector.load %arg6[%c15_78, %c0_79] : memref<49x32xf32, #tpu.memory_space<vmem>>, vector<1x32xf32>
    %180 = vector.broadcast %179 : vector<1x32xf32> to vector<16x32xf32>
    %181 = arith.mulf %178, %180 : vector<16x32xf32>
    %182 = arith.addf %177, %181 : vector<16x32xf32>
    %c13_80 = arith.constant 13 : index
    %c0_81 = arith.constant 0 : index
    %183 = vector.load %arg52[%c13_80, %c0_81] : memref<46x32xf32, #tpu.memory_space<vmem>>, vector<16x32xf32>
    %c22 = arith.constant 22 : index
    %c0_82 = arith.constant 0 : index
    %184 = vector.load %arg6[%c22, %c0_82] : memref<49x32xf32, #tpu.memory_space<vmem>>, vector<1x32xf32>
    %185 = vector.broadcast %184 : vector<1x32xf32> to vector<16x32xf32>
    %186 = arith.mulf %183, %185 : vector<16x32xf32>
    %187 = arith.addf %182, %186 : vector<16x32xf32>
    %c17 = arith.constant 17 : index
    %c0_83 = arith.constant 0 : index
    %188 = vector.load %arg52[%c17, %c0_83] : memref<46x32xf32, #tpu.memory_space<vmem>>, vector<16x32xf32>
    %c29 = arith.constant 29 : index
    %c0_84 = arith.constant 0 : index
    %189 = vector.load %arg6[%c29, %c0_84] : memref<49x32xf32, #tpu.memory_space<vmem>>, vector<1x32xf32>
    %190 = vector.broadcast %189 : vector<1x32xf32> to vector<16x32xf32>
    %191 = arith.mulf %188, %190 : vector<16x32xf32>
    %192 = arith.addf %187, %191 : vector<16x32xf32>
    %c21_85 = arith.constant 21 : index
    %c0_86 = arith.constant 0 : index
    %193 = vector.load %arg52[%c21_85, %c0_86] : memref<46x32xf32, #tpu.memory_space<vmem>>, vector<16x32xf32>
    %c36 = arith.constant 36 : index
    %c0_87 = arith.constant 0 : index
    %194 = vector.load %arg6[%c36, %c0_87] : memref<49x32xf32, #tpu.memory_space<vmem>>, vector<1x32xf32>
    %195 = vector.broadcast %194 : vector<1x32xf32> to vector<16x32xf32>
    %196 = arith.mulf %193, %195 : vector<16x32xf32>
    %197 = arith.addf %192, %196 : vector<16x32xf32>
    %c25 = arith.constant 25 : index
    %c0_88 = arith.constant 0 : index
    %198 = vector.load %arg52[%c25, %c0_88] : memref<46x32xf32, #tpu.memory_space<vmem>>, vector<16x32xf32>
    %c43 = arith.constant 43 : index
    %c0_89 = arith.constant 0 : index
    %199 = vector.load %arg6[%c43, %c0_89] : memref<49x32xf32, #tpu.memory_space<vmem>>, vector<1x32xf32>
    %200 = vector.broadcast %199 : vector<1x32xf32> to vector<16x32xf32>
    %201 = arith.mulf %198, %200 : vector<16x32xf32>
    %202 = arith.addf %197, %201 : vector<16x32xf32>
    %203 = vector.broadcast %24 : vector<16x1xf32> to vector<16x32xf32>
    %204 = arith.mulf %202, %203 : vector<16x32xf32>
    %c2 = arith.constant 2 : index
    %c0_90 = arith.constant 0 : index
    %205 = vector.load %arg52[%c2, %c0_90] : memref<46x32xf32, #tpu.memory_space<vmem>>, vector<16x32xf32>
    %c2_91 = arith.constant 2 : index
    %c0_92 = arith.constant 0 : index
    %206 = vector.load %arg6[%c2_91, %c0_92] : memref<49x32xf32, #tpu.memory_space<vmem>>, vector<1x32xf32>
    %207 = vector.broadcast %206 : vector<1x32xf32> to vector<16x32xf32>
    %208 = arith.mulf %205, %207 : vector<16x32xf32>
    %c6 = arith.constant 6 : index
    %c0_93 = arith.constant 0 : index
    %209 = vector.load %arg52[%c6, %c0_93] : memref<46x32xf32, #tpu.memory_space<vmem>>, vector<16x32xf32>
    %c9_94 = arith.constant 9 : index
    %c0_95 = arith.constant 0 : index
    %210 = vector.load %arg6[%c9_94, %c0_95] : memref<49x32xf32, #tpu.memory_space<vmem>>, vector<1x32xf32>
    %211 = vector.broadcast %210 : vector<1x32xf32> to vector<16x32xf32>
    %212 = arith.mulf %209, %211 : vector<16x32xf32>
    %213 = arith.addf %208, %212 : vector<16x32xf32>
    %c10 = arith.constant 10 : index
    %c0_96 = arith.constant 0 : index
    %214 = vector.load %arg52[%c10, %c0_96] : memref<46x32xf32, #tpu.memory_space<vmem>>, vector<16x32xf32>
    %c16_97 = arith.constant 16 : index
    %c0_98 = arith.constant 0 : index
    %215 = vector.load %arg6[%c16_97, %c0_98] : memref<49x32xf32, #tpu.memory_space<vmem>>, vector<1x32xf32>
    %216 = vector.broadcast %215 : vector<1x32xf32> to vector<16x32xf32>
    %217 = arith.mulf %214, %216 : vector<16x32xf32>
    %218 = arith.addf %213, %217 : vector<16x32xf32>
    %c14_99 = arith.constant 14 : index
    %c0_100 = arith.constant 0 : index
    %219 = vector.load %arg52[%c14_99, %c0_100] : memref<46x32xf32, #tpu.memory_space<vmem>>, vector<16x32xf32>
    %c23 = arith.constant 23 : index
    %c0_101 = arith.constant 0 : index
    %220 = vector.load %arg6[%c23, %c0_101] : memref<49x32xf32, #tpu.memory_space<vmem>>, vector<1x32xf32>
    %221 = vector.broadcast %220 : vector<1x32xf32> to vector<16x32xf32>
    %222 = arith.mulf %219, %221 : vector<16x32xf32>
    %223 = arith.addf %218, %222 : vector<16x32xf32>
    %c18 = arith.constant 18 : index
    %c0_102 = arith.constant 0 : index
    %224 = vector.load %arg52[%c18, %c0_102] : memref<46x32xf32, #tpu.memory_space<vmem>>, vector<16x32xf32>
    %c30 = arith.constant 30 : index
    %c0_103 = arith.constant 0 : index
    %225 = vector.load %arg6[%c30, %c0_103] : memref<49x32xf32, #tpu.memory_space<vmem>>, vector<1x32xf32>
    %226 = vector.broadcast %225 : vector<1x32xf32> to vector<16x32xf32>
    %227 = arith.mulf %224, %226 : vector<16x32xf32>
    %228 = arith.addf %223, %227 : vector<16x32xf32>
    %c22_104 = arith.constant 22 : index
    %c0_105 = arith.constant 0 : index
    %229 = vector.load %arg52[%c22_104, %c0_105] : memref<46x32xf32, #tpu.memory_space<vmem>>, vector<16x32xf32>
    %c37 = arith.constant 37 : index
    %c0_106 = arith.constant 0 : index
    %230 = vector.load %arg6[%c37, %c0_106] : memref<49x32xf32, #tpu.memory_space<vmem>>, vector<1x32xf32>
    %231 = vector.broadcast %230 : vector<1x32xf32> to vector<16x32xf32>
    %232 = arith.mulf %229, %231 : vector<16x32xf32>
    %233 = arith.addf %228, %232 : vector<16x32xf32>
    %c26 = arith.constant 26 : index
    %c0_107 = arith.constant 0 : index
    %234 = vector.load %arg52[%c26, %c0_107] : memref<46x32xf32, #tpu.memory_space<vmem>>, vector<16x32xf32>
    %c44 = arith.constant 44 : index
    %c0_108 = arith.constant 0 : index
    %235 = vector.load %arg6[%c44, %c0_108] : memref<49x32xf32, #tpu.memory_space<vmem>>, vector<1x32xf32>
    %236 = vector.broadcast %235 : vector<1x32xf32> to vector<16x32xf32>
    %237 = arith.mulf %234, %236 : vector<16x32xf32>
    %238 = arith.addf %233, %237 : vector<16x32xf32>
    %239 = vector.broadcast %35 : vector<16x1xf32> to vector<16x32xf32>
    %240 = arith.mulf %238, %239 : vector<16x32xf32>
    %c3 = arith.constant 3 : index
    %c0_109 = arith.constant 0 : index
    %241 = vector.load %arg52[%c3, %c0_109] : memref<46x32xf32, #tpu.memory_space<vmem>>, vector<16x32xf32>
    %c3_110 = arith.constant 3 : index
    %c0_111 = arith.constant 0 : index
    %242 = vector.load %arg6[%c3_110, %c0_111] : memref<49x32xf32, #tpu.memory_space<vmem>>, vector<1x32xf32>
    %243 = vector.broadcast %242 : vector<1x32xf32> to vector<16x32xf32>
    %244 = arith.mulf %241, %243 : vector<16x32xf32>
    %c7_112 = arith.constant 7 : index
    %c0_113 = arith.constant 0 : index
    %245 = vector.load %arg52[%c7_112, %c0_113] : memref<46x32xf32, #tpu.memory_space<vmem>>, vector<16x32xf32>
    %c10_114 = arith.constant 10 : index
    %c0_115 = arith.constant 0 : index
    %246 = vector.load %arg6[%c10_114, %c0_115] : memref<49x32xf32, #tpu.memory_space<vmem>>, vector<1x32xf32>
    %247 = vector.broadcast %246 : vector<1x32xf32> to vector<16x32xf32>
    %248 = arith.mulf %245, %247 : vector<16x32xf32>
    %249 = arith.addf %244, %248 : vector<16x32xf32>
    %c11 = arith.constant 11 : index
    %c0_116 = arith.constant 0 : index
    %250 = vector.load %arg52[%c11, %c0_116] : memref<46x32xf32, #tpu.memory_space<vmem>>, vector<16x32xf32>
    %c17_117 = arith.constant 17 : index
    %c0_118 = arith.constant 0 : index
    %251 = vector.load %arg6[%c17_117, %c0_118] : memref<49x32xf32, #tpu.memory_space<vmem>>, vector<1x32xf32>
    %252 = vector.broadcast %251 : vector<1x32xf32> to vector<16x32xf32>
    %253 = arith.mulf %250, %252 : vector<16x32xf32>
    %254 = arith.addf %249, %253 : vector<16x32xf32>
    %c15_119 = arith.constant 15 : index
    %c0_120 = arith.constant 0 : index
    %255 = vector.load %arg52[%c15_119, %c0_120] : memref<46x32xf32, #tpu.memory_space<vmem>>, vector<16x32xf32>
    %c24_121 = arith.constant 24 : index
    %c0_122 = arith.constant 0 : index
    %256 = vector.load %arg6[%c24_121, %c0_122] : memref<49x32xf32, #tpu.memory_space<vmem>>, vector<1x32xf32>
    %257 = vector.broadcast %256 : vector<1x32xf32> to vector<16x32xf32>
    %258 = arith.mulf %255, %257 : vector<16x32xf32>
    %259 = arith.addf %254, %258 : vector<16x32xf32>
    %c19 = arith.constant 19 : index
    %c0_123 = arith.constant 0 : index
    %260 = vector.load %arg52[%c19, %c0_123] : memref<46x32xf32, #tpu.memory_space<vmem>>, vector<16x32xf32>
    %c31_124 = arith.constant 31 : index
    %c0_125 = arith.constant 0 : index
    %261 = vector.load %arg6[%c31_124, %c0_125] : memref<49x32xf32, #tpu.memory_space<vmem>>, vector<1x32xf32>
    %262 = vector.broadcast %261 : vector<1x32xf32> to vector<16x32xf32>
    %263 = arith.mulf %260, %262 : vector<16x32xf32>
    %264 = arith.addf %259, %263 : vector<16x32xf32>
    %c23_126 = arith.constant 23 : index
    %c0_127 = arith.constant 0 : index
    %265 = vector.load %arg52[%c23_126, %c0_127] : memref<46x32xf32, #tpu.memory_space<vmem>>, vector<16x32xf32>
    %c38 = arith.constant 38 : index
    %c0_128 = arith.constant 0 : index
    %266 = vector.load %arg6[%c38, %c0_128] : memref<49x32xf32, #tpu.memory_space<vmem>>, vector<1x32xf32>
    %267 = vector.broadcast %266 : vector<1x32xf32> to vector<16x32xf32>
    %268 = arith.mulf %265, %267 : vector<16x32xf32>
    %269 = arith.addf %264, %268 : vector<16x32xf32>
    %c27 = arith.constant 27 : index
    %c0_129 = arith.constant 0 : index
    %270 = vector.load %arg52[%c27, %c0_129] : memref<46x32xf32, #tpu.memory_space<vmem>>, vector<16x32xf32>
    %c45 = arith.constant 45 : index
    %c0_130 = arith.constant 0 : index
    %271 = vector.load %arg6[%c45, %c0_130] : memref<49x32xf32, #tpu.memory_space<vmem>>, vector<1x32xf32>
    %272 = vector.broadcast %271 : vector<1x32xf32> to vector<16x32xf32>
    %273 = arith.mulf %270, %272 : vector<16x32xf32>
    %274 = arith.addf %269, %273 : vector<16x32xf32>
    %c4_131 = arith.constant 4 : index
    %c0_132 = arith.constant 0 : index
    %275 = vector.load %arg52[%c4_131, %c0_132] : memref<46x32xf32, #tpu.memory_space<vmem>>, vector<16x32xf32>
    %c4_133 = arith.constant 4 : index
    %c0_134 = arith.constant 0 : index
    %276 = vector.load %arg6[%c4_133, %c0_134] : memref<49x32xf32, #tpu.memory_space<vmem>>, vector<1x32xf32>
    %277 = vector.broadcast %276 : vector<1x32xf32> to vector<16x32xf32>
    %278 = arith.mulf %275, %277 : vector<16x32xf32>
    %c8_135 = arith.constant 8 : index
    %c0_136 = arith.constant 0 : index
    %279 = vector.load %arg52[%c8_135, %c0_136] : memref<46x32xf32, #tpu.memory_space<vmem>>, vector<16x32xf32>
    %c11_137 = arith.constant 11 : index
    %c0_138 = arith.constant 0 : index
    %280 = vector.load %arg6[%c11_137, %c0_138] : memref<49x32xf32, #tpu.memory_space<vmem>>, vector<1x32xf32>
    %281 = vector.broadcast %280 : vector<1x32xf32> to vector<16x32xf32>
    %282 = arith.mulf %279, %281 : vector<16x32xf32>
    %283 = arith.addf %278, %282 : vector<16x32xf32>
    %c12_139 = arith.constant 12 : index
    %c0_140 = arith.constant 0 : index
    %284 = vector.load %arg52[%c12_139, %c0_140] : memref<46x32xf32, #tpu.memory_space<vmem>>, vector<16x32xf32>
    %c18_141 = arith.constant 18 : index
    %c0_142 = arith.constant 0 : index
    %285 = vector.load %arg6[%c18_141, %c0_142] : memref<49x32xf32, #tpu.memory_space<vmem>>, vector<1x32xf32>
    %286 = vector.broadcast %285 : vector<1x32xf32> to vector<16x32xf32>
    %287 = arith.mulf %284, %286 : vector<16x32xf32>
    %288 = arith.addf %283, %287 : vector<16x32xf32>
    %c16_143 = arith.constant 16 : index
    %c0_144 = arith.constant 0 : index
    %289 = vector.load %arg52[%c16_143, %c0_144] : memref<46x32xf32, #tpu.memory_space<vmem>>, vector<16x32xf32>
    %c25_145 = arith.constant 25 : index
    %c0_146 = arith.constant 0 : index
    %290 = vector.load %arg6[%c25_145, %c0_146] : memref<49x32xf32, #tpu.memory_space<vmem>>, vector<1x32xf32>
    %291 = vector.broadcast %290 : vector<1x32xf32> to vector<16x32xf32>
    %292 = arith.mulf %289, %291 : vector<16x32xf32>
    %293 = arith.addf %288, %292 : vector<16x32xf32>
    %c20_147 = arith.constant 20 : index
    %c0_148 = arith.constant 0 : index
    %294 = vector.load %arg52[%c20_147, %c0_148] : memref<46x32xf32, #tpu.memory_space<vmem>>, vector<16x32xf32>
    %c32 = arith.constant 32 : index
    %c0_149 = arith.constant 0 : index
    %295 = vector.load %arg6[%c32, %c0_149] : memref<49x32xf32, #tpu.memory_space<vmem>>, vector<1x32xf32>
    %296 = vector.broadcast %295 : vector<1x32xf32> to vector<16x32xf32>
    %297 = arith.mulf %294, %296 : vector<16x32xf32>
    %298 = arith.addf %293, %297 : vector<16x32xf32>
    %c24_150 = arith.constant 24 : index
    %c0_151 = arith.constant 0 : index
    %299 = vector.load %arg52[%c24_150, %c0_151] : memref<46x32xf32, #tpu.memory_space<vmem>>, vector<16x32xf32>
    %c39 = arith.constant 39 : index
    %c0_152 = arith.constant 0 : index
    %300 = vector.load %arg6[%c39, %c0_152] : memref<49x32xf32, #tpu.memory_space<vmem>>, vector<1x32xf32>
    %301 = vector.broadcast %300 : vector<1x32xf32> to vector<16x32xf32>
    %302 = arith.mulf %299, %301 : vector<16x32xf32>
    %303 = arith.addf %298, %302 : vector<16x32xf32>
    %c28_153 = arith.constant 28 : index
    %c0_154 = arith.constant 0 : index
    %304 = vector.load %arg52[%c28_153, %c0_154] : memref<46x32xf32, #tpu.memory_space<vmem>>, vector<16x32xf32>
    %c46 = arith.constant 46 : index
    %c0_155 = arith.constant 0 : index
    %305 = vector.load %arg6[%c46, %c0_155] : memref<49x32xf32, #tpu.memory_space<vmem>>, vector<1x32xf32>
    %306 = vector.broadcast %305 : vector<1x32xf32> to vector<16x32xf32>
    %307 = arith.mulf %304, %306 : vector<16x32xf32>
    %308 = arith.addf %303, %307 : vector<16x32xf32>
    %309 = vector.broadcast %46 : vector<16x1xf32> to vector<16x32xf32>
    %310 = arith.mulf %308, %309 : vector<16x32xf32>
    %c5_156 = arith.constant 5 : index
    %c0_157 = arith.constant 0 : index
    %311 = vector.load %arg52[%c5_156, %c0_157] : memref<46x32xf32, #tpu.memory_space<vmem>>, vector<16x32xf32>
    %c5_158 = arith.constant 5 : index
    %c0_159 = arith.constant 0 : index
    %312 = vector.load %arg6[%c5_158, %c0_159] : memref<49x32xf32, #tpu.memory_space<vmem>>, vector<1x32xf32>
    %313 = vector.broadcast %312 : vector<1x32xf32> to vector<16x32xf32>
    %314 = arith.mulf %311, %313 : vector<16x32xf32>
    %c9_160 = arith.constant 9 : index
    %c0_161 = arith.constant 0 : index
    %315 = vector.load %arg52[%c9_160, %c0_161] : memref<46x32xf32, #tpu.memory_space<vmem>>, vector<16x32xf32>
    %c12_162 = arith.constant 12 : index
    %c0_163 = arith.constant 0 : index
    %316 = vector.load %arg6[%c12_162, %c0_163] : memref<49x32xf32, #tpu.memory_space<vmem>>, vector<1x32xf32>
    %317 = vector.broadcast %316 : vector<1x32xf32> to vector<16x32xf32>
    %318 = arith.mulf %315, %317 : vector<16x32xf32>
    %319 = arith.addf %314, %318 : vector<16x32xf32>
    %c13_164 = arith.constant 13 : index
    %c0_165 = arith.constant 0 : index
    %320 = vector.load %arg52[%c13_164, %c0_165] : memref<46x32xf32, #tpu.memory_space<vmem>>, vector<16x32xf32>
    %c19_166 = arith.constant 19 : index
    %c0_167 = arith.constant 0 : index
    %321 = vector.load %arg6[%c19_166, %c0_167] : memref<49x32xf32, #tpu.memory_space<vmem>>, vector<1x32xf32>
    %322 = vector.broadcast %321 : vector<1x32xf32> to vector<16x32xf32>
    %323 = arith.mulf %320, %322 : vector<16x32xf32>
    %324 = arith.addf %319, %323 : vector<16x32xf32>
    %c17_168 = arith.constant 17 : index
    %c0_169 = arith.constant 0 : index
    %325 = vector.load %arg52[%c17_168, %c0_169] : memref<46x32xf32, #tpu.memory_space<vmem>>, vector<16x32xf32>
    %c26_170 = arith.constant 26 : index
    %c0_171 = arith.constant 0 : index
    %326 = vector.load %arg6[%c26_170, %c0_171] : memref<49x32xf32, #tpu.memory_space<vmem>>, vector<1x32xf32>
    %327 = vector.broadcast %326 : vector<1x32xf32> to vector<16x32xf32>
    %328 = arith.mulf %325, %327 : vector<16x32xf32>
    %329 = arith.addf %324, %328 : vector<16x32xf32>
    %c21_172 = arith.constant 21 : index
    %c0_173 = arith.constant 0 : index
    %330 = vector.load %arg52[%c21_172, %c0_173] : memref<46x32xf32, #tpu.memory_space<vmem>>, vector<16x32xf32>
    %c33 = arith.constant 33 : index
    %c0_174 = arith.constant 0 : index
    %331 = vector.load %arg6[%c33, %c0_174] : memref<49x32xf32, #tpu.memory_space<vmem>>, vector<1x32xf32>
    %332 = vector.broadcast %331 : vector<1x32xf32> to vector<16x32xf32>
    %333 = arith.mulf %330, %332 : vector<16x32xf32>
    %334 = arith.addf %329, %333 : vector<16x32xf32>
    %c25_175 = arith.constant 25 : index
    %c0_176 = arith.constant 0 : index
    %335 = vector.load %arg52[%c25_175, %c0_176] : memref<46x32xf32, #tpu.memory_space<vmem>>, vector<16x32xf32>
    %c40 = arith.constant 40 : index
    %c0_177 = arith.constant 0 : index
    %336 = vector.load %arg6[%c40, %c0_177] : memref<49x32xf32, #tpu.memory_space<vmem>>, vector<1x32xf32>
    %337 = vector.broadcast %336 : vector<1x32xf32> to vector<16x32xf32>
    %338 = arith.mulf %335, %337 : vector<16x32xf32>
    %339 = arith.addf %334, %338 : vector<16x32xf32>
    %c29_178 = arith.constant 29 : index
    %c0_179 = arith.constant 0 : index
    %340 = vector.load %arg52[%c29_178, %c0_179] : memref<46x32xf32, #tpu.memory_space<vmem>>, vector<16x32xf32>
    %c47 = arith.constant 47 : index
    %c0_180 = arith.constant 0 : index
    %341 = vector.load %arg6[%c47, %c0_180] : memref<49x32xf32, #tpu.memory_space<vmem>>, vector<1x32xf32>
    %342 = vector.broadcast %341 : vector<1x32xf32> to vector<16x32xf32>
    %343 = arith.mulf %340, %342 : vector<16x32xf32>
    %344 = arith.addf %339, %343 : vector<16x32xf32>
    %345 = vector.broadcast %57 : vector<16x1xf32> to vector<16x32xf32>
    %346 = arith.mulf %344, %345 : vector<16x32xf32>
    %c6_181 = arith.constant 6 : index
    %c0_182 = arith.constant 0 : index
    %347 = vector.load %arg52[%c6_181, %c0_182] : memref<46x32xf32, #tpu.memory_space<vmem>>, vector<16x32xf32>
    %c6_183 = arith.constant 6 : index
    %c0_184 = arith.constant 0 : index
    %348 = vector.load %arg6[%c6_183, %c0_184] : memref<49x32xf32, #tpu.memory_space<vmem>>, vector<1x32xf32>
    %349 = vector.broadcast %348 : vector<1x32xf32> to vector<16x32xf32>
    %350 = arith.mulf %347, %349 : vector<16x32xf32>
    %c10_185 = arith.constant 10 : index
    %c0_186 = arith.constant 0 : index
    %351 = vector.load %arg52[%c10_185, %c0_186] : memref<46x32xf32, #tpu.memory_space<vmem>>, vector<16x32xf32>
    %c13_187 = arith.constant 13 : index
    %c0_188 = arith.constant 0 : index
    %352 = vector.load %arg6[%c13_187, %c0_188] : memref<49x32xf32, #tpu.memory_space<vmem>>, vector<1x32xf32>
    %353 = vector.broadcast %352 : vector<1x32xf32> to vector<16x32xf32>
    %354 = arith.mulf %351, %353 : vector<16x32xf32>
    %355 = arith.addf %350, %354 : vector<16x32xf32>
    %c14_189 = arith.constant 14 : index
    %c0_190 = arith.constant 0 : index
    %356 = vector.load %arg52[%c14_189, %c0_190] : memref<46x32xf32, #tpu.memory_space<vmem>>, vector<16x32xf32>
    %c20_191 = arith.constant 20 : index
    %c0_192 = arith.constant 0 : index
    %357 = vector.load %arg6[%c20_191, %c0_192] : memref<49x32xf32, #tpu.memory_space<vmem>>, vector<1x32xf32>
    %358 = vector.broadcast %357 : vector<1x32xf32> to vector<16x32xf32>
    %359 = arith.mulf %356, %358 : vector<16x32xf32>
    %360 = arith.addf %355, %359 : vector<16x32xf32>
    %c18_193 = arith.constant 18 : index
    %c0_194 = arith.constant 0 : index
    %361 = vector.load %arg52[%c18_193, %c0_194] : memref<46x32xf32, #tpu.memory_space<vmem>>, vector<16x32xf32>
    %c27_195 = arith.constant 27 : index
    %c0_196 = arith.constant 0 : index
    %362 = vector.load %arg6[%c27_195, %c0_196] : memref<49x32xf32, #tpu.memory_space<vmem>>, vector<1x32xf32>
    %363 = vector.broadcast %362 : vector<1x32xf32> to vector<16x32xf32>
    %364 = arith.mulf %361, %363 : vector<16x32xf32>
    %365 = arith.addf %360, %364 : vector<16x32xf32>
    %c22_197 = arith.constant 22 : index
    %c0_198 = arith.constant 0 : index
    %366 = vector.load %arg52[%c22_197, %c0_198] : memref<46x32xf32, #tpu.memory_space<vmem>>, vector<16x32xf32>
    %c34 = arith.constant 34 : index
    %c0_199 = arith.constant 0 : index
    %367 = vector.load %arg6[%c34, %c0_199] : memref<49x32xf32, #tpu.memory_space<vmem>>, vector<1x32xf32>
    %368 = vector.broadcast %367 : vector<1x32xf32> to vector<16x32xf32>
    %369 = arith.mulf %366, %368 : vector<16x32xf32>
    %370 = arith.addf %365, %369 : vector<16x32xf32>
    %c26_200 = arith.constant 26 : index
    %c0_201 = arith.constant 0 : index
    %371 = vector.load %arg52[%c26_200, %c0_201] : memref<46x32xf32, #tpu.memory_space<vmem>>, vector<16x32xf32>
    %c41 = arith.constant 41 : index
    %c0_202 = arith.constant 0 : index
    %372 = vector.load %arg6[%c41, %c0_202] : memref<49x32xf32, #tpu.memory_space<vmem>>, vector<1x32xf32>
    %373 = vector.broadcast %372 : vector<1x32xf32> to vector<16x32xf32>
    %374 = arith.mulf %371, %373 : vector<16x32xf32>
    %375 = arith.addf %370, %374 : vector<16x32xf32>
    %c30_203 = arith.constant 30 : index
    %c0_204 = arith.constant 0 : index
    %376 = vector.load %arg52[%c30_203, %c0_204] : memref<46x32xf32, #tpu.memory_space<vmem>>, vector<16x32xf32>
    %c48 = arith.constant 48 : index
    %c0_205 = arith.constant 0 : index
    %377 = vector.load %arg6[%c48, %c0_205] : memref<49x32xf32, #tpu.memory_space<vmem>>, vector<1x32xf32>
    %378 = vector.broadcast %377 : vector<1x32xf32> to vector<16x32xf32>
    %379 = arith.mulf %376, %378 : vector<16x32xf32>
    %380 = arith.addf %375, %379 : vector<16x32xf32>
    %381 = vector.broadcast %68 : vector<16x1xf32> to vector<16x32xf32>
    %382 = arith.mulf %380, %381 : vector<16x32xf32>
    %383 = arith.addf %168, %204 : vector<16x32xf32>
    %384 = arith.addf %383, %240 : vector<16x32xf32>
    %385 = arith.addf %384, %274 : vector<16x32xf32>
    %386 = arith.addf %385, %310 : vector<16x32xf32>
    %387 = arith.addf %386, %346 : vector<16x32xf32>
    %388 = arith.addf %387, %382 : vector<16x32xf32>
    %389 = vector.broadcast %131 : vector<1x32xf32> to vector<16x32xf32>
    %390 = arith.addf %388, %389 : vector<16x32xf32>
    %c0_206 = arith.constant 0 : index
    %c0_207 = arith.constant 0 : index
    %391 = vector.load %arg8[%c0_206, %c0_207] : memref<1x32xf32, #tpu.memory_space<vmem>>, vector<1x32xf32>
    %c0_208 = arith.constant 0 : index
    %c0_209 = arith.constant 0 : index
    %392 = vector.load %arg9[%c0_208, %c0_209] : memref<1x32xf32, #tpu.memory_space<vmem>>, vector<1x32xf32>
    %cst_210 = arith.constant dense<0.000000e+00> : vector<16xf32>
    %393 = vector.multi_reduction <add>, %390, %cst_210 [1] : vector<16x32xf32> to vector<16xf32>
    %394 = vector.shape_cast %393 : vector<16xf32> to vector<16x1xf32>
    %cst_211 = arith.constant 3.200000e+01 : f32
    %395 = vector.broadcast %cst_211 : f32 to vector<16x1xf32>
    %396 = arith.divf %394, %395 : vector<16x1xf32>
    %397 = vector.broadcast %396 : vector<16x1xf32> to vector<16x32xf32>
    %398 = arith.subf %390, %397 : vector<16x32xf32>
    %399 = arith.mulf %398, %398 : vector<16x32xf32>
    %cst_212 = arith.constant dense<0.000000e+00> : vector<16xf32>
    %400 = vector.multi_reduction <add>, %399, %cst_212 [1] : vector<16x32xf32> to vector<16xf32>
    %401 = vector.shape_cast %400 : vector<16xf32> to vector<16x1xf32>
    %cst_213 = arith.constant 3.200000e+01 : f32
    %402 = vector.broadcast %cst_213 : f32 to vector<16x1xf32>
    %403 = arith.divf %401, %402 : vector<16x1xf32>
    %cst_214 = arith.constant 9.99999997E-7 : f32
    %404 = vector.broadcast %cst_214 : f32 to vector<16x1xf32>
    %405 = arith.addf %403, %404 : vector<16x1xf32>
    %406 = math.rsqrt %405 : vector<16x1xf32>
    %407 = vector.broadcast %406 : vector<16x1xf32> to vector<16x32xf32>
    %408 = arith.mulf %398, %407 : vector<16x32xf32>
    %409 = vector.broadcast %391 : vector<1x32xf32> to vector<16x32xf32>
    %410 = arith.mulf %408, %409 : vector<16x32xf32>
    %411 = vector.broadcast %392 : vector<1x32xf32> to vector<16x32xf32>
    %412 = arith.addf %410, %411 : vector<16x32xf32>
    %c0_215 = arith.constant 0 : index
    %c0_216 = arith.constant 0 : index
    %413 = vector.load %arg10[%c0_215, %c0_216] : memref<32x128xbf16, #tpu.memory_space<vmem>>, vector<32x128xbf16>
    %c0_217 = arith.constant 0 : index
    %c0_218 = arith.constant 0 : index
    %414 = vector.load %arg11[%c0_217, %c0_218] : memref<1x128xf32, #tpu.memory_space<vmem>>, vector<1x128xf32>
    %415 = arith.truncf %412 : vector<16x32xf32> to vector<16x32xbf16>
    %cst_219 = arith.constant dense<0.000000e+00> : vector<16x128xf32>
    %416 = tpu.matmul %415, %413, %cst_219 {dimension_numbers = #tpu.dot_dimension_numbers<[1], [0], [0], [1], [0, 0, 1, 1], [], []>} : vector<16x32xbf16>, vector<32x128xbf16>, vector<16x128xf32> -> vector<16x128xf32>
    %417 = vector.broadcast %414 : vector<1x128xf32> to vector<16x128xf32>
    %418 = arith.addf %416, %417 : vector<16x128xf32>
    %cst_220 = arith.constant 5.000000e-01 : f32
    %419 = vector.broadcast %cst_220 : f32 to vector<16x128xf32>
    %420 = arith.mulf %419, %418 : vector<16x128xf32>
    %cst_221 = arith.constant 0.707106769 : f32
    %421 = vector.broadcast %cst_221 : f32 to vector<16x128xf32>
    %422 = arith.mulf %418, %421 : vector<16x128xf32>
    %423 = math.absf %422 : vector<16x128xf32>
    %cst_222 = arith.constant 0.327591091 : f32
    %424 = vector.broadcast %cst_222 : f32 to vector<16x128xf32>
    %425 = arith.mulf %424, %423 : vector<16x128xf32>
    %cst_223 = arith.constant 1.000000e+00 : f32
    %426 = vector.broadcast %cst_223 : f32 to vector<16x128xf32>
    %427 = arith.addf %426, %425 : vector<16x128xf32>
    %428 = tpu.reciprocal %427 {approx = true} : vector<16x128xf32> -> vector<16x128xf32>
    %cst_224 = arith.constant 1.06140542 : f32
    %429 = vector.broadcast %cst_224 : f32 to vector<16x128xf32>
    %430 = arith.mulf %429, %428 : vector<16x128xf32>
    %cst_225 = arith.constant -1.45315206 : f32
    %431 = vector.broadcast %cst_225 : f32 to vector<16x128xf32>
    %432 = arith.addf %430, %431 : vector<16x128xf32>
    %433 = arith.mulf %432, %428 : vector<16x128xf32>
    %cst_226 = arith.constant 1.42141378 : f32
    %434 = vector.broadcast %cst_226 : f32 to vector<16x128xf32>
    %435 = arith.addf %433, %434 : vector<16x128xf32>
    %436 = arith.mulf %435, %428 : vector<16x128xf32>
    %cst_227 = arith.constant -0.284496725 : f32
    %437 = vector.broadcast %cst_227 : f32 to vector<16x128xf32>
    %438 = arith.addf %436, %437 : vector<16x128xf32>
    %439 = arith.mulf %438, %428 : vector<16x128xf32>
    %cst_228 = arith.constant 0.254829586 : f32
    %440 = vector.broadcast %cst_228 : f32 to vector<16x128xf32>
    %441 = arith.addf %439, %440 : vector<16x128xf32>
    %442 = arith.mulf %441, %428 : vector<16x128xf32>
    %cst_229 = arith.constant 0.000000e+00 : f32
    %443 = vector.broadcast %cst_229 : f32 to vector<16x128xf32>
    %444 = arith.subf %443, %423 : vector<16x128xf32>
    %445 = arith.mulf %444, %423 : vector<16x128xf32>
    %446 = math.exp %445 : vector<16x128xf32>
    %447 = arith.mulf %442, %446 : vector<16x128xf32>
    %cst_230 = arith.constant 1.000000e+00 : f32
    %448 = vector.broadcast %cst_230 : f32 to vector<16x128xf32>
    %449 = arith.subf %448, %447 : vector<16x128xf32>
    %cst_231 = arith.constant 0.000000e+00 : f32
    %450 = vector.broadcast %cst_231 : f32 to vector<16x128xf32>
    %451 = arith.cmpf oge, %422, %450 : vector<16x128xf32>
    %cst_232 = arith.constant 0.000000e+00 : f32
    %452 = vector.broadcast %cst_232 : f32 to vector<16x128xf32>
    %453 = arith.subf %452, %449 : vector<16x128xf32>
    %454 = arith.select %451, %449, %453 : vector<16x128xi1>, vector<16x128xf32>
    %cst_233 = arith.constant 1.000000e+00 : f32
    %455 = vector.broadcast %cst_233 : f32 to vector<16x128xf32>
    %456 = arith.addf %455, %454 : vector<16x128xf32>
    %457 = arith.mulf %420, %456 : vector<16x128xf32>
    %c0_234 = arith.constant 0 : index
    %c0_235 = arith.constant 0 : index
    %458 = vector.load %arg12[%c0_234, %c0_235] : memref<128x32xbf16, #tpu.memory_space<vmem>>, vector<128x32xbf16>
    %c0_236 = arith.constant 0 : index
    %c0_237 = arith.constant 0 : index
    %459 = vector.load %arg13[%c0_236, %c0_237] : memref<1x32xf32, #tpu.memory_space<vmem>>, vector<1x32xf32>
    %460 = arith.truncf %457 : vector<16x128xf32> to vector<16x128xbf16>
    %cst_238 = arith.constant dense<0.000000e+00> : vector<16x32xf32>
    %461 = tpu.matmul %460, %458, %cst_238 {dimension_numbers = #tpu.dot_dimension_numbers<[1], [0], [0], [1], [0, 0, 1, 1], [], []>} : vector<16x128xbf16>, vector<128x32xbf16>, vector<16x32xf32> -> vector<16x32xf32>
    %462 = vector.broadcast %459 : vector<1x32xf32> to vector<16x32xf32>
    %463 = arith.addf %461, %462 : vector<16x32xf32>
    %c0_239 = arith.constant 0 : index
    %c0_240 = arith.constant 0 : index
    %464 = vector.load %arg14[%c0_239, %c0_240] : memref<1x32xf32, #tpu.memory_space<vmem>>, vector<1x32xf32>
    %465 = vector.broadcast %464 : vector<1x32xf32> to vector<16x32xf32>
    %466 = arith.mulf %465, %463 : vector<16x32xf32>
    %467 = arith.addf %130, %466 : vector<16x32xf32>
    %c0_241 = arith.constant 0 : index
    %c0_242 = arith.constant 0 : index
    %468 = vector.load %arg16[%c0_241, %c0_242] : memref<1x32xf32, #tpu.memory_space<vmem>>, vector<1x32xf32>
    %c15_243 = arith.constant 15 : index
    %c0_244 = arith.constant 0 : index
    %469 = vector.load %arg52[%c15_243, %c0_244] : memref<46x32xf32, #tpu.memory_space<vmem>>, vector<16x32xf32>
    tpu.vector_store %arg52[%c15_243, %c0_244], %467 {strides = array<i32>} : memref<46x32xf32, #tpu.memory_space<vmem>>, vector<16x32xf32>,
    %c0_245 = arith.constant 0 : index
    %c0_246 = arith.constant 0 : index
    %470 = vector.load %arg52[%c0_245, %c0_246] : memref<46x32xf32, #tpu.memory_space<vmem>>, vector<16x32xf32>
    %c0_247 = arith.constant 0 : index
    %c0_248 = arith.constant 0 : index
    %471 = vector.load %arg15[%c0_247, %c0_248] : memref<49x32xf32, #tpu.memory_space<vmem>>, vector<1x32xf32>
    %472 = vector.broadcast %471 : vector<1x32xf32> to vector<16x32xf32>
    %473 = arith.mulf %470, %472 : vector<16x32xf32>
    %c4_249 = arith.constant 4 : index
    %c0_250 = arith.constant 0 : index
    %474 = vector.load %arg52[%c4_249, %c0_250] : memref<46x32xf32, #tpu.memory_space<vmem>>, vector<16x32xf32>
    %c7_251 = arith.constant 7 : index
    %c0_252 = arith.constant 0 : index
    %475 = vector.load %arg15[%c7_251, %c0_252] : memref<49x32xf32, #tpu.memory_space<vmem>>, vector<1x32xf32>
    %476 = vector.broadcast %475 : vector<1x32xf32> to vector<16x32xf32>
    %477 = arith.mulf %474, %476 : vector<16x32xf32>
    %478 = arith.addf %473, %477 : vector<16x32xf32>
    %c8_253 = arith.constant 8 : index
    %c0_254 = arith.constant 0 : index
    %479 = vector.load %arg52[%c8_253, %c0_254] : memref<46x32xf32, #tpu.memory_space<vmem>>, vector<16x32xf32>
    %c14_255 = arith.constant 14 : index
    %c0_256 = arith.constant 0 : index
    %480 = vector.load %arg15[%c14_255, %c0_256] : memref<49x32xf32, #tpu.memory_space<vmem>>, vector<1x32xf32>
    %481 = vector.broadcast %480 : vector<1x32xf32> to vector<16x32xf32>
    %482 = arith.mulf %479, %481 : vector<16x32xf32>
    %483 = arith.addf %478, %482 : vector<16x32xf32>
    %c12_257 = arith.constant 12 : index
    %c0_258 = arith.constant 0 : index
    %484 = vector.load %arg52[%c12_257, %c0_258] : memref<46x32xf32, #tpu.memory_space<vmem>>, vector<16x32xf32>
    %c21_259 = arith.constant 21 : index
    %c0_260 = arith.constant 0 : index
    %485 = vector.load %arg15[%c21_259, %c0_260] : memref<49x32xf32, #tpu.memory_space<vmem>>, vector<1x32xf32>
    %486 = vector.broadcast %485 : vector<1x32xf32> to vector<16x32xf32>
    %487 = arith.mulf %484, %486 : vector<16x32xf32>
    %488 = arith.addf %483, %487 : vector<16x32xf32>
    %c16_261 = arith.constant 16 : index
    %c0_262 = arith.constant 0 : index
    %489 = vector.load %arg52[%c16_261, %c0_262] : memref<46x32xf32, #tpu.memory_space<vmem>>, vector<16x32xf32>
    %c28_263 = arith.constant 28 : index
    %c0_264 = arith.constant 0 : index
    %490 = vector.load %arg15[%c28_263, %c0_264] : memref<49x32xf32, #tpu.memory_space<vmem>>, vector<1x32xf32>
    %491 = vector.broadcast %490 : vector<1x32xf32> to vector<16x32xf32>
    %492 = arith.mulf %489, %491 : vector<16x32xf32>
    %493 = arith.addf %488, %492 : vector<16x32xf32>
    %c20_265 = arith.constant 20 : index
    %c0_266 = arith.constant 0 : index
    %494 = vector.load %arg52[%c20_265, %c0_266] : memref<46x32xf32, #tpu.memory_space<vmem>>, vector<16x32xf32>
    %c35_267 = arith.constant 35 : index
    %c0_268 = arith.constant 0 : index
    %495 = vector.load %arg15[%c35_267, %c0_268] : memref<49x32xf32, #tpu.memory_space<vmem>>, vector<1x32xf32>
    %496 = vector.broadcast %495 : vector<1x32xf32> to vector<16x32xf32>
    %497 = arith.mulf %494, %496 : vector<16x32xf32>
    %498 = arith.addf %493, %497 : vector<16x32xf32>
    %c24_269 = arith.constant 24 : index
    %c0_270 = arith.constant 0 : index
    %499 = vector.load %arg52[%c24_269, %c0_270] : memref<46x32xf32, #tpu.memory_space<vmem>>, vector<16x32xf32>
    %c42_271 = arith.constant 42 : index
    %c0_272 = arith.constant 0 : index
    %500 = vector.load %arg15[%c42_271, %c0_272] : memref<49x32xf32, #tpu.memory_space<vmem>>, vector<1x32xf32>
    %501 = vector.broadcast %500 : vector<1x32xf32> to vector<16x32xf32>
    %502 = arith.mulf %499, %501 : vector<16x32xf32>
    %503 = arith.addf %498, %502 : vector<16x32xf32>
    %504 = vector.broadcast %13 : vector<16x1xf32> to vector<16x32xf32>
    %505 = arith.mulf %503, %504 : vector<16x32xf32>
    %c1_273 = arith.constant 1 : index
    %c0_274 = arith.constant 0 : index
    %506 = vector.load %arg52[%c1_273, %c0_274] : memref<46x32xf32, #tpu.memory_space<vmem>>, vector<16x32xf32>
    %c1_275 = arith.constant 1 : index
    %c0_276 = arith.constant 0 : index
    %507 = vector.load %arg15[%c1_275, %c0_276] : memref<49x32xf32, #tpu.memory_space<vmem>>, vector<1x32xf32>
    %508 = vector.broadcast %507 : vector<1x32xf32> to vector<16x32xf32>
    %509 = arith.mulf %506, %508 : vector<16x32xf32>
    %c5_277 = arith.constant 5 : index
    %c0_278 = arith.constant 0 : index
    %510 = vector.load %arg52[%c5_277, %c0_278] : memref<46x32xf32, #tpu.memory_space<vmem>>, vector<16x32xf32>
    %c8_279 = arith.constant 8 : index
    %c0_280 = arith.constant 0 : index
    %511 = vector.load %arg15[%c8_279, %c0_280] : memref<49x32xf32, #tpu.memory_space<vmem>>, vector<1x32xf32>
    %512 = vector.broadcast %511 : vector<1x32xf32> to vector<16x32xf32>
    %513 = arith.mulf %510, %512 : vector<16x32xf32>
    %514 = arith.addf %509, %513 : vector<16x32xf32>
    %c9_281 = arith.constant 9 : index
    %c0_282 = arith.constant 0 : index
    %515 = vector.load %arg52[%c9_281, %c0_282] : memref<46x32xf32, #tpu.memory_space<vmem>>, vector<16x32xf32>
    %c15_283 = arith.constant 15 : index
    %c0_284 = arith.constant 0 : index
    %516 = vector.load %arg15[%c15_283, %c0_284] : memref<49x32xf32, #tpu.memory_space<vmem>>, vector<1x32xf32>
    %517 = vector.broadcast %516 : vector<1x32xf32> to vector<16x32xf32>
    %518 = arith.mulf %515, %517 : vector<16x32xf32>
    %519 = arith.addf %514, %518 : vector<16x32xf32>
    %c13_285 = arith.constant 13 : index
    %c0_286 = arith.constant 0 : index
    %520 = vector.load %arg52[%c13_285, %c0_286] : memref<46x32xf32, #tpu.memory_space<vmem>>, vector<16x32xf32>
    %c22_287 = arith.constant 22 : index
    %c0_288 = arith.constant 0 : index
    %521 = vector.load %arg15[%c22_287, %c0_288] : memref<49x32xf32, #tpu.memory_space<vmem>>, vector<1x32xf32>
    %522 = vector.broadcast %521 : vector<1x32xf32> to vector<16x32xf32>
    %523 = arith.mulf %520, %522 : vector<16x32xf32>
    %524 = arith.addf %519, %523 : vector<16x32xf32>
    %c17_289 = arith.constant 17 : index
    %c0_290 = arith.constant 0 : index
    %525 = vector.load %arg52[%c17_289, %c0_290] : memref<46x32xf32, #tpu.memory_space<vmem>>, vector<16x32xf32>
    %c29_291 = arith.constant 29 : index
    %c0_292 = arith.constant 0 : index
    %526 = vector.load %arg15[%c29_291, %c0_292] : memref<49x32xf32, #tpu.memory_space<vmem>>, vector<1x32xf32>
    %527 = vector.broadcast %526 : vector<1x32xf32> to vector<16x32xf32>
    %528 = arith.mulf %525, %527 : vector<16x32xf32>
    %529 = arith.addf %524, %528 : vector<16x32xf32>
    %c21_293 = arith.constant 21 : index
    %c0_294 = arith.constant 0 : index
    %530 = vector.load %arg52[%c21_293, %c0_294] : memref<46x32xf32, #tpu.memory_space<vmem>>, vector<16x32xf32>
    %c36_295 = arith.constant 36 : index
    %c0_296 = arith.constant 0 : index
    %531 = vector.load %arg15[%c36_295, %c0_296] : memref<49x32xf32, #tpu.memory_space<vmem>>, vector<1x32xf32>
    %532 = vector.broadcast %531 : vector<1x32xf32> to vector<16x32xf32>
    %533 = arith.mulf %530, %532 : vector<16x32xf32>
    %534 = arith.addf %529, %533 : vector<16x32xf32>
    %c25_297 = arith.constant 25 : index
    %c0_298 = arith.constant 0 : index
    %535 = vector.load %arg52[%c25_297, %c0_298] : memref<46x32xf32, #tpu.memory_space<vmem>>, vector<16x32xf32>
    %c43_299 = arith.constant 43 : index
    %c0_300 = arith.constant 0 : index
    %536 = vector.load %arg15[%c43_299, %c0_300] : memref<49x32xf32, #tpu.memory_space<vmem>>, vector<1x32xf32>
    %537 = vector.broadcast %536 : vector<1x32xf32> to vector<16x32xf32>
    %538 = arith.mulf %535, %537 : vector<16x32xf32>
    %539 = arith.addf %534, %538 : vector<16x32xf32>
    %540 = vector.broadcast %24 : vector<16x1xf32> to vector<16x32xf32>
    %541 = arith.mulf %539, %540 : vector<16x32xf32>
    %c2_301 = arith.constant 2 : index
    %c0_302 = arith.constant 0 : index
    %542 = vector.load %arg52[%c2_301, %c0_302] : memref<46x32xf32, #tpu.memory_space<vmem>>, vector<16x32xf32>
    %c2_303 = arith.constant 2 : index
    %c0_304 = arith.constant 0 : index
    %543 = vector.load %arg15[%c2_303, %c0_304] : memref<49x32xf32, #tpu.memory_space<vmem>>, vector<1x32xf32>
    %544 = vector.broadcast %543 : vector<1x32xf32> to vector<16x32xf32>
    %545 = arith.mulf %542, %544 : vector<16x32xf32>
    %c6_305 = arith.constant 6 : index
    %c0_306 = arith.constant 0 : index
    %546 = vector.load %arg52[%c6_305, %c0_306] : memref<46x32xf32, #tpu.memory_space<vmem>>, vector<16x32xf32>
    %c9_307 = arith.constant 9 : index
    %c0_308 = arith.constant 0 : index
    %547 = vector.load %arg15[%c9_307, %c0_308] : memref<49x32xf32, #tpu.memory_space<vmem>>, vector<1x32xf32>
    %548 = vector.broadcast %547 : vector<1x32xf32> to vector<16x32xf32>
    %549 = arith.mulf %546, %548 : vector<16x32xf32>
    %550 = arith.addf %545, %549 : vector<16x32xf32>
    %c10_309 = arith.constant 10 : index
    %c0_310 = arith.constant 0 : index
    %551 = vector.load %arg52[%c10_309, %c0_310] : memref<46x32xf32, #tpu.memory_space<vmem>>, vector<16x32xf32>
    %c16_311 = arith.constant 16 : index
    %c0_312 = arith.constant 0 : index
    %552 = vector.load %arg15[%c16_311, %c0_312] : memref<49x32xf32, #tpu.memory_space<vmem>>, vector<1x32xf32>
    %553 = vector.broadcast %552 : vector<1x32xf32> to vector<16x32xf32>
    %554 = arith.mulf %551, %553 : vector<16x32xf32>
    %555 = arith.addf %550, %554 : vector<16x32xf32>
    %c14_313 = arith.constant 14 : index
    %c0_314 = arith.constant 0 : index
    %556 = vector.load %arg52[%c14_313, %c0_314] : memref<46x32xf32, #tpu.memory_space<vmem>>, vector<16x32xf32>
    %c23_315 = arith.constant 23 : index
    %c0_316 = arith.constant 0 : index
    %557 = vector.load %arg15[%c23_315, %c0_316] : memref<49x32xf32, #tpu.memory_space<vmem>>, vector<1x32xf32>
    %558 = vector.broadcast %557 : vector<1x32xf32> to vector<16x32xf32>
    %559 = arith.mulf %556, %558 : vector<16x32xf32>
    %560 = arith.addf %555, %559 : vector<16x32xf32>
    %c18_317 = arith.constant 18 : index
    %c0_318 = arith.constant 0 : index
    %561 = vector.load %arg52[%c18_317, %c0_318] : memref<46x32xf32, #tpu.memory_space<vmem>>, vector<16x32xf32>
    %c30_319 = arith.constant 30 : index
    %c0_320 = arith.constant 0 : index
    %562 = vector.load %arg15[%c30_319, %c0_320] : memref<49x32xf32, #tpu.memory_space<vmem>>, vector<1x32xf32>
    %563 = vector.broadcast %562 : vector<1x32xf32> to vector<16x32xf32>
    %564 = arith.mulf %561, %563 : vector<16x32xf32>
    %565 = arith.addf %560, %564 : vector<16x32xf32>
    %c22_321 = arith.constant 22 : index
    %c0_322 = arith.constant 0 : index
    %566 = vector.load %arg52[%c22_321, %c0_322] : memref<46x32xf32, #tpu.memory_space<vmem>>, vector<16x32xf32>
    %c37_323 = arith.constant 37 : index
    %c0_324 = arith.constant 0 : index
    %567 = vector.load %arg15[%c37_323, %c0_324] : memref<49x32xf32, #tpu.memory_space<vmem>>, vector<1x32xf32>
    %568 = vector.broadcast %567 : vector<1x32xf32> to vector<16x32xf32>
    %569 = arith.mulf %566, %568 : vector<16x32xf32>
    %570 = arith.addf %565, %569 : vector<16x32xf32>
    %c26_325 = arith.constant 26 : index
    %c0_326 = arith.constant 0 : index
    %571 = vector.load %arg52[%c26_325, %c0_326] : memref<46x32xf32, #tpu.memory_space<vmem>>, vector<16x32xf32>
    %c44_327 = arith.constant 44 : index
    %c0_328 = arith.constant 0 : index
    %572 = vector.load %arg15[%c44_327, %c0_328] : memref<49x32xf32, #tpu.memory_space<vmem>>, vector<1x32xf32>
    %573 = vector.broadcast %572 : vector<1x32xf32> to vector<16x32xf32>
    %574 = arith.mulf %571, %573 : vector<16x32xf32>
    %575 = arith.addf %570, %574 : vector<16x32xf32>
    %576 = vector.broadcast %35 : vector<16x1xf32> to vector<16x32xf32>
    %577 = arith.mulf %575, %576 : vector<16x32xf32>
    %c3_329 = arith.constant 3 : index
    %c0_330 = arith.constant 0 : index
    %578 = vector.load %arg52[%c3_329, %c0_330] : memref<46x32xf32, #tpu.memory_space<vmem>>, vector<16x32xf32>
    %c3_331 = arith.constant 3 : index
    %c0_332 = arith.constant 0 : index
    %579 = vector.load %arg15[%c3_331, %c0_332] : memref<49x32xf32, #tpu.memory_space<vmem>>, vector<1x32xf32>
    %580 = vector.broadcast %579 : vector<1x32xf32> to vector<16x32xf32>
    %581 = arith.mulf %578, %580 : vector<16x32xf32>
    %c7_333 = arith.constant 7 : index
    %c0_334 = arith.constant 0 : index
    %582 = vector.load %arg52[%c7_333, %c0_334] : memref<46x32xf32, #tpu.memory_space<vmem>>, vector<16x32xf32>
    %c10_335 = arith.constant 10 : index
    %c0_336 = arith.constant 0 : index
    %583 = vector.load %arg15[%c10_335, %c0_336] : memref<49x32xf32, #tpu.memory_space<vmem>>, vector<1x32xf32>
    %584 = vector.broadcast %583 : vector<1x32xf32> to vector<16x32xf32>
    %585 = arith.mulf %582, %584 : vector<16x32xf32>
    %586 = arith.addf %581, %585 : vector<16x32xf32>
    %c11_337 = arith.constant 11 : index
    %c0_338 = arith.constant 0 : index
    %587 = vector.load %arg52[%c11_337, %c0_338] : memref<46x32xf32, #tpu.memory_space<vmem>>, vector<16x32xf32>
    %c17_339 = arith.constant 17 : index
    %c0_340 = arith.constant 0 : index
    %588 = vector.load %arg15[%c17_339, %c0_340] : memref<49x32xf32, #tpu.memory_space<vmem>>, vector<1x32xf32>
    %589 = vector.broadcast %588 : vector<1x32xf32> to vector<16x32xf32>
    %590 = arith.mulf %587, %589 : vector<16x32xf32>
    %591 = arith.addf %586, %590 : vector<16x32xf32>
    %c15_341 = arith.constant 15 : index
    %c0_342 = arith.constant 0 : index
    %592 = vector.load %arg52[%c15_341, %c0_342] : memref<46x32xf32, #tpu.memory_space<vmem>>, vector<16x32xf32>
    %c24_343 = arith.constant 24 : index
    %c0_344 = arith.constant 0 : index
    %593 = vector.load %arg15[%c24_343, %c0_344] : memref<49x32xf32, #tpu.memory_space<vmem>>, vector<1x32xf32>
    %594 = vector.broadcast %593 : vector<1x32xf32> to vector<16x32xf32>
    %595 = arith.mulf %592, %594 : vector<16x32xf32>
    %596 = arith.addf %591, %595 : vector<16x32xf32>
    %c19_345 = arith.constant 19 : index
    %c0_346 = arith.constant 0 : index
    %597 = vector.load %arg52[%c19_345, %c0_346] : memref<46x32xf32, #tpu.memory_space<vmem>>, vector<16x32xf32>
    %c31_347 = arith.constant 31 : index
    %c0_348 = arith.constant 0 : index
    %598 = vector.load %arg15[%c31_347, %c0_348] : memref<49x32xf32, #tpu.memory_space<vmem>>, vector<1x32xf32>
    %599 = vector.broadcast %598 : vector<1x32xf32> to vector<16x32xf32>
    %600 = arith.mulf %597, %599 : vector<16x32xf32>
    %601 = arith.addf %596, %600 : vector<16x32xf32>
    %c23_349 = arith.constant 23 : index
    %c0_350 = arith.constant 0 : index
    %602 = vector.load %arg52[%c23_349, %c0_350] : memref<46x32xf32, #tpu.memory_space<vmem>>, vector<16x32xf32>
    %c38_351 = arith.constant 38 : index
    %c0_352 = arith.constant 0 : index
    %603 = vector.load %arg15[%c38_351, %c0_352] : memref<49x32xf32, #tpu.memory_space<vmem>>, vector<1x32xf32>
    %604 = vector.broadcast %603 : vector<1x32xf32> to vector<16x32xf32>
    %605 = arith.mulf %602, %604 : vector<16x32xf32>
    %606 = arith.addf %601, %605 : vector<16x32xf32>
    %c27_353 = arith.constant 27 : index
    %c0_354 = arith.constant 0 : index
    %607 = vector.load %arg52[%c27_353, %c0_354] : memref<46x32xf32, #tpu.memory_space<vmem>>, vector<16x32xf32>
    %c45_355 = arith.constant 45 : index
    %c0_356 = arith.constant 0 : index
    %608 = vector.load %arg15[%c45_355, %c0_356] : memref<49x32xf32, #tpu.memory_space<vmem>>, vector<1x32xf32>
    %609 = vector.broadcast %608 : vector<1x32xf32> to vector<16x32xf32>
    %610 = arith.mulf %607, %609 : vector<16x32xf32>
    %611 = arith.addf %606, %610 : vector<16x32xf32>
    %c4_357 = arith.constant 4 : index
    %c0_358 = arith.constant 0 : index
    %612 = vector.load %arg52[%c4_357, %c0_358] : memref<46x32xf32, #tpu.memory_space<vmem>>, vector<16x32xf32>
    %c4_359 = arith.constant 4 : index
    %c0_360 = arith.constant 0 : index
    %613 = vector.load %arg15[%c4_359, %c0_360] : memref<49x32xf32, #tpu.memory_space<vmem>>, vector<1x32xf32>
    %614 = vector.broadcast %613 : vector<1x32xf32> to vector<16x32xf32>
    %615 = arith.mulf %612, %614 : vector<16x32xf32>
    %c8_361 = arith.constant 8 : index
    %c0_362 = arith.constant 0 : index
    %616 = vector.load %arg52[%c8_361, %c0_362] : memref<46x32xf32, #tpu.memory_space<vmem>>, vector<16x32xf32>
    %c11_363 = arith.constant 11 : index
    %c0_364 = arith.constant 0 : index
    %617 = vector.load %arg15[%c11_363, %c0_364] : memref<49x32xf32, #tpu.memory_space<vmem>>, vector<1x32xf32>
    %618 = vector.broadcast %617 : vector<1x32xf32> to vector<16x32xf32>
    %619 = arith.mulf %616, %618 : vector<16x32xf32>
    %620 = arith.addf %615, %619 : vector<16x32xf32>
    %c12_365 = arith.constant 12 : index
    %c0_366 = arith.constant 0 : index
    %621 = vector.load %arg52[%c12_365, %c0_366] : memref<46x32xf32, #tpu.memory_space<vmem>>, vector<16x32xf32>
    %c18_367 = arith.constant 18 : index
    %c0_368 = arith.constant 0 : index
    %622 = vector.load %arg15[%c18_367, %c0_368] : memref<49x32xf32, #tpu.memory_space<vmem>>, vector<1x32xf32>
    %623 = vector.broadcast %622 : vector<1x32xf32> to vector<16x32xf32>
    %624 = arith.mulf %621, %623 : vector<16x32xf32>
    %625 = arith.addf %620, %624 : vector<16x32xf32>
    %c16_369 = arith.constant 16 : index
    %c0_370 = arith.constant 0 : index
    %626 = vector.load %arg52[%c16_369, %c0_370] : memref<46x32xf32, #tpu.memory_space<vmem>>, vector<16x32xf32>
    %c25_371 = arith.constant 25 : index
    %c0_372 = arith.constant 0 : index
    %627 = vector.load %arg15[%c25_371, %c0_372] : memref<49x32xf32, #tpu.memory_space<vmem>>, vector<1x32xf32>
    %628 = vector.broadcast %627 : vector<1x32xf32> to vector<16x32xf32>
    %629 = arith.mulf %626, %628 : vector<16x32xf32>
    %630 = arith.addf %625, %629 : vector<16x32xf32>
    %c20_373 = arith.constant 20 : index
    %c0_374 = arith.constant 0 : index
    %631 = vector.load %arg52[%c20_373, %c0_374] : memref<46x32xf32, #tpu.memory_space<vmem>>, vector<16x32xf32>
    %c32_375 = arith.constant 32 : index
    %c0_376 = arith.constant 0 : index
    %632 = vector.load %arg15[%c32_375, %c0_376] : memref<49x32xf32, #tpu.memory_space<vmem>>, vector<1x32xf32>
    %633 = vector.broadcast %632 : vector<1x32xf32> to vector<16x32xf32>
    %634 = arith.mulf %631, %633 : vector<16x32xf32>
    %635 = arith.addf %630, %634 : vector<16x32xf32>
    %c24_377 = arith.constant 24 : index
    %c0_378 = arith.constant 0 : index
    %636 = vector.load %arg52[%c24_377, %c0_378] : memref<46x32xf32, #tpu.memory_space<vmem>>, vector<16x32xf32>
    %c39_379 = arith.constant 39 : index
    %c0_380 = arith.constant 0 : index
    %637 = vector.load %arg15[%c39_379, %c0_380] : memref<49x32xf32, #tpu.memory_space<vmem>>, vector<1x32xf32>
    %638 = vector.broadcast %637 : vector<1x32xf32> to vector<16x32xf32>
    %639 = arith.mulf %636, %638 : vector<16x32xf32>
    %640 = arith.addf %635, %639 : vector<16x32xf32>
    %c28_381 = arith.constant 28 : index
    %c0_382 = arith.constant 0 : index
    %641 = vector.load %arg52[%c28_381, %c0_382] : memref<46x32xf32, #tpu.memory_space<vmem>>, vector<16x32xf32>
    %c46_383 = arith.constant 46 : index
    %c0_384 = arith.constant 0 : index
    %642 = vector.load %arg15[%c46_383, %c0_384] : memref<49x32xf32, #tpu.memory_space<vmem>>, vector<1x32xf32>
    %643 = vector.broadcast %642 : vector<1x32xf32> to vector<16x32xf32>
    %644 = arith.mulf %641, %643 : vector<16x32xf32>
    %645 = arith.addf %640, %644 : vector<16x32xf32>
    %646 = vector.broadcast %46 : vector<16x1xf32> to vector<16x32xf32>
    %647 = arith.mulf %645, %646 : vector<16x32xf32>
    %c5_385 = arith.constant 5 : index
    %c0_386 = arith.constant 0 : index
    %648 = vector.load %arg52[%c5_385, %c0_386] : memref<46x32xf32, #tpu.memory_space<vmem>>, vector<16x32xf32>
    %c5_387 = arith.constant 5 : index
    %c0_388 = arith.constant 0 : index
    %649 = vector.load %arg15[%c5_387, %c0_388] : memref<49x32xf32, #tpu.memory_space<vmem>>, vector<1x32xf32>
    %650 = vector.broadcast %649 : vector<1x32xf32> to vector<16x32xf32>
    %651 = arith.mulf %648, %650 : vector<16x32xf32>
    %c9_389 = arith.constant 9 : index
    %c0_390 = arith.constant 0 : index
    %652 = vector.load %arg52[%c9_389, %c0_390] : memref<46x32xf32, #tpu.memory_space<vmem>>, vector<16x32xf32>
    %c12_391 = arith.constant 12 : index
    %c0_392 = arith.constant 0 : index
    %653 = vector.load %arg15[%c12_391, %c0_392] : memref<49x32xf32, #tpu.memory_space<vmem>>, vector<1x32xf32>
    %654 = vector.broadcast %653 : vector<1x32xf32> to vector<16x32xf32>
    %655 = arith.mulf %652, %654 : vector<16x32xf32>
    %656 = arith.addf %651, %655 : vector<16x32xf32>
    %c13_393 = arith.constant 13 : index
    %c0_394 = arith.constant 0 : index
    %657 = vector.load %arg52[%c13_393, %c0_394] : memref<46x32xf32, #tpu.memory_space<vmem>>, vector<16x32xf32>
    %c19_395 = arith.constant 19 : index
    %c0_396 = arith.constant 0 : index
    %658 = vector.load %arg15[%c19_395, %c0_396] : memref<49x32xf32, #tpu.memory_space<vmem>>, vector<1x32xf32>
    %659 = vector.broadcast %658 : vector<1x32xf32> to vector<16x32xf32>
    %660 = arith.mulf %657, %659 : vector<16x32xf32>
    %661 = arith.addf %656, %660 : vector<16x32xf32>
    %c17_397 = arith.constant 17 : index
    %c0_398 = arith.constant 0 : index
    %662 = vector.load %arg52[%c17_397, %c0_398] : memref<46x32xf32, #tpu.memory_space<vmem>>, vector<16x32xf32>
    %c26_399 = arith.constant 26 : index
    %c0_400 = arith.constant 0 : index
    %663 = vector.load %arg15[%c26_399, %c0_400] : memref<49x32xf32, #tpu.memory_space<vmem>>, vector<1x32xf32>
    %664 = vector.broadcast %663 : vector<1x32xf32> to vector<16x32xf32>
    %665 = arith.mulf %662, %664 : vector<16x32xf32>
    %666 = arith.addf %661, %665 : vector<16x32xf32>
    %c21_401 = arith.constant 21 : index
    %c0_402 = arith.constant 0 : index
    %667 = vector.load %arg52[%c21_401, %c0_402] : memref<46x32xf32, #tpu.memory_space<vmem>>, vector<16x32xf32>
    %c33_403 = arith.constant 33 : index
    %c0_404 = arith.constant 0 : index
    %668 = vector.load %arg15[%c33_403, %c0_404] : memref<49x32xf32, #tpu.memory_space<vmem>>, vector<1x32xf32>
    %669 = vector.broadcast %668 : vector<1x32xf32> to vector<16x32xf32>
    %670 = arith.mulf %667, %669 : vector<16x32xf32>
    %671 = arith.addf %666, %670 : vector<16x32xf32>
    %c25_405 = arith.constant 25 : index
    %c0_406 = arith.constant 0 : index
    %672 = vector.load %arg52[%c25_405, %c0_406] : memref<46x32xf32, #tpu.memory_space<vmem>>, vector<16x32xf32>
    %c40_407 = arith.constant 40 : index
    %c0_408 = arith.constant 0 : index
    %673 = vector.load %arg15[%c40_407, %c0_408] : memref<49x32xf32, #tpu.memory_space<vmem>>, vector<1x32xf32>
    %674 = vector.broadcast %673 : vector<1x32xf32> to vector<16x32xf32>
    %675 = arith.mulf %672, %674 : vector<16x32xf32>
    %676 = arith.addf %671, %675 : vector<16x32xf32>
    %c29_409 = arith.constant 29 : index
    %c0_410 = arith.constant 0 : index
    %677 = vector.load %arg52[%c29_409, %c0_410] : memref<46x32xf32, #tpu.memory_space<vmem>>, vector<16x32xf32>
    %c47_411 = arith.constant 47 : index
    %c0_412 = arith.constant 0 : index
    %678 = vector.load %arg15[%c47_411, %c0_412] : memref<49x32xf32, #tpu.memory_space<vmem>>, vector<1x32xf32>
    %679 = vector.broadcast %678 : vector<1x32xf32> to vector<16x32xf32>
    %680 = arith.mulf %677, %679 : vector<16x32xf32>
    %681 = arith.addf %676, %680 : vector<16x32xf32>
    %682 = vector.broadcast %57 : vector<16x1xf32> to vector<16x32xf32>
    %683 = arith.mulf %681, %682 : vector<16x32xf32>
    %c6_413 = arith.constant 6 : index
    %c0_414 = arith.constant 0 : index
    %684 = vector.load %arg52[%c6_413, %c0_414] : memref<46x32xf32, #tpu.memory_space<vmem>>, vector<16x32xf32>
    %c6_415 = arith.constant 6 : index
    %c0_416 = arith.constant 0 : index
    %685 = vector.load %arg15[%c6_415, %c0_416] : memref<49x32xf32, #tpu.memory_space<vmem>>, vector<1x32xf32>
    %686 = vector.broadcast %685 : vector<1x32xf32> to vector<16x32xf32>
    %687 = arith.mulf %684, %686 : vector<16x32xf32>
    %c10_417 = arith.constant 10 : index
    %c0_418 = arith.constant 0 : index
    %688 = vector.load %arg52[%c10_417, %c0_418] : memref<46x32xf32, #tpu.memory_space<vmem>>, vector<16x32xf32>
    %c13_419 = arith.constant 13 : index
    %c0_420 = arith.constant 0 : index
    %689 = vector.load %arg15[%c13_419, %c0_420] : memref<49x32xf32, #tpu.memory_space<vmem>>, vector<1x32xf32>
    %690 = vector.broadcast %689 : vector<1x32xf32> to vector<16x32xf32>
    %691 = arith.mulf %688, %690 : vector<16x32xf32>
    %692 = arith.addf %687, %691 : vector<16x32xf32>
    %c14_421 = arith.constant 14 : index
    %c0_422 = arith.constant 0 : index
    %693 = vector.load %arg52[%c14_421, %c0_422] : memref<46x32xf32, #tpu.memory_space<vmem>>, vector<16x32xf32>
    %c20_423 = arith.constant 20 : index
    %c0_424 = arith.constant 0 : index
    %694 = vector.load %arg15[%c20_423, %c0_424] : memref<49x32xf32, #tpu.memory_space<vmem>>, vector<1x32xf32>
    %695 = vector.broadcast %694 : vector<1x32xf32> to vector<16x32xf32>
    %696 = arith.mulf %693, %695 : vector<16x32xf32>
    %697 = arith.addf %692, %696 : vector<16x32xf32>
    %c18_425 = arith.constant 18 : index
    %c0_426 = arith.constant 0 : index
    %698 = vector.load %arg52[%c18_425, %c0_426] : memref<46x32xf32, #tpu.memory_space<vmem>>, vector<16x32xf32>
    %c27_427 = arith.constant 27 : index
    %c0_428 = arith.constant 0 : index
    %699 = vector.load %arg15[%c27_427, %c0_428] : memref<49x32xf32, #tpu.memory_space<vmem>>, vector<1x32xf32>
    %700 = vector.broadcast %699 : vector<1x32xf32> to vector<16x32xf32>
    %701 = arith.mulf %698, %700 : vector<16x32xf32>
    %702 = arith.addf %697, %701 : vector<16x32xf32>
    %c22_429 = arith.constant 22 : index
    %c0_430 = arith.constant 0 : index
    %703 = vector.load %arg52[%c22_429, %c0_430] : memref<46x32xf32, #tpu.memory_space<vmem>>, vector<16x32xf32>
    %c34_431 = arith.constant 34 : index
    %c0_432 = arith.constant 0 : index
    %704 = vector.load %arg15[%c34_431, %c0_432] : memref<49x32xf32, #tpu.memory_space<vmem>>, vector<1x32xf32>
    %705 = vector.broadcast %704 : vector<1x32xf32> to vector<16x32xf32>
    %706 = arith.mulf %703, %705 : vector<16x32xf32>
    %707 = arith.addf %702, %706 : vector<16x32xf32>
    %c26_433 = arith.constant 26 : index
    %c0_434 = arith.constant 0 : index
    %708 = vector.load %arg52[%c26_433, %c0_434] : memref<46x32xf32, #tpu.memory_space<vmem>>, vector<16x32xf32>
    %c41_435 = arith.constant 41 : index
    %c0_436 = arith.constant 0 : index
    %709 = vector.load %arg15[%c41_435, %c0_436] : memref<49x32xf32, #tpu.memory_space<vmem>>, vector<1x32xf32>
    %710 = vector.broadcast %709 : vector<1x32xf32> to vector<16x32xf32>
    %711 = arith.mulf %708, %710 : vector<16x32xf32>
    %712 = arith.addf %707, %711 : vector<16x32xf32>
    %c30_437 = arith.constant 30 : index
    %c0_438 = arith.constant 0 : index
    %713 = vector.load %arg52[%c30_437, %c0_438] : memref<46x32xf32, #tpu.memory_space<vmem>>, vector<16x32xf32>
    %c48_439 = arith.constant 48 : index
    %c0_440 = arith.constant 0 : index
    %714 = vector.load %arg15[%c48_439, %c0_440] : memref<49x32xf32, #tpu.memory_space<vmem>>, vector<1x32xf32>
    %715 = vector.broadcast %714 : vector<1x32xf32> to vector<16x32xf32>
    %716 = arith.mulf %713, %715 : vector<16x32xf32>
    %717 = arith.addf %712, %716 : vector<16x32xf32>
    %718 = vector.broadcast %68 : vector<16x1xf32> to vector<16x32xf32>
    %719 = arith.mulf %717, %718 : vector<16x32xf32>
    %720 = arith.addf %505, %541 : vector<16x32xf32>
    %721 = arith.addf %720, %577 : vector<16x32xf32>
    %722 = arith.addf %721, %611 : vector<16x32xf32>
    %723 = arith.addf %722, %647 : vector<16x32xf32>
    %724 = arith.addf %723, %683 : vector<16x32xf32>
    %725 = arith.addf %724, %719 : vector<16x32xf32>
    %726 = vector.broadcast %468 : vector<1x32xf32> to vector<16x32xf32>
    %727 = arith.addf %725, %726 : vector<16x32xf32>
    %c0_441 = arith.constant 0 : index
    %c0_442 = arith.constant 0 : index
    %728 = vector.load %arg17[%c0_441, %c0_442] : memref<1x32xf32, #tpu.memory_space<vmem>>, vector<1x32xf32>
    %c0_443 = arith.constant 0 : index
    %c0_444 = arith.constant 0 : index
    %729 = vector.load %arg18[%c0_443, %c0_444] : memref<1x32xf32, #tpu.memory_space<vmem>>, vector<1x32xf32>
    %cst_445 = arith.constant dense<0.000000e+00> : vector<16xf32>
    %730 = vector.multi_reduction <add>, %727, %cst_445 [1] : vector<16x32xf32> to vector<16xf32>
    %731 = vector.shape_cast %730 : vector<16xf32> to vector<16x1xf32>
    %cst_446 = arith.constant 3.200000e+01 : f32
    %732 = vector.broadcast %cst_446 : f32 to vector<16x1xf32>
    %733 = arith.divf %731, %732 : vector<16x1xf32>
    %734 = vector.broadcast %733 : vector<16x1xf32> to vector<16x32xf32>
    %735 = arith.subf %727, %734 : vector<16x32xf32>
    %736 = arith.mulf %735, %735 : vector<16x32xf32>
    %cst_447 = arith.constant dense<0.000000e+00> : vector<16xf32>
    %737 = vector.multi_reduction <add>, %736, %cst_447 [1] : vector<16x32xf32> to vector<16xf32>
    %738 = vector.shape_cast %737 : vector<16xf32> to vector<16x1xf32>
    %cst_448 = arith.constant 3.200000e+01 : f32
    %739 = vector.broadcast %cst_448 : f32 to vector<16x1xf32>
    %740 = arith.divf %738, %739 : vector<16x1xf32>
    %cst_449 = arith.constant 9.99999997E-7 : f32
    %741 = vector.broadcast %cst_449 : f32 to vector<16x1xf32>
    %742 = arith.addf %740, %741 : vector<16x1xf32>
    %743 = math.rsqrt %742 : vector<16x1xf32>
    %744 = vector.broadcast %743 : vector<16x1xf32> to vector<16x32xf32>
    %745 = arith.mulf %735, %744 : vector<16x32xf32>
    %746 = vector.broadcast %728 : vector<1x32xf32> to vector<16x32xf32>
    %747 = arith.mulf %745, %746 : vector<16x32xf32>
    %748 = vector.broadcast %729 : vector<1x32xf32> to vector<16x32xf32>
    %749 = arith.addf %747, %748 : vector<16x32xf32>
    %c0_450 = arith.constant 0 : index
    %c0_451 = arith.constant 0 : index
    %750 = vector.load %arg19[%c0_450, %c0_451] : memref<32x128xbf16, #tpu.memory_space<vmem>>, vector<32x128xbf16>
    %c0_452 = arith.constant 0 : index
    %c0_453 = arith.constant 0 : index
    %751 = vector.load %arg20[%c0_452, %c0_453] : memref<1x128xf32, #tpu.memory_space<vmem>>, vector<1x128xf32>
    %752 = arith.truncf %749 : vector<16x32xf32> to vector<16x32xbf16>
    %cst_454 = arith.constant dense<0.000000e+00> : vector<16x128xf32>
    %753 = tpu.matmul %752, %750, %cst_454 {dimension_numbers = #tpu.dot_dimension_numbers<[1], [0], [0], [1], [0, 0, 1, 1], [], []>} : vector<16x32xbf16>, vector<32x128xbf16>, vector<16x128xf32> -> vector<16x128xf32>
    %754 = vector.broadcast %751 : vector<1x128xf32> to vector<16x128xf32>
    %755 = arith.addf %753, %754 : vector<16x128xf32>
    %cst_455 = arith.constant 5.000000e-01 : f32
    %756 = vector.broadcast %cst_455 : f32 to vector<16x128xf32>
    %757 = arith.mulf %756, %755 : vector<16x128xf32>
    %cst_456 = arith.constant 0.707106769 : f32
    %758 = vector.broadcast %cst_456 : f32 to vector<16x128xf32>
    %759 = arith.mulf %755, %758 : vector<16x128xf32>
    %760 = math.absf %759 : vector<16x128xf32>
    %cst_457 = arith.constant 0.327591091 : f32
    %761 = vector.broadcast %cst_457 : f32 to vector<16x128xf32>
    %762 = arith.mulf %761, %760 : vector<16x128xf32>
    %cst_458 = arith.constant 1.000000e+00 : f32
    %763 = vector.broadcast %cst_458 : f32 to vector<16x128xf32>
    %764 = arith.addf %763, %762 : vector<16x128xf32>
    %765 = tpu.reciprocal %764 {approx = true} : vector<16x128xf32> -> vector<16x128xf32>
    %cst_459 = arith.constant 1.06140542 : f32
    %766 = vector.broadcast %cst_459 : f32 to vector<16x128xf32>
    %767 = arith.mulf %766, %765 : vector<16x128xf32>
    %cst_460 = arith.constant -1.45315206 : f32
    %768 = vector.broadcast %cst_460 : f32 to vector<16x128xf32>
    %769 = arith.addf %767, %768 : vector<16x128xf32>
    %770 = arith.mulf %769, %765 : vector<16x128xf32>
    %cst_461 = arith.constant 1.42141378 : f32
    %771 = vector.broadcast %cst_461 : f32 to vector<16x128xf32>
    %772 = arith.addf %770, %771 : vector<16x128xf32>
    %773 = arith.mulf %772, %765 : vector<16x128xf32>
    %cst_462 = arith.constant -0.284496725 : f32
    %774 = vector.broadcast %cst_462 : f32 to vector<16x128xf32>
    %775 = arith.addf %773, %774 : vector<16x128xf32>
    %776 = arith.mulf %775, %765 : vector<16x128xf32>
    %cst_463 = arith.constant 0.254829586 : f32
    %777 = vector.broadcast %cst_463 : f32 to vector<16x128xf32>
    %778 = arith.addf %776, %777 : vector<16x128xf32>
    %779 = arith.mulf %778, %765 : vector<16x128xf32>
    %cst_464 = arith.constant 0.000000e+00 : f32
    %780 = vector.broadcast %cst_464 : f32 to vector<16x128xf32>
    %781 = arith.subf %780, %760 : vector<16x128xf32>
    %782 = arith.mulf %781, %760 : vector<16x128xf32>
    %783 = math.exp %782 : vector<16x128xf32>
    %784 = arith.mulf %779, %783 : vector<16x128xf32>
    %cst_465 = arith.constant 1.000000e+00 : f32
    %785 = vector.broadcast %cst_465 : f32 to vector<16x128xf32>
    %786 = arith.subf %785, %784 : vector<16x128xf32>
    %cst_466 = arith.constant 0.000000e+00 : f32
    %787 = vector.broadcast %cst_466 : f32 to vector<16x128xf32>
    %788 = arith.cmpf oge, %759, %787 : vector<16x128xf32>
    %cst_467 = arith.constant 0.000000e+00 : f32
    %789 = vector.broadcast %cst_467 : f32 to vector<16x128xf32>
    %790 = arith.subf %789, %786 : vector<16x128xf32>
    %791 = arith.select %788, %786, %790 : vector<16x128xi1>, vector<16x128xf32>
    %cst_468 = arith.constant 1.000000e+00 : f32
    %792 = vector.broadcast %cst_468 : f32 to vector<16x128xf32>
    %793 = arith.addf %792, %791 : vector<16x128xf32>
    %794 = arith.mulf %757, %793 : vector<16x128xf32>
    %c0_469 = arith.constant 0 : index
    %c0_470 = arith.constant 0 : index
    %795 = vector.load %arg21[%c0_469, %c0_470] : memref<128x32xbf16, #tpu.memory_space<vmem>>, vector<128x32xbf16>
    %c0_471 = arith.constant 0 : index
    %c0_472 = arith.constant 0 : index
    %796 = vector.load %arg22[%c0_471, %c0_472] : memref<1x32xf32, #tpu.memory_space<vmem>>, vector<1x32xf32>
    %797 = arith.truncf %794 : vector<16x128xf32> to vector<16x128xbf16>
    %cst_473 = arith.constant dense<0.000000e+00> : vector<16x32xf32>
    %798 = tpu.matmul %797, %795, %cst_473 {dimension_numbers = #tpu.dot_dimension_numbers<[1], [0], [0], [1], [0, 0, 1, 1], [], []>} : vector<16x128xbf16>, vector<128x32xbf16>, vector<16x32xf32> -> vector<16x32xf32>
    %799 = vector.broadcast %796 : vector<1x32xf32> to vector<16x32xf32>
    %800 = arith.addf %798, %799 : vector<16x32xf32>
    %c0_474 = arith.constant 0 : index
    %c0_475 = arith.constant 0 : index
    %801 = vector.load %arg23[%c0_474, %c0_475] : memref<1x32xf32, #tpu.memory_space<vmem>>, vector<1x32xf32>
    %802 = vector.broadcast %801 : vector<1x32xf32> to vector<16x32xf32>
    %803 = arith.mulf %802, %800 : vector<16x32xf32>
    %804 = arith.addf %467, %803 : vector<16x32xf32>
    %c0_476 = arith.constant 0 : index
    %c0_477 = arith.constant 0 : index
    %805 = vector.load %arg24[%c0_476, %c0_477] : memref<1x32xf32, #tpu.memory_space<vmem>>, vector<1x32xf32>
    %c0_478 = arith.constant 0 : index
    %c0_479 = arith.constant 0 : index
    %806 = vector.load %arg25[%c0_478, %c0_479] : memref<1x32xf32, #tpu.memory_space<vmem>>, vector<1x32xf32>
    %cst_480 = arith.constant dense<0.000000e+00> : vector<16xf32>
    %807 = vector.multi_reduction <add>, %804, %cst_480 [1] : vector<16x32xf32> to vector<16xf32>
    %808 = vector.shape_cast %807 : vector<16xf32> to vector<16x1xf32>
    %cst_481 = arith.constant 3.200000e+01 : f32
    %809 = vector.broadcast %cst_481 : f32 to vector<16x1xf32>
    %810 = arith.divf %808, %809 : vector<16x1xf32>
    %811 = vector.broadcast %810 : vector<16x1xf32> to vector<16x32xf32>
    %812 = arith.subf %804, %811 : vector<16x32xf32>
    %813 = arith.mulf %812, %812 : vector<16x32xf32>
    %cst_482 = arith.constant dense<0.000000e+00> : vector<16xf32>
    %814 = vector.multi_reduction <add>, %813, %cst_482 [1] : vector<16x32xf32> to vector<16xf32>
    %815 = vector.shape_cast %814 : vector<16xf32> to vector<16x1xf32>
    %cst_483 = arith.constant 3.200000e+01 : f32
    %816 = vector.broadcast %cst_483 : f32 to vector<16x1xf32>
    %817 = arith.divf %815, %816 : vector<16x1xf32>
    %cst_484 = arith.constant 9.99999997E-7 : f32
    %818 = vector.broadcast %cst_484 : f32 to vector<16x1xf32>
    %819 = arith.addf %817, %818 : vector<16x1xf32>
    %820 = math.rsqrt %819 : vector<16x1xf32>
    %821 = vector.broadcast %820 : vector<16x1xf32> to vector<16x32xf32>
    %822 = arith.mulf %812, %821 : vector<16x32xf32>
    %823 = vector.broadcast %805 : vector<1x32xf32> to vector<16x32xf32>
    %824 = arith.mulf %822, %823 : vector<16x32xf32>
    %825 = vector.broadcast %806 : vector<1x32xf32> to vector<16x32xf32>
    %826 = arith.addf %824, %825 : vector<16x32xf32>
    %827 = arith.truncf %826 : vector<16x32xf32> to vector<16x32xbf16>
    %c0_485 = arith.constant 0 : index
    %c0_486 = arith.constant 0 : index
    %828 = vector.load %arg27[%c0_485, %c0_486] : memref<128x64xbf16, #tpu.memory_space<vmem>>, vector<32x64xbf16>
    %cst_487 = arith.constant dense<0.000000e+00> : vector<16x64xf32>
    %829 = tpu.matmul %827, %828, %cst_487 {dimension_numbers = #tpu.dot_dimension_numbers<[1], [0], [0], [1], [0, 0, 1, 1], [], []>} : vector<16x32xbf16>, vector<32x64xbf16>, vector<16x64xf32> -> vector<16x64xf32>
    %c0_488 = arith.constant 0 : index
    %c0_489 = arith.constant 0 : index
    %c0_490 = arith.constant 0 : index
    %830 = vector.load %arg26[%c0_488, %c0_489, %c0_490] : memref<4x4x16xf32, #tpu.memory_space<vmem>>, vector<1x4x16xf32>
    %831 = vector.shape_cast %830 : vector<1x4x16xf32> to vector<4x16xf32>
    %cst_491 = arith.constant dense<0.000000e+00> : vector<4x64xf32>
    %832 = tpu.matmul %831, %829, %cst_491 {dimension_numbers = #tpu.dot_dimension_numbers<[1], [0], [0], [1], [0, 0, 1, 1], [], []>} : vector<4x16xf32>, vector<16x64xf32>, vector<4x64xf32> -> vector<4x64xf32>
    %c32_492 = arith.constant 32 : index
    %c0_493 = arith.constant 0 : index
    %833 = vector.load %arg27[%c32_492, %c0_493] : memref<128x64xbf16, #tpu.memory_space<vmem>>, vector<32x64xbf16>
    %cst_494 = arith.constant dense<0.000000e+00> : vector<16x64xf32>
    %834 = tpu.matmul %827, %833, %cst_494 {dimension_numbers = #tpu.dot_dimension_numbers<[1], [0], [0], [1], [0, 0, 1, 1], [], []>} : vector<16x32xbf16>, vector<32x64xbf16>, vector<16x64xf32> -> vector<16x64xf32>
    %c1_495 = arith.constant 1 : index
    %c0_496 = arith.constant 0 : index
    %c0_497 = arith.constant 0 : index
    %835 = vector.load %arg26[%c1_495, %c0_496, %c0_497] : memref<4x4x16xf32, #tpu.memory_space<vmem>>, vector<1x4x16xf32>
    %836 = vector.shape_cast %835 : vector<1x4x16xf32> to vector<4x16xf32>
    %cst_498 = arith.constant dense<0.000000e+00> : vector<4x64xf32>
    %837 = tpu.matmul %836, %834, %cst_498 {dimension_numbers = #tpu.dot_dimension_numbers<[1], [0], [0], [1], [0, 0, 1, 1], [], []>} : vector<4x16xf32>, vector<16x64xf32>, vector<4x64xf32> -> vector<4x64xf32>
    %838 = arith.addf %832, %837 : vector<4x64xf32>
    %c64 = arith.constant 64 : index
    %c0_499 = arith.constant 0 : index
    %839 = vector.load %arg27[%c64, %c0_499] : memref<128x64xbf16, #tpu.memory_space<vmem>>, vector<32x64xbf16>
    %cst_500 = arith.constant dense<0.000000e+00> : vector<16x64xf32>
    %840 = tpu.matmul %827, %839, %cst_500 {dimension_numbers = #tpu.dot_dimension_numbers<[1], [0], [0], [1], [0, 0, 1, 1], [], []>} : vector<16x32xbf16>, vector<32x64xbf16>, vector<16x64xf32> -> vector<16x64xf32>
    %c2_501 = arith.constant 2 : index
    %c0_502 = arith.constant 0 : index
    %c0_503 = arith.constant 0 : index
    %841 = vector.load %arg26[%c2_501, %c0_502, %c0_503] : memref<4x4x16xf32, #tpu.memory_space<vmem>>, vector<1x4x16xf32>
    %842 = vector.shape_cast %841 : vector<1x4x16xf32> to vector<4x16xf32>
    %cst_504 = arith.constant dense<0.000000e+00> : vector<4x64xf32>
    %843 = tpu.matmul %842, %840, %cst_504 {dimension_numbers = #tpu.dot_dimension_numbers<[1], [0], [0], [1], [0, 0, 1, 1], [], []>} : vector<4x16xf32>, vector<16x64xf32>, vector<4x64xf32> -> vector<4x64xf32>
    %844 = arith.addf %838, %843 : vector<4x64xf32>
    %c96 = arith.constant 96 : index
    %c0_505 = arith.constant 0 : index
    %845 = vector.load %arg27[%c96, %c0_505] : memref<128x64xbf16, #tpu.memory_space<vmem>>, vector<32x64xbf16>
    %cst_506 = arith.constant dense<0.000000e+00> : vector<16x64xf32>
    %846 = tpu.matmul %827, %845, %cst_506 {dimension_numbers = #tpu.dot_dimension_numbers<[1], [0], [0], [1], [0, 0, 1, 1], [], []>} : vector<16x32xbf16>, vector<32x64xbf16>, vector<16x64xf32> -> vector<16x64xf32>
    %c3_507 = arith.constant 3 : index
    %c0_508 = arith.constant 0 : index
    %c0_509 = arith.constant 0 : index
    %847 = vector.load %arg26[%c3_507, %c0_508, %c0_509] : memref<4x4x16xf32, #tpu.memory_space<vmem>>, vector<1x4x16xf32>
    %848 = vector.shape_cast %847 : vector<1x4x16xf32> to vector<4x16xf32>
    %cst_510 = arith.constant dense<0.000000e+00> : vector<4x64xf32>
    %849 = tpu.matmul %848, %846, %cst_510 {dimension_numbers = #tpu.dot_dimension_numbers<[1], [0], [0], [1], [0, 0, 1, 1], [], []>} : vector<4x16xf32>, vector<16x64xf32>, vector<4x64xf32> -> vector<4x64xf32>
    %850 = arith.addf %844, %849 : vector<4x64xf32>
    %c0_511 = arith.constant 0 : index
    %c0_512 = arith.constant 0 : index
    %851 = vector.load %arg28[%c0_511, %c0_512] : memref<1x64xf32, #tpu.memory_space<vmem>>, vector<1x64xf32>
    %852 = vector.broadcast %851 : vector<1x64xf32> to vector<4x64xf32>
    %853 = arith.addf %850, %852 : vector<4x64xf32>
    %c0_513 = arith.constant 0 : index
    %c0_514 = arith.constant 0 : index
    %854 = vector.load %arg30[%c0_513, %c0_514] : memref<1x64xf32, #tpu.memory_space<vmem>>, vector<1x64xf32>
    %c9_515 = arith.constant 9 : index
    %c0_516 = arith.constant 0 : index
    %855 = vector.load %arg53[%c9_515, %c0_516] : memref<22x64xf32, #tpu.memory_space<vmem>>, vector<4x64xf32>
    tpu.vector_store %arg53[%c9_515, %c0_516], %853 {strides = array<i32>} : memref<22x64xf32, #tpu.memory_space<vmem>>, vector<4x64xf32>,
    %c2_517 = arith.constant 2 : index
    %c0_518 = arith.constant 0 : index
    %856 = vector.load %arg53[%c2_517, %c0_518] : memref<22x64xf32, #tpu.memory_space<vmem>>, vector<4x64xf32>
    %c2_519 = arith.constant 2 : index
    %c0_520 = arith.constant 0 : index
    %857 = vector.load %arg29[%c2_519, %c0_520] : memref<49x64xf32, #tpu.memory_space<vmem>>, vector<1x64xf32>
    %858 = vector.broadcast %857 : vector<1x64xf32> to vector<4x64xf32>
    %859 = arith.mulf %856, %858 : vector<4x64xf32>
    %c4_521 = arith.constant 4 : index
    %c0_522 = arith.constant 0 : index
    %860 = vector.load %arg53[%c4_521, %c0_522] : memref<22x64xf32, #tpu.memory_space<vmem>>, vector<4x64xf32>
    %c9_523 = arith.constant 9 : index
    %c0_524 = arith.constant 0 : index
    %861 = vector.load %arg29[%c9_523, %c0_524] : memref<49x64xf32, #tpu.memory_space<vmem>>, vector<1x64xf32>
    %862 = vector.broadcast %861 : vector<1x64xf32> to vector<4x64xf32>
    %863 = arith.mulf %860, %862 : vector<4x64xf32>
    %864 = arith.addf %859, %863 : vector<4x64xf32>
    %c6_525 = arith.constant 6 : index
    %c0_526 = arith.constant 0 : index
    %865 = vector.load %arg53[%c6_525, %c0_526] : memref<22x64xf32, #tpu.memory_space<vmem>>, vector<4x64xf32>
    %c16_527 = arith.constant 16 : index
    %c0_528 = arith.constant 0 : index
    %866 = vector.load %arg29[%c16_527, %c0_528] : memref<49x64xf32, #tpu.memory_space<vmem>>, vector<1x64xf32>
    %867 = vector.broadcast %866 : vector<1x64xf32> to vector<4x64xf32>
    %868 = arith.mulf %865, %867 : vector<4x64xf32>
    %869 = arith.addf %864, %868 : vector<4x64xf32>
    %c8_529 = arith.constant 8 : index
    %c0_530 = arith.constant 0 : index
    %870 = vector.load %arg53[%c8_529, %c0_530] : memref<22x64xf32, #tpu.memory_space<vmem>>, vector<4x64xf32>
    %c23_531 = arith.constant 23 : index
    %c0_532 = arith.constant 0 : index
    %871 = vector.load %arg29[%c23_531, %c0_532] : memref<49x64xf32, #tpu.memory_space<vmem>>, vector<1x64xf32>
    %872 = vector.broadcast %871 : vector<1x64xf32> to vector<4x64xf32>
    %873 = arith.mulf %870, %872 : vector<4x64xf32>
    %874 = arith.addf %869, %873 : vector<4x64xf32>
    %c10_533 = arith.constant 10 : index
    %c0_534 = arith.constant 0 : index
    %875 = vector.load %arg53[%c10_533, %c0_534] : memref<22x64xf32, #tpu.memory_space<vmem>>, vector<4x64xf32>
    %c30_535 = arith.constant 30 : index
    %c0_536 = arith.constant 0 : index
    %876 = vector.load %arg29[%c30_535, %c0_536] : memref<49x64xf32, #tpu.memory_space<vmem>>, vector<1x64xf32>
    %877 = vector.broadcast %876 : vector<1x64xf32> to vector<4x64xf32>
    %878 = arith.mulf %875, %877 : vector<4x64xf32>
    %879 = arith.addf %874, %878 : vector<4x64xf32>
    %c12_537 = arith.constant 12 : index
    %c0_538 = arith.constant 0 : index
    %880 = vector.load %arg53[%c12_537, %c0_538] : memref<22x64xf32, #tpu.memory_space<vmem>>, vector<4x64xf32>
    %c37_539 = arith.constant 37 : index
    %c0_540 = arith.constant 0 : index
    %881 = vector.load %arg29[%c37_539, %c0_540] : memref<49x64xf32, #tpu.memory_space<vmem>>, vector<1x64xf32>
    %882 = vector.broadcast %881 : vector<1x64xf32> to vector<4x64xf32>
    %883 = arith.mulf %880, %882 : vector<4x64xf32>
    %884 = arith.addf %879, %883 : vector<4x64xf32>
    %c14_541 = arith.constant 14 : index
    %c0_542 = arith.constant 0 : index
    %885 = vector.load %arg53[%c14_541, %c0_542] : memref<22x64xf32, #tpu.memory_space<vmem>>, vector<4x64xf32>
    %c44_543 = arith.constant 44 : index
    %c0_544 = arith.constant 0 : index
    %886 = vector.load %arg29[%c44_543, %c0_544] : memref<49x64xf32, #tpu.memory_space<vmem>>, vector<1x64xf32>
    %887 = vector.broadcast %886 : vector<1x64xf32> to vector<4x64xf32>
    %888 = arith.mulf %885, %887 : vector<4x64xf32>
    %889 = arith.addf %884, %888 : vector<4x64xf32>
    %890 = vector.broadcast %82 : vector<4x1xf32> to vector<4x64xf32>
    %891 = arith.mulf %889, %890 : vector<4x64xf32>
    %c3_545 = arith.constant 3 : index
    %c0_546 = arith.constant 0 : index
    %892 = vector.load %arg53[%c3_545, %c0_546] : memref<22x64xf32, #tpu.memory_space<vmem>>, vector<4x64xf32>
    %c3_547 = arith.constant 3 : index
    %c0_548 = arith.constant 0 : index
    %893 = vector.load %arg29[%c3_547, %c0_548] : memref<49x64xf32, #tpu.memory_space<vmem>>, vector<1x64xf32>
    %894 = vector.broadcast %893 : vector<1x64xf32> to vector<4x64xf32>
    %895 = arith.mulf %892, %894 : vector<4x64xf32>
    %c5_549 = arith.constant 5 : index
    %c0_550 = arith.constant 0 : index
    %896 = vector.load %arg53[%c5_549, %c0_550] : memref<22x64xf32, #tpu.memory_space<vmem>>, vector<4x64xf32>
    %c10_551 = arith.constant 10 : index
    %c0_552 = arith.constant 0 : index
    %897 = vector.load %arg29[%c10_551, %c0_552] : memref<49x64xf32, #tpu.memory_space<vmem>>, vector<1x64xf32>
    %898 = vector.broadcast %897 : vector<1x64xf32> to vector<4x64xf32>
    %899 = arith.mulf %896, %898 : vector<4x64xf32>
    %900 = arith.addf %895, %899 : vector<4x64xf32>
    %c7_553 = arith.constant 7 : index
    %c0_554 = arith.constant 0 : index
    %901 = vector.load %arg53[%c7_553, %c0_554] : memref<22x64xf32, #tpu.memory_space<vmem>>, vector<4x64xf32>
    %c17_555 = arith.constant 17 : index
    %c0_556 = arith.constant 0 : index
    %902 = vector.load %arg29[%c17_555, %c0_556] : memref<49x64xf32, #tpu.memory_space<vmem>>, vector<1x64xf32>
    %903 = vector.broadcast %902 : vector<1x64xf32> to vector<4x64xf32>
    %904 = arith.mulf %901, %903 : vector<4x64xf32>
    %905 = arith.addf %900, %904 : vector<4x64xf32>
    %c9_557 = arith.constant 9 : index
    %c0_558 = arith.constant 0 : index
    %906 = vector.load %arg53[%c9_557, %c0_558] : memref<22x64xf32, #tpu.memory_space<vmem>>, vector<4x64xf32>
    %c24_559 = arith.constant 24 : index
    %c0_560 = arith.constant 0 : index
    %907 = vector.load %arg29[%c24_559, %c0_560] : memref<49x64xf32, #tpu.memory_space<vmem>>, vector<1x64xf32>
    %908 = vector.broadcast %907 : vector<1x64xf32> to vector<4x64xf32>
    %909 = arith.mulf %906, %908 : vector<4x64xf32>
    %910 = arith.addf %905, %909 : vector<4x64xf32>
    %c11_561 = arith.constant 11 : index
    %c0_562 = arith.constant 0 : index
    %911 = vector.load %arg53[%c11_561, %c0_562] : memref<22x64xf32, #tpu.memory_space<vmem>>, vector<4x64xf32>
    %c31_563 = arith.constant 31 : index
    %c0_564 = arith.constant 0 : index
    %912 = vector.load %arg29[%c31_563, %c0_564] : memref<49x64xf32, #tpu.memory_space<vmem>>, vector<1x64xf32>
    %913 = vector.broadcast %912 : vector<1x64xf32> to vector<4x64xf32>
    %914 = arith.mulf %911, %913 : vector<4x64xf32>
    %915 = arith.addf %910, %914 : vector<4x64xf32>
    %c13_565 = arith.constant 13 : index
    %c0_566 = arith.constant 0 : index
    %916 = vector.load %arg53[%c13_565, %c0_566] : memref<22x64xf32, #tpu.memory_space<vmem>>, vector<4x64xf32>
    %c38_567 = arith.constant 38 : index
    %c0_568 = arith.constant 0 : index
    %917 = vector.load %arg29[%c38_567, %c0_568] : memref<49x64xf32, #tpu.memory_space<vmem>>, vector<1x64xf32>
    %918 = vector.broadcast %917 : vector<1x64xf32> to vector<4x64xf32>
    %919 = arith.mulf %916, %918 : vector<4x64xf32>
    %920 = arith.addf %915, %919 : vector<4x64xf32>
    %c15_569 = arith.constant 15 : index
    %c0_570 = arith.constant 0 : index
    %921 = vector.load %arg53[%c15_569, %c0_570] : memref<22x64xf32, #tpu.memory_space<vmem>>, vector<4x64xf32>
    %c45_571 = arith.constant 45 : index
    %c0_572 = arith.constant 0 : index
    %922 = vector.load %arg29[%c45_571, %c0_572] : memref<49x64xf32, #tpu.memory_space<vmem>>, vector<1x64xf32>
    %923 = vector.broadcast %922 : vector<1x64xf32> to vector<4x64xf32>
    %924 = arith.mulf %921, %923 : vector<4x64xf32>
    %925 = arith.addf %920, %924 : vector<4x64xf32>
    %c4_573 = arith.constant 4 : index
    %c0_574 = arith.constant 0 : index
    %926 = vector.load %arg53[%c4_573, %c0_574] : memref<22x64xf32, #tpu.memory_space<vmem>>, vector<4x64xf32>
    %c4_575 = arith.constant 4 : index
    %c0_576 = arith.constant 0 : index
    %927 = vector.load %arg29[%c4_575, %c0_576] : memref<49x64xf32, #tpu.memory_space<vmem>>, vector<1x64xf32>
    %928 = vector.broadcast %927 : vector<1x64xf32> to vector<4x64xf32>
    %929 = arith.mulf %926, %928 : vector<4x64xf32>
    %c6_577 = arith.constant 6 : index
    %c0_578 = arith.constant 0 : index
    %930 = vector.load %arg53[%c6_577, %c0_578] : memref<22x64xf32, #tpu.memory_space<vmem>>, vector<4x64xf32>
    %c11_579 = arith.constant 11 : index
    %c0_580 = arith.constant 0 : index
    %931 = vector.load %arg29[%c11_579, %c0_580] : memref<49x64xf32, #tpu.memory_space<vmem>>, vector<1x64xf32>
    %932 = vector.broadcast %931 : vector<1x64xf32> to vector<4x64xf32>
    %933 = arith.mulf %930, %932 : vector<4x64xf32>
    %934 = arith.addf %929, %933 : vector<4x64xf32>
    %c8_581 = arith.constant 8 : index
    %c0_582 = arith.constant 0 : index
    %935 = vector.load %arg53[%c8_581, %c0_582] : memref<22x64xf32, #tpu.memory_space<vmem>>, vector<4x64xf32>
    %c18_583 = arith.constant 18 : index
    %c0_584 = arith.constant 0 : index
    %936 = vector.load %arg29[%c18_583, %c0_584] : memref<49x64xf32, #tpu.memory_space<vmem>>, vector<1x64xf32>
    %937 = vector.broadcast %936 : vector<1x64xf32> to vector<4x64xf32>
    %938 = arith.mulf %935, %937 : vector<4x64xf32>
    %939 = arith.addf %934, %938 : vector<4x64xf32>
    %c10_585 = arith.constant 10 : index
    %c0_586 = arith.constant 0 : index
    %940 = vector.load %arg53[%c10_585, %c0_586] : memref<22x64xf32, #tpu.memory_space<vmem>>, vector<4x64xf32>
    %c25_587 = arith.constant 25 : index
    %c0_588 = arith.constant 0 : index
    %941 = vector.load %arg29[%c25_587, %c0_588] : memref<49x64xf32, #tpu.memory_space<vmem>>, vector<1x64xf32>
    %942 = vector.broadcast %941 : vector<1x64xf32> to vector<4x64xf32>
    %943 = arith.mulf %940, %942 : vector<4x64xf32>
    %944 = arith.addf %939, %943 : vector<4x64xf32>
    %c12_589 = arith.constant 12 : index
    %c0_590 = arith.constant 0 : index
    %945 = vector.load %arg53[%c12_589, %c0_590] : memref<22x64xf32, #tpu.memory_space<vmem>>, vector<4x64xf32>
    %c32_591 = arith.constant 32 : index
    %c0_592 = arith.constant 0 : index
    %946 = vector.load %arg29[%c32_591, %c0_592] : memref<49x64xf32, #tpu.memory_space<vmem>>, vector<1x64xf32>
    %947 = vector.broadcast %946 : vector<1x64xf32> to vector<4x64xf32>
    %948 = arith.mulf %945, %947 : vector<4x64xf32>
    %949 = arith.addf %944, %948 : vector<4x64xf32>
    %c14_593 = arith.constant 14 : index
    %c0_594 = arith.constant 0 : index
    %950 = vector.load %arg53[%c14_593, %c0_594] : memref<22x64xf32, #tpu.memory_space<vmem>>, vector<4x64xf32>
    %c39_595 = arith.constant 39 : index
    %c0_596 = arith.constant 0 : index
    %951 = vector.load %arg29[%c39_595, %c0_596] : memref<49x64xf32, #tpu.memory_space<vmem>>, vector<1x64xf32>
    %952 = vector.broadcast %951 : vector<1x64xf32> to vector<4x64xf32>
    %953 = arith.mulf %950, %952 : vector<4x64xf32>
    %954 = arith.addf %949, %953 : vector<4x64xf32>
    %c16_597 = arith.constant 16 : index
    %c0_598 = arith.constant 0 : index
    %955 = vector.load %arg53[%c16_597, %c0_598] : memref<22x64xf32, #tpu.memory_space<vmem>>, vector<4x64xf32>
    %c46_599 = arith.constant 46 : index
    %c0_600 = arith.constant 0 : index
    %956 = vector.load %arg29[%c46_599, %c0_600] : memref<49x64xf32, #tpu.memory_space<vmem>>, vector<1x64xf32>
    %957 = vector.broadcast %956 : vector<1x64xf32> to vector<4x64xf32>
    %958 = arith.mulf %955, %957 : vector<4x64xf32>
    %959 = arith.addf %954, %958 : vector<4x64xf32>
    %960 = vector.broadcast %93 : vector<4x1xf32> to vector<4x64xf32>
    %961 = arith.mulf %959, %960 : vector<4x64xf32>
    %962 = arith.addf %891, %925 : vector<4x64xf32>
    %963 = arith.addf %962, %961 : vector<4x64xf32>
    %964 = vector.broadcast %854 : vector<1x64xf32> to vector<4x64xf32>
    %965 = arith.addf %963, %964 : vector<4x64xf32>
    %c0_601 = arith.constant 0 : index
    %c0_602 = arith.constant 0 : index
    %966 = vector.load %arg31[%c0_601, %c0_602] : memref<1x64xf32, #tpu.memory_space<vmem>>, vector<1x64xf32>
    %c0_603 = arith.constant 0 : index
    %c0_604 = arith.constant 0 : index
    %967 = vector.load %arg32[%c0_603, %c0_604] : memref<1x64xf32, #tpu.memory_space<vmem>>, vector<1x64xf32>
    %cst_605 = arith.constant dense<0.000000e+00> : vector<4xf32>
    %968 = vector.multi_reduction <add>, %965, %cst_605 [1] : vector<4x64xf32> to vector<4xf32>
    %969 = vector.shape_cast %968 : vector<4xf32> to vector<4x1xf32>
    %cst_606 = arith.constant 6.400000e+01 : f32
    %970 = vector.broadcast %cst_606 : f32 to vector<4x1xf32>
    %971 = arith.divf %969, %970 : vector<4x1xf32>
    %972 = vector.broadcast %971 : vector<4x1xf32> to vector<4x64xf32>
    %973 = arith.subf %965, %972 : vector<4x64xf32>
    %974 = arith.mulf %973, %973 : vector<4x64xf32>
    %cst_607 = arith.constant dense<0.000000e+00> : vector<4xf32>
    %975 = vector.multi_reduction <add>, %974, %cst_607 [1] : vector<4x64xf32> to vector<4xf32>
    %976 = vector.shape_cast %975 : vector<4xf32> to vector<4x1xf32>
    %cst_608 = arith.constant 6.400000e+01 : f32
    %977 = vector.broadcast %cst_608 : f32 to vector<4x1xf32>
    %978 = arith.divf %976, %977 : vector<4x1xf32>
    %cst_609 = arith.constant 9.99999997E-7 : f32
    %979 = vector.broadcast %cst_609 : f32 to vector<4x1xf32>
    %980 = arith.addf %978, %979 : vector<4x1xf32>
    %981 = math.rsqrt %980 : vector<4x1xf32>
    %982 = vector.broadcast %981 : vector<4x1xf32> to vector<4x64xf32>
    %983 = arith.mulf %973, %982 : vector<4x64xf32>
    %984 = vector.broadcast %966 : vector<1x64xf32> to vector<4x64xf32>
    %985 = arith.mulf %983, %984 : vector<4x64xf32>
    %986 = vector.broadcast %967 : vector<1x64xf32> to vector<4x64xf32>
    %987 = arith.addf %985, %986 : vector<4x64xf32>
    %c0_610 = arith.constant 0 : index
    %c0_611 = arith.constant 0 : index
    %988 = vector.load %arg33[%c0_610, %c0_611] : memref<64x256xbf16, #tpu.memory_space<vmem>>, vector<64x256xbf16>
    %c0_612 = arith.constant 0 : index
    %c0_613 = arith.constant 0 : index
    %989 = vector.load %arg34[%c0_612, %c0_613] : memref<1x256xf32, #tpu.memory_space<vmem>>, vector<1x256xf32>
    %990 = arith.truncf %987 : vector<4x64xf32> to vector<4x64xbf16>
    %cst_614 = arith.constant dense<0.000000e+00> : vector<4x256xf32>
    %991 = tpu.matmul %990, %988, %cst_614 {dimension_numbers = #tpu.dot_dimension_numbers<[1], [0], [0], [1], [0, 0, 1, 1], [], []>} : vector<4x64xbf16>, vector<64x256xbf16>, vector<4x256xf32> -> vector<4x256xf32>
    %992 = vector.broadcast %989 : vector<1x256xf32> to vector<4x256xf32>
    %993 = arith.addf %991, %992 : vector<4x256xf32>
    %cst_615 = arith.constant 5.000000e-01 : f32
    %994 = vector.broadcast %cst_615 : f32 to vector<4x256xf32>
    %995 = arith.mulf %994, %993 : vector<4x256xf32>
    %cst_616 = arith.constant 0.707106769 : f32
    %996 = vector.broadcast %cst_616 : f32 to vector<4x256xf32>
    %997 = arith.mulf %993, %996 : vector<4x256xf32>
    %998 = math.absf %997 : vector<4x256xf32>
    %cst_617 = arith.constant 0.327591091 : f32
    %999 = vector.broadcast %cst_617 : f32 to vector<4x256xf32>
    %1000 = arith.mulf %999, %998 : vector<4x256xf32>
    %cst_618 = arith.constant 1.000000e+00 : f32
    %1001 = vector.broadcast %cst_618 : f32 to vector<4x256xf32>
    %1002 = arith.addf %1001, %1000 : vector<4x256xf32>
    %1003 = tpu.reciprocal %1002 {approx = true} : vector<4x256xf32> -> vector<4x256xf32>
    %cst_619 = arith.constant 1.06140542 : f32
    %1004 = vector.broadcast %cst_619 : f32 to vector<4x256xf32>
    %1005 = arith.mulf %1004, %1003 : vector<4x256xf32>
    %cst_620 = arith.constant -1.45315206 : f32
    %1006 = vector.broadcast %cst_620 : f32 to vector<4x256xf32>
    %1007 = arith.addf %1005, %1006 : vector<4x256xf32>
    %1008 = arith.mulf %1007, %1003 : vector<4x256xf32>
    %cst_621 = arith.constant 1.42141378 : f32
    %1009 = vector.broadcast %cst_621 : f32 to vector<4x256xf32>
    %1010 = arith.addf %1008, %1009 : vector<4x256xf32>
    %1011 = arith.mulf %1010, %1003 : vector<4x256xf32>
    %cst_622 = arith.constant -0.284496725 : f32
    %1012 = vector.broadcast %cst_622 : f32 to vector<4x256xf32>
    %1013 = arith.addf %1011, %1012 : vector<4x256xf32>
    %1014 = arith.mulf %1013, %1003 : vector<4x256xf32>
    %cst_623 = arith.constant 0.254829586 : f32
    %1015 = vector.broadcast %cst_623 : f32 to vector<4x256xf32>
    %1016 = arith.addf %1014, %1015 : vector<4x256xf32>
    %1017 = arith.mulf %1016, %1003 : vector<4x256xf32>
    %cst_624 = arith.constant 0.000000e+00 : f32
    %1018 = vector.broadcast %cst_624 : f32 to vector<4x256xf32>
    %1019 = arith.subf %1018, %998 : vector<4x256xf32>
    %1020 = arith.mulf %1019, %998 : vector<4x256xf32>
    %1021 = math.exp %1020 : vector<4x256xf32>
    %1022 = arith.mulf %1017, %1021 : vector<4x256xf32>
    %cst_625 = arith.constant 1.000000e+00 : f32
    %1023 = vector.broadcast %cst_625 : f32 to vector<4x256xf32>
    %1024 = arith.subf %1023, %1022 : vector<4x256xf32>
    %cst_626 = arith.constant 0.000000e+00 : f32
    %1025 = vector.broadcast %cst_626 : f32 to vector<4x256xf32>
    %1026 = arith.cmpf oge, %997, %1025 : vector<4x256xf32>
    %cst_627 = arith.constant 0.000000e+00 : f32
    %1027 = vector.broadcast %cst_627 : f32 to vector<4x256xf32>
    %1028 = arith.subf %1027, %1024 : vector<4x256xf32>
    %1029 = arith.select %1026, %1024, %1028 : vector<4x256xi1>, vector<4x256xf32>
    %cst_628 = arith.constant 1.000000e+00 : f32
    %1030 = vector.broadcast %cst_628 : f32 to vector<4x256xf32>
    %1031 = arith.addf %1030, %1029 : vector<4x256xf32>
    %1032 = arith.mulf %995, %1031 : vector<4x256xf32>
    %c0_629 = arith.constant 0 : index
    %c0_630 = arith.constant 0 : index
    %1033 = vector.load %arg35[%c0_629, %c0_630] : memref<256x64xbf16, #tpu.memory_space<vmem>>, vector<256x64xbf16>
    %c0_631 = arith.constant 0 : index
    %c0_632 = arith.constant 0 : index
    %1034 = vector.load %arg36[%c0_631, %c0_632] : memref<1x64xf32, #tpu.memory_space<vmem>>, vector<1x64xf32>
    %1035 = arith.truncf %1032 : vector<4x256xf32> to vector<4x256xbf16>
    %cst_633 = arith.constant dense<0.000000e+00> : vector<4x64xf32>
    %1036 = tpu.matmul %1035, %1033, %cst_633 {dimension_numbers = #tpu.dot_dimension_numbers<[1], [0], [0], [1], [0, 0, 1, 1], [], []>} : vector<4x256xbf16>, vector<256x64xbf16>, vector<4x64xf32> -> vector<4x64xf32>
    %1037 = vector.broadcast %1034 : vector<1x64xf32> to vector<4x64xf32>
    %1038 = arith.addf %1036, %1037 : vector<4x64xf32>
    %c0_634 = arith.constant 0 : index
    %c0_635 = arith.constant 0 : index
    %1039 = vector.load %arg37[%c0_634, %c0_635] : memref<1x64xf32, #tpu.memory_space<vmem>>, vector<1x64xf32>
    %1040 = vector.broadcast %1039 : vector<1x64xf32> to vector<4x64xf32>
    %1041 = arith.mulf %1040, %1038 : vector<4x64xf32>
    %1042 = arith.addf %853, %1041 : vector<4x64xf32>
    %c0_636 = arith.constant 0 : index
    %c0_637 = arith.constant 0 : index
    %1043 = vector.load %arg39[%c0_636, %c0_637] : memref<1x64xf32, #tpu.memory_space<vmem>>, vector<1x64xf32>
    %c9_638 = arith.constant 9 : index
    %c0_639 = arith.constant 0 : index
    %1044 = vector.load %arg53[%c9_638, %c0_639] : memref<22x64xf32, #tpu.memory_space<vmem>>, vector<4x64xf32>
    tpu.vector_store %arg53[%c9_638, %c0_639], %1042 {strides = array<i32>} : memref<22x64xf32, #tpu.memory_space<vmem>>, vector<4x64xf32>,
    %c2_640 = arith.constant 2 : index
    %c0_641 = arith.constant 0 : index
    %1045 = vector.load %arg53[%c2_640, %c0_641] : memref<22x64xf32, #tpu.memory_space<vmem>>, vector<4x64xf32>
    %c2_642 = arith.constant 2 : index
    %c0_643 = arith.constant 0 : index
    %1046 = vector.load %arg38[%c2_642, %c0_643] : memref<49x64xf32, #tpu.memory_space<vmem>>, vector<1x64xf32>
    %1047 = vector.broadcast %1046 : vector<1x64xf32> to vector<4x64xf32>
    %1048 = arith.mulf %1045, %1047 : vector<4x64xf32>
    %c4_644 = arith.constant 4 : index
    %c0_645 = arith.constant 0 : index
    %1049 = vector.load %arg53[%c4_644, %c0_645] : memref<22x64xf32, #tpu.memory_space<vmem>>, vector<4x64xf32>
    %c9_646 = arith.constant 9 : index
    %c0_647 = arith.constant 0 : index
    %1050 = vector.load %arg38[%c9_646, %c0_647] : memref<49x64xf32, #tpu.memory_space<vmem>>, vector<1x64xf32>
    %1051 = vector.broadcast %1050 : vector<1x64xf32> to vector<4x64xf32>
    %1052 = arith.mulf %1049, %1051 : vector<4x64xf32>
    %1053 = arith.addf %1048, %1052 : vector<4x64xf32>
    %c6_648 = arith.constant 6 : index
    %c0_649 = arith.constant 0 : index
    %1054 = vector.load %arg53[%c6_648, %c0_649] : memref<22x64xf32, #tpu.memory_space<vmem>>, vector<4x64xf32>
    %c16_650 = arith.constant 16 : index
    %c0_651 = arith.constant 0 : index
    %1055 = vector.load %arg38[%c16_650, %c0_651] : memref<49x64xf32, #tpu.memory_space<vmem>>, vector<1x64xf32>
    %1056 = vector.broadcast %1055 : vector<1x64xf32> to vector<4x64xf32>
    %1057 = arith.mulf %1054, %1056 : vector<4x64xf32>
    %1058 = arith.addf %1053, %1057 : vector<4x64xf32>
    %c8_652 = arith.constant 8 : index
    %c0_653 = arith.constant 0 : index
    %1059 = vector.load %arg53[%c8_652, %c0_653] : memref<22x64xf32, #tpu.memory_space<vmem>>, vector<4x64xf32>
    %c23_654 = arith.constant 23 : index
    %c0_655 = arith.constant 0 : index
    %1060 = vector.load %arg38[%c23_654, %c0_655] : memref<49x64xf32, #tpu.memory_space<vmem>>, vector<1x64xf32>
    %1061 = vector.broadcast %1060 : vector<1x64xf32> to vector<4x64xf32>
    %1062 = arith.mulf %1059, %1061 : vector<4x64xf32>
    %1063 = arith.addf %1058, %1062 : vector<4x64xf32>
    %c10_656 = arith.constant 10 : index
    %c0_657 = arith.constant 0 : index
    %1064 = vector.load %arg53[%c10_656, %c0_657] : memref<22x64xf32, #tpu.memory_space<vmem>>, vector<4x64xf32>
    %c30_658 = arith.constant 30 : index
    %c0_659 = arith.constant 0 : index
    %1065 = vector.load %arg38[%c30_658, %c0_659] : memref<49x64xf32, #tpu.memory_space<vmem>>, vector<1x64xf32>
    %1066 = vector.broadcast %1065 : vector<1x64xf32> to vector<4x64xf32>
    %1067 = arith.mulf %1064, %1066 : vector<4x64xf32>
    %1068 = arith.addf %1063, %1067 : vector<4x64xf32>
    %c12_660 = arith.constant 12 : index
    %c0_661 = arith.constant 0 : index
    %1069 = vector.load %arg53[%c12_660, %c0_661] : memref<22x64xf32, #tpu.memory_space<vmem>>, vector<4x64xf32>
    %c37_662 = arith.constant 37 : index
    %c0_663 = arith.constant 0 : index
    %1070 = vector.load %arg38[%c37_662, %c0_663] : memref<49x64xf32, #tpu.memory_space<vmem>>, vector<1x64xf32>
    %1071 = vector.broadcast %1070 : vector<1x64xf32> to vector<4x64xf32>
    %1072 = arith.mulf %1069, %1071 : vector<4x64xf32>
    %1073 = arith.addf %1068, %1072 : vector<4x64xf32>
    %c14_664 = arith.constant 14 : index
    %c0_665 = arith.constant 0 : index
    %1074 = vector.load %arg53[%c14_664, %c0_665] : memref<22x64xf32, #tpu.memory_space<vmem>>, vector<4x64xf32>
    %c44_666 = arith.constant 44 : index
    %c0_667 = arith.constant 0 : index
    %1075 = vector.load %arg38[%c44_666, %c0_667] : memref<49x64xf32, #tpu.memory_space<vmem>>, vector<1x64xf32>
    %1076 = vector.broadcast %1075 : vector<1x64xf32> to vector<4x64xf32>
    %1077 = arith.mulf %1074, %1076 : vector<4x64xf32>
    %1078 = arith.addf %1073, %1077 : vector<4x64xf32>
    %1079 = vector.broadcast %82 : vector<4x1xf32> to vector<4x64xf32>
    %1080 = arith.mulf %1078, %1079 : vector<4x64xf32>
    %c3_668 = arith.constant 3 : index
    %c0_669 = arith.constant 0 : index
    %1081 = vector.load %arg53[%c3_668, %c0_669] : memref<22x64xf32, #tpu.memory_space<vmem>>, vector<4x64xf32>
    %c3_670 = arith.constant 3 : index
    %c0_671 = arith.constant 0 : index
    %1082 = vector.load %arg38[%c3_670, %c0_671] : memref<49x64xf32, #tpu.memory_space<vmem>>, vector<1x64xf32>
    %1083 = vector.broadcast %1082 : vector<1x64xf32> to vector<4x64xf32>
    %1084 = arith.mulf %1081, %1083 : vector<4x64xf32>
    %c5_672 = arith.constant 5 : index
    %c0_673 = arith.constant 0 : index
    %1085 = vector.load %arg53[%c5_672, %c0_673] : memref<22x64xf32, #tpu.memory_space<vmem>>, vector<4x64xf32>
    %c10_674 = arith.constant 10 : index
    %c0_675 = arith.constant 0 : index
    %1086 = vector.load %arg38[%c10_674, %c0_675] : memref<49x64xf32, #tpu.memory_space<vmem>>, vector<1x64xf32>
    %1087 = vector.broadcast %1086 : vector<1x64xf32> to vector<4x64xf32>
    %1088 = arith.mulf %1085, %1087 : vector<4x64xf32>
    %1089 = arith.addf %1084, %1088 : vector<4x64xf32>
    %c7_676 = arith.constant 7 : index
    %c0_677 = arith.constant 0 : index
    %1090 = vector.load %arg53[%c7_676, %c0_677] : memref<22x64xf32, #tpu.memory_space<vmem>>, vector<4x64xf32>
    %c17_678 = arith.constant 17 : index
    %c0_679 = arith.constant 0 : index
    %1091 = vector.load %arg38[%c17_678, %c0_679] : memref<49x64xf32, #tpu.memory_space<vmem>>, vector<1x64xf32>
    %1092 = vector.broadcast %1091 : vector<1x64xf32> to vector<4x64xf32>
    %1093 = arith.mulf %1090, %1092 : vector<4x64xf32>
    %1094 = arith.addf %1089, %1093 : vector<4x64xf32>
    %c9_680 = arith.constant 9 : index
    %c0_681 = arith.constant 0 : index
    %1095 = vector.load %arg53[%c9_680, %c0_681] : memref<22x64xf32, #tpu.memory_space<vmem>>, vector<4x64xf32>
    %c24_682 = arith.constant 24 : index
    %c0_683 = arith.constant 0 : index
    %1096 = vector.load %arg38[%c24_682, %c0_683] : memref<49x64xf32, #tpu.memory_space<vmem>>, vector<1x64xf32>
    %1097 = vector.broadcast %1096 : vector<1x64xf32> to vector<4x64xf32>
    %1098 = arith.mulf %1095, %1097 : vector<4x64xf32>
    %1099 = arith.addf %1094, %1098 : vector<4x64xf32>
    %c11_684 = arith.constant 11 : index
    %c0_685 = arith.constant 0 : index
    %1100 = vector.load %arg53[%c11_684, %c0_685] : memref<22x64xf32, #tpu.memory_space<vmem>>, vector<4x64xf32>
    %c31_686 = arith.constant 31 : index
    %c0_687 = arith.constant 0 : index
    %1101 = vector.load %arg38[%c31_686, %c0_687] : memref<49x64xf32, #tpu.memory_space<vmem>>, vector<1x64xf32>
    %1102 = vector.broadcast %1101 : vector<1x64xf32> to vector<4x64xf32>
    %1103 = arith.mulf %1100, %1102 : vector<4x64xf32>
    %1104 = arith.addf %1099, %1103 : vector<4x64xf32>
    %c13_688 = arith.constant 13 : index
    %c0_689 = arith.constant 0 : index
    %1105 = vector.load %arg53[%c13_688, %c0_689] : memref<22x64xf32, #tpu.memory_space<vmem>>, vector<4x64xf32>
    %c38_690 = arith.constant 38 : index
    %c0_691 = arith.constant 0 : index
    %1106 = vector.load %arg38[%c38_690, %c0_691] : memref<49x64xf32, #tpu.memory_space<vmem>>, vector<1x64xf32>
    %1107 = vector.broadcast %1106 : vector<1x64xf32> to vector<4x64xf32>
    %1108 = arith.mulf %1105, %1107 : vector<4x64xf32>
    %1109 = arith.addf %1104, %1108 : vector<4x64xf32>
    %c15_692 = arith.constant 15 : index
    %c0_693 = arith.constant 0 : index
    %1110 = vector.load %arg53[%c15_692, %c0_693] : memref<22x64xf32, #tpu.memory_space<vmem>>, vector<4x64xf32>
    %c45_694 = arith.constant 45 : index
    %c0_695 = arith.constant 0 : index
    %1111 = vector.load %arg38[%c45_694, %c0_695] : memref<49x64xf32, #tpu.memory_space<vmem>>, vector<1x64xf32>
    %1112 = vector.broadcast %1111 : vector<1x64xf32> to vector<4x64xf32>
    %1113 = arith.mulf %1110, %1112 : vector<4x64xf32>
    %1114 = arith.addf %1109, %1113 : vector<4x64xf32>
    %c4_696 = arith.constant 4 : index
    %c0_697 = arith.constant 0 : index
    %1115 = vector.load %arg53[%c4_696, %c0_697] : memref<22x64xf32, #tpu.memory_space<vmem>>, vector<4x64xf32>
    %c4_698 = arith.constant 4 : index
    %c0_699 = arith.constant 0 : index
    %1116 = vector.load %arg38[%c4_698, %c0_699] : memref<49x64xf32, #tpu.memory_space<vmem>>, vector<1x64xf32>
    %1117 = vector.broadcast %1116 : vector<1x64xf32> to vector<4x64xf32>
    %1118 = arith.mulf %1115, %1117 : vector<4x64xf32>
    %c6_700 = arith.constant 6 : index
    %c0_701 = arith.constant 0 : index
    %1119 = vector.load %arg53[%c6_700, %c0_701] : memref<22x64xf32, #tpu.memory_space<vmem>>, vector<4x64xf32>
    %c11_702 = arith.constant 11 : index
    %c0_703 = arith.constant 0 : index
    %1120 = vector.load %arg38[%c11_702, %c0_703] : memref<49x64xf32, #tpu.memory_space<vmem>>, vector<1x64xf32>
    %1121 = vector.broadcast %1120 : vector<1x64xf32> to vector<4x64xf32>
    %1122 = arith.mulf %1119, %1121 : vector<4x64xf32>
    %1123 = arith.addf %1118, %1122 : vector<4x64xf32>
    %c8_704 = arith.constant 8 : index
    %c0_705 = arith.constant 0 : index
    %1124 = vector.load %arg53[%c8_704, %c0_705] : memref<22x64xf32, #tpu.memory_space<vmem>>, vector<4x64xf32>
    %c18_706 = arith.constant 18 : index
    %c0_707 = arith.constant 0 : index
    %1125 = vector.load %arg38[%c18_706, %c0_707] : memref<49x64xf32, #tpu.memory_space<vmem>>, vector<1x64xf32>
    %1126 = vector.broadcast %1125 : vector<1x64xf32> to vector<4x64xf32>
    %1127 = arith.mulf %1124, %1126 : vector<4x64xf32>
    %1128 = arith.addf %1123, %1127 : vector<4x64xf32>
    %c10_708 = arith.constant 10 : index
    %c0_709 = arith.constant 0 : index
    %1129 = vector.load %arg53[%c10_708, %c0_709] : memref<22x64xf32, #tpu.memory_space<vmem>>, vector<4x64xf32>
    %c25_710 = arith.constant 25 : index
    %c0_711 = arith.constant 0 : index
    %1130 = vector.load %arg38[%c25_710, %c0_711] : memref<49x64xf32, #tpu.memory_space<vmem>>, vector<1x64xf32>
    %1131 = vector.broadcast %1130 : vector<1x64xf32> to vector<4x64xf32>
    %1132 = arith.mulf %1129, %1131 : vector<4x64xf32>
    %1133 = arith.addf %1128, %1132 : vector<4x64xf32>
    %c12_712 = arith.constant 12 : index
    %c0_713 = arith.constant 0 : index
    %1134 = vector.load %arg53[%c12_712, %c0_713] : memref<22x64xf32, #tpu.memory_space<vmem>>, vector<4x64xf32>
    %c32_714 = arith.constant 32 : index
    %c0_715 = arith.constant 0 : index
    %1135 = vector.load %arg38[%c32_714, %c0_715] : memref<49x64xf32, #tpu.memory_space<vmem>>, vector<1x64xf32>
    %1136 = vector.broadcast %1135 : vector<1x64xf32> to vector<4x64xf32>
    %1137 = arith.mulf %1134, %1136 : vector<4x64xf32>
    %1138 = arith.addf %1133, %1137 : vector<4x64xf32>
    %c14_716 = arith.constant 14 : index
    %c0_717 = arith.constant 0 : index
    %1139 = vector.load %arg53[%c14_716, %c0_717] : memref<22x64xf32, #tpu.memory_space<vmem>>, vector<4x64xf32>
    %c39_718 = arith.constant 39 : index
    %c0_719 = arith.constant 0 : index
    %1140 = vector.load %arg38[%c39_718, %c0_719] : memref<49x64xf32, #tpu.memory_space<vmem>>, vector<1x64xf32>
    %1141 = vector.broadcast %1140 : vector<1x64xf32> to vector<4x64xf32>
    %1142 = arith.mulf %1139, %1141 : vector<4x64xf32>
    %1143 = arith.addf %1138, %1142 : vector<4x64xf32>
    %c16_720 = arith.constant 16 : index
    %c0_721 = arith.constant 0 : index
    %1144 = vector.load %arg53[%c16_720, %c0_721] : memref<22x64xf32, #tpu.memory_space<vmem>>, vector<4x64xf32>
    %c46_722 = arith.constant 46 : index
    %c0_723 = arith.constant 0 : index
    %1145 = vector.load %arg38[%c46_722, %c0_723] : memref<49x64xf32, #tpu.memory_space<vmem>>, vector<1x64xf32>
    %1146 = vector.broadcast %1145 : vector<1x64xf32> to vector<4x64xf32>
    %1147 = arith.mulf %1144, %1146 : vector<4x64xf32>
    %1148 = arith.addf %1143, %1147 : vector<4x64xf32>
    %1149 = vector.broadcast %93 : vector<4x1xf32> to vector<4x64xf32>
    %1150 = arith.mulf %1148, %1149 : vector<4x64xf32>
    %1151 = arith.addf %1080, %1114 : vector<4x64xf32>
    %1152 = arith.addf %1151, %1150 : vector<4x64xf32>
    %1153 = vector.broadcast %1043 : vector<1x64xf32> to vector<4x64xf32>
    %1154 = arith.addf %1152, %1153 : vector<4x64xf32>
    %c0_724 = arith.constant 0 : index
    %c0_725 = arith.constant 0 : index
    %1155 = vector.load %arg40[%c0_724, %c0_725] : memref<1x64xf32, #tpu.memory_space<vmem>>, vector<1x64xf32>
    %c0_726 = arith.constant 0 : index
    %c0_727 = arith.constant 0 : index
    %1156 = vector.load %arg41[%c0_726, %c0_727] : memref<1x64xf32, #tpu.memory_space<vmem>>, vector<1x64xf32>
    %cst_728 = arith.constant dense<0.000000e+00> : vector<4xf32>
    %1157 = vector.multi_reduction <add>, %1154, %cst_728 [1] : vector<4x64xf32> to vector<4xf32>
    %1158 = vector.shape_cast %1157 : vector<4xf32> to vector<4x1xf32>
    %cst_729 = arith.constant 6.400000e+01 : f32
    %1159 = vector.broadcast %cst_729 : f32 to vector<4x1xf32>
    %1160 = arith.divf %1158, %1159 : vector<4x1xf32>
    %1161 = vector.broadcast %1160 : vector<4x1xf32> to vector<4x64xf32>
    %1162 = arith.subf %1154, %1161 : vector<4x64xf32>
    %1163 = arith.mulf %1162, %1162 : vector<4x64xf32>
    %cst_730 = arith.constant dense<0.000000e+00> : vector<4xf32>
    %1164 = vector.multi_reduction <add>, %1163, %cst_730 [1] : vector<4x64xf32> to vector<4xf32>
    %1165 = vector.shape_cast %1164 : vector<4xf32> to vector<4x1xf32>
    %cst_731 = arith.constant 6.400000e+01 : f32
    %1166 = vector.broadcast %cst_731 : f32 to vector<4x1xf32>
    %1167 = arith.divf %1165, %1166 : vector<4x1xf32>
    %cst_732 = arith.constant 9.99999997E-7 : f32
    %1168 = vector.broadcast %cst_732 : f32 to vector<4x1xf32>
    %1169 = arith.addf %1167, %1168 : vector<4x1xf32>
    %1170 = math.rsqrt %1169 : vector<4x1xf32>
    %1171 = vector.broadcast %1170 : vector<4x1xf32> to vector<4x64xf32>
    %1172 = arith.mulf %1162, %1171 : vector<4x64xf32>
    %1173 = vector.broadcast %1155 : vector<1x64xf32> to vector<4x64xf32>
    %1174 = arith.mulf %1172, %1173 : vector<4x64xf32>
    %1175 = vector.broadcast %1156 : vector<1x64xf32> to vector<4x64xf32>
    %1176 = arith.addf %1174, %1175 : vector<4x64xf32>
    %c0_733 = arith.constant 0 : index
    %c0_734 = arith.constant 0 : index
    %1177 = vector.load %arg42[%c0_733, %c0_734] : memref<64x256xbf16, #tpu.memory_space<vmem>>, vector<64x256xbf16>
    %c0_735 = arith.constant 0 : index
    %c0_736 = arith.constant 0 : index
    %1178 = vector.load %arg43[%c0_735, %c0_736] : memref<1x256xf32, #tpu.memory_space<vmem>>, vector<1x256xf32>
    %1179 = arith.truncf %1176 : vector<4x64xf32> to vector<4x64xbf16>
    %cst_737 = arith.constant dense<0.000000e+00> : vector<4x256xf32>
    %1180 = tpu.matmul %1179, %1177, %cst_737 {dimension_numbers = #tpu.dot_dimension_numbers<[1], [0], [0], [1], [0, 0, 1, 1], [], []>} : vector<4x64xbf16>, vector<64x256xbf16>, vector<4x256xf32> -> vector<4x256xf32>
    %1181 = vector.broadcast %1178 : vector<1x256xf32> to vector<4x256xf32>
    %1182 = arith.addf %1180, %1181 : vector<4x256xf32>
    %cst_738 = arith.constant 5.000000e-01 : f32
    %1183 = vector.broadcast %cst_738 : f32 to vector<4x256xf32>
    %1184 = arith.mulf %1183, %1182 : vector<4x256xf32>
    %cst_739 = arith.constant 0.707106769 : f32
    %1185 = vector.broadcast %cst_739 : f32 to vector<4x256xf32>
    %1186 = arith.mulf %1182, %1185 : vector<4x256xf32>
    %1187 = math.absf %1186 : vector<4x256xf32>
    %cst_740 = arith.constant 0.327591091 : f32
    %1188 = vector.broadcast %cst_740 : f32 to vector<4x256xf32>
    %1189 = arith.mulf %1188, %1187 : vector<4x256xf32>
    %cst_741 = arith.constant 1.000000e+00 : f32
    %1190 = vector.broadcast %cst_741 : f32 to vector<4x256xf32>
    %1191 = arith.addf %1190, %1189 : vector<4x256xf32>
    %1192 = tpu.reciprocal %1191 {approx = true} : vector<4x256xf32> -> vector<4x256xf32>
    %cst_742 = arith.constant 1.06140542 : f32
    %1193 = vector.broadcast %cst_742 : f32 to vector<4x256xf32>
    %1194 = arith.mulf %1193, %1192 : vector<4x256xf32>
    %cst_743 = arith.constant -1.45315206 : f32
    %1195 = vector.broadcast %cst_743 : f32 to vector<4x256xf32>
    %1196 = arith.addf %1194, %1195 : vector<4x256xf32>
    %1197 = arith.mulf %1196, %1192 : vector<4x256xf32>
    %cst_744 = arith.constant 1.42141378 : f32
    %1198 = vector.broadcast %cst_744 : f32 to vector<4x256xf32>
    %1199 = arith.addf %1197, %1198 : vector<4x256xf32>
    %1200 = arith.mulf %1199, %1192 : vector<4x256xf32>
    %cst_745 = arith.constant -0.284496725 : f32
    %1201 = vector.broadcast %cst_745 : f32 to vector<4x256xf32>
    %1202 = arith.addf %1200, %1201 : vector<4x256xf32>
    %1203 = arith.mulf %1202, %1192 : vector<4x256xf32>
    %cst_746 = arith.constant 0.254829586 : f32
    %1204 = vector.broadcast %cst_746 : f32 to vector<4x256xf32>
    %1205 = arith.addf %1203, %1204 : vector<4x256xf32>
    %1206 = arith.mulf %1205, %1192 : vector<4x256xf32>
    %cst_747 = arith.constant 0.000000e+00 : f32
    %1207 = vector.broadcast %cst_747 : f32 to vector<4x256xf32>
    %1208 = arith.subf %1207, %1187 : vector<4x256xf32>
    %1209 = arith.mulf %1208, %1187 : vector<4x256xf32>
    %1210 = math.exp %1209 : vector<4x256xf32>
    %1211 = arith.mulf %1206, %1210 : vector<4x256xf32>
    %cst_748 = arith.constant 1.000000e+00 : f32
    %1212 = vector.broadcast %cst_748 : f32 to vector<4x256xf32>
    %1213 = arith.subf %1212, %1211 : vector<4x256xf32>
    %cst_749 = arith.constant 0.000000e+00 : f32
    %1214 = vector.broadcast %cst_749 : f32 to vector<4x256xf32>
    %1215 = arith.cmpf oge, %1186, %1214 : vector<4x256xf32>
    %cst_750 = arith.constant 0.000000e+00 : f32
    %1216 = vector.broadcast %cst_750 : f32 to vector<4x256xf32>
    %1217 = arith.subf %1216, %1213 : vector<4x256xf32>
    %1218 = arith.select %1215, %1213, %1217 : vector<4x256xi1>, vector<4x256xf32>
    %cst_751 = arith.constant 1.000000e+00 : f32
    %1219 = vector.broadcast %cst_751 : f32 to vector<4x256xf32>
    %1220 = arith.addf %1219, %1218 : vector<4x256xf32>
    %1221 = arith.mulf %1184, %1220 : vector<4x256xf32>
    %c0_752 = arith.constant 0 : index
    %c0_753 = arith.constant 0 : index
    %1222 = vector.load %arg44[%c0_752, %c0_753] : memref<256x64xbf16, #tpu.memory_space<vmem>>, vector<256x64xbf16>
    %c0_754 = arith.constant 0 : index
    %c0_755 = arith.constant 0 : index
    %1223 = vector.load %arg45[%c0_754, %c0_755] : memref<1x64xf32, #tpu.memory_space<vmem>>, vector<1x64xf32>
    %1224 = arith.truncf %1221 : vector<4x256xf32> to vector<4x256xbf16>
    %cst_756 = arith.constant dense<0.000000e+00> : vector<4x64xf32>
    %1225 = tpu.matmul %1224, %1222, %cst_756 {dimension_numbers = #tpu.dot_dimension_numbers<[1], [0], [0], [1], [0, 0, 1, 1], [], []>} : vector<4x256xbf16>, vector<256x64xbf16>, vector<4x64xf32> -> vector<4x64xf32>
    %1226 = vector.broadcast %1223 : vector<1x64xf32> to vector<4x64xf32>
    %1227 = arith.addf %1225, %1226 : vector<4x64xf32>
    %c0_757 = arith.constant 0 : index
    %c0_758 = arith.constant 0 : index
    %1228 = vector.load %arg46[%c0_757, %c0_758] : memref<1x64xf32, #tpu.memory_space<vmem>>, vector<1x64xf32>
    %1229 = vector.broadcast %1228 : vector<1x64xf32> to vector<4x64xf32>
    %1230 = arith.mulf %1229, %1227 : vector<4x64xf32>
    %1231 = arith.addf %1042, %1230 : vector<4x64xf32>
    %cst_759 = arith.constant dense<0.000000e+00> : vector<64xf32>
    %1232 = vector.multi_reduction <add>, %1231, %cst_759 [0] : vector<4x64xf32> to vector<64xf32>
    %1233 = vector.shape_cast %1232 : vector<64xf32> to vector<1x64xf32>
    %cst_760 = arith.constant 4.000000e+00 : f32
    %1234 = vector.broadcast %cst_760 : f32 to vector<1x64xf32>
    %1235 = arith.divf %1233, %1234 : vector<1x64xf32>
    %c0_761 = arith.constant 0 : index
    %c0_762 = arith.constant 0 : index
    %1236 = vector.load %arg47[%c0_761, %c0_762] : memref<1x64xf32, #tpu.memory_space<vmem>>, vector<1x64xf32>
    %c0_763 = arith.constant 0 : index
    %c0_764 = arith.constant 0 : index
    %1237 = vector.load %arg48[%c0_763, %c0_764] : memref<1x64xf32, #tpu.memory_space<vmem>>, vector<1x64xf32>
    %cst_765 = arith.constant dense<0.000000e+00> : vector<1xf32>
    %1238 = vector.multi_reduction <add>, %1235, %cst_765 [1] : vector<1x64xf32> to vector<1xf32>
    %1239 = vector.shape_cast %1238 : vector<1xf32> to vector<1x1xf32>
    %cst_766 = arith.constant 6.400000e+01 : f32
    %1240 = vector.broadcast %cst_766 : f32 to vector<1x1xf32>
    %1241 = arith.divf %1239, %1240 : vector<1x1xf32>
    %1242 = vector.broadcast %1241 : vector<1x1xf32> to vector<1x64xf32>
    %1243 = arith.subf %1235, %1242 : vector<1x64xf32>
    %1244 = arith.mulf %1243, %1243 : vector<1x64xf32>
    %cst_767 = arith.constant dense<0.000000e+00> : vector<1xf32>
    %1245 = vector.multi_reduction <add>, %1244, %cst_767 [1] : vector<1x64xf32> to vector<1xf32>
    %1246 = vector.shape_cast %1245 : vector<1xf32> to vector<1x1xf32>
    %cst_768 = arith.constant 6.400000e+01 : f32
    %1247 = vector.broadcast %cst_768 : f32 to vector<1x1xf32>
    %1248 = arith.divf %1246, %1247 : vector<1x1xf32>
    %cst_769 = arith.constant 9.99999997E-7 : f32
    %1249 = vector.broadcast %cst_769 : f32 to vector<1x1xf32>
    %1250 = arith.addf %1248, %1249 : vector<1x1xf32>
    %1251 = math.rsqrt %1250 : vector<1x1xf32>
    %1252 = vector.broadcast %1251 : vector<1x1xf32> to vector<1x64xf32>
    %1253 = arith.mulf %1243, %1252 : vector<1x64xf32>
    %1254 = arith.mulf %1253, %1236 : vector<1x64xf32>
    %1255 = arith.addf %1254, %1237 : vector<1x64xf32>
    %c0_770 = arith.constant 0 : index
    %c0_771 = arith.constant 0 : index
    %1256 = vector.load %arg49[%c0_770, %c0_771] : memref<64x128xf32, #tpu.memory_space<vmem>>, vector<64x128xf32>
    %cst_772 = arith.constant dense<0.000000e+00> : vector<1x128xf32>
    %1257 = tpu.matmul %1255, %1256, %cst_772 {dimension_numbers = #tpu.dot_dimension_numbers<[1], [0], [0], [1], [0, 0, 1, 1], [], []>} : vector<1x64xf32>, vector<64x128xf32>, vector<1x128xf32> -> vector<1x128xf32>
    %c0_773 = arith.constant 0 : index
    %c0_774 = arith.constant 0 : index
    %1258 = vector.load %arg50[%c0_773, %c0_774] : memref<1x128xf32, #tpu.memory_space<vmem>>, vector<1x128xf32>
    %1259 = arith.addf %1257, %1258 : vector<1x128xf32>
    %c0_775 = arith.constant 0 : index
    %c0_776 = arith.constant 0 : index
    %c0_777 = arith.constant 0 : index
    %1260 = vector.load %arg51[%c0_775, %c0_776, %c0_777] : memref<1x1x128xf32, #tpu.memory_space<vmem>>, vector<1x1x128xf32>
    %1261 = vector.shape_cast %1260 : vector<1x1x128xf32> to vector<1x128xf32>
    %1262 = vector.shape_cast %1259 : vector<1x128xf32> to vector<1x1x128xf32>
    tpu.vector_store %arg51[%c0_775, %c0_776, %c0_777], %1262 {strides = array<i32>} : memref<1x1x128xf32, #tpu.memory_space<vmem>>, vector<1x1x128xf32>,
    return
  }
  func.func @transform_0(%arg0: i32) -> (i32, i32, i32, i32) {
    %c0_i32 = arith.constant 0 : i32
    %c0_i32_0 = arith.constant 0 : i32
    %c0_i32_1 = arith.constant 0 : i32
    %c0_i32_2 = arith.constant 0 : i32
    return %arg0, %c0_i32, %c0_i32_0, %c0_i32_1 : i32, i32, i32, i32
  }
  func.func @transform_1(%arg0: i32) -> (i32, i32) {
    %c0_i32 = arith.constant 0 : i32
    %c0_i32_0 = arith.constant 0 : i32
    %c0_i32_1 = arith.constant 0 : i32
    return %c0_i32, %c0_i32_0 : i32, i32
  }
  func.func @transform_2(%arg0: i32) -> (i32, i32) {
    %c0_i32 = arith.constant 0 : i32
    %c0_i32_0 = arith.constant 0 : i32
    %c0_i32_1 = arith.constant 0 : i32
    return %c0_i32, %c0_i32_0 : i32, i32
  }
  func.func @transform_3(%arg0: i32) -> (i32, i32) {
    %c0_i32 = arith.constant 0 : i32
    %c0_i32_0 = arith.constant 0 : i32
    %c0_i32_1 = arith.constant 0 : i32
    return %c0_i32, %c0_i32_0 : i32, i32
  }
  func.func @transform_4(%arg0: i32) -> (i32, i32) {
    %c0_i32 = arith.constant 0 : i32
    %c0_i32_0 = arith.constant 0 : i32
    %c0_i32_1 = arith.constant 0 : i32
    return %c0_i32, %c0_i32_0 : i32, i32
  }
  func.func @transform_5(%arg0: i32) -> (i32, i32) {
    %c0_i32 = arith.constant 0 : i32
    %c0_i32_0 = arith.constant 0 : i32
    %c0_i32_1 = arith.constant 0 : i32
    return %c0_i32, %c0_i32_0 : i32, i32
  }
  func.func @transform_6(%arg0: i32) -> (i32, i32) {
    %c0_i32 = arith.constant 0 : i32
    %c0_i32_0 = arith.constant 0 : i32
    %c0_i32_1 = arith.constant 0 : i32
    return %c0_i32, %c0_i32_0 : i32, i32
  }
  func.func @transform_7(%arg0: i32) -> (i32, i32) {
    %c0_i32 = arith.constant 0 : i32
    %c0_i32_0 = arith.constant 0 : i32
    %c0_i32_1 = arith.constant 0 : i32
    return %c0_i32, %c0_i32_0 : i32, i32
  }
  func.func @transform_8(%arg0: i32) -> (i32, i32) {
    %c0_i32 = arith.constant 0 : i32
    %c0_i32_0 = arith.constant 0 : i32
    %c0_i32_1 = arith.constant 0 : i32
    return %c0_i32, %c0_i32_0 : i32, i32
  }
  func.func @transform_9(%arg0: i32) -> (i32, i32) {
    %c0_i32 = arith.constant 0 : i32
    %c0_i32_0 = arith.constant 0 : i32
    %c0_i32_1 = arith.constant 0 : i32
    return %c0_i32, %c0_i32_0 : i32, i32
  }
  func.func @transform_10(%arg0: i32) -> (i32, i32) {
    %c0_i32 = arith.constant 0 : i32
    %c0_i32_0 = arith.constant 0 : i32
    %c0_i32_1 = arith.constant 0 : i32
    return %c0_i32, %c0_i32_0 : i32, i32
  }
  func.func @transform_11(%arg0: i32) -> (i32, i32) {
    %c0_i32 = arith.constant 0 : i32
    %c0_i32_0 = arith.constant 0 : i32
    %c0_i32_1 = arith.constant 0 : i32
    return %c0_i32, %c0_i32_0 : i32, i32
  }
  func.func @transform_12(%arg0: i32) -> (i32, i32) {
    %c0_i32 = arith.constant 0 : i32
    %c0_i32_0 = arith.constant 0 : i32
    %c0_i32_1 = arith.constant 0 : i32
    return %c0_i32, %c0_i32_0 : i32, i32
  }
  func.func @transform_13(%arg0: i32) -> (i32, i32) {
    %c0_i32 = arith.constant 0 : i32
    %c0_i32_0 = arith.constant 0 : i32
    %c0_i32_1 = arith.constant 0 : i32
    return %c0_i32, %c0_i32_0 : i32, i32
  }
  func.func @transform_14(%arg0: i32) -> (i32, i32) {
    %c0_i32 = arith.constant 0 : i32
    %c0_i32_0 = arith.constant 0 : i32
    %c0_i32_1 = arith.constant 0 : i32
    return %c0_i32, %c0_i32_0 : i32, i32
  }
  func.func @transform_15(%arg0: i32) -> (i32, i32) {
    %c0_i32 = arith.constant 0 : i32
    %c0_i32_0 = arith.constant 0 : i32
    %c0_i32_1 = arith.constant 0 : i32
    return %c0_i32, %c0_i32_0 : i32, i32
  }
  func.func @transform_16(%arg0: i32) -> (i32, i32) {
    %c0_i32 = arith.constant 0 : i32
    %c0_i32_0 = arith.constant 0 : i32
    %c0_i32_1 = arith.constant 0 : i32
    return %c0_i32, %c0_i32_0 : i32, i32
  }
  func.func @transform_17(%arg0: i32) -> (i32, i32) {
    %c0_i32 = arith.constant 0 : i32
    %c0_i32_0 = arith.constant 0 : i32
    %c0_i32_1 = arith.constant 0 : i32
    return %c0_i32, %c0_i32_0 : i32, i32
  }
  func.func @transform_18(%arg0: i32) -> (i32, i32) {
    %c0_i32 = arith.constant 0 : i32
    %c0_i32_0 = arith.constant 0 : i32
    %c0_i32_1 = arith.constant 0 : i32
    return %c0_i32, %c0_i32_0 : i32, i32
  }
  func.func @transform_19(%arg0: i32) -> (i32, i32) {
    %c0_i32 = arith.constant 0 : i32
    %c0_i32_0 = arith.constant 0 : i32
    %c0_i32_1 = arith.constant 0 : i32
    return %c0_i32, %c0_i32_0 : i32, i32
  }
  func.func @transform_20(%arg0: i32) -> (i32, i32) {
    %c0_i32 = arith.constant 0 : i32
    %c0_i32_0 = arith.constant 0 : i32
    %c0_i32_1 = arith.constant 0 : i32
    return %c0_i32, %c0_i32_0 : i32, i32
  }
  func.func @transform_21(%arg0: i32) -> (i32, i32) {
    %c0_i32 = arith.constant 0 : i32
    %c0_i32_0 = arith.constant 0 : i32
    %c0_i32_1 = arith.constant 0 : i32
    return %c0_i32, %c0_i32_0 : i32, i32
  }
  func.func @transform_22(%arg0: i32) -> (i32, i32) {
    %c0_i32 = arith.constant 0 : i32
    %c0_i32_0 = arith.constant 0 : i32
    %c0_i32_1 = arith.constant 0 : i32
    return %c0_i32, %c0_i32_0 : i32, i32
  }
  func.func @transform_23(%arg0: i32) -> (i32, i32) {
    %c0_i32 = arith.constant 0 : i32
    %c0_i32_0 = arith.constant 0 : i32
    %c0_i32_1 = arith.constant 0 : i32
    return %c0_i32, %c0_i32_0 : i32, i32
  }
  func.func @transform_24(%arg0: i32) -> (i32, i32) {
    %c0_i32 = arith.constant 0 : i32
    %c0_i32_0 = arith.constant 0 : i32
    %c0_i32_1 = arith.constant 0 : i32
    return %c0_i32, %c0_i32_0 : i32, i32
  }
  func.func @transform_25(%arg0: i32) -> (i32, i32, i32) {
    %c0_i32 = arith.constant 0 : i32
    %c0_i32_0 = arith.constant 0 : i32
    %c0_i32_1 = arith.constant 0 : i32
    %c0_i32_2 = arith.constant 0 : i32
    return %c0_i32, %c0_i32_0, %c0_i32_1 : i32, i32, i32
  }
  func.func @transform_26(%arg0: i32) -> (i32, i32) {
    %c0_i32 = arith.constant 0 : i32
    %c0_i32_0 = arith.constant 0 : i32
    %c0_i32_1 = arith.constant 0 : i32
    return %c0_i32, %c0_i32_0 : i32, i32
  }
  func.func @transform_27(%arg0: i32) -> (i32, i32) {
    %c0_i32 = arith.constant 0 : i32
    %c0_i32_0 = arith.constant 0 : i32
    %c0_i32_1 = arith.constant 0 : i32
    return %c0_i32, %c0_i32_0 : i32, i32
  }
  func.func @transform_28(%arg0: i32) -> (i32, i32) {
    %c0_i32 = arith.constant 0 : i32
    %c0_i32_0 = arith.constant 0 : i32
    %c0_i32_1 = arith.constant 0 : i32
    return %c0_i32, %c0_i32_0 : i32, i32
  }
  func.func @transform_29(%arg0: i32) -> (i32, i32) {
    %c0_i32 = arith.constant 0 : i32
    %c0_i32_0 = arith.constant 0 : i32
    %c0_i32_1 = arith.constant 0 : i32
    return %c0_i32, %c0_i32_0 : i32, i32
  }
  func.func @transform_30(%arg0: i32) -> (i32, i32) {
    %c0_i32 = arith.constant 0 : i32
    %c0_i32_0 = arith.constant 0 : i32
    %c0_i32_1 = arith.constant 0 : i32
    return %c0_i32, %c0_i32_0 : i32, i32
  }
  func.func @transform_31(%arg0: i32) -> (i32, i32) {
    %c0_i32 = arith.constant 0 : i32
    %c0_i32_0 = arith.constant 0 : i32
    %c0_i32_1 = arith.constant 0 : i32
    return %c0_i32, %c0_i32_0 : i32, i32
  }
  func.func @transform_32(%arg0: i32) -> (i32, i32) {
    %c0_i32 = arith.constant 0 : i32
    %c0_i32_0 = arith.constant 0 : i32
    %c0_i32_1 = arith.constant 0 : i32
    return %c0_i32, %c0_i32_0 : i32, i32
  }
  func.func @transform_33(%arg0: i32) -> (i32, i32) {
    %c0_i32 = arith.constant 0 : i32
    %c0_i32_0 = arith.constant 0 : i32
    %c0_i32_1 = arith.constant 0 : i32
    return %c0_i32, %c0_i32_0 : i32, i32
  }
  func.func @transform_34(%arg0: i32) -> (i32, i32) {
    %c0_i32 = arith.constant 0 : i32
    %c0_i32_0 = arith.constant 0 : i32
    %c0_i32_1 = arith.constant 0 : i32
    return %c0_i32, %c0_i32_0 : i32, i32
  }
  func.func @transform_35(%arg0: i32) -> (i32, i32) {
    %c0_i32 = arith.constant 0 : i32
    %c0_i32_0 = arith.constant 0 : i32
    %c0_i32_1 = arith.constant 0 : i32
    return %c0_i32, %c0_i32_0 : i32, i32
  }
  func.func @transform_36(%arg0: i32) -> (i32, i32) {
    %c0_i32 = arith.constant 0 : i32
    %c0_i32_0 = arith.constant 0 : i32
    %c0_i32_1 = arith.constant 0 : i32
    return %c0_i32, %c0_i32_0 : i32, i32
  }
  func.func @transform_37(%arg0: i32) -> (i32, i32) {
    %c0_i32 = arith.constant 0 : i32
    %c0_i32_0 = arith.constant 0 : i32
    %c0_i32_1 = arith.constant 0 : i32
    return %c0_i32, %c0_i32_0 : i32, i32
  }
  func.func @transform_38(%arg0: i32) -> (i32, i32) {
    %c0_i32 = arith.constant 0 : i32
    %c0_i32_0 = arith.constant 0 : i32
    %c0_i32_1 = arith.constant 0 : i32
    return %c0_i32, %c0_i32_0 : i32, i32
  }
  func.func @transform_39(%arg0: i32) -> (i32, i32) {
    %c0_i32 = arith.constant 0 : i32
    %c0_i32_0 = arith.constant 0 : i32
    %c0_i32_1 = arith.constant 0 : i32
    return %c0_i32, %c0_i32_0 : i32, i32
  }
  func.func @transform_40(%arg0: i32) -> (i32, i32) {
    %c0_i32 = arith.constant 0 : i32
    %c0_i32_0 = arith.constant 0 : i32
    %c0_i32_1 = arith.constant 0 : i32
    return %c0_i32, %c0_i32_0 : i32, i32
  }
  func.func @transform_41(%arg0: i32) -> (i32, i32) {
    %c0_i32 = arith.constant 0 : i32
    %c0_i32_0 = arith.constant 0 : i32
    %c0_i32_1 = arith.constant 0 : i32
    return %c0_i32, %c0_i32_0 : i32, i32
  }
  func.func @transform_42(%arg0: i32) -> (i32, i32) {
    %c0_i32 = arith.constant 0 : i32
    %c0_i32_0 = arith.constant 0 : i32
    %c0_i32_1 = arith.constant 0 : i32
    return %c0_i32, %c0_i32_0 : i32, i32
  }
  func.func @transform_43(%arg0: i32) -> (i32, i32) {
    %c0_i32 = arith.constant 0 : i32
    %c0_i32_0 = arith.constant 0 : i32
    %c0_i32_1 = arith.constant 0 : i32
    return %c0_i32, %c0_i32_0 : i32, i32
  }
  func.func @transform_44(%arg0: i32) -> (i32, i32) {
    %c0_i32 = arith.constant 0 : i32
    %c0_i32_0 = arith.constant 0 : i32
    %c0_i32_1 = arith.constant 0 : i32
    return %c0_i32, %c0_i32_0 : i32, i32
  }
  func.func @transform_45(%arg0: i32) -> (i32, i32) {
    %c0_i32 = arith.constant 0 : i32
    %c0_i32_0 = arith.constant 0 : i32
    %c0_i32_1 = arith.constant 0 : i32
    return %c0_i32, %c0_i32_0 : i32, i32
  }
  func.func @transform_46(%arg0: i32) -> (i32, i32) {
    %c0_i32 = arith.constant 0 : i32
    %c0_i32_0 = arith.constant 0 : i32
    %c0_i32_1 = arith.constant 0 : i32
    return %c0_i32, %c0_i32_0 : i32, i32
  }
  func.func @transform_47(%arg0: i32) -> (i32, i32) {
    %c0_i32 = arith.constant 0 : i32
    %c0_i32_0 = arith.constant 0 : i32
    %c0_i32_1 = arith.constant 0 : i32
    return %c0_i32, %c0_i32_0 : i32, i32
  }
  func.func @transform_48(%arg0: i32) -> (i32, i32) {
    %c0_i32 = arith.constant 0 : i32
    %c0_i32_0 = arith.constant 0 : i32
    %c0_i32_1 = arith.constant 0 : i32
    return %c0_i32, %c0_i32_0 : i32, i32
  }
  func.func @transform_49(%arg0: i32) -> (i32, i32) {
    %c0_i32 = arith.constant 0 : i32
    %c0_i32_0 = arith.constant 0 : i32
    %c0_i32_1 = arith.constant 0 : i32
    return %c0_i32, %c0_i32_0 : i32, i32
  }
  func.func @transform_50(%arg0: i32) -> (i32, i32, i32) {
    %c0_i32 = arith.constant 0 : i32
    %c0_i32_0 = arith.constant 0 : i32
    %c0_i32_1 = arith.constant 0 : i32
    return %arg0, %c0_i32, %c0_i32_0 : i32, i32, i32
  }
}

</mosaic_0001>

<bundles_post_ra>
// kernel: convnext_forward.1
= control target key start
LH: loop header
LB: loop body
LE: loop exit
PB: predicated region body
PF: predicated region fallthrough
CT: control target
= control target key end

     0   :  { %s6603_s6 = smov 1   ;;  %s6604_s10 = smov 2   ;;  %s8370_s0 = inlined_call_operand.smem [shape: u32[51], index: -1, kind: input, shape index: {}] }
   0x1   :  { %s6674_s5 = sld [smem:[%s8370_s0]]   ;;  %s6605_s14 = smov 3  }
   0x2   :  { %s6679_s9 = sld [smem:[%s8370_s0 + %s6603_s6]]   ;;  %s6606_s18 = smov 4  }
   0x3   :  { %s6684_s13 = sld [smem:[%s8370_s0 + %s6604_s10]]   ;;  %s6607_s22 = smov 5  }
   0x4   :  { %s6689_s17 = sld [smem:[%s8370_s0 + %s6605_s14]]   ;;  %s6608_s26 = smov 6  }
   0x5   :  { %s6694_s21 = sld [smem:[%s8370_s0 + %s6606_s18]]   ;;  %s6609_s30 = smov 7  }
   0x6   :  { %s6699_s25 = sld [smem:[%s8370_s0 + %s6607_s22]]   ;;  %s6610_s4 = smov 8  }
   0x7   :  { %8485 = sst [smem:[#allocation26_spill]] %s6674_s5  ;;  %s6611_s10 = smov 9  }
   0x8   :  { %s6704_s29 = sld [smem:[%s8370_s0 + %s6608_s26]]   ;;  %s6612_s15 = smov 10  }
   0x9   :  { %s6709_s3 = sld [smem:[%s8370_s0 + %s6609_s30]]   ;;  %s6613_s20 = smov 11  }
   0xa   :  { %s6714_s8 = sld [smem:[%s8370_s0 + %s6610_s4]]   ;;  %s6614_s26 = smov 12  }
   0xb   :  { %s6719_s14 = sld [smem:[%s8370_s0 + %s6611_s10]]   ;;  %s6615_s1 = smov 13  }
   0xc   :  { %s6724_s19 = sld [smem:[%s8370_s0 + %s6612_s15]]   ;;  %s6616_s7 = smov 14  }
   0xd   :  { %s6729_s24 = sld [smem:[%s8370_s0 + %s6613_s20]]   ;;  %s6617_s15 = smov 15  }
   0xe   :  { %s6734_s30 = sld [smem:[%s8370_s0 + %s6614_s26]]   ;;  %s6618_s22 = smov 16  }
   0xf   :  { %8486 = sst [smem:[#allocation27_spill]] %s6709_s3  ;;  %s6619_s28 = smov 17  }
  0x10   :  { %8487 = sst [smem:[#allocation28_spill]] %s6714_s8 }
  0x11   :  { %8488 = sst [smem:[#allocation29_spill]] %s6719_s14 }
  0x12   :  { %8489 = sst [smem:[#allocation30_spill]] %s6724_s19 }
  0x13   :  { %8490 = sst [smem:[#allocation31_spill]] %s6729_s24 }
  0x14   :  { %8491 = sst [smem:[#allocation32_spill]] %s6734_s30 }
  0x15   :  { %s6739_s6 = sld [smem:[%s8370_s0 + %s6615_s1]]  }
  0x16   :  { %s6744_s12 = sld [smem:[%s8370_s0 + %s6616_s7]]   ;;  %s6620_s7 = smov 18  }
  0x17   :  { %s6749_s20 = sld [smem:[%s8370_s0 + %s6617_s15]]   ;;  %s6621_s15 = smov 19  }
  0x18   :  { %s6754_s27 = sld [smem:[%s8370_s0 + %s6618_s22]]   ;;  %s6622_s22 = smov 20  }
  0x19   :  { %s6759_s4 = sld [smem:[%s8370_s0 + %s6619_s28]]   ;;  %s6623_s28 = smov 21  }
  0x1b   :  { %8492 = sst [smem:[#allocation33_spill]] %s6739_s6 }
  0x1c   :  { %8493 = sst [smem:[#allocation34_spill]] %s6744_s12 }
  0x1d   :  { %8494 = sst [smem:[#allocation35_spill]] %s6749_s20 }
  0x1e   :  { %8495 = sst [smem:[#allocation36_spill]] %s6754_s27 }
  0x1f   :  { %8496 = sst [smem:[#allocation37_spill]] %s6759_s4 }
  0x20   :  { %s6764_s12 = sld [smem:[%s8370_s0 + %s6620_s7]]   ;;  %s6624_s7 = smov 22  }
  0x21   :  { %s6769_s20 = sld [smem:[%s8370_s0 + %s6621_s15]]   ;;  %s6625_s15 = smov 23  }
  0x22   :  { %s6774_s27 = sld [smem:[%s8370_s0 + %s6622_s22]]   ;;  %s6626_s22 = smov 24  }
  0x23   :  { %s6779_s4 = sld [smem:[%s8370_s0 + %s6623_s28]]   ;;  %s6627_s28 = smov 25  }
  0x26   :  { %8497 = sst [smem:[#allocation38_spill]] %s6764_s12 }
  0x27   :  { %8498 = sst [smem:[#allocation39_spill]] %s6769_s20 }
  0x28   :  { %8499 = sst [smem:[#allocation40_spill]] %s6774_s27 }
  0x29   :  { %8500 = sst [smem:[#allocation41_spill]] %s6779_s4 }
  0x2a   :  { %s6784_s12 = sld [smem:[%s8370_s0 + %s6624_s7]]   ;;  %s6628_s7 = smov 26  }
  0x2b   :  { %s6789_s20 = sld [smem:[%s8370_s0 + %s6625_s15]]   ;;  %s6629_s15 = smov 27  }
  0x2c   :  { %s6794_s27 = sld [smem:[%s8370_s0 + %s6626_s22]]   ;;  %s6630_s22 = smov 28  }
  0x2d   :  { %s6799_s4 = sld [smem:[%s8370_s0 + %s6627_s28]]   ;;  %s6631_s28 = smov 29  }
  0x30   :  { %8501 = sst [smem:[#allocation42_spill]] %s6784_s12 }
  0x31   :  { %8502 = sst [smem:[#allocation43_spill]] %s6789_s20 }
  0x32   :  { %8503 = sst [smem:[#allocation44_spill]] %s6794_s27 }
  0x33   :  { %8504 = sst [smem:[#allocation45_spill]] %s6799_s4 }
  0x34   :  { %s6804_s12 = sld [smem:[%s8370_s0 + %s6628_s7]]   ;;  %s6632_s7 = smov 30  }
  0x35   :  { %s6809_s20 = sld [smem:[%s8370_s0 + %s6629_s15]]   ;;  %s6633_s15 = smov 31  }
  0x36   :  { %s6814_s27 = sld [smem:[%s8370_s0 + %s6630_s22]]   ;;  %s6634_s22 = smov 32  }
  0x37   :  { %s6819_s4 = sld [smem:[%s8370_s0 + %s6631_s28]]   ;;  %s6635_s28 = smov 33  }
  0x3a   :  { %8505 = sst [smem:[#allocation46_spill]] %s6804_s12 }
  0x3b   :  { %8506 = sst [smem:[#allocation47_spill]] %s6809_s20 }
  0x3c   :  { %8507 = sst [smem:[#allocation48_spill]] %s6814_s27 }
  0x3d   :  { %8508 = sst [smem:[#allocation49_spill]] %s6819_s4 }
  0x3e   :  { %s6824_s12 = sld [smem:[%s8370_s0 + %s6632_s7]]   ;;  %s6636_s7 = smov 34  }
  0x3f   :  { %s6829_s20 = sld [smem:[%s8370_s0 + %s6633_s15]]   ;;  %s6637_s15 = smov 35  }
  0x40   :  { %s6834_s27 = sld [smem:[%s8370_s0 + %s6634_s22]]   ;;  %s6638_s22 = smov 36  }
  0x41   :  { %s6839_s4 = sld [smem:[%s8370_s0 + %s6635_s28]]   ;;  %s6639_s28 = smov 37  }
  0x44   :  { %8509 = sst [smem:[#allocation50_spill]] %s6824_s12 }
  0x45   :  { %8510 = sst [smem:[#allocation51_spill]] %s6829_s20 }
  0x46   :  { %8511 = sst [smem:[#allocation52_spill]] %s6834_s27 }
  0x47   :  { %8512 = sst [smem:[#allocation53_spill]] %s6839_s4 }
  0x48   :  { %s6844_s12 = sld [smem:[%s8370_s0 + %s6636_s7]]   ;;  %s6640_s7 = smov 38  }
  0x49   :  { %s6849_s20 = sld [smem:[%s8370_s0 + %s6637_s15]]   ;;  %s6641_s15 = smov 39  }
  0x4a   :  { %s6854_s27 = sld [smem:[%s8370_s0 + %s6638_s22]]   ;;  %s6642_s22 = smov 40  }
  0x4b   :  { %s6859_s4 = sld [smem:[%s8370_s0 + %s6639_s28]]   ;;  %s6643_s28 = smov 41  }
  0x4c   :  { %s6874_s6 = sld [smem:[%s8370_s0 + %s6642_s22]]   ;;  %s6646_s22 = smov 44  }
  0x4d   :  { %s6894_s24 = sld [smem:[%s8370_s0 + %s6646_s22]]   ;;  %s6650_s22 = smov 48  }
  0x4e   :  { %8513 = sst [smem:[#allocation54_spill]] %s6844_s12 }
  0x4f   :  { %8514 = sst [smem:[#allocation55_spill]] %s6849_s20 }
  0x50   :  { %s6864_s12 = sld [smem:[%s8370_s0 + %s6640_s7]]   ;;  %s6644_s7 = smov 42  }
  0x51   :  { %8515 = sst [smem:[#allocation56_spill]] %s6859_s4 }
  0x52   :  { %s6869_s20 = sld [smem:[%s8370_s0 + %s6641_s15]]   ;;  %s6645_s15 = smov 43  }
  0x53   :  { %8516 = sst [smem:[#allocation57_spill]] %s6874_s6 }
  0x54   :  { %s6879_s4 = sld [smem:[%s8370_s0 + %s6643_s28]]   ;;  %s6647_s28 = smov 45  }
  0x55   :  { %s6884_s30 = sld [smem:[%s8370_s0 + %s6644_s7]]   ;;  %s6648_s7 = smov 46  }
  0x56   :  { %s6889_s19 = sld [smem:[%s8370_s0 + %s6645_s15]]   ;;  %s6649_s15 = smov 47  }
  0x57   :  { %s6914_s8 = sld [smem:[%s8370_s0 + %s6650_s22]]  }
  0x5a   :  { %8517 = sst [smem:[#allocation58_spill]] %s6879_s4 }
  0x5b   :  { %8518 = sst [smem:[#allocation59_spill]] %s6884_s30 }
  0x5c   :  { %8519 = sst [smem:[#allocation60_spill]] %s6889_s19 }
  0x5d   :  { %s6899_s4 = sld [smem:[%s8370_s0 + %s6647_s28]]   ;;  %s6651_s28 = smov 49  }
  0x5e   :  { %s6904_s30 = sld [smem:[%s8370_s0 + %s6648_s7]]   ;;  %s6652_s7 = smov 50  }
  0x5f   :  { %s6909_s19 = sld [smem:[%s8370_s0 + %s6649_s15]]  }
  0x60   :  { %8521 = sst [smem:[#allocation62_spill]] %s6914_s8 }
  0x61   :  { %s6919_s3 = sld [smem:[%s8370_s0 + %s6651_s28]]  }
  0x62   :  { %s6924_s14 = sld [smem:[%s8370_s0 + %s6652_s7]]  }
  0x63   :  { %8520 = sst [smem:[#allocation61_spill]] %s6899_s4 }
  0x67   :  { %8522 = sst [smem:[#allocation63_spill]] %s6919_s3 }
  0x68   :  { %106 = vsyncpa [#allocation5], 0 }
  0x69   :  { %107 = vsyncpa [#allocation8], 0 }
  0x6a   :  { %108 = vsyncpa [#allocation11], 0 }
  0x6b   :  { %109 = vsyncpa [#allocation14], 0 }
  0x6c   :  { %110 = vsyncpa [#allocation17], 0 }
  0x6d   :  { %111 = vsyncpa [#allocation6], 0 }
  0x6e   :  { %113 = vsyncpa [#allocation6 + $0x1], 0  ;;  %s6926_s15 = smov 0   ;;  %s6928_s16 = smov 0  }
  0x6f   :  { %s6930_s18 = smov 0   ;;  %s6932_s22 = smov 0  }
  0x70 LB: > { %s8523_s8 = sld [smem:[#allocation62_spill]]  ;;  %s6947_s0 = sadd.s32 4294967295, %s6601_s22   ;;  %s6589_s15 = sphi %s6926_s15, %s8786_s15   ;;  %s6601_s22 = sphi %s6932_s22, %s8783_s22   ;;  %s6597_s18 = sphi %s6930_s18, %s8785_s18   ;;  %s6593_s16 = sphi %s6928_s16, %s8787_s16  }
  0x71   : > { %8524 = sst [smem:[#allocation64_spill]] %s6589_s15  ;;  %s5401_s23 = sadd.s32 4294967294, %s6601_s22  }
  0x72   : > { %8525 = sst [smem:[#allocation65_spill]] %s6597_s18  ;;  %s6951_s26 = sadd.s32 1, %s6601_s22  }
  0x73   : > { %8526 = sst [smem:[#allocation66_spill]] %s6601_s22  ;;  %s1181_s28 = sadd.s32 1, %s6597_s18 }
  0x74   : > { %8527 = sst [smem:[#allocation67_spill]] %s6951_s26  ;;  %s1178_s1 = ssub.s32 %s6601_s22, %s6951_s26 }
  0x75   : > { %p1191_p0 = scmp.ne.s32.totalorder %s6597_s18, %s6593_s16  ;;  %p1179_p1 = scmp.eq.s32.totalorder %s1178_s1, 0 }
  0x76   : > { %p1192_p2 = scmp.eq.s32.totalorder %s6947_s0, 1  ;;  %p1197_p3 = scmp.ne.s32.totalorder %s6593_s16, %s6589_s15 }
  0x77   : > { %p1198_p4 = scmp.eq.s32.totalorder %s5401_s23, 1  ;;  %p5402_p7 = scmp.ge.s32.totalorder %s6601_s22, 1 }
  0x78   : > { %s6962_s2 = scalar_select %p1179_p1, %s6597_s18, %s1181_s28  }
  0x79   : > { %p6964_p5 = por %p1192_p2, %p1191_p0  ;;  %p6968_p6 = por %p1198_p4, %p1197_p3 }
  0x7a   : > { %8528 = sst [smem:[#allocation68_spill]] %s6962_s2  ;;  %p1205_p8 = scmp.lt.s32.totalorder %s6601_s22, 3 }
  0x7b   : > { %s8529_s7 = scalar_select %p6964_p5, 1, 0 }
  0x7c   : > { %s8530_s10 = scalar_select %p6968_p6, 1, 0 }
  0x7d   : > { %p8389_p9 = scmp.eq.s32.totalorder %s6947_s0, 0  ;;  %p6975_p10 = pnand %p5402_p7, %p1205_p8 }
  0x7e   : > { %8531 = sst [smem:[#allocation69_spill]] %s8530_s10  ;;  %s6653_s1 = smov [#allocation7]  }
  0x7f   : > { %s8532_s11 = scalar_select %p6975_p10, 1, 0 }
  0x80   : > { %s1337_s23 = sshll.u32 %s6653_s1, 4  ;;  %p5996_p11 = pneg %p6975_p10  ;;  %s1338_s23 = int_to_ptr.vmem [resolvable:$true] %s1337_s23 }
  0x81   : > { %s6654_s28 = smov [#allocation10]   ;;  %s6655_s26 = smov [#allocation13]  }
  0x82   : > { %s1359_s2 = sshll.u32 %s6654_s28, 4  ;;  %p6983_p12 = pnand %p8389_p9, %p5996_p11  ;;  %s1360_s2 = int_to_ptr.vmem [resolvable:$true] %s1359_s2 }
  0x83   : > { %s1390_s10 = sshll.u32 %s6655_s26, 4  ;;  %s6298_s1 = scalar_lea.vmem %s1338_s23, 16  ;;  %s6987_s10 = int_to_ptr.vmem [resolvable:$true] %s1390_s10 }
  0x84   : > { %p6991_p13 = pneg %p6983_p12  ;;  %p6299_p0 = scmp.ne.s32.totalorder %s1338_s23, %s6298_s1 }
  0x85   : > { %s6305_s28 = scalar_lea.vmem %s1338_s23, 32  ;;  %p6306_p3 = scmp.lt.s32.totalorder %s1338_s23, %s1338_s23 }
  0x86   : > { %p6301_p1 = pnand %p6299_p0, %p6991_p13  ;;  %p6307_p4 = scmp.lt.s32.totalorder %s6305_s28, %s6298_s1 }
  0x88   : > { %p6302_p2 = pneg %p6301_p1  ;;  %p6308_p7 = por %p6307_p4, %p6306_p3 }
  0x8a   : > { %p6309_p8 = pnand %p6308_p7, %p6302_p2 }
  0x8c   : > { %6312 = shalt.err (!%p6309_p8)
}
  0x8d   : > { %6002 = dma.hbm_to_vmem [thread:$0]  (!%p6983_p12), %s6864_s12, 16, %s1338_s23, [#allocation8]  }
  0x8e   : > { %s6324_s26 = scalar_lea.vmem %s1360_s2, 16  ;;  %s6331_s22 = scalar_lea.vmem %s1360_s2, 32 }
  0x8f   : > { %p6325_p11 = scmp.ne.s32.totalorder %s1360_s2, %s6324_s26  ;;  %p6332_p5 = scmp.lt.s32.totalorder %s1360_s2, %s1360_s2 }
  0x90   : > { %p6333_p0 = scmp.lt.s32.totalorder %s6331_s22, %s6324_s26 }
  0x91   : > { %p6327_p9 = pnand %p6325_p11, %p6991_p13 }
  0x92   : > { %p6334_p1 = por %p6333_p0, %p6332_p5 }
  0x93   : > { %p6328_p6 = pneg %p6327_p9 }
  0x95   : > { %p6335_p10 = pnand %p6334_p1, %p6328_p6 }
  0x97   : > { %6338 = shalt.err (!%p6335_p10)
}
  0x98   : > { %s8535_s6 = sld [smem:[#allocation57_spill]]  ;;  %s6350_s23 = scalar_lea.vmem %s6987_s10, 16 }
  0x99   : > { %p6351_p2 = scmp.ne.s32.totalorder %s6987_s10, %s6350_s23  ;;  %s6357_s1 = scalar_lea.vmem %s6987_s10, 32 }
  0x9a   : > { %p6358_p4 = scmp.lt.s32.totalorder %s6987_s10, %s6987_s10  ;;  %p6359_p5 = scmp.lt.s32.totalorder %s6357_s1, %s6350_s23 }
  0x9b   : > { %p6353_p3 = pnand %p6351_p2, %p6991_p13 }
  0x9c   : > { %p6360_p6 = por %p6359_p5, %p6358_p4 }
  0x9d   : > { %p6354_p9 = pneg %p6353_p3 }
  0x9e   : > { %6008 = dma.hbm_to_vmem [thread:$0]  (!%p6983_p12), %s8535_s6, 16, %s1360_s2, [#allocation11]  }
  0x9f   : > { %p6361_p10 = pnand %p6360_p6, %p6354_p9 }
  0xa1   : > { %6364 = shalt.err (!%p6361_p10)
}
  0xa2   : > { %s8536_s4 = sld [smem:[#allocation61_spill]]  ;;  %s6656_s22 = smov [#allocation16]  }
  0xa3   : > { %s1412_s2 = sshll.u32 %s6656_s22, 4  ;;  %s6657_s28 = smov [#allocation4]   ;;  %s1413_s2 = int_to_ptr.vmem [resolvable:$true] %s1412_s2 }
  0xa4   : > { %s1323_s26 = sshll.u32 %s6657_s28, 4  ;;  %s6376_s6 = scalar_lea.vmem %s1413_s2, 16  ;;  %s1324_s26 = int_to_ptr.vmem [resolvable:$true] %s1323_s26 }
  0xa5   : > { %p6377_p7 = scmp.ne.s32.totalorder %s1413_s2, %s6376_s6  ;;  %s6383_s23 = scalar_lea.vmem %s1413_s2, 32 }
  0xa6   : > { %p6384_p0 = scmp.lt.s32.totalorder %s1413_s2, %s1413_s2  ;;  %p6385_p1 = scmp.lt.s32.totalorder %s6383_s23, %s6376_s6 }
  0xa7   : > { %p6379_p8 = pnand %p6377_p7, %p6991_p13 }
  0xa8   : > { %6014 = dma.hbm_to_vmem [thread:$0]  (!%p6983_p12), %s8536_s4, 16, %s6987_s10, [#allocation14]  }
  0xa9   : > { %p6380_p11 = pneg %p6379_p8  ;;  %p6386_p2 = por %p6385_p1, %p6384_p0 }
  0xab   : > { %p6387_p3 = pnand %p6386_p2, %p6380_p11 }
  0xad   : > { %6390 = shalt.err (!%p6387_p3)
}
  0xae   : > { %6020 = dma.hbm_to_vmem [thread:$0]  (!%p6983_p12), %s6909_s19, 16, %s1413_s2, [#allocation17]  }
  0xaf   : > { %s6402_s10 = scalar_lea.vmem %s1324_s26, 16  ;;  %s6409_s1 = scalar_lea.vmem %s1324_s26, 32 }
  0xb0   : > { %p6403_p9 = scmp.ne.s32.totalorder %s1324_s26, %s6402_s10  ;;  %p6410_p6 = scmp.lt.s32.totalorder %s1324_s26, %s1324_s26 }
  0xb1   : > { %p6411_p10 = scmp.lt.s32.totalorder %s6409_s1, %s6402_s10 }
  0xb2   : > { %p6405_p4 = pnand %p6403_p9, %p6991_p13 }
  0xb3   : > { %p6412_p7 = por %p6411_p10, %p6410_p6 }
  0xb4   : > { %p6406_p5 = pneg %p6405_p4 }
  0xb6   : > { %p6413_p8 = pnand %p6412_p7, %p6406_p5 }
  0xb8   : > { %6416 = shalt.err (!%p6413_p8)
}
  0xb9   : > { %5999 = dma.hbm_to_vmem [thread:$0]  (!%p6983_p12), %s6854_s27, 16, %s1324_s26, [#allocation5]  }
  0xba   : > { %s6658_s6 = smov [#allocation9]   ;;  %s6659_s2 = smov [#allocation12]  }
  0xbb   : > { %s1348_s22 = sshll.u32 %s6658_s6, 4  ;;  %s1379_s28 = sshll.u32 %s6659_s2, 4  ;;  %s1349_s22 = int_to_ptr.vmem [resolvable:$true] %s1348_s22  ;;  %s1380_s28 = int_to_ptr.vmem [resolvable:$true] %s1379_s28 }
  0xbc   : > { %s6428_s23 = scalar_lea.vmem %s1349_s22, 16  ;;  %s6435_s4 = scalar_lea.vmem %s1349_s22, 32 }
  0xbd   : > { %p6429_p11 = scmp.ne.s32.totalorder %s1349_s22, %s6428_s23  ;;  %p6436_p2 = scmp.lt.s32.totalorder %s1349_s22, %s1349_s22 }
  0xbe   : > { %p6437_p3 = scmp.lt.s32.totalorder %s6435_s4, %s6428_s23 }
  0xbf   : > { %p6431_p0 = pnand %p6429_p11, %p6991_p13 }
  0xc0   : > { %p6438_p9 = por %p6437_p3, %p6436_p2 }
  0xc1   : > { %p6432_p1 = pneg %p6431_p0 }
  0xc3   : > { %p6439_p4 = pnand %p6438_p9, %p6432_p1 }
  0xc5   : > { %6442 = shalt.err (!%p6439_p4)
}
  0xc6   : > { %6005 = dma.hbm_to_vmem [thread:$0]  (!%p6983_p12), %s6869_s20, 16, %s1349_s22, [#allocation8]  }
  0xc7   : > { %s6454_s26 = scalar_lea.vmem %s1380_s28, 16  ;;  %s6461_s10 = scalar_lea.vmem %s1380_s28, 32 }
  0xc8   : > { %p6455_p5 = scmp.ne.s32.totalorder %s1380_s28, %s6454_s26  ;;  %p6462_p7 = scmp.lt.s32.totalorder %s1380_s28, %s1380_s28 }
  0xc9   : > { %p6463_p8 = scmp.lt.s32.totalorder %s6461_s10, %s6454_s26 }
  0xca   : > { %p6457_p6 = pnand %p6455_p5, %p6991_p13 }
  0xcb   : > { %p6464_p11 = por %p6463_p8, %p6462_p7 }
  0xcc   : > { %p6458_p10 = pneg %p6457_p6 }
  0xce   : > { %p6465_p0 = pnand %p6464_p11, %p6458_p10 }
  0xd0   : > { %6468 = shalt.err (!%p6465_p0)
}
  0xd1   : > { %6011 = dma.hbm_to_vmem [thread:$0]  (!%p6983_p12), %s6894_s24, 16, %s1380_s28, [#allocation11]  }
  0xd2   : > { %s6660_s4 = smov [#allocation15]   ;;  %s6661_s6 = smov [#allocation18]  }
  0xd3   : > { %s1401_s1 = sshll.u32 %s6660_s4, 4  ;;  %s1426_s22 = sshll.u32 %s6661_s6, 4  ;;  %s1402_s1 = int_to_ptr.vmem [resolvable:$true] %s1401_s1  ;;  %s1427_s22 = int_to_ptr.vmem [resolvable:$true] %s1426_s22 }
  0xd4   : > { %s6480_s2 = scalar_lea.vmem %s1402_s1, 16  ;;  %s6487_s23 = scalar_lea.vmem %s1402_s1, 32 }
  0xd5   : > { %p6481_p1 = scmp.ne.s32.totalorder %s1402_s1, %s6480_s2  ;;  %p6488_p9 = scmp.lt.s32.totalorder %s1402_s1, %s1402_s1 }
  0xd6   : > { %p6489_p4 = scmp.lt.s32.totalorder %s6487_s23, %s6480_s2 }
  0xd7   : > { %p6483_p2 = pnand %p6481_p1, %p6991_p13 }
  0xd8   : > { %p6490_p5 = por %p6489_p4, %p6488_p9 }
  0xd9   : > { %p6484_p3 = pneg %p6483_p2 }
  0xdb   : > { %p6491_p6 = pnand %p6490_p5, %p6484_p3 }
  0xdd   : > { %6494 = shalt.err (!%p6491_p6)
}
  0xde   : > { %6017 = dma.hbm_to_vmem [thread:$0]  (!%p6983_p12), %s6904_s30, 16, %s1402_s1, [#allocation14]  }
  0xdf   : > { %s6506_s28 = scalar_lea.vmem %s1427_s22, 16  ;;  %s6513_s26 = scalar_lea.vmem %s1427_s22, 32 }
  0xe0   : > { %p6507_p10 = scmp.ne.s32.totalorder %s1427_s22, %s6506_s28  ;;  %p6514_p11 = scmp.lt.s32.totalorder %s1427_s22, %s1427_s22 }
  0xe1   : > { %p6515_p0 = scmp.lt.s32.totalorder %s6513_s26, %s6506_s28 }
  0xe2   : > { %p6509_p7 = pnand %p6507_p10, %p6991_p13 }
  0xe3   : > { %p6516_p1 = por %p6515_p0, %p6514_p11 }
  0xe4   : > { %p6510_p8 = pneg %p6509_p7 }
  0xe6   : > { %p6517_p2 = pnand %p6516_p1, %p6510_p8 }
  0xe8   : > { %6520 = shalt.err (!%p6517_p2)
}
  0xe9   : > { %s8537_s3 = sld [smem:[#allocation63_spill]]  ;;  %p8538_p3 = scmp.ne.s32.totalorder %s8532_s11, 0 }
  0xeb   : > { %1447 = sbr.rel (%p8538_p3) target bundleno = 5285 (0x14a5), region = 220 }
  0xef   : > { %6023 = dma.hbm_to_vmem [thread:$0]  (!%p6983_p12), %s8537_s3, 16, %s1427_s22, [#allocation17]  }
  0xf0   : > { %p8539_p9 = scmp.eq.s32.totalorder %s6947_s0, 0 }
  0xf2   : > { %6564 = dma.done.wait (%p8539_p9), [#allocation5], 16   ;;  %p8540_p4 = pmov %p8539_p9 }
  0xf4   : > { %6566 = vsyncadd (%p8540_p4), [#allocation5], 4294967280  ;;  %p8541_p13 = pmov %p8540_p4 }
  0xf5   : > { %p8542_p5 = pmov %p8540_p4 }
  0xf6   : > { %6568 = dma.done.wait (%p8541_p13), [#allocation8], 32  }
  0xf7   : > { %6570 = vsyncadd (%p8542_p5), [#allocation8], 4294967264  ;;  %p8543_p6 = pmov %p8540_p4 }
  0xf8   : > { %p8544_p12 = pmov %p8540_p4 }
  0xf9   : > { %6572 = dma.done.wait (%p8543_p6), [#allocation11], 32  }
  0xfa   : > { %6574 = vsyncadd (%p8544_p12), [#allocation11], 4294967264  ;;  %p8545_p10 = pmov %p8540_p4 }
  0xfb   : > { %p8546_p7 = pmov %p8540_p4 }
  0xfc   : > { %6576 = dma.done.wait (%p8545_p10), [#allocation14], 32  }
  0xfd   : > { %6578 = vsyncadd (%p8546_p7), [#allocation14], 4294967264  ;;  %p8547_p8 = pmov %p8540_p4 }
  0xfe   : > { %p8548_p11 = pmov %p8540_p4 }
  0xff   : > { %6580 = dma.done.wait (%p8547_p8), [#allocation17], 32  }
 0x100   : > { %6582 = vsyncadd (%p8548_p11), [#allocation17], 4294967264  ;;  %s8549_s5 = sld [smem:[#allocation26_spill]]  ;;  %p1596_p0 = scmp.lt.s32.totalorder %s6947_s0, 1  ;;  %v8400_v0 = vmov 0.0   ;;  %vm6663_vm0 = vmmov 0   ;;  %v1602_v27 = vlaneseq }
 0x101   : > { %5813 = vmatprep.subr.bf16.mxu1 %v8400_v0  ;;  %5819 = vmatprep.mubr.msk.bf16.mxu1 %vm6663_vm0, %v8400_v0  ;;  %v6141_v1 = vld [vmem:[%s6679_s9 + $0x10] sm:$0xff]   ;;  %v6142_v2 = vld [vmem:[%s6679_s9 + $0x8] sm:$0xff]   ;;  %v6143_v3 = vld [vmem:[%s6679_s9] sm:$0xff]   ;;  %vm1742_vm1 = vcmask 392192   ;;  %vm1692_vm2 = vcmask 261120   ;;  %vm1694_vm3 = vcmask 260096  }
 0x102   : > { %s1597_s15 = scalar_select %p1596_p0, %s6947_s0, 1  ;;  %5851 = vmatprep.subr.bf16.mxu0 %v8400_v0  ;;  %5855 = vmatprep.mubr.msk.bf16.mxu0 %vm6663_vm0, %v8400_v0  ;;  %1693 = vst.msk [vmem:[#allocation2] sm:$0xff] %vm1692_vm2, %v8400_v0  ;;  %1696 = vst.msk [vmem:[#allocation2 + $0x1f] sm:$0xff] %vm1692_vm2, %v8400_v0  ;;  %v5439_v5 = vld [vmem:[%s6684_s13] ss:$0 sm:$0xff]  ;;  %v7096_v31 = vshrl.u32 %v1602_v27, 7 }
 0x103   : > { %5814 = vmatpush3.bf16.msra.mxu1 %v6141_v1  ;;  %1695 = vst.msk [vmem:[#allocation2 + $0x8] sm:$0x7f] %vm1694_vm3, %v8400_v0  ;;  %1697 = vst.msk [vmem:[#allocation2 + $0x27] sm:$0x7f] %vm1694_vm3, %v8400_v0  ;;  %v7103_v38 = vld [vmem:[%s6699_s25] ss:$0 sm:$0xff] }
 0x104   : > { %s5707_s18 = sshll.u32 %s1597_s15, 3  ;;  %5815 = vmatprep.subr.bf16.mxu1 %v8400_v0  ;;  %8550 = vst [vmem:[#allocation70_spill] sm:$0xff] %v7096_v31  ;;  %v1605_v32 = vand.u32 3, %v7096_v31  ;;  %v1604_v36 = vadd.s32 8, %v7096_v31  ;;  %v7108_v40 = vld [vmem:[%s6699_s25 + $0x7] ss:$0 sm:$0xff] }
 0x105   : > { %v5445_v42 = vld [vmem:[%s6689_s17] ss:$0 sm:$0xff]  ;;  %v7114_v45 = vld [vmem:[%s6699_s25 + $0x1] ss:$0 sm:$0xff]  ;;  %v7120_v49 = vld [vmem:[%s6699_s25 + $0x8] ss:$0 sm:$0xff] }
 0x106   : > { %s1600_s11 = scalar_lea.vmem %s8549_s5, %s5707_s18  ;;  %v1607_v33 = vadd.s32 4294967293, %v1605_v32  ;;  %v1619_v34 = vadd.s32 4294967294, %v1605_v32  ;;  %v1631_v37 = vadd.s32 4294967295, %v1605_v32  ;;  %v1643_v43 = vadd.s32 1, %v1605_v32  ;;  %v5446_v46 = vld [vmem:[%s6694_s21] ss:$0 sm:$0xff] }
 0x107   : > { %5816 = vmatpush3.bf16.msra.mxu1 %v6142_v2  ;;  %v6144_v4 = vld [vmem:[%s1600_s11] sm:$0xff]   ;;  %v7131_v54 = vand.u32 3, %v1604_v36  ;;  %v1655_v56 = vadd.s32 2, %v1605_v32  ;;  %v1667_v61 = vadd.s32 3, %v1605_v32  ;;  %v7143_v63 = vld [vmem:[%s6699_s25 + $0x9] ss:$0 sm:$0xff] }
 0x108   : > { %5817 = vmatprep.subr.bf16.mxu1 %v8400_v0  ;;  %vm1609_vm4 = vcmp.ge.s32.totalorder %v1607_v33, 0  ;;  %vm1621_vm5 = vcmp.ge.s32.totalorder %v1619_v34, 0  ;;  %v7129_v53 = vld [vmem:[%s6699_s25 + $0x2] ss:$0 sm:$0xff]  ;;  %vm1633_vm6 = vcmp.ge.s32.totalorder %v1631_v37, 0  ;;  %vm1647_vm7 = vcmp.lt.s32.totalorder %v1643_v43, 4 }
 0x109   : > { %v7099_v35 = vld [vmem:[#allocation2] sm:$0xff]  ;;  %v7138_v60 = vsel %vm1609_vm4, 1.0, %v8400_v0  ;;  %vm1659_vm8 = vcmp.lt.s32.totalorder %v1655_v56, 4  ;;  %vm1671_vm9 = vcmp.lt.s32.totalorder %v1667_v61, 4  ;;  %v7215_v32 = vld [vmem:[%s6699_s25 + $0x2b] ss:$0 sm:$0xff] }
 0x10a   : > { %8551 = vst [vmem:[#allocation71_spill] sm:$0xff] %v7099_v35  ;;  %v7105_v39 = vld [vmem:[#allocation2 + $0x4] sm:$0xff]  ;;  %v1842_v50 = vmul.f32 %v7103_v38, %v7099_v35  ;;  %8557 = vst [vmem:[#allocation77_spill] sm:$0xff] %v7138_v60  ;;  %v7206_v27 = vsel %vm1671_vm9, 1.0, %v8400_v0  ;;  %v7218_v34 = vld [vmem:[%s6699_s25 + $0x10] ss:$0 sm:$0xff] }
 0x10b   : > { %5818 = vmatpush3.bf16.msra.mxu1 %v6143_v3  ;;  %8552 = vst [vmem:[#allocation72_spill] sm:$0xff] %v7105_v39  ;;  %v7111_v44 = vld [vmem:[#allocation2 + $0x1] sm:$0xff]  ;;  %v1851_v51 = vmul.f32 %v7108_v40, %v7105_v39  ;;  %8571 = vst [vmem:[#allocation91_spill] sm:$0xff] %v7206_v27  ;;  %v7249_v56 = vld [vmem:[%s6699_s25 + $0x17] ss:$0 sm:$0xff]  ;;  %s8665_s10 = sld [smem:[#allocation29_spill]] }
 0x10c   : > { %5823 = vmatprep.subr.bf16.mxu1 %v8400_v0  ;;  %8553 = vst [vmem:[#allocation73_spill] sm:$0xff] %v7111_v44  ;;  %v7117_v48 = vld [vmem:[#allocation2 + $0x5] sm:$0xff]  ;;  %v1914_v57 = vmul.f32 %v7114_v45, %v7111_v44  ;;  %8576 = vst [vmem:[#allocation96_spill] sm:$0xff] %v7249_v56  ;;  %s8666_s4 = sld [smem:[#allocation27_spill]]  ;;  %p8778_p2 = scmp.ne.s32.totalorder %s8529_s7, 0 }
 0x10d   : > { %8554 = vst [vmem:[#allocation74_spill] sm:$0xff] %v7117_v48  ;;  %v7126_v52 = vld [vmem:[#allocation2 + $0x2] sm:$0xff]  ;;  %v1923_v62 = vmul.f32 %v7120_v49, %v7117_v48  ;;  %v7285_v31 = vld [vmem:[%s6699_s25 + $0xb] ss:$0 sm:$0xff]  ;;  %s8667_s1 = sld [smem:[#allocation28_spill]]  ;;  %s6665_s5 = smov [#allocation19]  }
 0x10e   : > { %5820 = vmatmul.mubr.msk.bf16.vlgmr.msra.gmra.mxu1 %vm1742_vm1, %v6144_v4  ;;  %8555 = vst [vmem:[#allocation75_spill] sm:$0xff] %v7126_v52  ;;  %v7135_v58 = vld [vmem:[#allocation2 + $0x6] sm:$0xff]  ;;  %v7151_v4 = vsel %vm1621_vm5, 1.0, %v8400_v0  ;;  %8584 = vst [vmem:[#allocation104_spill] sm:$0xff] %v7285_v31  ;;  %s8668_s6 = sld [smem:[#allocation31_spill]] }
 0x10f   : > { %5827 = vmatprep.mubr.msk.bf16.mxu1 %vm6663_vm0, %v8400_v0  ;;  %8556 = vst [vmem:[#allocation76_spill] sm:$0xff] %v7135_v58  ;;  %v7145_v1 = vld [vmem:[#allocation2 + $0x3] sm:$0xff]  ;;  %8560 = vst [vmem:[#allocation80_spill] sm:$0xff] %v7151_v4  ;;  %s8669_s22 = sld [smem:[#allocation30_spill]] }
 0x110   : > { %8558 = vst [vmem:[#allocation78_spill] sm:$0xff] %v7145_v1  ;;  %v7220_v36 = vld [vmem:[#allocation2 + $0x20] sm:$0xff]  ;;  %s8670_s2 = sld [smem:[#allocation32_spill]] }
 0x111   : > { %8572 = vst [vmem:[#allocation92_spill] sm:$0xff] %v7220_v36  ;;  %v7222_v37 = vld [vmem:[#allocation2 + $0x21] sm:$0xff]  ;;  %s8671_s23 = sld [smem:[#allocation33_spill]] }
 0x112   : > { %8573 = vst [vmem:[#allocation93_spill] sm:$0xff] %v7222_v37  ;;  %v7258_v61 = vld [vmem:[%s6699_s25 + $0x26] ss:$0 sm:$0xff]  ;;  %s8672_s28 = sld [smem:[#allocation34_spill]] }
 0x113   : > { %s8717_s26 = sld [smem:[#allocation35_spill]] }
 0x114   : > { %s8745_s15 = sld [smem:[#allocation38_spill]] }
 0x115   : > { %s8747_s18 = sld [smem:[#allocation36_spill]] }
 0x11a   : > { %s8746_s11 = smov %s8745_s15 }
 0x1ce   : > { %v1780_v6 = vpop.f32.mrf.mxu1 }
 0x1cf   : > { %v1781_v7 = vadd.f32 %v5439_v5, %v1780_v6  ;;  %v7156_v6 = vld [vmem:[%s6699_s25 + $0x3] ss:$0 sm:$0xff] }
 0x1d0   : > { %v5821_v8 = vpop.f32.mrf.mxu1  ;;  %8561 = vst [vmem:[#allocation81_spill] sm:$0xff] %v7156_v6 }
 0x1d1   : > { %v1789_v9 = vsel %vm1692_vm2, %v1781_v7, 0.0  ;;  %v7161_v8 = vld [vmem:[%s6699_s25 + $0xa] ss:$0 sm:$0xff] }
 0x1d2   : > { %1790 = vadd.xlane.f32.xlu0 %v1789_v9  ;;  %v1783_v10 = vpop.f32.mrf.mxu1  ;;  %8563 = vst [vmem:[#allocation83_spill] sm:$0xff] %v7161_v8  ;;  %v7165_v9 = vsel %vm1633_vm6, 1.0, %v8400_v0  ;;  %vm3575_vm6 = vcmask 130048  }
 0x1d3   : > { %v1784_v11 = vadd.f32 %v5439_v5, %v1783_v10  ;;  %v1986_v5 = vmul.f32 %v7129_v53, %v7126_v52  ;;  %8564 = vst [vmem:[#allocation84_spill] sm:$0xff] %v7165_v9  ;;  %v1608_v10 = vadd.s32 4294967293, %v7131_v54 }
 0x1d4   : > { %v5822_v12 = vpop.f32.mrf.mxu1 }
 0x1d5   : > { %v1792_v13 = vsel %vm1692_vm2, %v1784_v11, 0.0  ;;  %v1632_v12 = vadd.s32 4294967295, %v7131_v54  ;;  %vm1610_vm10 = vcmp.ge.s32.totalorder %v1608_v10, 0 }
 0x1d6   : > { %1793 = vadd.xlane.f32.xlu0 %v1792_v13 }
 0x1d7   : > { %vm1634_vm12 = vcmp.ge.s32.totalorder %v1632_v12, 0  ;;  %v7292_v12 = vadd.s32 3, %v7131_v54 }
 0x1d9   : > { %8586 = vst [vmem:[#allocation106_spill] sm:$0xff] %v7292_v12 }
 0x25b   : > { %v1791_v14 = vpop.xlane.xlu0 %1790 }
 0x25c   : > { %v1796_v15 = vmul.f32 0.03125, %v1791_v14  ;;  %v1995_v14 = vmul.f32 %v7143_v63, %v7135_v58 }
 0x25e   : > { %v1798_v16 = vsub.f32 %v1781_v7, %v1796_v15  ;;  %v7158_v7 = vld [vmem:[#allocation2 + $0x7] sm:$0xff]  ;;  %v1644_v15 = vadd.s32 1, %v7131_v54  ;;  %v1997_v33 = vadd.f32 %v1995_v14, %v1986_v5  ;;  %v7270_v5 = vsel %vm1634_vm12, 1.0, %v8400_v0 }
 0x25f   : > { %v1794_v17 = vpop.xlane.xlu0 %1793  ;;  %8562 = vst [vmem:[#allocation82_spill] sm:$0xff] %v7158_v7  ;;  %8581 = vst [vmem:[#allocation101_spill] sm:$0xff] %v7270_v5 }
 0x260   : > { %v1797_v18 = vmul.f32 0.03125, %v1794_v17  ;;  %v1800_v19 = vmul.f32 %v1798_v16, %v1798_v16  ;;  %v2058_v17 = vmul.f32 %v7156_v6, %v7145_v1  ;;  %vm1648_vm13 = vcmp.lt.s32.totalorder %v1644_v15, 4 }
 0x262   : > { %v1799_v20 = vsub.f32 %v1784_v11, %v1797_v18  ;;  %v1802_v21 = vsel %vm1692_vm2, %v1800_v19, 0.0  ;;  %v1620_v11 = vadd.s32 4294967294, %v7131_v54  ;;  %v2067_v18 = vmul.f32 %v7161_v8, %v7158_v7 }
 0x263   : > { %1803 = vadd.xlane.f32.xlu1 %v1802_v21  ;;  %v7186_v21 = vld [vmem:[%s6699_s25 + $0x4] ss:$0 sm:$0xff]  ;;  %v7300_v7 = vmul.f32 %v7215_v32, %v7222_v37 }
 0x264   : > { %v1801_v22 = vmul.f32 %v1799_v20, %v1799_v20  ;;  %8567 = vst [vmem:[#allocation87_spill] sm:$0xff] %v7186_v21  ;;  %vm1622_vm11 = vcmp.ge.s32.totalorder %v1620_v11, 0  ;;  %v7230_v43 = vadd.f32 %v2067_v18, %v2058_v17  ;;  %v7280_v18 = vld [vmem:[%s6699_s25 + $0x1c] ss:$0 sm:$0xff]  ;;  %v7289_v11 = vsel %vm1648_vm13, 1.0, %v8400_v0 }
 0x265   : > { %8585 = vst [vmem:[#allocation105_spill] sm:$0xff] %v7289_v11  ;;  %8588 = vst [vmem:[#allocation108_spill] sm:$0xff] %v7300_v7 }
 0x266   : > { %v1805_v23 = vsel %vm1692_vm2, %v1801_v22, 0.0  ;;  %v7189_v22 = vld [vmem:[%s6699_s25 + $0x5] ss:$0 sm:$0xff] }
 0x267   : > { %1806 = vadd.xlane.f32.xlu1 %v1805_v23  ;;  %8568 = vst [vmem:[#allocation88_spill] sm:$0xff] %v7189_v22  ;;  %v7192_v23 = vld [vmem:[%s6699_s25 + $0x6] ss:$0 sm:$0xff] }
 0x268   : > { %8569 = vst [vmem:[#allocation89_spill] sm:$0xff] %v7192_v23 }
 0x2ec   : > { %v1804_v24 = vpop.xlane.xlu1 %1803 }
 0x2ed   : > { %v1808_v25 = vmul.f32 0.03125, %v1804_v24  ;;  %v7195_v24 = vsel %vm1659_vm8, 1.0, %v8400_v0  ;;  %vm3997_vm8 = vcmask 519168  }
 0x2ee   : > { %8570 = vst [vmem:[#allocation90_spill] sm:$0xff] %v7195_v24 }
 0x2ef   : > { %v1810_v26 = vadd.f32 1e-06, %v1808_v25  ;;  %v7198_v25 = vld [vmem:[%s6699_s25 + $0xe] ss:$0 sm:$0xff] }
 0x2f0   : > { %v1807_v28 = vpop.xlane.xlu1 %1806 }
 0x2f1   : > { %6229 = vrsqrt.f32 %v1810_v26  ;;  %v1809_v29 = vmul.f32 0.03125, %v1807_v28  ;;  %v7201_v26 = vld [vmem:[%s6699_s25 + $0xf] ss:$0 sm:$0xff]  ;;  %v7209_v28 = vld [vmem:[%s6699_s25 + $0x15] ss:$0 sm:$0xff] }
 0x2f3   : > { %v1811_v30 = vadd.f32 1e-06, %v1809_v29  ;;  %v7212_v29 = vld [vmem:[%s6699_s25 + $0x2a] ss:$0 sm:$0xff] }
 0x2f5   : > { %6231 = vrsqrt.f32 %v1811_v30  ;;  %v1925_v30 = vadd.f32 %v1923_v62, %v1914_v57  ;;  %v7252_v57 = vld [vmem:[%s6699_s25 + $0x11] ss:$0 sm:$0xff]  ;;  %v7262_v62 = vsel %vm1610_vm10, 1.0, %v8400_v0 }
 0x2f6   : > { %8577 = vst [vmem:[#allocation97_spill] sm:$0xff] %v7252_v57  ;;  %8579 = vst [vmem:[#allocation99_spill] sm:$0xff] %v7262_v62 }
 0x2fe   : > { %v6230_v41 = vpop.eup %6229 }
 0x2ff   : > { %v1814_v47 = vmul.f32 %v6230_v41, %v1798_v16  ;;  %v7177_v16 = vsel %vm1647_vm7, 1.0, %v8400_v0  ;;  %v7225_v41 = vld [vmem:[%s6699_s25 + $0x16] ss:$0 sm:$0xff]  ;;  %vm1700_vm7 = vcmask 516096  }
 0x300   : > { %8565 = vst [vmem:[#allocation85_spill] sm:$0xff] %v7177_v16 }
 0x301   : > { %v1822_v55 = vmul.f32 %v5445_v42, %v1814_v47  ;;  %v7238_v47 = vmul.f32 %v7189_v22, %v7117_v48 }
 0x302   : > { %v6232_v59 = vpop.eup %6231 }
 0x303   : > { %v7147_v2 = vadd.f32 %v5446_v46, %v1822_v55  ;;  %v1815_v3 = vmul.f32 %v6232_v59, %v1799_v20  ;;  %v1853_v20 = vadd.f32 %v1851_v51, %v1842_v50  ;;  %v7242_v50 = vmul.f32 %v7192_v23, %v7135_v58  ;;  %v7244_v51 = vld [vmem:[#allocation2 + $0x22] sm:$0xff]  ;;  %v7255_v59 = vld [vmem:[%s6699_s25 + $0x18] ss:$0 sm:$0xff] }
 0x304   : > { %8574 = vst [vmem:[#allocation94_spill] sm:$0xff] %v7244_v51  ;;  %v7246_v55 = vld [vmem:[#allocation2 + $0x1f] sm:$0xff]  ;;  %8578 = vst [vmem:[#allocation98_spill] sm:$0xff] %v7255_v59 }
 0x305   : > { %8559 = vst [vmem:[#allocation79_spill] sm:$0xff] %v7147_v2  ;;  %1833 = vst.msk [vmem:[#allocation2 + $0xf] sm:$0xff] %vm1692_vm2, %v7147_v2  ;;  %v1823_v13 = vmul.f32 %v5445_v42, %v1815_v3  ;;  %v7228_v42 = vld [vmem:[%s6699_s25 + $0x2c] ss:$0 sm:$0xff]  ;;  %v7266_v3 = vsel %vm1622_vm11, 1.0, %v8400_v0 }
 0x306   : > { %8575 = vst [vmem:[#allocation95_spill] sm:$0xff] %v7246_v55  ;;  %8580 = vst [vmem:[#allocation100_spill] sm:$0xff] %v7266_v3  ;;  %v7305_v58 = vld [vmem:[%s6699_s25 + $0x23] ss:$0 sm:$0xff]  ;;  %v7312_v0 = vld [vmem:[%s6699_s25 + $0x1d] ss:$0 sm:$0xff]  ;;  %v7320_v44 = vmul.f32 %v7228_v42, %v7244_v51 }
 0x307   : > { %v7183_v19 = vadd.f32 %v5446_v46, %v1823_v13  ;;  %v7234_v46 = vmul.f32 %v7186_v21, %v7105_v39  ;;  %v7273_v13 = vadd.s32 2, %v7131_v54  ;;  %v7324_v39 = vmul.f32 %v7258_v61, %v7246_v55  ;;  %v7343_v55 = vld [vmem:[%s6699_s25 + $0x12] ss:$0 sm:$0xff]  ;;  %v5459_v23 = vld [vmem:[%s6699_s25 + $0x24] ss:$0 sm:$0xff] }
 0x308   : > { %8589 = vst [vmem:[#allocation109_spill] sm:$0xff] %v7320_v44  ;;  %8593 = vst [vmem:[#allocation113_spill] sm:$0xff] %v7343_v55  ;;  %v7356_v44 = vld [vmem:[%s6699_s25 + $0x25] ss:$0 sm:$0xff]  ;;  %v7377_v21 = vld [vmem:[%s6699_s25 + $0x1f] ss:$0 sm:$0xff] }
 0x309   : > { %8566 = vst [vmem:[#allocation86_spill] sm:$0xff] %v7183_v19  ;;  %1834 = vst.msk [vmem:[#allocation2 + $0x17] sm:$0xff] %vm1692_vm2, %v7183_v19  ;;  %v7296_v19 = vmul.f32 %v7212_v29, %v7220_v36 }
 0x30a   : > { %8582 = vst [vmem:[#allocation102_spill] sm:$0xff] %v7273_v13  ;;  %8590 = vst [vmem:[#allocation110_spill] sm:$0xff] %v7324_v39  ;;  %v7353_v39 = vld [vmem:[%s6699_s25 + $0x1e] ss:$0 sm:$0xff] }
 0x30b   : > { %8587 = vst [vmem:[#allocation107_spill] sm:$0xff] %v7296_v19  ;;  %8595 = vst [vmem:[#allocation115_spill] sm:$0xff] %v7353_v39 }
 0x30c   : > { %v7275_v14 = vld [vmem:[#allocation2 + $0x8] sm:$0xff]  ;;  %8596 = vst [vmem:[#allocation116_spill] sm:$0xff] %v7356_v44  ;;  %8597 = vst [vmem:[#allocation117_spill] sm:$0xff] %v7377_v21 }
 0x30d   : > { %v7277_v17 = vld [vmem:[#allocation2 + $0xc] sm:$0xff]  ;;  %v1861_v1 = vmul.f32 %v7198_v25, %v7275_v14 }
 0x30e   : > { %8583 = vst [vmem:[#allocation103_spill] sm:$0xff] %v7277_v17  ;;  %v7282_v10 = vld [vmem:[#allocation2 + $0x9] sm:$0xff]  ;;  %v7328_v35 = vmul.f32 %v7108_v40, %v7277_v17  ;;  %v1871_v2 = vmul.f32 %v7209_v28, %v7277_v17 }
 0x30f   : > { %v7307_v15 = vld [vmem:[#allocation2 + $0xd] sm:$0xff]  ;;  %v1933_v54 = vmul.f32 %v7201_v26, %v7282_v10  ;;  %v1863_v37 = vadd.f32 %v1861_v1, %v1853_v20 }
 0x310   : > { %v7314_v52 = vld [vmem:[#allocation2 + $0xa] sm:$0xff]  ;;  %v7334_v12 = vmul.f32 %v7120_v49, %v7307_v15  ;;  %v1943_v40 = vmul.f32 %v7225_v41, %v7307_v15  ;;  %v7360_v62 = vld [vmem:[#allocation2 + $0x14] sm:$0xff] }
 0x311   : > { %v7316_v48 = vld [vmem:[#allocation2 + $0xe] sm:$0xff]  ;;  %v2005_v11 = vmul.f32 %v7218_v34, %v7314_v52  ;;  %v1935_v5 = vadd.f32 %v1933_v54, %v1925_v30  ;;  %v7362_v22 = vld [vmem:[#allocation2 + $0x18] sm:$0xff]  ;;  %v1873_v54 = vadd.f32 %v1871_v2, %v1863_v37  ;;  %v1891_v27 = vmul.f32 %v7305_v58, %v7360_v62 }
 0x312   : > { %v7338_v51 = vld [vmem:[#allocation2 + $0xb] sm:$0xff]  ;;  %v7350_v49 = vmul.f32 %v7143_v63, %v7316_v48  ;;  %v2015_v20 = vmul.f32 %v7249_v56, %v7316_v48  ;;  %v7374_v19 = vld [vmem:[#allocation2 + $0x15] sm:$0xff] }
 0x313   : > { %8591 = vst [vmem:[#allocation111_spill] sm:$0xff] %v7338_v51  ;;  %v7340_v13 = vld [vmem:[#allocation2 + $0xf] sm:$0xff]  ;;  %v2007_v1 = vadd.f32 %v2005_v11, %v1997_v33  ;;  %v2077_v30 = vmul.f32 %v7252_v57, %v7338_v51  ;;  %v2133_v33 = vmul.f32 %v7285_v31, %v7275_v14  ;;  %v2142_v11 = vmul.f32 %v7343_v55, %v7277_v17  ;;  %v7385_v2 = vld [vmem:[#allocation2 + $0x19] sm:$0xff] }
 0x314   : > { %8592 = vst [vmem:[#allocation112_spill] sm:$0xff] %v7340_v13  ;;  %8594 = vst [vmem:[#allocation114_spill] sm:$0xff] %v7350_v49  ;;  %v7358_v3 = vld [vmem:[#allocation2 + $0x10] sm:$0xff]  ;;  %v2087_v63 = vmul.f32 %v7255_v59, %v7340_v13  ;;  %v1945_v59 = vadd.f32 %v1943_v40, %v1935_v5  ;;  %v7389_v57 = vld [vmem:[#allocation2 + $0x1d] sm:$0xff]  ;;  %v1901_v31 = vmul.f32 %v7212_v29, %v7362_v22 }
 0x315   : > { %v1881_v36 = vmul.f32 %v7280_v18, %v7358_v3  ;;  %v7372_v7 = vld [vmem:[#allocation2 + $0x11] sm:$0xff]  ;;  %8598 = vst [vmem:[#allocation118_spill] sm:$0xff] %v7389_v57  ;;  %v2017_v13 = vadd.f32 %v2015_v20, %v2007_v1  ;;  %v1963_v55 = vmul.f32 %v5459_v23, %v7374_v19  ;;  %v7398_v5 = vld [vmem:[#allocation2 + $0x1a] sm:$0xff]  ;;  %v7403_v24 = vmul.f32 %v5459_v23, %v7389_v57 }
 0x316   : > { %v1953_v37 = vmul.f32 %v7312_v0, %v7372_v7  ;;  %v7391_v8 = vld [vmem:[#allocation2 + $0x12] sm:$0xff]  ;;  %v7417_v23 = vld [vmem:[#allocation2 + $0x1b] sm:$0xff] }
 0x317   : > { %v1883_v6 = vadd.f32 %v1881_v36, %v1873_v54  ;;  %v7396_v17 = vld [vmem:[#allocation2 + $0x16] sm:$0xff]  ;;  %v2025_v40 = vmul.f32 %v7353_v39, %v7391_v8  ;;  %8599 = vst [vmem:[#allocation119_spill] sm:$0xff] %v7403_v24  ;;  %v1973_v36 = vmul.f32 %v7215_v32, %v7385_v2  ;;  %v7425_v24 = vld [vmem:[%s6699_s25 + $0x20] ss:$0 sm:$0xff] }
 0x318   : > { %v1955_v51 = vadd.f32 %v1953_v37, %v1945_v59  ;;  %v2035_v29 = vmul.f32 %v7356_v44, %v7396_v17  ;;  %v7409_v1 = vld [vmem:[#allocation2 + $0x13] sm:$0xff]  ;;  %v2079_v59 = vadd.f32 %v2077_v30, %v7230_v43  ;;  %v7422_v37 = vld [vmem:[%s6699_s25 + $0x2d] ss:$0 sm:$0xff]  ;;  %8602 = vst [vmem:[#allocation122_spill] sm:$0xff] %v7425_v24  ;;  %v2045_v44 = vmul.f32 %v7228_v42, %v7398_v5  ;;  %v7433_v43 = vld [vmem:[%s6699_s25 + $0x27] ss:$0 sm:$0xff] }
 0x319   : > { %8600 = vst [vmem:[#allocation120_spill] sm:$0xff] %v7409_v1  ;;  %v7411_v20 = vld [vmem:[#allocation2 + $0x17] sm:$0xff]  ;;  %v1893_v56 = vadd.f32 %v1891_v27, %v1883_v6  ;;  %v2027_v49 = vadd.f32 %v2025_v40, %v2017_v13  ;;  %v2097_v32 = vmul.f32 %v7377_v21, %v7409_v1  ;;  %8601 = vst [vmem:[#allocation121_spill] sm:$0xff] %v7422_v37  ;;  %v7443_v42 = vld [vmem:[%s6699_s25 + $0xc] ss:$0 sm:$0xff] }
 0x31a   : > { %v7414_v54 = vld [vmem:[%s6699_s25 + $0x19] ss:$0 sm:$0xff]  ;;  %v1965_v39 = vadd.f32 %v1963_v55, %v1955_v51  ;;  %v2107_v6 = vmul.f32 %v7258_v61, %v7411_v20  ;;  %v2135_v27 = vadd.f32 %v2133_v33, %v7234_v46  ;;  %v7435_v13 = vld [vmem:[#allocation2 + $0x1c] sm:$0xff]  ;;  %v2089_v21 = vadd.f32 %v2087_v63, %v2079_v59  ;;  %v7440_v55 = vld [vmem:[%s6699_s25 + $0x2e] ss:$0 sm:$0xff]  ;;  %8604 = vst [vmem:[#allocation124_spill] sm:$0xff] %v7443_v42 }
 0x31b   : > { %v1903_v30 = vadd.f32 %v1901_v31, %v1893_v56  ;;  %v2037_v40 = vadd.f32 %v2035_v29, %v2027_v49  ;;  %v2151_v51 = vmul.f32 %v7414_v54, %v7358_v3  ;;  %8603 = vst [vmem:[#allocation123_spill] sm:$0xff] %v7440_v55  ;;  %v2117_v46 = vmul.f32 %v7422_v37, %v7417_v23  ;;  %v7450_v56 = vld [vmem:[%s6699_s25 + $0x13] ss:$0 sm:$0xff]  ;;  %v7453_v49 = vld [vmem:[%s6699_s25 + $0x1a] ss:$0 sm:$0xff] }
 0x31c   : > { %v1975_v1 = vadd.f32 %v1973_v36, %v1965_v39  ;;  %v2144_v61 = vadd.f32 %v2142_v11, %v2135_v27  ;;  %v2160_v31 = vmul.f32 %v7425_v24, %v7360_v62  ;;  %8605 = vst [vmem:[#allocation125_spill] sm:$0xff] %v7450_v56  ;;  %8606 = vst [vmem:[#allocation126_spill] sm:$0xff] %v7453_v49  ;;  %v7459_v36 = vld [vmem:[%s6699_s25 + $0x21] ss:$0 sm:$0xff]  ;;  %v7462_v11 = vld [vmem:[%s6699_s25 + $0x28] ss:$0 sm:$0xff] }
 0x31d   : > { %v1905_v63 = vmul.f32 %v7138_v60, %v1903_v30  ;;  %v2047_v33 = vadd.f32 %v2045_v44, %v2037_v40  ;;  %v2099_v29 = vadd.f32 %v2097_v32, %v2089_v21  ;;  %v2169_v39 = vmul.f32 %v7433_v43, %v7362_v22  ;;  %8607 = vst [vmem:[#allocation127_spill] sm:$0xff] %v7459_v36  ;;  %v7470_v30 = vld [vmem:[%s6699_s25 + $0x2f] ss:$0 sm:$0xff]  ;;  %v7473_v21 = vld [vmem:[%s6699_s25 + $0xd] ss:$0 sm:$0xff] }
 0x31e   : > { %8608 = vst [vmem:[#allocation128_spill] sm:$0xff] %v7462_v11  ;;  %v1977_v59 = vmul.f32 %v7151_v4, %v1975_v1  ;;  %v2153_v27 = vadd.f32 %v2151_v51, %v2144_v61  ;;  %v2179_v37 = vmul.f32 %v7440_v55, %v7435_v13  ;;  %v2197_v44 = vmul.f32 %v7443_v42, %v7282_v10  ;;  %v7476_v32 = vld [vmem:[%s6699_s25 + $0x14] ss:$0 sm:$0xff]  ;;  %v7484_v61 = vld [vmem:[%s6699_s25 + $0x1b] ss:$0 sm:$0xff] }
 0x31f   : > { %8609 = vst [vmem:[#allocation129_spill] sm:$0xff] %v7470_v30  ;;  %8610 = vst [vmem:[#allocation130_spill] sm:$0xff] %v7473_v21  ;;  %v2049_v40 = vmul.f32 %v7165_v9, %v2047_v33  ;;  %v2109_v60 = vadd.f32 %v2107_v6, %v2099_v29  ;;  %v2206_v1 = vmul.f32 %v7450_v56, %v7307_v15  ;;  %v7487_v4 = vld [vmem:[%s6699_s25 + $0x22] ss:$0 sm:$0xff]  ;;  %v7495_v6 = vld [vmem:[%s6699_s25 + $0x29] ss:$0 sm:$0xff] }
 0x320   : > { %8611 = vst [vmem:[#allocation131_spill] sm:$0xff] %v7476_v32  ;;  %v2215_v51 = vmul.f32 %v7453_v49, %v7372_v7  ;;  %8612 = vst [vmem:[#allocation132_spill] sm:$0xff] %v7487_v4  ;;  %v2162_v55 = vadd.f32 %v2160_v31, %v2153_v27  ;;  %v2199_v24 = vadd.f32 %v2197_v44, %v7238_v47  ;;  %v7497_v29 = vld [vmem:[#allocation2 + $0x1e] sm:$0xff]  ;;  %v7506_v31 = vld [vmem:[%s6699_s25 + $0x30] ss:$0 sm:$0xff] }
 0x321   : > { %v2224_v42 = vmul.f32 %v7459_v36, %v7374_v19  ;;  %v2233_v33 = vmul.f32 %v7462_v11, %v7385_v2  ;;  %v2119_v9 = vadd.f32 %v2117_v46, %v2109_v60  ;;  %v2243_v49 = vmul.f32 %v7470_v30, %v7389_v57 }
 0x322   : > { %v2261_v56 = vmul.f32 %v7473_v21, %v7314_v52  ;;  %v2270_v47 = vmul.f32 %v7476_v32, %v7316_v48  ;;  %v2171_v27 = vadd.f32 %v2169_v39, %v2162_v55  ;;  %v2208_v44 = vadd.f32 %v2206_v1, %v2199_v24 }
 0x323   : > { %v2279_v11 = vmul.f32 %v7484_v61, %v7391_v8  ;;  %v2288_v36 = vmul.f32 %v7487_v4, %v7396_v17  ;;  %v2297_v46 = vmul.f32 %v7495_v6, %v7398_v5  ;;  %v2313_v30 = vadd.f32 %v1977_v59, %v1905_v63 }
 0x324   : > { %v2263_v60 = vadd.f32 %v2261_v56, %v7242_v50  ;;  %v1843_v57 = vmul.f32 %v7103_v38, %v7275_v14  ;;  %v2181_v32 = vadd.f32 %v2179_v37, %v2171_v27  ;;  %v2217_v21 = vadd.f32 %v2215_v51, %v2208_v44  ;;  %v8617_v27 = vld [vmem:[#allocation81_spill] sm:$0xff] }
 0x325   : > { %v2307_v24 = vmul.f32 %v7506_v31, %v7497_v29  ;;  %v1862_v55 = vmul.f32 %v7198_v25, %v7358_v3  ;;  %v2315_v1 = vadd.f32 %v2313_v30, %v2049_v40  ;;  %v1872_v50 = vmul.f32 %v7209_v28, %v7360_v62  ;;  %v8615_v40 = vld [vmem:[#allocation90_spill] sm:$0xff] }
 0x326   : > { %v2272_v39 = vadd.f32 %v2270_v47, %v2263_v60  ;;  %v1854_v4 = vadd.f32 %v7328_v35, %v1843_v57  ;;  %v2183_v56 = vmul.f32 %v7177_v16, %v2181_v32  ;;  %v2226_v63 = vadd.f32 %v2224_v42, %v2217_v21  ;;  %v8616_v47 = vld [vmem:[#allocation111_spill] sm:$0xff] }
 0x327   : > { %v1882_v38 = vmul.f32 %v7280_v18, %v7362_v22  ;;  %v1915_v14 = vmul.f32 %v7114_v45, %v7282_v10  ;;  %v2317_v59 = vadd.f32 %v2315_v1, %v2119_v9  ;;  %v1934_v25 = vmul.f32 %v7201_v26, %v7372_v7  ;;  %v5532_v16 = vld [vmem:[%s8672_s28 + $0x25] ss:$0 sm:$0xff] }
 0x328   : > { %v2281_v37 = vadd.f32 %v2279_v11, %v2272_v39  ;;  %v1864_v51 = vadd.f32 %v1862_v55, %v1854_v4  ;;  %v2235_v30 = vadd.f32 %v2233_v33, %v2226_v63  ;;  %v1892_v35 = vmul.f32 %v7305_v58, %v7435_v13  ;;  %v8621_v39 = vld [vmem:[#allocation97_spill] sm:$0xff] }
 0x329   : > { %v1926_v28 = vadd.f32 %v7334_v12, %v1915_v14  ;;  %v1944_v57 = vmul.f32 %v7225_v41, %v7374_v19  ;;  %v1954_v45 = vmul.f32 %v7312_v0, %v7385_v2  ;;  %v1987_v4 = vmul.f32 %v7129_v53, %v7314_v52  ;;  %v8613_v12 = vld [vmem:[#allocation114_spill] sm:$0xff]  ;;  %v8614_v41 = vld [vmem:[#allocation96_spill] sm:$0xff] }
 0x32a   : > { %v2290_v42 = vadd.f32 %v2288_v36, %v2281_v37  ;;  %v1874_v18 = vadd.f32 %v1872_v50, %v1864_v51  ;;  %v2245_v9 = vadd.f32 %v2243_v49, %v2235_v30  ;;  %v2319_v10 = vadd.f32 %v2317_v59, %v2183_v56  ;;  %v8618_v53 = vld [vmem:[#allocation112_spill] sm:$0xff]  ;;  %v8619_v49 = vld [vmem:[#allocation83_spill] sm:$0xff] }
 0x32b   : > { %v1936_v26 = vadd.f32 %v1934_v25, %v1926_v28  ;;  %v2006_v11 = vmul.f32 %v7218_v34, %v7391_v8  ;;  %v1998_v32 = vadd.f32 %v8613_v12, %v1987_v4  ;;  %v2016_v36 = vmul.f32 %v8614_v41, %v7396_v17  ;;  %v8622_v50 = vld [vmem:[#allocation116_spill] sm:$0xff]  ;;  %v8623_v37 = vld [vmem:[#allocation91_spill] sm:$0xff]  ;;  %v8625_v28 = vld [vmem:[#allocation98_spill] sm:$0xff] }
 0x32c   : > { %v2299_v58 = vadd.f32 %v2297_v46, %v2290_v42  ;;  %v1884_v21 = vadd.f32 %v1882_v38, %v1874_v18  ;;  %v2247_v33 = vmul.f32 %v8615_v40, %v2245_v9  ;;  %v2059_v52 = vmul.f32 %v8617_v27, %v8616_v47  ;;  %v8620_v46 = vld [vmem:[#allocation120_spill] sm:$0xff]  ;;  %v8624_v25 = vld [vmem:[#allocation115_spill] sm:$0xff]  ;;  %v8633_v47 = vld [vmem:[#allocation113_spill] sm:$0xff] }
 0x32d   : > { %v1946_v0 = vadd.f32 %v1944_v57, %v1936_v26  ;;  %v2068_v44 = vmul.f32 %v8619_v49, %v8618_v53  ;;  %v2008_v34 = vadd.f32 %v2006_v11, %v1998_v32  ;;  %v2078_v1 = vmul.f32 %v8621_v39, %v8620_v46  ;;  %v8626_v57 = vld [vmem:[#allocation119_spill] sm:$0xff]  ;;  %v8631_v32 = vld [vmem:[#allocation117_spill] sm:$0xff]  ;;  %v8634_v49 = vld [vmem:[#allocation92_spill] sm:$0xff] }
 0x32e   : > { %v2309_v60 = vadd.f32 %v2307_v24, %v2299_v58  ;;  %v1894_v55 = vadd.f32 %v1892_v35, %v1884_v21  ;;  %v2036_v56 = vmul.f32 %v8622_v50, %v7497_v29  ;;  %v2321_v63 = vadd.f32 %v2319_v10, %v2247_v33  ;;  %v7560_v35 = vld [vmem:[%s6704_s29] ss:$0 sm:$0xff]  ;;  %v8627_v4 = vld [vmem:[#allocation103_spill] sm:$0xff]  ;;  %v8636_v39 = vld [vmem:[#allocation124_spill] sm:$0xff] }
 0x32f   : > { %v1956_v38 = vadd.f32 %v1954_v45, %v1946_v0  ;;  %v2070_v14 = vadd.f32 %v2068_v44, %v2059_v52  ;;  %v2018_v51 = vadd.f32 %v2016_v36, %v2008_v34  ;;  %v2026_v30 = vmul.f32 %v8624_v25, %v7398_v5  ;;  %v8628_v9 = vld [vmem:[#allocation87_spill] sm:$0xff]  ;;  %v8629_v45 = vld [vmem:[#allocation104_spill] sm:$0xff]  ;;  %v8641_v25 = vld [vmem:[#allocation125_spill] sm:$0xff] }
 0x330   : > { %v2311_v59 = vmul.f32 %v8623_v37, %v2309_v60  ;;  %v2088_v24 = vmul.f32 %v8625_v28, %v7411_v20  ;;  %v2127_v26 = vmul.f32 %v8628_v9, %v8627_v4  ;;  %v2134_v10 = vmul.f32 %v8629_v45, %v7358_v3  ;;  %v8630_v58 = vld [vmem:[#allocation107_spill] sm:$0xff]  ;;  %v8632_v36 = vld [vmem:[#allocation108_spill] sm:$0xff]  ;;  %v8645_v4 = vld [vmem:[#allocation130_spill] sm:$0xff] }
 0x331   : > { %v1966_v42 = vadd.f32 %v8626_v57, %v1956_v38  ;;  %v2080_v18 = vadd.f32 %v2078_v1, %v2070_v14  ;;  %v1904_v21 = vadd.f32 %v8630_v58, %v1894_v55  ;;  %v2028_v12 = vadd.f32 %v2026_v30, %v2018_v51  ;;  %v7580_v55 = vld [vmem:[#allocation2 + $0x23] sm:$0xff]  ;;  %v8635_v34 = vld [vmem:[#allocation88_spill] sm:$0xff] }
 0x332   : > { %v2323_v11 = vadd.f32 %v2321_v63, %v2311_v59  ;;  %v2098_v41 = vmul.f32 %v8631_v32, %v7417_v23  ;;  %v2136_v0 = vadd.f32 %v2134_v10, %v2127_v26  ;;  %v2143_v27 = vmul.f32 %v8633_v47, %v7360_v62  ;;  %v8637_v50 = vld [vmem:[#allocation99_spill] sm:$0xff]  ;;  %v8638_v63 = vld [vmem:[#allocation100_spill] sm:$0xff]  ;;  %v8640_v59 = vld [vmem:[#allocation122_spill] sm:$0xff] }
 0x333   : > { %v1976_v20 = vadd.f32 %v8632_v36, %v1966_v42  ;;  %v2090_v33 = vadd.f32 %v2088_v24, %v2080_v18  ;;  %v2038_v53 = vadd.f32 %v2036_v56, %v2028_v12  ;;  %v2152_v3 = vmul.f32 %v7414_v54, %v7362_v22  ;;  %v8639_v54 = vld [vmem:[#allocation109_spill] sm:$0xff]  ;;  %v8642_v30 = vld [vmem:[#allocation110_spill] sm:$0xff]  ;;  %v8646_v45 = vld [vmem:[#allocation123_spill] sm:$0xff] }
 0x334   : > { %v7574_v52 = vadd.f32 %v7560_v35, %v2323_v11  ;;  %v2170_v44 = vmul.f32 %v7433_v43, %v8634_v49  ;;  %v2145_v23 = vadd.f32 %v2143_v27, %v2136_v0  ;;  %v2191_v46 = vmul.f32 %v8635_v34, %v7307_v15  ;;  %v7591_v43 = vld [vmem:[#allocation2 + $0x24] sm:$0xff]  ;;  %v8643_v24 = vld [vmem:[#allocation121_spill] sm:$0xff]  ;;  %v8647_v11 = vld [vmem:[#allocation126_spill] sm:$0xff] }
 0x335   : > { %v2100_v60 = vadd.f32 %v2098_v41, %v2090_v33  ;;  %v2198_v62 = vmul.f32 %v8636_v39, %v7372_v7  ;;  %v1906_v56 = vmul.f32 %v8637_v50, %v1904_v21  ;;  %v1978_v22 = vmul.f32 %v8638_v63, %v1976_v20  ;;  %v8644_v42 = vld [vmem:[#allocation89_spill] sm:$0xff]  ;;  %v7609_v12 = vld [vmem:[#allocation2 + $0x25] sm:$0xff] }
 0x336   : > { %v2335_v1 = vsel %vm1692_vm2, %v7574_v52, 0.0  ;;  %v2048_v38 = vadd.f32 %v8639_v54, %v2038_v53  ;;  %v2154_v14 = vadd.f32 %v2152_v3, %v2145_v23  ;;  %v2161_v51 = vmul.f32 %v8640_v59, %v7435_v13  ;;  %8649 = vst [vmem:[#allocation114_spill] sm:$0xff] %v7609_v12  ;;  %v8650_v41 = vld [vmem:[#allocation131_spill] sm:$0xff]  ;;  %v8653_v27 = vld [vmem:[#allocation93_spill] sm:$0xff]  ;;  %v8654_v53 = vld [vmem:[#allocation128_spill] sm:$0xff] }
 0x337   : > { %2336 = vadd.xlane.f32.xlu0 %v2335_v1  ;;  %v2200_v15 = vadd.f32 %v2198_v62, %v2191_v46  ;;  %v2207_v7 = vmul.f32 %v8641_v25, %v7374_v19  ;;  %v2110_v28 = vadd.f32 %v8642_v30, %v2100_v60  ;;  %v2118_v57 = vmul.f32 %v8643_v24, %v7580_v55  ;;  %v8648_v19 = vld [vmem:[#allocation101_spill] sm:$0xff]  ;;  %v8652_v0 = vld [vmem:[#allocation127_spill] sm:$0xff]  ;;  %v8655_v46 = vld [vmem:[#allocation102_spill] sm:$0xff] }
 0x338   : > { %v2255_v18 = vmul.f32 %v8644_v42, %v7316_v48  ;;  %v2262_v9 = vmul.f32 %v8645_v4, %v7391_v8  ;;  %v2163_v26 = vadd.f32 %v2161_v51, %v2154_v14  ;;  %v2180_v10 = vmul.f32 %v8646_v45, %v7591_v43  ;;  %v8651_v8 = vld [vmem:[#allocation118_spill] sm:$0xff]  ;;  %v7622_v1 = vld [vmem:[#allocation2 + $0x26] sm:$0xff]  ;;  %v8660_v51 = vld [vmem:[#allocation105_spill] sm:$0xff] }
 0x339   : > { %v2209_v13 = vadd.f32 %v2207_v7, %v2200_v15  ;;  %v2216_v58 = vmul.f32 %v8647_v11, %v7385_v2  ;;  %v2050_v21 = vmul.f32 %v8648_v19, %v2048_v38  ;;  %v2271_v36 = vmul.f32 %v8650_v41, %v7396_v17  ;;  %v8656_v17 = vld [vmem:[#allocation129_spill] sm:$0xff]  ;;  %8657 = vst [vmem:[#allocation96_spill] sm:$0xff] %v7622_v1  ;;  %v8659_v38 = vld [vmem:[#allocation94_spill] sm:$0xff] }
 0x33a   : > { %v2264_v32 = vadd.f32 %v2262_v9, %v2255_v18  ;;  %v2314_v48 = vadd.f32 %v1978_v22, %v1906_v56  ;;  %v2172_v20 = vadd.f32 %v2170_v44, %v2163_v26  ;;  %v2225_v47 = vmul.f32 %v8652_v0, %v8651_v8  ;;  %v8658_v22 = vld [vmem:[#allocation132_spill] sm:$0xff]  ;;  %v8663_v7 = vld [vmem:[#allocation106_spill] sm:$0xff] }
 0x33b   : > { %v2218_v33 = vadd.f32 %v2216_v58, %v2209_v13  ;;  %v2234_v3 = vmul.f32 %v8654_v53, %v8653_v27  ;;  %v2120_v60 = vadd.f32 %v2118_v57, %v2110_v28  ;;  %v2280_v2 = vmul.f32 %v7484_v61, %v7398_v5 }
 0x33c   : > { %v2273_v23 = vadd.f32 %v2271_v36, %v2264_v32  ;;  %v2316_v34 = vadd.f32 %v2314_v48, %v2050_v21  ;;  %vm1660_vm14 = vcmp.lt.s32.totalorder %v8655_v46, 4  ;;  %v2182_v39 = vadd.f32 %v2180_v10, %v2172_v20 }
 0x33d   : > { %v2227_v62 = vadd.f32 %v2225_v47, %v2218_v33  ;;  %v2244_v44 = vmul.f32 %v8656_v17, %v7609_v12  ;;  %v2289_v54 = vmul.f32 %v8658_v22, %v7497_v29  ;;  %v2298_v14 = vmul.f32 %v7495_v6, %v8659_v38  ;;  %v6146_v33 = vld [vmem:[%s8665_s10] sm:$0xff]  }
 0x33e   : > { %v2282_v56 = vadd.f32 %v2280_v2, %v2273_v23  ;;  %v2318_v59 = vadd.f32 %v2316_v34, %v2120_v60  ;;  %v2184_v5 = vmul.f32 %v8660_v51, %v2182_v39  ;;  %v8661_v15 = vmov 0.0   ;;  %v5497_v2 = vld [vmem:[%s8666_s4] ss:$0 sm:$0xff]  ;;  %s8749_s4 = sld [smem:[#allocation37_spill]] }
 0x33f   : > { %v2236_v61 = vadd.f32 %v2234_v3, %v2227_v62  ;;  %v7630_v25 = vsel %vm1660_vm14, 1.0, %v8661_v15  ;;  %vm1672_vm15 = vcmp.lt.s32.totalorder %v8663_v7, 4  ;;  %v2308_v28 = vmul.f32 %v7506_v31, %v7622_v1  ;;  %v5498_v62 = vld [vmem:[%s8667_s1] ss:$0 sm:$0xff]  ;;  %v6152_v7 = vld [vmem:[%s8668_s6 + $0x10] sm:$0xff]   ;;  %s8750_s1 = sld [smem:[#allocation40_spill]] }
 0x340   : > { %8662 = vst [vmem:[#allocation111_spill] sm:$0xff] %v7630_v25  ;;  %v2291_v30 = vadd.f32 %v2289_v54, %v2282_v56  ;;  %v2320_v57 = vadd.f32 %v2318_v59, %v2184_v5  ;;  %v7636_v29 = vsel %vm1672_vm15, 1.0, %v8661_v15  ;;  %v6147_v54 = vld [vmem:[%s8668_s6 + $0x38] sm:$0xff]   ;;  %v6149_v59 = vld [vmem:[%s8668_s6 + $0x28] sm:$0xff]   ;;  %v6150_v5 = vld [vmem:[%s8668_s6 + $0x20] sm:$0xff]  }
 0x341   : > { %v2246_v24 = vadd.f32 %v2244_v44, %v2236_v61  ;;  %8664 = vst [vmem:[#allocation81_spill] sm:$0xff] %v7636_v29  ;;  %v6151_v61 = vld [vmem:[%s8668_s6 + $0x18] sm:$0xff]   ;;  %v5525_v1 = vld [vmem:[%s8672_s28 + $0x24] ss:$0 sm:$0xff] }
 0x342   : > { %v2300_v42 = vadd.f32 %v2298_v14, %v2291_v30  ;;  %v6148_v14 = vld [vmem:[%s8668_s6 + $0x30] sm:$0xff]   ;;  %v6153_v30 = vld [vmem:[%s8668_s6 + $0x8] sm:$0xff]  }
 0x343   : > { %v2248_v6 = vmul.f32 %v7630_v25, %v2246_v24  ;;  %v5499_v24 = vld [vmem:[%s8669_s22] ss:$0 sm:$0xff]  ;;  %v5524_v25 = vld [vmem:[%s8672_s28 + $0x1d] ss:$0 sm:$0xff]  ;;  %s8751_s22 = sld [smem:[#allocation39_spill]] }
 0x344   : > { %v2310_v18 = vadd.f32 %v2308_v28, %v2300_v42  ;;  %v6154_v28 = vld [vmem:[%s8668_s6] sm:$0xff]   ;;  %s6525_s6 = sshll.u32 %s6665_s5, 4  ;;  %s6526_s6 = int_to_ptr.vmem [resolvable:$false] %s6525_s6 }
 0x345   : > { %v2322_v4 = vadd.f32 %v2320_v57, %v2248_v6 }
 0x346   : > { %v2312_v9 = vmul.f32 %v7636_v29, %v2310_v18  ;;  %v5518_v29 = vld [vmem:[%s8672_s28 + $0x23] ss:$0 sm:$0xff] }
 0x348   : > { %v2324_v26 = vadd.f32 %v2322_v4, %v2312_v9 }
 0x34a   : > { %v2332_v45 = vadd.f32 %v7560_v35, %v2324_v26  ;;  %v6145_v35 = vld [vmem:[%s8665_s10 + $0x8] sm:$0xff]  }
 0x34b   : > { %5824 = vmatpush3.bf16.msra.mxu1 %v6145_v35 }
 0x34c   : > { %v2338_v10 = vsel %vm1692_vm2, %v2332_v45, 0.0  ;;  %5825 = vmatprep.subr.bf16.mxu1 %v8661_v15 }
 0x34d   : > { %2339 = vadd.xlane.f32.xlu1 %v2338_v10 }
 0x34f   : > { %5826 = vmatpush3.bf16.msra.mxu1 %v6146_v33 }
 0x350   : > { %5831 = vmatprep.subr.bf16.mxu1 %v8661_v15 }
 0x3c0   : > { %v2337_v31 = vpop.xlane.xlu0 %2336 }
 0x3c1   : > { %v2341_v13 = vmul.f32 0.03125, %v2337_v31 }
 0x3c3   : > { %v2343_v11 = vsub.f32 %v7574_v52, %v2341_v13 }
 0x3c5   : > { %v2345_v58 = vmul.f32 %v2343_v11, %v2343_v11 }
 0x3c7   : > { %v2347_v21 = vsel %vm1692_vm2, %v2345_v58, 0.0 }
 0x3c8   : > { %2348 = vadd.xlane.f32.xlu0 %v2347_v21 }
 0x3d6   : > { %v2340_v32 = vpop.xlane.xlu1 %2339 }
 0x3d7   : > { %v2342_v41 = vmul.f32 0.03125, %v2340_v32 }
 0x3d9   : > { %v2344_v36 = vsub.f32 %v2332_v45, %v2342_v41 }
 0x3db   : > { %v2346_v48 = vmul.f32 %v2344_v36, %v2344_v36 }
 0x3dd   : > { %v2350_v20 = vsel %vm1692_vm2, %v2346_v48, 0.0 }
 0x3de   : > { %2351 = vadd.xlane.f32.xlu1 %v2350_v20 }
 0x451   : > { %v2349_v52 = vpop.xlane.xlu0 %2348 }
 0x452   : > { %v2353_v8 = vmul.f32 0.03125, %v2349_v52 }
 0x454   : > { %v2355_v0 = vadd.f32 1e-06, %v2353_v8 }
 0x456   : > { %6233 = vrsqrt.f32 %v2355_v0 }
 0x463   : > { %v6234_v60 = vpop.eup %6233 }
 0x464   : > { %v2359_v23 = vmul.f32 %v6234_v60, %v2343_v11 }
 0x466   : > { %v2367_v39 = vmul.f32 %v5497_v2, %v2359_v23 }
 0x467   : > { %v2352_v47 = vpop.xlane.xlu1 %2351 }
 0x468   : > { %v2354_v53 = vmul.f32 0.03125, %v2352_v47  ;;  %v2375_v44 = vadd.f32 %v5498_v62, %v2367_v39 }
 0x46a   : > { %v2356_v3 = vadd.f32 1e-06, %v2354_v53 }
 0x46c   : > { %6235 = vrsqrt.f32 %v2356_v3 }
 0x479   : > { %v6236_v34 = vpop.eup %6235 }
 0x47a   : > { %v2360_v46 = vmul.f32 %v6236_v34, %v2344_v36 }
 0x47c   : > { %v2368_v17 = vmul.f32 %v5497_v2, %v2360_v46 }
 0x47e   : > { %v2376_v56 = vadd.f32 %v5498_v62, %v2368_v17 }
 0x480   : > { %v2382_v22 = vpack.c.bf16 %v2376_v56, %v2375_v44 }
 0x482   : > { %5828 = vmatmul.mubr.msk.bf16.vlgmr.msra.gmra.mxu1 %vm1692_vm2, %v2382_v22 }
 0x483   : > { %5847 = vmatprep.mubr.msk.bf16.mxu1 %vm6663_vm0, %v8661_v15  ;;  %5832 = vmatpush3.bf16.msra.mxu1 %v6147_v54 }
 0x484   : > { %5833 = vmatprep.subr.bf16.mxu1 %v8661_v15 }
 0x487   : > { %5834 = vmatpush3.bf16.msra.mxu1 %v6148_v14 }
 0x488   : > { %5835 = vmatprep.subr.bf16.mxu1 %v8661_v15 }
 0x48b   : > { %5836 = vmatpush3.bf16.msra.mxu1 %v6149_v59 }
 0x48c   : > { %5837 = vmatprep.subr.bf16.mxu1 %v8661_v15 }
 0x48f   : > { %5838 = vmatpush3.bf16.msra.mxu1 %v6150_v5 }
 0x490   : > { %5839 = vmatprep.subr.bf16.mxu1 %v8661_v15 }
 0x493   : > { %5840 = vmatpush3.bf16.msra.mxu1 %v6151_v61 }
 0x494   : > { %5841 = vmatprep.subr.bf16.mxu1 %v8661_v15 }
 0x497   : > { %5842 = vmatpush3.bf16.msra.mxu1 %v6152_v7 }
 0x498   : > { %5843 = vmatprep.subr.bf16.mxu1 %v8661_v15 }
 0x49b   : > { %5844 = vmatpush3.bf16.msra.mxu1 %v6153_v30 }
 0x49c   : > { %5845 = vmatprep.subr.bf16.mxu1 %v8661_v15 }
 0x49f   : > { %5846 = vmatpush3.bf16.msra.mxu1 %v6154_v28 }
 0x4a0   : > { %5879 = vmatprep.subr.bf16.mxu1 %v8661_v15 }
 0x542   : > { %v2438_v57 = vpop.f32.mrf.mxu1 }
 0x543   : > { %v2439_v42 = vadd.f32 %v5499_v24, %v2438_v57 }
 0x544   : > { %v5829_v6 = vpop.f32.mrf.mxu1 }
 0x545   : > { %v2447_v18 = vmul.f32 0.70710677, %v2439_v42 }
 0x546   : > { %v2441_v4 = vpop.f32.mrf.mxu1 }
 0x547   : > { %v2449_v9 = vand.u32 2147483647, %v2447_v18  ;;  %v2442_v26 = vadd.f32 %v5499_v24, %v2441_v4  ;;  %vm2487_vm1 = vcmp.ge.f32.partialorder %v2447_v18, 0.0  ;;  %v5503_v18 = vld [vmem:[%s8670_s2] ss:$0 sm:$0xff]  ;;  %s8752_s2 = sld [smem:[#allocation41_spill]] }
 0x548   : > { %v5830_v45 = vpop.f32.mrf.mxu1 }
 0x549   : > { %v2451_v10 = vmul.f32 0.3275911, %v2449_v9  ;;  %v2448_v31 = vmul.f32 0.70710677, %v2442_v26  ;;  %v2475_v32 = vsub.f32 0.0, %v2449_v9  ;;  %v2445_v45 = vmul.f32 0.5, %v2439_v42 }
 0x54b   : > { %v2453_v13 = vadd.f32 1.0, %v2451_v10  ;;  %v2450_v11 = vand.u32 2147483647, %v2448_v31  ;;  %v2477_v41 = vmul.f32 %v2475_v32, %v2449_v9  ;;  %vm2488_vm3 = vcmp.ge.f32.partialorder %v2448_v31, 0.0  ;;  %v5512_v32 = vld [vmem:[%s8671_s23] ss:$0 sm:$0xff] }
 0x54c   : > { %v2446_v10 = vmul.f32 0.5, %v2442_v26  ;;  %s8753_s23 = sld [smem:[#allocation42_spill]] }
 0x54d   : > { %6237 = vrcp.f32 %v2453_v13  ;;  %v2452_v58 = vmul.f32 0.3275911, %v2450_v11  ;;  %v2476_v36 = vsub.f32 0.0, %v2450_v11  ;;  %v2479_v35 = vmul.f32 1.442695, %v2477_v41 }
 0x54f   : > { %v2454_v21 = vadd.f32 1.0, %v2452_v58  ;;  %v2478_v33 = vmul.f32 %v2476_v36, %v2450_v11  ;;  %v5513_v36 = vld [vmem:[%s8672_s28] ss:$0 sm:$0xff] }
 0x551   : > { %6239 = vrcp.f32 %v2454_v21  ;;  %v2481_v53 = vmul.f32 1.442695, %v2478_v33  ;;  %v5521_v33 = vld [vmem:[%s8672_s28 + $0x8] ss:$0 sm:$0xff] }
 0x552   : > { %6241 = vpow2.f32 %v2479_v35  ;;  %v5520_v35 = vld [vmem:[%s8672_s28 + $0x1] ss:$0 sm:$0xff] }
 0x553   : > { %6243 = vpow2.f32 %v2481_v53  ;;  %v7686_v53 = vld [vmem:[%s8672_s28 + $0x9] ss:$0 sm:$0xff] }
 0x55a   : > { %v6238_v48 = vpop.eup %6237 }
 0x55b   : > { %v2457_v20 = vmul.f32 1.0614054, %v6238_v48 }
 0x55d   : > { %v2459_v52 = vadd.f32 -1.4531521, %v2457_v20 }
 0x55e   : > { %v6240_v8 = vpop.eup %6239 }
 0x55f   : > { %v2461_v0 = vmul.f32 %v6238_v48, %v2459_v52  ;;  %v2458_v47 = vmul.f32 1.0614054, %v6240_v8  ;;  %v6242_v54 = vpop.eup %6241  ;;  %v7680_v52 = vld [vmem:[%s8672_s28 + $0x2] ss:$0 sm:$0xff] }
 0x560   : > { %v6244_v7 = vpop.eup %6243 }
 0x561   : > { %v2463_v3 = vadd.f32 1.4214138, %v2461_v0  ;;  %v2460_v60 = vadd.f32 -1.4531521, %v2458_v47 }
 0x563   : > { %v2465_v23 = vmul.f32 %v6238_v48, %v2463_v3  ;;  %v2462_v2 = vmul.f32 %v6240_v8, %v2460_v60  ;;  %v7689_v3 = vld [vmem:[%s8672_s28 + $0x3] ss:$0 sm:$0xff]  ;;  %v7692_v60 = vld [vmem:[%s8672_s28 + $0xa] ss:$0 sm:$0xff] }
 0x565   : > { %v2467_v34 = vadd.f32 -0.28449672, %v2465_v23  ;;  %v2464_v46 = vadd.f32 1.4214138, %v2462_v2  ;;  %v8675_v2 = vld [vmem:[#allocation71_spill] sm:$0xff] }
 0x567   : > { %v2469_v39 = vmul.f32 %v6238_v48, %v2467_v34  ;;  %v2466_v62 = vmul.f32 %v6240_v8, %v2464_v46  ;;  %v2631_v34 = vmul.f32 %v5513_v36, %v8675_v2  ;;  %v7760_v2 = vld [vmem:[%s8672_s28 + $0x27] ss:$0 sm:$0xff] }
 0x569   : > { %v2471_v17 = vadd.f32 0.2548296, %v2469_v39  ;;  %v2468_v44 = vadd.f32 -0.28449672, %v2466_v62  ;;  %v8676_v39 = vld [vmem:[#allocation72_spill] sm:$0xff] }
 0x56b   : > { %v2473_v56 = vmul.f32 %v6238_v48, %v2471_v17  ;;  %v2470_v22 = vmul.f32 %v6240_v8, %v2468_v44  ;;  %v5514_v48 = vld [vmem:[%s8672_s28 + $0x7] ss:$0 sm:$0xff]  ;;  %v8677_v17 = vld [vmem:[#allocation73_spill] sm:$0xff] }
 0x56c   : > { %v2640_v62 = vmul.f32 %v5514_v48, %v8676_v39  ;;  %v2703_v44 = vmul.f32 %v5520_v35, %v8677_v17 }
 0x56d   : > { %v2483_v14 = vmul.f32 %v6242_v54, %v2473_v56  ;;  %v2472_v59 = vadd.f32 0.2548296, %v2470_v22  ;;  %v8678_v56 = vld [vmem:[#allocation74_spill] sm:$0xff]  ;;  %v8679_v54 = vld [vmem:[#allocation75_spill] sm:$0xff] }
 0x56e   : > { %v2712_v22 = vmul.f32 %v5521_v33, %v8678_v56 }
 0x56f   : > { %v2485_v5 = vsub.f32 1.0, %v2483_v14  ;;  %v2474_v61 = vmul.f32 %v6240_v8, %v2472_v59  ;;  %v8673_v8 = vld [vmem:[#allocation79_spill] sm:$0xff]  ;;  %v2775_v14 = vmul.f32 %v7680_v52, %v8679_v54  ;;  %v8680_v59 = vld [vmem:[#allocation76_spill] sm:$0xff] }
 0x571   : > { %v2489_v30 = vsub.f32 0.0, %v2485_v5  ;;  %v2484_v28 = vmul.f32 %v6244_v7, %v2474_v61  ;;  %v8681_v61 = vld [vmem:[#allocation78_spill] sm:$0xff] }
 0x572   : > { %v2847_v7 = vmul.f32 %v7689_v3, %v8681_v61 }
 0x573   : > { %v2491_v24 = vsel %vm2487_vm1, %v2485_v5, %v2489_v30  ;;  %v2486_v57 = vsub.f32 1.0, %v2484_v28  ;;  %v2784_v5 = vmul.f32 %v7686_v53, %v8680_v59  ;;  %v8682_v30 = vld [vmem:[#allocation82_spill] sm:$0xff] }
 0x574   : > { %v2493_v4 = vadd.f32 1.0, %v2491_v24  ;;  %v2856_v28 = vmul.f32 %v7692_v60, %v8682_v30  ;;  %v8683_v24 = vld [vmem:[#allocation86_spill] sm:$0xff] }
 0x575   : > { %v2490_v6 = vsub.f32 0.0, %v2486_v57 }
 0x576   : > { %v2495_v11 = vmul.f32 %v2493_v4, %v2445_v45  ;;  %v7715_v4 = vld [vmem:[%s8672_s28 + $0x5] ss:$0 sm:$0xff]  ;;  %v7723_v45 = vld [vmem:[%s8672_s28 + $0xe] ss:$0 sm:$0xff] }
 0x577   : > { %v2492_v9 = vsel %vm2488_vm3, %v2486_v57, %v2490_v6  ;;  %v7712_v6 = vld [vmem:[%s8672_s28 + $0x4] ss:$0 sm:$0xff]  ;;  %8686 = vst [vmem:[#allocation97_spill] sm:$0xff] %v7715_v4 }
 0x578   : > { %v2494_v13 = vadd.f32 1.0, %v2492_v9  ;;  %8685 = vst [vmem:[#allocation120_spill] sm:$0xff] %v7712_v6  ;;  %v7718_v9 = vld [vmem:[%s8672_s28 + $0x6] ss:$0 sm:$0xff] }
 0x579   : > { %8687 = vst [vmem:[#allocation116_spill] sm:$0xff] %v7718_v9 }
 0x57a   : > { %v2496_v58 = vmul.f32 %v2494_v13, %v2446_v10  ;;  %v7726_v10 = vld [vmem:[%s8672_s28 + $0x2a] ss:$0 sm:$0xff]  ;;  %v7729_v13 = vld [vmem:[%s8672_s28 + $0xf] ss:$0 sm:$0xff] }
 0x57b   : > { %v7774_v17 = vmul.f32 %v7726_v10, %v8634_v49 }
 0x57c   : > { %v2514_v21 = vpack.c.bf16 %v2496_v58, %v2495_v11  ;;  %v2642_v11 = vadd.f32 %v2640_v62, %v2631_v34  ;;  %v7732_v58 = vld [vmem:[%s8672_s28 + $0x15] ss:$0 sm:$0xff]  ;;  %v7763_v34 = vld [vmem:[%s8672_s28 + $0x2e] ss:$0 sm:$0xff]  ;;  %v7770_v62 = vmul.f32 %v7718_v9, %v8680_v59  ;;  %v8690_v59 = vld [vmem:[#allocation95_spill] sm:$0xff] }
 0x57d   : > { %8688 = vst [vmem:[#allocation115_spill] sm:$0xff] %v7774_v17 }
 0x57e   : > { %5848 = vmatmul.mubr.bf16.vlgmr.msra.gmra.mxu1 %v2514_v21  ;;  %v2714_v21 = vadd.f32 %v2712_v22, %v2703_v44 }
 0x57f   : > { %5883 = vmatprep.mubr.msk.bf16.mxu1 %vm6663_vm0, %v8661_v15 }
 0x63e   : > { %v2603_v31 = vpop.f32.mrf.mxu1 }
 0x63f   : > { %v2604_v41 = vadd.f32 %v5503_v18, %v2603_v31  ;;  %v7738_v31 = vld [vmem:[%s8672_s28 + $0x2b] ss:$0 sm:$0xff] }
 0x640   : > { %v5849_v42 = vpop.f32.mrf.mxu1  ;;  %v7784_v54 = vmul.f32 %v7738_v31, %v8653_v27 }
 0x641   : > { %v2617_v26 = vmul.f32 %v5512_v32, %v2604_v41  ;;  %v7743_v41 = vld [vmem:[%s8672_s28 + $0x2c] ss:$0 sm:$0xff]  ;;  %v7745_v42 = vadd.f32 %v2856_v28, %v2847_v7 }
 0x642   : > { %v2606_v20 = vpop.f32.mrf.mxu1 }
 0x643   : > { %v7683_v0 = vadd.f32 %v2617_v26, %v8673_v8  ;;  %v2607_v47 = vadd.f32 %v5503_v18, %v2606_v20  ;;  %v7735_v18 = vld [vmem:[%s8672_s28 + $0x16] ss:$0 sm:$0xff]  ;;  %v7748_v26 = vld [vmem:[%s8672_s28 + $0x26] ss:$0 sm:$0xff]  ;;  %v7751_v20 = vld [vmem:[%s8672_s28 + $0x10] ss:$0 sm:$0xff] }
 0x644   : > { %v5850_v23 = vpop.f32.mrf.mxu1  ;;  %v7754_v8 = vld [vmem:[%s8672_s28 + $0x2d] ss:$0 sm:$0xff] }
 0x645   : > { %8674 = vst [vmem:[#allocation112_spill] sm:$0xff] %v7683_v0  ;;  %2622 = vst.msk [vmem:[#allocation2 + $0xf] sm:$0xff] %vm1692_vm2, %v7683_v0  ;;  %v2618_v46 = vmul.f32 %v5512_v32, %v2607_v47  ;;  %v7740_v32 = vadd.f32 %v2784_v5, %v2775_v14  ;;  %v6283_v47 = vld [vmem:[#allocation2 + $0x4] sm:$0xff]  ;;  %v7788_v14 = vmul.f32 %v7743_v41, %v8659_v38  ;;  %v5530_v0 = vld [vmem:[%s8672_s28 + $0x17] ss:$0 sm:$0xff] }
 0x646   : > { %v7757_v23 = vmul.f32 %v6283_v47, %v7712_v6  ;;  %v7792_v5 = vmul.f32 %v7748_v26, %v8690_v59  ;;  %v7796_v61 = vmul.f32 %v7754_v8, %v7580_v55  ;;  %v7815_v55 = vmul.f32 %v7763_v34, %v7591_v43  ;;  %v7821_v47 = vld [vmem:[%s8672_s28 + $0x1c] ss:$0 sm:$0xff] }
 0x647   : > { %v7709_v57 = vadd.f32 %v2618_v46, %v8683_v24  ;;  %v6284_v46 = vld [vmem:[#allocation2 + $0x5] sm:$0xff]  ;;  %8689 = vst [vmem:[#allocation98_spill] sm:$0xff] %v7788_v14  ;;  %v7811_v24 = vmul.f32 %v7760_v2, %v8634_v49 }
 0x648   : > { %v7766_v39 = vmul.f32 %v6284_v46, %v7715_v4  ;;  %8691 = vst [vmem:[#allocation119_spill] sm:$0xff] %v7792_v5  ;;  %8692 = vst [vmem:[#allocation103_spill] sm:$0xff] %v7796_v61 }
 0x649   : > { %8684 = vst [vmem:[#allocation83_spill] sm:$0xff] %v7709_v57  ;;  %2623 = vst.msk [vmem:[#allocation2 + $0x17] sm:$0xff] %vm1692_vm2, %v7709_v57 }
 0x64a   : > { %8693 = vst [vmem:[#allocation87_spill] sm:$0xff] %v7811_v24  ;;  %8694 = vst [vmem:[#allocation104_spill] sm:$0xff] %v7815_v55 }
 0x64c   : > { %v7776_v44 = vld [vmem:[#allocation2 + $0x8] sm:$0xff] }
 0x64d   : > { %v7778_v56 = vld [vmem:[#allocation2 + $0xc] sm:$0xff]  ;;  %v7799_v7 = vmul.f32 %v5513_v36, %v7776_v44  ;;  %v2650_v27 = vmul.f32 %v7723_v45, %v7776_v44 }
 0x64e   : > { %v7780_v22 = vld [vmem:[#allocation2 + $0x9] sm:$0xff]  ;;  %v7818_v36 = vmul.f32 %v5514_v48, %v7778_v56  ;;  %v2660_v43 = vmul.f32 %v7732_v58, %v7778_v56 }
 0x64f   : > { %v7803_v30 = vld [vmem:[#allocation2 + $0xd] sm:$0xff]  ;;  %v2704_v46 = vmul.f32 %v5520_v35, %v7780_v22  ;;  %v2722_v57 = vmul.f32 %v7729_v13, %v7780_v22  ;;  %v2652_v49 = vadd.f32 %v2650_v27, %v2642_v11 }
 0x650   : > { %v7805_v38 = vld [vmem:[#allocation2 + $0xa] sm:$0xff]  ;;  %v2713_v59 = vmul.f32 %v5521_v33, %v7803_v30  ;;  %v2732_v48 = vmul.f32 %v7735_v18, %v7803_v30  ;;  %v7841_v51 = vld [vmem:[#allocation2 + $0x14] sm:$0xff]  ;;  %v7851_v9 = vld [vmem:[#allocation2 + $0x1c] sm:$0xff] }
 0x651   : > { %v7807_v28 = vld [vmem:[#allocation2 + $0xe] sm:$0xff]  ;;  %v2776_v35 = vmul.f32 %v7680_v52, %v7805_v38  ;;  %v7843_v55 = vld [vmem:[#allocation2 + $0x18] sm:$0xff]  ;;  %v2724_v11 = vadd.f32 %v2722_v57, %v2714_v21  ;;  %v2794_v61 = vmul.f32 %v7751_v20, %v7805_v38  ;;  %v2662_v24 = vadd.f32 %v2660_v43, %v2652_v49  ;;  %8695 = vst [vmem:[#allocation107_spill] sm:$0xff] %v7851_v9 }
 0x652   : > { %v7828_v15 = vld [vmem:[#allocation2 + $0xf] sm:$0xff]  ;;  %v2715_v12 = vadd.f32 %v2713_v59, %v2704_v46  ;;  %v2785_v27 = vmul.f32 %v7686_v53, %v7807_v28  ;;  %v2804_v46 = vmul.f32 %v5530_v0, %v7807_v28  ;;  %v2680_v53 = vmul.f32 %v5518_v29, %v7841_v51  ;;  %v7867_v43 = vld [vmem:[#allocation2 + $0x19] sm:$0xff] }
 0x653   : > { %v7839_v33 = vld [vmem:[#allocation2 + $0x10] sm:$0xff]  ;;  %v7860_v57 = vmul.f32 %v7692_v60, %v7828_v15  ;;  %v2690_v21 = vmul.f32 %v7726_v10, %v7843_v55  ;;  %v2734_v49 = vadd.f32 %v2732_v48, %v2724_v11  ;;  %v7872_v4 = vmul.f32 %v5518_v29, %v7851_v9  ;;  %v5531_v10 = vld [vmem:[%s8672_s28 + $0x1e] ss:$0 sm:$0xff] }
 0x654   : > { %v2670_v19 = vmul.f32 %v7821_v47, %v7839_v33  ;;  %v7853_v52 = vld [vmem:[#allocation2 + $0x11] sm:$0xff]  ;;  %v2787_v11 = vadd.f32 %v2785_v27, %v2776_v35 }
 0x655   : > { %v7855_v5 = vld [vmem:[#allocation2 + $0x15] sm:$0xff]  ;;  %8697 = vst [vmem:[#allocation108_spill] sm:$0xff] %v7860_v57  ;;  %v2723_v59 = vmul.f32 %v7729_v13, %v7853_v52  ;;  %8698 = vst [vmem:[#allocation113_spill] sm:$0xff] %v7872_v4  ;;  %v2742_v17 = vmul.f32 %v5524_v25, %v7853_v52  ;;  %v2743_v13 = vmul.f32 %v5524_v25, %v7867_v43 }
 0x656   : > { %8696 = vst [vmem:[#allocation117_spill] sm:$0xff] %v7855_v5  ;;  %v7869_v50 = vld [vmem:[#allocation2 + $0x12] sm:$0xff]  ;;  %v2672_v37 = vadd.f32 %v2670_v19, %v2662_v24  ;;  %v2733_v60 = vmul.f32 %v7735_v18, %v7855_v5  ;;  %v2752_v48 = vmul.f32 %v5525_v1, %v7855_v5  ;;  %v7882_v24 = vld [vmem:[#allocation2 + $0x1d] sm:$0xff]  ;;  %v2796_v18 = vadd.f32 %v2794_v61, %v7740_v32  ;;  %v5536_v61 = vld [vmem:[%s8672_s28 + $0x11] ss:$0 sm:$0xff] }
 0x657   : > { %v7877_v40 = vld [vmem:[#allocation2 + $0x16] sm:$0xff]  ;;  %v2725_v63 = vadd.f32 %v2723_v59, %v2715_v12  ;;  %v2744_v19 = vadd.f32 %v2742_v17, %v2734_v49  ;;  %8699 = vst [vmem:[#allocation92_spill] sm:$0xff] %v7882_v24  ;;  %v2795_v29 = vmul.f32 %v7751_v20, %v7869_v50  ;;  %v2762_v12 = vmul.f32 %v7738_v31, %v7867_v43  ;;  %v7894_v17 = vld [vmem:[#allocation2 + $0x1e] sm:$0xff]  ;;  %v7896_v32 = vld [vmem:[#allocation2 + $0xb] sm:$0xff] }
 0x658   : > { %v2682_v6 = vadd.f32 %v2680_v53, %v2672_v37  ;;  %v7887_v4 = vld [vmem:[#allocation2 + $0x1a] sm:$0xff]  ;;  %v2805_v25 = vmul.f32 %v5530_v0, %v7877_v40  ;;  %v2814_v37 = vmul.f32 %v5531_v10, %v7869_v50  ;;  %v2806_v53 = vadd.f32 %v2804_v46, %v2796_v18  ;;  %v7912_v18 = vld [vmem:[%s8672_s28 + $0xb] ss:$0 sm:$0xff] }
 0x659   : > { %v2735_v57 = vadd.f32 %v2733_v60, %v2725_v63  ;;  %v2754_v27 = vadd.f32 %v2752_v48, %v2744_v19  ;;  %v2797_v20 = vadd.f32 %v2795_v29, %v2787_v11  ;;  %v2753_v63 = vmul.f32 %v5525_v1, %v7882_v24  ;;  %v2860_v49 = vld [vmem:[#allocation2 + $0x13] sm:$0xff]  ;;  %v5538_v11 = vld [vmem:[%s8672_s28 + $0x1f] ss:$0 sm:$0xff] }
 0x65a   : > { %v2692_v35 = vadd.f32 %v2690_v21, %v2682_v6  ;;  %v2815_v31 = vmul.f32 %v5531_v10, %v7887_v4  ;;  %v2824_v0 = vmul.f32 %v5532_v16, %v7877_v40  ;;  %v5537_v60 = vld [vmem:[%s8672_s28 + $0x18] ss:$0 sm:$0xff]  ;;  %v2816_v21 = vadd.f32 %v2814_v37, %v2806_v53  ;;  %v2880_v29 = vld [vmem:[#allocation2 + $0x1b] sm:$0xff] }
 0x65b   : > { %v2745_v59 = vadd.f32 %v2743_v13, %v2735_v57  ;;  %v2764_v14 = vadd.f32 %v2762_v12, %v2754_v27  ;;  %v2807_v6 = vadd.f32 %v2805_v25, %v2797_v20  ;;  %v2825_v48 = vmul.f32 %v5532_v16, %v7894_v17  ;;  %v2870_v46 = vld [vmem:[#allocation2 + $0x17] sm:$0xff]  ;;  %v7918_v27 = vld [vmem:[%s8672_s28 + $0x12] ss:$0 sm:$0xff] }
 0x65c   : > { %v8700_v19 = vld [vmem:[#allocation77_spill] sm:$0xff]  ;;  %v2834_v10 = vmul.f32 %v7743_v41, %v7887_v4  ;;  %v2866_v13 = vmul.f32 %v5536_v61, %v7896_v32  ;;  %v2826_v25 = vadd.f32 %v2824_v0, %v2816_v21  ;;  %v7914_v16 = vmul.f32 %v5536_v61, %v2860_v49 }
 0x65d   : > { %v2694_v57 = vmul.f32 %v8700_v19, %v2692_v35  ;;  %v7906_v1 = vadd.f32 %v2753_v63, %v2745_v59  ;;  %v2817_v12 = vadd.f32 %v2815_v31, %v2807_v6  ;;  %v2876_v37 = vmul.f32 %v5537_v60, %v7828_v15  ;;  %v8701_v35 = vld [vmem:[#allocation80_spill] sm:$0xff]  ;;  %v7925_v63 = vld [vmem:[%s8672_s28 + $0x19] ss:$0 sm:$0xff]  ;;  %v7928_v31 = vld [vmem:[%s8672_s28 + $0x20] ss:$0 sm:$0xff] }
 0x65e   : > { %v2766_v20 = vmul.f32 %v8701_v35, %v2764_v14  ;;  %v2868_v41 = vadd.f32 %v2866_v13, %v7745_v42  ;;  %v7922_v53 = vmul.f32 %v5537_v60, %v2870_v46  ;;  %v2886_v59 = vmul.f32 %v5538_v11, %v2860_v49  ;;  %8702 = vst [vmem:[#allocation88_spill] sm:$0xff] %v7928_v31  ;;  %v7936_v6 = vld [vmem:[%s8672_s28 + $0xc] ss:$0 sm:$0xff]  ;;  %v7945_v19 = vld [vmem:[%s8672_s28 + $0x1a] ss:$0 sm:$0xff] }
 0x65f   : > { %v2836_v61 = vadd.f32 %v2834_v10, %v2826_v25  ;;  %v7930_v0 = vmul.f32 %v5538_v11, %v2880_v29  ;;  %v2896_v15 = vmul.f32 %v7748_v26, %v2870_v46  ;;  %v2922_v14 = vmul.f32 %v7912_v18, %v7776_v44  ;;  %v7942_v11 = vld [vmem:[%s8672_s28 + $0x13] ss:$0 sm:$0xff]  ;;  %8704 = vst [vmem:[#allocation109_spill] sm:$0xff] %v7945_v19  ;;  %v7948_v26 = vld [vmem:[%s8672_s28 + $0x21] ss:$0 sm:$0xff] }
 0x660   : > { %v2827_v42 = vadd.f32 %v2825_v48, %v2817_v12  ;;  %v2878_v60 = vadd.f32 %v2876_v37, %v2868_v41  ;;  %v2906_v49 = vmul.f32 %v7754_v8, %v2880_v29  ;;  %v2931_v21 = vmul.f32 %v7918_v27, %v7778_v56  ;;  %8703 = vst [vmem:[#allocation124_spill] sm:$0xff] %v7942_v11  ;;  %v8706_v46 = vld [vmem:[#allocation84_spill] sm:$0xff]  ;;  %v7957_v13 = vld [vmem:[%s8672_s28 + $0x28] ss:$0 sm:$0xff]  ;;  %v7972_v41 = vld [vmem:[%s8672_s28 + $0x14] ss:$0 sm:$0xff] }
 0x661   : > { %8705 = vst [vmem:[#allocation122_spill] sm:$0xff] %v7948_v26  ;;  %v2838_v44 = vmul.f32 %v8706_v46, %v2836_v61  ;;  %v2924_v10 = vadd.f32 %v2922_v14, %v7757_v23  ;;  %v2940_v48 = vmul.f32 %v7925_v63, %v7839_v33  ;;  %v2949_v8 = vmul.f32 %v7928_v31, %v7841_v51  ;;  %v7960_v29 = vld [vmem:[%s8672_s28 + $0xd] ss:$0 sm:$0xff]  ;;  %v7969_v35 = vld [vmem:[%s8672_s28 + $0x2f] ss:$0 sm:$0xff] }
 0x662   : > { %v2888_v12 = vadd.f32 %v2886_v59, %v2878_v60  ;;  %v2958_v25 = vmul.f32 %v7760_v2, %v7843_v55  ;;  %v2968_v37 = vmul.f32 %v7763_v34, %v7851_v9  ;;  %v2986_v23 = vmul.f32 %v7936_v6, %v7780_v22  ;;  %8707 = vst [vmem:[#allocation125_spill] sm:$0xff] %v7969_v35  ;;  %v7975_v61 = vld [vmem:[%s8672_s28 + $0x1b] ss:$0 sm:$0xff]  ;;  %v7984_v60 = vld [vmem:[%s8672_s28 + $0x22] ss:$0 sm:$0xff] }
 0x663   : > { %8708 = vst [vmem:[#allocation110_spill] sm:$0xff] %v7972_v41  ;;  %8709 = vst [vmem:[#allocation121_spill] sm:$0xff] %v7975_v61  ;;  %v2933_v14 = vadd.f32 %v2931_v21, %v2924_v10  ;;  %v2995_v59 = vmul.f32 %v7942_v11, %v7803_v30  ;;  %v3004_v2 = vmul.f32 %v7945_v19, %v7853_v52  ;;  %v7987_v22 = vld [vmem:[%s8672_s28 + $0x29] ss:$0 sm:$0xff] }
 0x664   : > { %v3013_v34 = vmul.f32 %v7948_v26, %v7855_v5  ;;  %8710 = vst [vmem:[#allocation89_spill] sm:$0xff] %v7987_v22  ;;  %v2898_v46 = vadd.f32 %v2896_v15, %v2888_v12  ;;  %v2988_v31 = vadd.f32 %v2986_v23, %v7766_v39  ;;  %v3022_v9 = vmul.f32 %v7957_v13, %v7867_v43  ;;  %v8001_v5 = vld [vmem:[%s8672_s28 + $0x30] ss:$0 sm:$0xff] }
 0x665   : > { %v3050_v21 = vmul.f32 %v7960_v29, %v7805_v38  ;;  %v2942_v10 = vadd.f32 %v2940_v48, %v2933_v14  ;;  %v3032_v19 = vmul.f32 %v7969_v35, %v7882_v24  ;;  %v3059_v26 = vmul.f32 %v7972_v41, %v7807_v28 }
 0x666   : > { %v3068_v11 = vmul.f32 %v7975_v61, %v7869_v50  ;;  %v2997_v15 = vadd.f32 %v2995_v59, %v2988_v31  ;;  %v3077_v12 = vmul.f32 %v7984_v60, %v7877_v40  ;;  %v3086_v38 = vmul.f32 %v7987_v22, %v7887_v4 }
 0x667   : > { %v3052_v39 = vadd.f32 %v3050_v21, %v7770_v62  ;;  %v2951_v48 = vadd.f32 %v2949_v8, %v2942_v10  ;;  %v3102_v23 = vadd.f32 %v2766_v20, %v2694_v57  ;;  %v2643_v14 = vadd.f32 %v7818_v36, %v7799_v7 }
 0x668   : > { %v2651_v35 = vmul.f32 %v7723_v45, %v7839_v33  ;;  %v2908_v61 = vadd.f32 %v2906_v49, %v2898_v46  ;;  %v3006_v41 = vadd.f32 %v3004_v2, %v2997_v15  ;;  %v3096_v62 = vmul.f32 %v8001_v5, %v7894_v17  ;;  %v8712_v46 = vld [vmem:[#allocation108_spill] sm:$0xff] }
 0x669   : > { %v3061_v24 = vadd.f32 %v3059_v26, %v3052_v39  ;;  %v2960_v31 = vadd.f32 %v2958_v25, %v2951_v48  ;;  %v3104_v59 = vadd.f32 %v3102_v23, %v2838_v44  ;;  %v2661_v22 = vmul.f32 %v7732_v58, %v7841_v51  ;;  %v8718_v39 = vld [vmem:[#allocation90_spill] sm:$0xff] }
 0x66a   : > { %v2653_v21 = vadd.f32 %v2651_v35, %v2643_v14  ;;  %v3015_v8 = vadd.f32 %v3013_v34, %v3006_v41  ;;  %v2765_v7 = vadd.f32 %v7784_v54, %v7906_v1  ;;  %v2848_v45 = vmul.f32 %v7689_v3, %v7896_v32  ;;  %v8711_v35 = vld [vmem:[#allocation98_spill] sm:$0xff]  ;;  %v8713_v41 = vld [vmem:[#allocation85_spill] sm:$0xff]  ;;  %v8714_v54 = vld [vmem:[#allocation120_spill] sm:$0xff] }
 0x66b   : > { %v3070_v57 = vadd.f32 %v3068_v11, %v3061_v24  ;;  %v2970_v36 = vadd.f32 %v2968_v37, %v2960_v31  ;;  %v3106_v20 = vadd.f32 %v3104_v59, %v2908_v61  ;;  %v2671_v26 = vmul.f32 %v7821_v47, %v7843_v55  ;;  %v8715_v61 = vld [vmem:[#allocation100_spill] sm:$0xff]  ;;  %v8721_v31 = vld [vmem:[#allocation91_spill] sm:$0xff] }
 0x66c   : > { %v2663_v49 = vadd.f32 %v2661_v22, %v2653_v21  ;;  %v3024_v25 = vadd.f32 %v3022_v9, %v3015_v8  ;;  %v2837_v2 = vadd.f32 %v8711_v35, %v2827_v42  ;;  %v2859_v58 = vadd.f32 %v8712_v46, %v2848_v45  ;;  %v8716_v22 = vld [vmem:[#allocation113_spill] sm:$0xff]  ;;  %v8723_v21 = vld [vmem:[#allocation88_spill] sm:$0xff]  ;;  %v5562_v8 = vld [vmem:[%s8717_s26] ss:$0 sm:$0xff]  ;;  %s8756_s26 = sld [smem:[#allocation46_spill]] }
 0x66d   : > { %v3079_v44 = vadd.f32 %v3077_v12, %v3070_v57  ;;  %v2972_v24 = vmul.f32 %v8713_v41, %v2970_v36  ;;  %v2916_v1 = vmul.f32 %v8714_v54, %v7778_v56  ;;  %v2923_v3 = vmul.f32 %v7912_v18, %v7839_v33  ;;  %v8719_v18 = vld [vmem:[#allocation115_spill] sm:$0xff]  ;;  %v8725_v45 = vld [vmem:[#allocation117_spill] sm:$0xff]  ;;  %v8726_v36 = vld [vmem:[#allocation124_spill] sm:$0xff] }
 0x66e   : > { %v2673_v11 = vadd.f32 %v2671_v26, %v2663_v49  ;;  %v3034_v32 = vadd.f32 %v3032_v19, %v3024_v25  ;;  %v2767_v34 = vmul.f32 %v8715_v61, %v2765_v7  ;;  %v2869_v9 = vadd.f32 %v7914_v16, %v2859_v58  ;;  %v8720_v16 = vld [vmem:[#allocation97_spill] sm:$0xff]  ;;  %v8724_v57 = vld [vmem:[#allocation99_spill] sm:$0xff]  ;;  %v8729_v46 = vld [vmem:[#allocation116_spill] sm:$0xff] }
 0x66f   : > { %v3088_v37 = vadd.f32 %v3086_v38, %v3079_v44  ;;  %v3108_v47 = vadd.f32 %v3106_v20, %v2972_v24  ;;  %v2925_v10 = vadd.f32 %v2923_v3, %v2916_v1  ;;  %v2932_v15 = vmul.f32 %v7918_v27, %v7841_v51  ;;  %v8727_v49 = vld [vmem:[#allocation119_spill] sm:$0xff]  ;;  %v8731_v1 = vld [vmem:[#allocation92_spill] sm:$0xff]  ;;  %v8732_v3 = vld [vmem:[#allocation122_spill] sm:$0xff] }
 0x670   : > { %v2683_v42 = vadd.f32 %v8716_v22, %v2673_v11  ;;  %v3036_v12 = vmul.f32 %v8718_v39, %v3034_v32  ;;  %v2879_v48 = vadd.f32 %v7922_v53, %v2869_v9  ;;  %v2941_v33 = vmul.f32 %v7925_v63, %v7843_v55  ;;  %v6285_v25 = vld [vmem:[#allocation2 + $0x21] sm:$0xff]  ;;  %v8730_v11 = vld [vmem:[#allocation101_spill] sm:$0xff] }
 0x671   : > { %v3098_v56 = vadd.f32 %v3096_v62, %v3088_v37  ;;  %v2934_v38 = vadd.f32 %v2932_v15, %v2925_v10  ;;  %v2980_v23 = vmul.f32 %v8720_v16, %v7803_v30  ;;  %v2987_v14 = vmul.f32 %v7936_v6, %v7853_v52  ;;  %v8722_v62 = vld [vmem:[#allocation107_spill] sm:$0xff]  ;;  %v8728_v52 = vld [vmem:[#allocation109_spill] sm:$0xff]  ;;  %v8733_v37 = vld [vmem:[#allocation110_spill] sm:$0xff] }
 0x672   : > { %v2693_v19 = vadd.f32 %v8719_v18, %v2683_v42  ;;  %v3110_v51 = vadd.f32 %v3108_v47, %v3036_v12  ;;  %v2889_v27 = vadd.f32 %v7930_v0, %v2879_v48  ;;  %v2950_v53 = vmul.f32 %v8723_v21, %v8722_v62  ;;  %v8734_v61 = vld [vmem:[#allocation87_spill] sm:$0xff]  ;;  %v8736_v15 = vld [vmem:[#allocation114_spill] sm:$0xff]  ;;  %v8739_v12 = vld [vmem:[#allocation104_spill] sm:$0xff] }
 0x673   : > { %v3100_v59 = vmul.f32 %v8721_v31, %v3098_v56  ;;  %v2943_v63 = vadd.f32 %v2941_v33, %v2934_v38  ;;  %v2989_v7 = vadd.f32 %v2987_v14, %v2980_v23  ;;  %v2996_v20 = vmul.f32 %v8726_v36, %v8725_v45  ;;  %v8741_v16 = vld [vmem:[#allocation105_spill] sm:$0xff] }
 0x674   : > { %v2695_v55 = vmul.f32 %v8724_v57, %v2693_v19  ;;  %v2899_v26 = vadd.f32 %v8727_v49, %v2889_v27  ;;  %v3005_v6 = vmul.f32 %v8728_v52, %v7867_v43  ;;  %v3023_v0 = vmul.f32 %v6285_v25, %v7957_v13  ;;  %v8740_v19 = vld [vmem:[#allocation89_spill] sm:$0xff] }
 0x675   : > { %v3112_v30 = vadd.f32 %v3110_v51, %v3100_v59  ;;  %v2952_v44 = vadd.f32 %v2950_v53, %v2943_v63  ;;  %v2998_v35 = vadd.f32 %v2996_v20, %v2989_v7  ;;  %v3044_v58 = vmul.f32 %v8729_v46, %v7807_v28  ;;  %v8735_v28 = vld [vmem:[#allocation103_spill] sm:$0xff] }
 0x676   : > { %v3051_v41 = vmul.f32 %v7960_v29, %v7869_v50  ;;  %v2839_v54 = vmul.f32 %v8730_v11, %v2837_v2  ;;  %v3014_v32 = vmul.f32 %v8732_v3, %v8731_v1  ;;  %v3060_v43 = vmul.f32 %v8733_v37, %v7877_v40  ;;  %v8737_v50 = vld [vmem:[#allocation125_spill] sm:$0xff]  ;;  %v8743_v53 = vld [vmem:[#allocation111_spill] sm:$0xff] }
 0x677   : > { %v3120_v24 = vadd.f32 %v5562_v8, %v3112_v30  ;;  %v2961_v9 = vadd.f32 %v8734_v61, %v2952_v44  ;;  %v3007_v13 = vadd.f32 %v3005_v6, %v2998_v35  ;;  %v3103_v22 = vadd.f32 %v2767_v34, %v2695_v55  ;;  %v8738_v2 = vld [vmem:[#allocation121_spill] sm:$0xff]  ;;  %v6286_v34 = vld [vmem:[#allocation2 + $0x22] sm:$0xff] }
 0x678   : > { %v3053_v47 = vadd.f32 %v3051_v41, %v3044_v58  ;;  %v2909_v10 = vadd.f32 %v8735_v28, %v2899_v26  ;;  %v3033_v29 = vmul.f32 %v8737_v50, %v8736_v15  ;;  %v3069_v39 = vmul.f32 %v8738_v2, %v7887_v4  ;;  %v8742_v4 = vld [vmem:[#allocation96_spill] sm:$0xff]  ;;  %v6157_v15 = vld [vmem:[%s8750_s1 + $0x38] sm:$0xff]   ;;  %v6160_v2 = vld [vmem:[%s8750_s1 + $0x20] sm:$0xff]  }
 0x679   : > { %v3124_v42 = vsel %vm1692_vm2, %v3120_v24, 0.0  ;;  %v2971_v56 = vadd.f32 %v8739_v12, %v2961_v9  ;;  %v3016_v48 = vadd.f32 %v3014_v32, %v3007_v13  ;;  %v3105_v33 = vadd.f32 %v3103_v22, %v2839_v54  ;;  %v6155_v46 = vld [vmem:[%s8745_s15 + $0x8] sm:$0xff]   ;;  %v6158_v50 = vld [vmem:[%s8750_s1 + $0x30] sm:$0xff]   ;;  %s8757_s15 = sld [smem:[#allocation43_spill]] }
 0x67a   : > { %3125 = vadd.xlane.f32.xlu0 %v3124_v42  ;;  %v3062_v40 = vadd.f32 %v3060_v43, %v3053_v47  ;;  %v3078_v18 = vmul.f32 %v7984_v60, %v7894_v17  ;;  %v3087_v38 = vmul.f32 %v6286_v34, %v8740_v19  ;;  %v3097_v62 = vmul.f32 %v8001_v5, %v8742_v4  ;;  %v8744_v17 = vld [vmem:[#allocation81_spill] sm:$0xff]  ;;  %v5563_v43 = vld [vmem:[%s8747_s18] ss:$0 sm:$0xff]  ;;  %s8758_s18 = sld [smem:[#allocation44_spill]] }
 0x67b   : > { %v2973_v23 = vmul.f32 %v8741_v16, %v2971_v56  ;;  %v3025_v14 = vadd.f32 %v3023_v0, %v3016_v48  ;;  %v3107_v59 = vadd.f32 %v3105_v33, %v2909_v10  ;;  %5852 = vmatpush3.bf16.msra.mxu0 %v6155_v46  ;;  %v8748_v58 = vmov 0.0   ;;  %v5564_v47 = vld [vmem:[%s8749_s4] ss:$0 sm:$0xff]  ;;  %v6162_v12 = vld [vmem:[%s8750_s1 + $0x10] sm:$0xff]   ;;  %v6163_v56 = vld [vmem:[%s8750_s1 + $0x8] sm:$0xff]   ;;  %s8759_s4 = sld [smem:[#allocation45_spill]] }
 0x67c   : > { %v3071_v31 = vadd.f32 %v3069_v39, %v3062_v40  ;;  %5853 = vmatprep.subr.bf16.mxu0 %v8748_v58  ;;  %v6161_v39 = vld [vmem:[%s8750_s1 + $0x18] sm:$0xff]   ;;  %v6164_v48 = vld [vmem:[%s8750_s1] sm:$0xff]   ;;  %1701 = vst.msk [vmem:[#allocation3 + $0x8] sm:$0x1] %vm1700_vm7, %v8748_v58 }
 0x67d   : > { %v3035_v51 = vadd.f32 %v3033_v29, %v3025_v14  ;;  %v3109_v21 = vadd.f32 %v3107_v59, %v2973_v23  ;;  %v6159_v29 = vld [vmem:[%s8750_s1 + $0x28] sm:$0xff]   ;;  %v5565_v40 = vld [vmem:[%s8751_s22] ss:$0 sm:$0xff]  ;;  %s8760_s22 = sld [smem:[#allocation47_spill]] }
 0x67e   : > { %v3080_v27 = vadd.f32 %v3078_v18, %v3071_v31 }
 0x67f   : > { %v3037_v57 = vmul.f32 %v8743_v53, %v3035_v51 }
 0x680   : > { %v3089_v55 = vadd.f32 %v3087_v38, %v3080_v27 }
 0x681   : > { %v3111_v7 = vadd.f32 %v3109_v21, %v3037_v57 }
 0x682   : > { %v3099_v63 = vadd.f32 %v3097_v62, %v3089_v55 }
 0x684   : > { %v3101_v60 = vmul.f32 %v8744_v17, %v3099_v63 }
 0x686   : > { %v3113_v45 = vadd.f32 %v3111_v7, %v3101_v60 }
 0x688   : > { %v3121_v36 = vadd.f32 %v5562_v8, %v3113_v45  ;;  %v6156_v8 = vld [vmem:[%s8746_s11] sm:$0xff]  }
 0x689   : > { %5854 = vmatpush3.bf16.msra.mxu0 %v6156_v8 }
 0x68a   : > { %v3127_v20 = vsel %vm1692_vm2, %v3121_v36, 0.0  ;;  %5859 = vmatprep.subr.bf16.mxu0 %v8748_v58 }
 0x68b   : > { %3128 = vadd.xlane.f32.xlu1 %v3127_v20 }
 0x703   : > { %v3126_v30 = vpop.xlane.xlu0 %3125 }
 0x704   : > { %v3130_v49 = vmul.f32 0.03125, %v3126_v30 }
 0x706   : > { %v3132_v26 = vsub.f32 %v3120_v24, %v3130_v49 }
 0x708   : > { %v3134_v52 = vmul.f32 %v3132_v26, %v3132_v26 }
 0x70a   : > { %v3136_v5 = vsel %vm1692_vm2, %v3134_v52, 0.0 }
 0x70b   : > { %3137 = vadd.xlane.f32.xlu0 %v3136_v5 }
 0x714   : > { %v3129_v6 = vpop.xlane.xlu1 %3128 }
 0x715   : > { %v3131_v25 = vmul.f32 0.03125, %v3129_v6 }
 0x717   : > { %v3133_v0 = vsub.f32 %v3121_v36, %v3131_v25 }
 0x719   : > { %v3135_v44 = vmul.f32 %v3133_v0, %v3133_v0 }
 0x71b   : > { %v3139_v35 = vsel %vm1692_vm2, %v3135_v44, 0.0 }
 0x71c   : > { %3140 = vadd.xlane.f32.xlu1 %v3139_v35 }
 0x794   : > { %v3138_v41 = vpop.xlane.xlu0 %3137 }
 0x795   : > { %v3142_v24 = vmul.f32 0.03125, %v3138_v41 }
 0x797   : > { %v3144_v11 = vadd.f32 1e-06, %v3142_v24 }
 0x799   : > { %6245 = vrsqrt.f32 %v3144_v11 }
 0x7a5   : > { %v3141_v54 = vpop.xlane.xlu1 %3140 }
 0x7a6   : > { %v3143_v1 = vmul.f32 0.03125, %v3141_v54  ;;  %v6246_v32 = vpop.eup %6245 }
 0x7a7   : > { %v3148_v37 = vmul.f32 %v6246_v32, %v3132_v26 }
 0x7a8   : > { %v3145_v3 = vadd.f32 1e-06, %v3143_v1 }
 0x7a9   : > { %v3156_v13 = vmul.f32 %v5563_v43, %v3148_v37 }
 0x7aa   : > { %6247 = vrsqrt.f32 %v3145_v3 }
 0x7ab   : > { %v3164_v42 = vadd.f32 %v5564_v47, %v3156_v13 }
 0x7b7   : > { %v6248_v61 = vpop.eup %6247 }
 0x7b8   : > { %v3149_v9 = vmul.f32 %v6248_v61, %v3133_v0 }
 0x7ba   : > { %v3157_v22 = vmul.f32 %v5563_v43, %v3149_v9 }
 0x7bc   : > { %v3165_v28 = vadd.f32 %v5564_v47, %v3157_v22 }
 0x7be   : > { %v3171_v10 = vpack.c.bf16 %v3165_v28, %v3164_v42 }
 0x7c0   : > { %5856 = vmatmul.mubr.msk.bf16.vlgmr.msra.gmra.mxu0 %vm1692_vm2, %v3171_v10 }
 0x7c1   : > { %5875 = vmatprep.mubr.msk.bf16.mxu0 %vm6663_vm0, %v8748_v58  ;;  %5860 = vmatpush3.bf16.msra.mxu0 %v6157_v15 }
 0x7c2   : > { %5861 = vmatprep.subr.bf16.mxu0 %v8748_v58 }
 0x7c5   : > { %5862 = vmatpush3.bf16.msra.mxu0 %v6158_v50 }
 0x7c6   : > { %5863 = vmatprep.subr.bf16.mxu0 %v8748_v58 }
 0x7c9   : > { %5864 = vmatpush3.bf16.msra.mxu0 %v6159_v29 }
 0x7ca   : > { %5865 = vmatprep.subr.bf16.mxu0 %v8748_v58 }
 0x7cd   : > { %5866 = vmatpush3.bf16.msra.mxu0 %v6160_v2  ;;  %v5569_v2 = vld [vmem:[%s8752_s2] ss:$0 sm:$0xff]  ;;  %s8761_s2 = sld [smem:[#allocation48_spill]] }
 0x7ce   : > { %5867 = vmatprep.subr.bf16.mxu0 %v8748_v58 }
 0x7d1   : > { %5868 = vmatpush3.bf16.msra.mxu0 %v6161_v39 }
 0x7d2   : > { %5869 = vmatprep.subr.bf16.mxu0 %v8748_v58 }
 0x7d5   : > { %5870 = vmatpush3.bf16.msra.mxu0 %v6162_v12  ;;  %v5578_v12 = vld [vmem:[%s8753_s23] ss:$0 sm:$0xff]  ;;  %s8763_s23 = sld [smem:[#allocation49_spill]] }
 0x7d6   : > { %5871 = vmatprep.subr.bf16.mxu0 %v8748_v58 }
 0x7d9   : > { %5872 = vmatpush3.bf16.msra.mxu0 %v6163_v56 }
 0x7da   : > { %5873 = vmatprep.subr.bf16.mxu0 %v8748_v58 }
 0x7dd   : > { %5874 = vmatpush3.bf16.msra.mxu0 %v6164_v48 }
 0x7de   : > { %5895 = vmatprep.subr.mxu0 %v8748_v58 }
 0x880   : > { %v3227_v33 = vpop.f32.mrf.mxu0 }
 0x881   : > { %v3228_v18 = vadd.f32 %v5565_v40, %v3227_v33 }
 0x882   : > { %v5857_v34 = vpop.f32.mrf.mxu0 }
 0x883   : > { %v3236_v19 = vmul.f32 0.70710677, %v3228_v18  ;;  %v3234_v42 = vmul.f32 0.5, %v3228_v18 }
 0x884   : > { %v3230_v38 = vpop.f32.mrf.mxu0 }
 0x885   : > { %v3238_v16 = vand.u32 2147483647, %v3236_v19  ;;  %v3231_v23 = vadd.f32 %v5565_v40, %v3230_v38  ;;  %vm3276_vm4 = vcmp.ge.f32.partialorder %v3236_v19, 0.0  ;;  %v8754_v19 = vld [vmem:[#allocation112_spill] sm:$0xff] }
 0x886   : > { %v5858_v14 = vpop.f32.mrf.mxu0 }
 0x887   : > { %v3240_v31 = vmul.f32 0.3275911, %v3238_v16  ;;  %v3237_v59 = vmul.f32 0.70710677, %v3231_v23  ;;  %v3264_v21 = vsub.f32 0.0, %v3238_v16  ;;  %v3235_v28 = vmul.f32 0.5, %v3231_v23 }
 0x888   : > { %v8755_v14 = vld [vmem:[#allocation83_spill] sm:$0xff] }
 0x889   : > { %v3242_v51 = vadd.f32 1.0, %v3240_v31  ;;  %v3239_v27 = vand.u32 2147483647, %v3237_v59  ;;  %v3266_v53 = vmul.f32 %v3264_v21, %v3238_v16  ;;  %vm3277_vm5 = vcmp.ge.f32.partialorder %v3237_v59, 0.0 }
 0x88b   : > { %6249 = vrcp.f32 %v3242_v51  ;;  %v3241_v4 = vmul.f32 0.3275911, %v3239_v27  ;;  %v3265_v57 = vsub.f32 0.0, %v3239_v27  ;;  %v3268_v7 = vmul.f32 1.442695, %v3266_v53 }
 0x88d   : > { %v3243_v62 = vadd.f32 1.0, %v3241_v4  ;;  %v3267_v17 = vmul.f32 %v3265_v57, %v3239_v27 }
 0x88f   : > { %6251 = vrcp.f32 %v3243_v62  ;;  %v3270_v30 = vmul.f32 1.442695, %v3267_v17  ;;  %v6165_v17 = vld [vmem:[%s8756_s26 + $0x8] sm:$0xff]  }
 0x890   : > { %6253 = vpow2.f32 %v3268_v7  ;;  %5880 = vmatpush3.bf16.msra.mxu1 %v6165_v17 }
 0x891   : > { %6255 = vpow2.f32 %v3270_v30  ;;  %5881 = vmatprep.subr.bf16.mxu1 %v8748_v58 }
 0x898   : > { %v6250_v55 = vpop.eup %6249 }
 0x899   : > { %v3246_v63 = vmul.f32 1.0614054, %v6250_v55 }
 0x89b   : > { %v3248_v60 = vadd.f32 -1.4531521, %v3246_v63 }
 0x89c   : > { %v6252_v45 = vpop.eup %6251 }
 0x89d   : > { %v3250_v36 = vmul.f32 %v6250_v55, %v3248_v60  ;;  %v3247_v20 = vmul.f32 1.0614054, %v6252_v45  ;;  %v6254_v24 = vpop.eup %6253  ;;  %v6166_v60 = vld [vmem:[%s8756_s26] sm:$0xff]  }
 0x89e   : > { %v6256_v32 = vpop.eup %6255  ;;  %5882 = vmatpush3.bf16.msra.mxu1 %v6166_v60 }
 0x89f   : > { %v3252_v49 = vadd.f32 1.4214138, %v3250_v36  ;;  %v3249_v26 = vadd.f32 -1.4531521, %v3247_v20  ;;  %5887 = vmatprep.subr.bf16.mxu1 %v8748_v58 }
 0x8a1   : > { %v3254_v52 = vmul.f32 %v6250_v55, %v3252_v49  ;;  %v3251_v5 = vmul.f32 %v6252_v45, %v3249_v26 }
 0x8a3   : > { %v3256_v6 = vadd.f32 -0.28449672, %v3254_v52  ;;  %v3253_v25 = vadd.f32 1.4214138, %v3251_v5 }
 0x8a5   : > { %v3258_v0 = vmul.f32 %v6250_v55, %v3256_v6  ;;  %v3255_v44 = vmul.f32 %v6252_v45, %v3253_v25  ;;  %v5579_v6 = vld [vmem:[%s8757_s15] ss:$0 sm:$0xff]  ;;  %s8764_s15 = sld [smem:[#allocation52_spill]] }
 0x8a7   : > { %v3260_v35 = vadd.f32 0.2548296, %v3258_v0  ;;  %v3257_v46 = vadd.f32 -0.28449672, %v3255_v44 }
 0x8a9   : > { %v3262_v8 = vmul.f32 %v6250_v55, %v3260_v35  ;;  %v3259_v41 = vmul.f32 %v6252_v45, %v3257_v46  ;;  %v5580_v35 = vld [vmem:[%s8758_s18] ss:$0 sm:$0xff]  ;;  %s8766_s18 = sld [smem:[#allocation50_spill]] }
 0x8ab   : > { %v3272_v11 = vmul.f32 %v6254_v24, %v3262_v8  ;;  %v3261_v54 = vadd.f32 0.2548296, %v3259_v41  ;;  %v6167_v24 = vld [vmem:[%s8756_s26 + $0x18] sm:$0xff]   ;;  %s8765_s1 = smov %s8764_s15 }
 0x8ad   : > { %v3274_v1 = vsub.f32 1.0, %v3272_v11  ;;  %v3263_v3 = vmul.f32 %v6252_v45, %v3261_v54  ;;  %v6168_v54 = vld [vmem:[%s8756_s26 + $0x10] sm:$0xff]  }
 0x8af   : > { %v3278_v37 = vsub.f32 0.0, %v3274_v1  ;;  %v3273_v43 = vmul.f32 %v6256_v32, %v3263_v3  ;;  %v6170_v3 = vld [vmem:[%s8756_s26 + $0x20] sm:$0xff]   ;;  %v6171_v32 = vld [vmem:[%s8756_s26 + $0x38] sm:$0xff]  }
 0x8b1   : > { %v3280_v61 = vsel %vm3276_vm4, %v3274_v1, %v3278_v37  ;;  %v3275_v9 = vsub.f32 1.0, %v3273_v43  ;;  %v6169_v1 = vld [vmem:[%s8756_s26 + $0x28] sm:$0xff]   ;;  %v6172_v37 = vld [vmem:[%s8756_s26 + $0x30] sm:$0xff]  }
 0x8b2   : > { %v3282_v47 = vadd.f32 1.0, %v3280_v61 }
 0x8b3   : > { %v3279_v13 = vsub.f32 0.0, %v3275_v9 }
 0x8b4   : > { %v3284_v15 = vmul.f32 %v3282_v47, %v3234_v42 }
 0x8b5   : > { %v3281_v22 = vsel %vm3277_vm5, %v3275_v9, %v3279_v13 }
 0x8b6   : > { %v3283_v10 = vadd.f32 1.0, %v3281_v22 }
 0x8b8   : > { %v3285_v50 = vmul.f32 %v3283_v10, %v3235_v28  ;;  %v5587_v28 = vld [vmem:[%s8759_s4 + $0x4] sm:$0xf] }
 0x8ba   : > { %v3303_v29 = vpack.c.bf16 %v3285_v50, %v3284_v15  ;;  %v3515_v50 = vld [vmem:[%s8759_s4] sm:$0xf] }
 0x8bc   : > { %5876 = vmatmul.mubr.bf16.vlgmr.msra.gmra.mxu0 %v3303_v29 }
 0x8bd   : > { %5899 = vmatprep.mubr.msk.f32.mxu0 %vm6663_vm0, %v8748_v58 }
 0x97c   : > { %v3392_v39 = vpop.f32.mrf.mxu0 }
 0x97d   : > { %v3393_v56 = vadd.f32 %v5569_v2, %v3392_v39  ;;  %v5593_v39 = vld [vmem:[%s8759_s4 + $0x8] sm:$0xf] }
 0x97e   : > { %v5877_v48 = vpop.f32.mrf.mxu0 }
 0x97f   : > { %v3406_v40 = vmul.f32 %v5578_v12, %v3393_v56 }
 0x980   : > { %v3395_v33 = vpop.f32.mrf.mxu0 }
 0x981   : > { %v3396_v34 = vadd.f32 %v5569_v2, %v3395_v33  ;;  %v3408_v38 = vadd.f32 %v3406_v40, %v8754_v19  ;;  %v5598_v33 = vld [vmem:[%s8759_s4 + $0xc] sm:$0xf] }
 0x982   : > { %v5878_v18 = vpop.f32.mrf.mxu0 }
 0x983   : > { %v3407_v16 = vmul.f32 %v5578_v12, %v3396_v34  ;;  %v3412_v23 = vsel %vm1692_vm2, %v3408_v38, 0.0 }
 0x984   : > { %3413 = vadd.xlane.f32.xlu0 %v3412_v23 }
 0x985   : > { %v3409_v31 = vadd.f32 %v3407_v16, %v8755_v14 }
 0x987   : > { %v3415_v59 = vsel %vm1692_vm2, %v3409_v31, 0.0 }
 0x988   : > { %3416 = vadd.xlane.f32.xlu1 %v3415_v59 }
 0xa0d   : > { %v3414_v51 = vpop.xlane.xlu0 %3413 }
 0xa0e   : > { %v3418_v27 = vmul.f32 0.03125, %v3414_v51 }
 0xa10   : > { %v3420_v4 = vsub.f32 %v3408_v38, %v3418_v27  ;;  %v5600_v27 = vld [vmem:[%s8760_s22] ss:$0 sm:$0xff]  ;;  %s8767_s22 = sld [smem:[#allocation51_spill]] }
 0xa11   : > { %v3417_v62 = vpop.xlane.xlu1 %3416 }
 0xa12   : > { %v3419_v21 = vmul.f32 0.03125, %v3417_v62  ;;  %v3422_v53 = vmul.f32 %v3420_v4, %v3420_v4 }
 0xa14   : > { %v3421_v57 = vsub.f32 %v3409_v31, %v3419_v21  ;;  %v3424_v55 = vsel %vm1692_vm2, %v3422_v53, 0.0  ;;  %v8762_v53 = vld [vmem:[#allocation70_spill] sm:$0xff] }
 0xa15   : > { %3425 = vadd.xlane.f32.xlu0 %v3424_v55  ;;  %v5601_v55 = vld [vmem:[%s8761_s2 + $0x2] ss:$0 sm:$0xff] }
 0xa16   : > { %v3423_v63 = vmul.f32 %v3421_v57, %v3421_v57 }
 0xa18   : > { %v3427_v7 = vsel %vm1692_vm2, %v3423_v63, 0.0  ;;  %v5602_v63 = vld [vmem:[%s8761_s2 + $0x9] ss:$0 sm:$0xff] }
 0xa19   : > { %3428 = vadd.xlane.f32.xlu1 %v3427_v7 }
 0xa9e   : > { %v3426_v45 = vpop.xlane.xlu0 %3425 }
 0xa9f   : > { %v3430_v36 = vmul.f32 0.03125, %v3426_v45  ;;  %v5608_v45 = vld [vmem:[%s8761_s2 + $0x3] ss:$0 sm:$0xff] }
 0xaa1   : > { %v3432_v20 = vadd.f32 1e-06, %v3430_v36 }
 0xaa2   : > { %v3429_v30 = vpop.xlane.xlu1 %3428 }
 0xaa3   : > { %6257 = vrsqrt.f32 %v3432_v20  ;;  %v3431_v49 = vmul.f32 0.03125, %v3429_v30  ;;  %v5609_v20 = vld [vmem:[%s8761_s2 + $0xa] ss:$0 sm:$0xff] }
 0xaa5   : > { %v3433_v26 = vadd.f32 1e-06, %v3431_v49 }
 0xaa7   : > { %6259 = vrsqrt.f32 %v3433_v26 }
 0xab0   : > { %v6258_v52 = vpop.eup %6257 }
 0xab1   : > { %v3436_v5 = vmul.f32 %v6258_v52, %v3420_v4 }
 0xab3   : > { %v3444_v44 = vmul.f32 %v5579_v6, %v3436_v5 }
 0xab4   : > { %v6260_v25 = vpop.eup %6259 }
 0xab5   : > { %v3437_v0 = vmul.f32 %v6260_v25, %v3421_v57  ;;  %v3452_v8 = vadd.f32 %v5580_v35, %v3444_v44  ;;  %v1679_v57 = vand.u32 1, %v8762_v53  ;;  %v5604_v44 = vld [vmem:[%s8761_s2 + $0x17] ss:$0 sm:$0xff] }
 0xab7   : > { %v3445_v46 = vmul.f32 %v5579_v6, %v3437_v0  ;;  %v8182_v30 = vadd.s32 4294967295, %v1679_v57  ;;  %v5615_v6 = vld [vmem:[%s8761_s2 + $0x4] ss:$0 sm:$0xff]  ;;  %v8185_v25 = vadd.s32 1, %v1679_v57  ;;  %v5603_v0 = vld [vmem:[%s8761_s2 + $0x10] ss:$0 sm:$0xff] }
 0xab9   : > { %v3453_v41 = vadd.f32 %v5580_v35, %v3445_v46  ;;  %v5616_v35 = vld [vmem:[%s8761_s2 + $0xb] ss:$0 sm:$0xff]  ;;  %vm1681_vm9 = vcmp.ge.s32.totalorder %v8182_v30, 0  ;;  %vm1688_vm10 = vcmp.lt.s32.totalorder %v8185_v25, 2 }
 0xabb   : > { %v3454_v11 = vpack.c.bf16 %v3453_v41, %v3452_v8  ;;  %v5607_v41 = vld [vmem:[%s8761_s2 + $0x2c] ss:$0 sm:$0xff] }
 0xabd   : > { %5884 = vmatmul.mubr.msk.bf16.vlgmr.msra.gmra.mxu1 %vm1692_vm2, %v3454_v11 }
 0xabe   : > { %5888 = vmatpush3.bf16.msra.mxu1 %v6167_v24  ;;  %5891 = vmatprep.mubr.msk.bf16.mxu1 %vm6663_vm0, %v8748_v58  ;;  %v5610_v24 = vld [vmem:[%s8761_s2 + $0x11] ss:$0 sm:$0xff] }
 0xabf   : > { %5889 = vmatprep.subr.bf16.mxu1 %v8748_v58 }
 0xac2   : > { %5890 = vmatpush3.bf16.msra.mxu1 %v6168_v54 }
 0xac3   : > { %5909 = vmatprep.subr.bf16.mxu1 %v8748_v58 }
 0xac5   : > { %5892 = vmatmul.mubr.msk.bf16.vlgmr.msra.gmra.mxu1 %vm1692_vm2, %v3454_v11 }
 0xac6   : > { %5910 = vmatpush3.bf16.msra.mxu1 %v6169_v1  ;;  %5913 = vmatprep.mubr.msk.bf16.mxu1 %vm6663_vm0, %v8748_v58 }
 0xac7   : > { %5911 = vmatprep.subr.bf16.mxu1 %v8748_v58 }
 0xaca   : > { %5912 = vmatpush3.bf16.msra.mxu1 %v6170_v3 }
 0xacb   : > { %5924 = vmatprep.subr.bf16.mxu1 %v8748_v58 }
 0xacd   : > { %5914 = vmatmul.mubr.msk.bf16.vlgmr.msra.gmra.mxu1 %vm1692_vm2, %v3454_v11 }
 0xace   : > { %5925 = vmatpush3.bf16.msra.mxu1 %v6171_v32  ;;  %5928 = vmatprep.mubr.msk.bf16.mxu1 %vm6663_vm0, %v8748_v58  ;;  %v5605_v32 = vld [vmem:[%s8761_s2 + $0x1e] ss:$0 sm:$0xff] }
 0xacf   : > { %5926 = vmatprep.subr.bf16.mxu1 %v8748_v58 }
 0xad2   : > { %5927 = vmatpush3.bf16.msra.mxu1 %v6172_v37 }
 0xad5   : > { %5929 = vmatmul.mubr.msk.bf16.vlgmr.msra.gmra.mxu1 %vm1692_vm2, %v3454_v11  ;;  %vm1698_vm2 = vcmask 523264   ;;  %v5611_v11 = vld [vmem:[%s8761_s2 + $0x18] ss:$0 sm:$0xff] }
 0xad6   : > { %1699 = vst.msk [vmem:[#allocation3] sm:$0xff] %vm1698_vm2, %v8748_v58  ;;  %1702 = vst.msk [vmem:[#allocation3 + $0xd] sm:$0xff] %vm1698_vm2, %v8748_v58 }
 0xadd   : > { %v3999_v7 = vld [vmem:[#allocation3 + $0x2] sm:$0xf]  ;;  %v4046_v8 = vld [vmem:[#allocation3 + $0xe] sm:$0xf] }
 0xade   : > { %v4006_v17 = vld [vmem:[#allocation3 + $0x4] sm:$0xf]  ;;  %v4005_v49 = vmul.f32 %v5601_v55, %v3999_v7  ;;  %v4151_v55 = vld [vmem:[#allocation3 + $0x10] sm:$0xf] }
 0xadf   : > { %v4055_v60 = vld [vmem:[#allocation3 + $0x3] sm:$0xf]  ;;  %v4012_v26 = vmul.f32 %v5602_v63, %v4006_v17  ;;  %v4115_v54 = vmul.f32 %v5615_v6, %v4006_v17  ;;  %v5621_v63 = vld [vmem:[%s8761_s2 + $0x2e] ss:$0 sm:$0xff] }
 0xae0   : > { %v4062_v36 = vld [vmem:[#allocation3 + $0x5] sm:$0xf]  ;;  %v4061_v52 = vmul.f32 %v5608_v45, %v4055_v60 }
 0xae1   : > { %v4068_v5 = vmul.f32 %v5609_v20, %v4062_v36  ;;  %v4013_v46 = vadd.f32 %v4012_v26, %v4005_v49 }
 0xae3   : > { %v4069_v37 = vadd.f32 %v4068_v5, %v4061_v52  ;;  %v4157_v52 = vmul.f32 %v5621_v63, %v4151_v55  ;;  %v8208_v5 = vsel %vm1681_vm9, 1.0, %v8748_v58 }
 0xb7d   : > { %v3508_v43 = vpop.f32.mrf.mxu1 }
 0xb7f   : > { %v5885_v61 = vpop.f32.mrf.mxu1 }
 0xb81   : > { %v3511_v9 = vpop.f32.mrf.mxu1 }
 0xb83   : > { %v5886_v13 = vpop.f32.mrf.mxu1 }
 0xb85   : > { %v3566_v47 = vpop.f32.mrf.mxu1 }
 0xb87   : > { %v5893_v22 = vpop.f32.mrf.mxu1 }
 0xb89   : > { %v3569_v42 = vpop.f32.mrf.mxu1 }
 0xb8a   : > { %5896 = vmatpush3.msra.mxu0 %v3569_v42 }
 0xb8b   : > { %v5894_v10 = vpop.f32.mrf.mxu1  ;;  %5897 = vmatprep.subr.mxu0 %v8748_v58 }
 0xb8c   : > { %5898 = vmatpush3.msra.mxu0 %v3566_v47  ;;  %v5612_v47 = vld [vmem:[%s8761_s2 + $0x1f] ss:$0 sm:$0xff] }
 0xb8d   : > { %5900 = vmatmul.mubr.msk.f32.vlgmr.msra.gmra.mxu0 %vm3575_vm6, %v5587_v28  ;;  %5902 = vmatprep.subr.mxu0 %v8748_v58  ;;  %v3772_v15 = vpop.f32.mrf.mxu1  ;;  %v4094_v10 = vld [vmem:[#allocation3 + $0xd] sm:$0xf] }
 0xb8e   : > { %5903 = vmatpush3.msra.mxu0 %v3511_v9  ;;  %5906 = vmatprep.mubr.msk.f32.mxu0 %vm6663_vm0, %v8748_v58 }
 0xb8f   : > { %5904 = vmatprep.subr.mxu0 %v8748_v58  ;;  %v5915_v29 = vpop.f32.mrf.mxu1 }
 0xb90   : > { %5905 = vmatpush3.msra.mxu0 %v3508_v43  ;;  %v5617_v43 = vld [vmem:[%s8761_s2 + $0x12] ss:$0 sm:$0xff] }
 0xb91   : > { %5907 = vmatmul.mubr.msk.f32.vlgmr.msra.gmra.mxu0 %vm3575_vm6, %v3515_v50  ;;  %v3775_v2 = vpop.f32.mrf.mxu1  ;;  %5917 = vmatprep.subr.mxu0 %v8748_v58 }
 0xb92   : > { %5918 = vmatpush3.msra.mxu0 %v3775_v2  ;;  %5921 = vmatprep.mubr.msk.f32.mxu0 %vm6663_vm0, %v8748_v58 }
 0xb93   : > { %v5916_v12 = vpop.f32.mrf.mxu1  ;;  %5919 = vmatprep.subr.mxu0 %v8748_v58 }
 0xb94   : > { %5920 = vmatpush3.msra.mxu0 %v3772_v15  ;;  %v5618_v15 = vld [vmem:[%s8761_s2 + $0x19] ss:$0 sm:$0xff] }
 0xb95   : > { %5922 = vmatmul.mubr.msk.f32.vlgmr.msra.gmra.mxu0 %vm3575_vm6, %v5593_v39  ;;  %v3905_v56 = vpop.f32.mrf.mxu1  ;;  %5932 = vmatprep.subr.mxu0 %v8748_v58  ;;  %v5613_v39 = vld [vmem:[%s8761_s2 + $0x26] ss:$0 sm:$0xff] }
 0xb96   : > { %5936 = vmatprep.mubr.msk.f32.mxu0 %vm6663_vm0, %v8748_v58 }
 0xb97   : > { %v5930_v48 = vpop.f32.mrf.mxu1 }
 0xb98   : > { %v5620_v48 = vld [vmem:[%s8761_s2 + $0x27] ss:$0 sm:$0xff] }
 0xb99   : > { %v3908_v40 = vpop.f32.mrf.mxu1  ;;  %v4149_v57 = vmul.f32 %v5620_v48, %v4046_v8 }
 0xb9a   : > { %5933 = vmatpush3.msra.mxu0 %v3908_v40 }
 0xb9b   : > { %v5931_v34 = vpop.f32.mrf.mxu1  ;;  %5934 = vmatprep.subr.mxu0 %v8748_v58 }
 0xb9c   : > { %5935 = vmatpush3.msra.mxu0 %v3905_v56  ;;  %v4052_v34 = vmul.f32 %v5607_v41, %v4046_v8 }
 0xb9d   : > { %5937 = vmatmul.mubr.msk.f32.vlgmr.msra.gmra.mxu0 %vm3575_vm6, %v5598_v33  ;;  %v5606_v33 = vld [vmem:[%s8761_s2 + $0x25] ss:$0 sm:$0xff] }
 0xc4d   : > { %v3645_v19 = vpop.f32.mrf.mxu0 }
 0xc4f   : > { %v5901_v38 = vpop.f32.mrf.mxu0 }
 0xc51   : > { %v3718_v18 = vpop.f32.mrf.mxu0 }
 0xc52   : > { %v3719_v31 = vadd.f32 %v3718_v18, %v3645_v19  ;;  %v5619_v18 = vld [vmem:[%s8761_s2 + $0x20] ss:$0 sm:$0xff] }
 0xc53   : > { %v5908_v16 = vpop.f32.mrf.mxu0 }
 0xc55   : > { %v3850_v23 = vpop.f32.mrf.mxu0 }
 0xc56   : > { %v3854_v59 = vadd.f32 %v3850_v23, %v3719_v31 }
 0xc57   : > { %v5923_v14 = vpop.f32.mrf.mxu0 }
 0xc58   : > { %v4102_v14 = vld [vmem:[#allocation3 + $0xf] sm:$0xf] }
 0xc5d   : > { %v3983_v51 = vpop.f32.mrf.mxu0 }
 0xc5e   : > { %v3987_v4 = vadd.f32 %v3983_v51, %v3854_v59 }
 0xc5f   : > { %v5938_v62 = vpop.f32.mrf.mxu0 }
 0xc60   : > { %v8173_v21 = vadd.f32 %v5600_v27, %v3987_v4  ;;  %v4100_v4 = vmul.f32 %v5613_v39, %v4094_v10  ;;  %v5614_v62 = vld [vmem:[%s8761_s2 + $0x2d] ss:$0 sm:$0xff]  ;;  %v6179_v10 = vld [vmem:[%s8765_s1 + $0x10] ss:$8 sps:$4 sm:$0xff]  }
 0xc61   : > { %v4108_v49 = vmul.f32 %v5614_v62, %v4102_v14 }
 0xc62   : > { %3998 = vst.msk [vmem:[#allocation3 + $0x9] sm:$0xf] %vm3997_vm8, %v8173_v21 }
 0xc69   : > { %v4014_v1 = vld [vmem:[#allocation3 + $0x6] sm:$0xf]  ;;  %v4030_v42 = vld [vmem:[#allocation3 + $0xa] sm:$0xf] }
 0xc6a   : > { %v4022_v3 = vld [vmem:[#allocation3 + $0x8] sm:$0xf]  ;;  %v4020_v61 = vmul.f32 %v5603_v0, %v4014_v1  ;;  %v4121_v22 = vmul.f32 %v5616_v35, %v4014_v1  ;;  %v4038_v40 = vld [vmem:[#allocation3 + $0xc] sm:$0xf]  ;;  %v4036_v23 = vmul.f32 %v5605_v32, %v4030_v42  ;;  %v4135_v59 = vmul.f32 %v5618_v15, %v4030_v42  ;;  %v6184_v15 = vld [vmem:[%s8765_s1 + $0x4] ss:$8 sps:$4 sm:$0xff]  }
 0xc6b   : > { %v4070_v9 = vld [vmem:[#allocation3 + $0x7] sm:$0xf]  ;;  %v4028_v29 = vmul.f32 %v5604_v44, %v4022_v3  ;;  %v4086_v2 = vld [vmem:[#allocation3 + $0xb] sm:$0xf]  ;;  %v4128_v56 = vmul.f32 %v5617_v43, %v4022_v3  ;;  %v4044_v17 = vmul.f32 %v5606_v33, %v4038_v40  ;;  %v4142_v45 = vmul.f32 %v5619_v18, %v4038_v40  ;;  %v5624_v40 = vld [vmem:[%s8767_s22] ss:$0 sm:$0xff] }
 0xc6c   : > { %v4078_v13 = vld [vmem:[#allocation3 + $0x9] sm:$0xf]  ;;  %v4076_v28 = vmul.f32 %v5610_v24, %v4070_v9  ;;  %v4021_v50 = vadd.f32 %v4020_v61, %v4013_v46  ;;  %v4122_v12 = vadd.f32 %v4121_v22, %v4115_v54  ;;  %v4092_v27 = vmul.f32 %v5612_v47, %v4086_v2  ;;  %v6178_v47 = vld [vmem:[%s8765_s1 + $0x24] ss:$8 sps:$4 sm:$0xff]   ;;  %v6176_v22 = vld [vmem:[%s8765_s1 + $0x20] ss:$8 sps:$4 sm:$0xff]  }
 0xc6d   : > { %v4084_v38 = vmul.f32 %v5611_v11, %v4078_v13  ;;  %v8211_v35 = vsel %vm1688_vm10, 1.0, %v8748_v58  ;;  %v5622_v11 = vld [vmem:[%s8763_s23] ss:$0 sm:$0xff]  ;;  %v6173_v9 = vld [vmem:[%s8764_s15 + $0x30] ss:$8 sps:$4 sm:$0xff]   ;;  %v6664_v42 = vmov 0  }
 0xc6e   : > { %v4077_v19 = vadd.f32 %v4076_v28, %v4069_v37  ;;  %v4029_v16 = vadd.f32 %v4028_v29, %v4021_v50  ;;  %v4129_v31 = vadd.f32 %v4128_v56, %v4122_v12  ;;  %v6175_v13 = vld [vmem:[%s8765_s1 + $0x34] ss:$8 sps:$4 sm:$0xff]   ;;  %4295 = vmatprep.mubr.bf16.mxu0 %v6664_v42  ;;  %v6182_v50 = vld [vmem:[%s8765_s1] ss:$8 sps:$4 sm:$0xff]   ;;  %s8768_s23 = sld [smem:[#allocation54_spill]] }
 0xc6f   : > { %4271 = vmatprep.subr.bf16.mxu0 %v6175_v13  ;;  %v6181_v28 = vld [vmem:[%s8765_s1 + $0x14] ss:$8 sps:$4 sm:$0xff]   ;;  %v5623_v56 = vld [vmem:[%s8766_s18] ss:$0 sm:$0xff]  ;;  %s8769_s15 = sld [smem:[#allocation53_spill]] }
 0xc70   : > { %v4085_v51 = vadd.f32 %v4084_v38, %v4077_v19  ;;  %v4037_v7 = vadd.f32 %v4036_v23, %v4029_v16  ;;  %v4136_v60 = vadd.f32 %v4135_v59, %v4129_v31  ;;  %4272 = vmatpush1.bf16.msra.mxu0 %v6173_v9  ;;  %s8770_s18 = sld [smem:[#allocation55_spill]] }
 0xc71   : > { %4273 = vmatprep.subr.bf16.mxu0 %v6178_v47  ;;  %s8771_s22 = sld [smem:[#allocation56_spill]] }
 0xc72   : > { %v4093_v36 = vadd.f32 %v4092_v27, %v4085_v51  ;;  %v4045_v20 = vadd.f32 %v4044_v17, %v4037_v7  ;;  %v4143_v26 = vadd.f32 %v4142_v45, %v4136_v60  ;;  %v4212_v60 = vsub.s32 0, %v8762_v53 }
 0xc74   : > { %v4101_v6 = vadd.f32 %v4100_v4, %v4093_v36  ;;  %v4053_v0 = vadd.f32 %v4052_v34, %v4045_v20  ;;  %v4150_v44 = vadd.f32 %v4149_v57, %v4143_v26  ;;  %4274 = vmatpush1.bf16.msra.mxu0 %v6176_v22  ;;  %v6185_v38 = vld [vmem:[%s8768_s23 + $0x78] sm:$0xff]   ;;  %v6187_v16 = vld [vmem:[%s8768_s23 + $0x70] sm:$0xff]   ;;  %v6189_v14 = vld [vmem:[%s8768_s23 + $0x68] sm:$0xff]   ;;  %v4216_v36 = vsub.s32 1, %v8762_v53 }
 0xc75   : > { %4275 = vmatprep.subr.bf16.mxu0 %v6181_v28  ;;  %v6186_v18 = vld [vmem:[%s8768_s23 + $0x38] sm:$0xff]   ;;  %5760 = vmatprep.subr.bf16.mxu1 %v6185_v38  ;;  %v6188_v23 = vld [vmem:[%s8768_s23 + $0x30] sm:$0xff]   ;;  %v6190_v31 = vld [vmem:[%s8768_s23 + $0x28] sm:$0xff]  }
 0xc76   : > { %v4054_v46 = vmul.f32 %v8208_v5, %v4053_v0  ;;  %v4109_v25 = vadd.f32 %v4108_v49, %v4101_v6  ;;  %v4158_v8 = vadd.f32 %v4157_v52, %v4150_v44  ;;  %5761 = vmatpush3.bf16.msra.mxu1 %v6186_v18  ;;  %v6191_v59 = vld [vmem:[%s8768_s23 + $0x60] sm:$0xff]   ;;  %v6193_v27 = vld [vmem:[%s8768_s23 + $0x58] sm:$0xff]   ;;  %v6195_v62 = vld [vmem:[%s8768_s23 + $0x50] sm:$0xff]  }
 0xc77   : > { %5762 = vmatprep.subr.bf16.mxu1 %v6187_v16  ;;  %v6192_v51 = vld [vmem:[%s8768_s23 + $0x20] sm:$0xff]   ;;  %v6194_v4 = vld [vmem:[%s8768_s23 + $0x18] sm:$0xff]   ;;  %v6196_v57 = vld [vmem:[%s8768_s23 + $0x10] sm:$0xff]   ;;  %s8772_s1 = smov %s8771_s22 }
 0xc78   : > { %v4159_v41 = vmul.f32 %v8211_v35, %v4158_v8  ;;  %v4160_v24 = vadd.f32 %v4109_v25, %v4054_v46  ;;  %4276 = vmatpush1.bf16.msra.mxu0 %v6179_v10  ;;  %v6197_v55 = vld [vmem:[%s8768_s23 + $0x48] sm:$0xff]   ;;  %v6199_v7 = vld [vmem:[%s8768_s23 + $0x40] sm:$0xff]  }
 0xc79   : > { %4277 = vmatprep.subr.bf16.mxu0 %v6184_v15  ;;  %v6198_v63 = vld [vmem:[%s8768_s23 + $0x8] sm:$0xff]   ;;  %v6200_v17 = vld [vmem:[%s8768_s23] sm:$0xff]  }
 0xc7a   : > { %v4161_v30 = vadd.f32 %v4160_v24, %v4159_v41  ;;  %5763 = vmatpush3.bf16.msra.mxu1 %v6188_v23  ;;  %v4207_v45 = vld [vmem:[%s8769_s15] sm:$0x3]  ;;  %s8773_s15 = sld [smem:[#allocation58_spill]] }
 0xc7b   : > { %5764 = vmatprep.subr.bf16.mxu1 %v6189_v14  ;;  %v4213_v20 = vrot.slane %v4207_v45, %v4212_v60  ;;  %v4217_v49 = vrot.slane %v4207_v45, %v4216_v36 }
 0xc7c   : > { %v4168_v54 = vadd.f32 %v5622_v11, %v4161_v30  ;;  %4278 = vmatpush1.bf16.msra.mxu0 %v6182_v50 }
 0xc7e   : > { %v4171_v1 = vsel %vm3997_vm8, %v4168_v54, 0.0  ;;  %5765 = vmatpush3.bf16.msra.mxu1 %v6190_v31 }
 0xc7f   : > { %4172 = vadd.xlane.f32.xlu0 %v4171_v1  ;;  %5766 = vmatprep.subr.bf16.mxu1 %v6191_v59 }
 0xc80   : > { %s8774_s2 = smov %s8773_s15 }
 0xc82   : > { %5767 = vmatpush3.bf16.msra.mxu1 %v6192_v51 }
 0xc83   : > { %5768 = vmatprep.subr.bf16.mxu1 %v6193_v27 }
 0xc86   : > { %5769 = vmatpush3.bf16.msra.mxu1 %v6194_v4 }
 0xc87   : > { %5770 = vmatprep.subr.bf16.mxu1 %v6195_v62 }
 0xc8a   : > { %5771 = vmatpush3.bf16.msra.mxu1 %v6196_v57 }
 0xc8b   : > { %5772 = vmatprep.subr.bf16.mxu1 %v6197_v55 }
 0xc8e   : > { %5773 = vmatpush3.bf16.msra.mxu1 %v6198_v63 }
 0xc8f   : > { %5774 = vmatprep.subr.bf16.mxu1 %v6199_v7 }
 0xc92   : > { %5775 = vmatpush3.bf16.msra.mxu1 %v6200_v17 }
 0xc93   : > { %5939 = vmatprep.subr.mxu1 %v8748_v58 }
 0xd08   : > { %v4173_v3 = vpop.xlane.xlu0 %4172 }
 0xd09   : > { %v4175_v32 = vmul.f32 0.015625, %v4173_v3 }
 0xd0b   : > { %v4176_v37 = vsub.f32 %v4168_v54, %v4175_v32 }
 0xd0d   : > { %v4177_v43 = vmul.f32 %v4176_v37, %v4176_v37 }
 0xd0f   : > { %v4178_v61 = vsel %vm3997_vm8, %v4177_v43, 0.0 }
 0xd10   : > { %4179 = vadd.xlane.f32.xlu1 %v4178_v61 }
 0xd99   : > { %v4180_v29 = vpop.xlane.xlu1 %4179 }
 0xd9a   : > { %v4181_v2 = vmul.f32 0.015625, %v4180_v29 }
 0xd9c   : > { %v4182_v39 = vadd.f32 1e-06, %v4181_v2 }
 0xd9e   : > { %6261 = vrsqrt.f32 %v4182_v39 }
 0xdab   : > { %v6262_v12 = vpop.eup %6261 }
 0xdac   : > { %v4184_v48 = vmul.f32 %v6262_v12, %v4176_v37 }
 0xdae   : > { %v4191_v33 = vmul.f32 %v5623_v56, %v4184_v48 }
 0xdb0   : > { %v4198_v34 = vadd.f32 %v5624_v40, %v4191_v33 }
 0xdb2   : > { %v4208_v19 = vpack.c.bf16 %v4198_v34, %v4198_v34 }
 0xdb4   : > { %5633 = vmatmul.mubr.msk.bf16.vlgmr.msra.gmra.mxu0 %vm1698_vm2, %v4208_v19 }
 0xdb5   : > { %4839 = vmatprep.mubr.bf16.mxu0 %v6664_v42 }
 0xe74   : > { %v4297_v26 = vpop.f32.mrf.mxu0 }
 0xe75   : > { %v4298_v52 = vadd.f32 %v4297_v26, %v4213_v20 }
 0xe76   : > { %v4299_v6 = vpop.f32.mrf.mxu0 }
 0xe77   : > { %v4306_v0 = vmul.f32 0.70710677, %v4298_v52  ;;  %v4300_v44 = vadd.f32 %v4299_v6, %v4217_v49  ;;  %v4304_v55 = vmul.f32 0.5, %v4298_v52 }
 0xe78   : > { %v4301_v46 = vpop.f32.mrf.mxu0 }
 0xe79   : > { %v4308_v25 = vand.u32 2147483647, %v4306_v0  ;;  %v4307_v8 = vmul.f32 0.70710677, %v4300_v44  ;;  %vm4346_vm11 = vcmp.ge.f32.partialorder %v4306_v0, 0.0  ;;  %v4305_v7 = vmul.f32 0.5, %v4300_v44 }
 0xe7a   : > { %v4302_v41 = vpop.f32.mrf.mxu0  ;;  %v5634_v0 = vld [vmem:[%s8770_s18] ss:$0 sm:$0xff]  ;;  %s8775_s18 = sld [smem:[#allocation60_spill]] }
 0xe7b   : > { %v4310_v24 = vmul.f32 0.3275911, %v4308_v25  ;;  %v4309_v11 = vand.u32 2147483647, %v4307_v8  ;;  %v4334_v3 = vsub.f32 0.0, %v4308_v25  ;;  %vm4347_vm12 = vcmp.ge.f32.partialorder %v4307_v8, 0.0 }
 0xe7d   : > { %v4312_v30 = vadd.f32 1.0, %v4310_v24  ;;  %v4311_v54 = vmul.f32 0.3275911, %v4309_v11  ;;  %v4335_v32 = vsub.f32 0.0, %v4309_v11  ;;  %v4336_v37 = vmul.f32 %v4334_v3, %v4308_v25  ;;  %v5651_v25 = vld [vmem:[#allocation4] ss:$0 sm:$0xff] }
 0xe7e   : > { %v5653_v3 = vld [vmem:[%s8772_s1 + $0x9] ss:$0 sm:$0xff] }
 0xe7f   : > { %6263 = vrcp.f32 %v4312_v30  ;;  %v4313_v1 = vadd.f32 1.0, %v4311_v54  ;;  %v4337_v61 = vmul.f32 %v4335_v32, %v4309_v11  ;;  %v4338_v13 = vmul.f32 1.442695, %v4336_v37  ;;  %v4544_v30 = vld [vmem:[#allocation3 + $0x2] sm:$0xf] }
 0xe80   : > { %v5652_v54 = vld [vmem:[%s8771_s22 + $0x2] ss:$0 sm:$0xff]  ;;  %v4600_v32 = vld [vmem:[#allocation3 + $0x3] sm:$0xf]  ;;  %v5659_v37 = vld [vmem:[%s8772_s1 + $0x3] ss:$0 sm:$0xff] }
 0xe81   : > { %6265 = vrcp.f32 %v4313_v1  ;;  %v4340_v42 = vmul.f32 1.442695, %v4337_v61  ;;  %v4551_v1 = vld [vmem:[#allocation3 + $0x4] sm:$0xf]  ;;  %v5660_v61 = vld [vmem:[%s8772_s1 + $0xa] ss:$0 sm:$0xff] }
 0xe82   : > { %6267 = vpow2.f32 %v4338_v13  ;;  %v4606_v13 = vmul.f32 %v5659_v37, %v4600_v32  ;;  %s8777_s22 = sld [smem:[#allocation59_spill]] }
 0xe83   : > { %6269 = vpow2.f32 %v4340_v42  ;;  %v5654_v42 = vld [vmem:[%s8772_s1 + $0x10] ss:$0 sm:$0xff] }
 0xe8c   : > { %v6264_v43 = vpop.eup %6263 }
 0xe8d   : > { %v4316_v9 = vmul.f32 1.0614054, %v6264_v43 }
 0xe8e   : > { %v6266_v47 = vpop.eup %6265 }
 0xe8f   : > { %v4318_v22 = vadd.f32 -1.4531521, %v4316_v9  ;;  %v4317_v28 = vmul.f32 1.0614054, %v6266_v47  ;;  %v6268_v38 = vpop.eup %6267  ;;  %v4550_v9 = vmul.f32 %v5652_v54, %v4544_v30  ;;  %v5665_v30 = vld [vmem:[%s8772_s1 + $0x2d] ss:$0 sm:$0xff] }
 0xe90   : > { %v6270_v14 = vpop.eup %6269 }
 0xe91   : > { %v4320_v10 = vmul.f32 %v6264_v43, %v4318_v22  ;;  %v4319_v15 = vadd.f32 -1.4531521, %v4317_v28  ;;  %v5666_v22 = vld [vmem:[%s8772_s1 + $0x4] ss:$0 sm:$0xff]  ;;  %v5655_v28 = vld [vmem:[%s8772_s1 + $0x17] ss:$0 sm:$0xff] }
 0xe93   : > { %v4322_v50 = vadd.f32 1.4214138, %v4320_v10  ;;  %v4321_v29 = vmul.f32 %v6266_v47, %v4319_v15  ;;  %v5667_v10 = vld [vmem:[%s8772_s1 + $0xb] ss:$0 sm:$0xff] }
 0xe95   : > { %v4324_v2 = vmul.f32 %v6264_v43, %v4322_v50  ;;  %v4323_v39 = vadd.f32 1.4214138, %v4321_v29  ;;  %v4591_v50 = vld [vmem:[#allocation3 + $0xe] sm:$0xf]  ;;  %v5658_v29 = vld [vmem:[%s8772_s1 + $0x2c] ss:$0 sm:$0xff] }
 0xe97   : > { %v4326_v12 = vadd.f32 -0.28449672, %v4324_v2  ;;  %v4325_v56 = vmul.f32 %v6266_v47, %v4323_v39  ;;  %v5661_v2 = vld [vmem:[%s8772_s1 + $0x11] ss:$0 sm:$0xff]  ;;  %v5662_v39 = vld [vmem:[%s8772_s1 + $0x18] ss:$0 sm:$0xff] }
 0xe99   : > { %v4328_v48 = vmul.f32 %v6264_v43, %v4326_v12  ;;  %v4327_v40 = vadd.f32 -0.28449672, %v4325_v56  ;;  %v4660_v12 = vmul.f32 %v5666_v22, %v4551_v1 }
 0xe9b   : > { %v4330_v33 = vadd.f32 0.2548296, %v4328_v48  ;;  %v4329_v34 = vmul.f32 %v6266_v47, %v4327_v40  ;;  %v5656_v40 = vld [vmem:[%s8772_s1 + $0x1e] ss:$0 sm:$0xff] }
 0xe9d   : > { %v4332_v19 = vmul.f32 %v6264_v43, %v4330_v33  ;;  %v4331_v18 = vadd.f32 0.2548296, %v4329_v34  ;;  %v4607_v43 = vld [vmem:[#allocation3 + $0x5] sm:$0xf]  ;;  %v5668_v34 = vld [vmem:[%s8772_s1 + $0x12] ss:$0 sm:$0xff] }
 0xe9f   : > { %v4342_v16 = vmul.f32 %v6268_v38, %v4332_v19  ;;  %v4333_v23 = vmul.f32 %v6266_v47, %v4331_v18  ;;  %v4613_v47 = vmul.f32 %v5660_v61, %v4607_v43 }
 0xea1   : > { %v4344_v31 = vsub.f32 1.0, %v4342_v16  ;;  %v4343_v59 = vmul.f32 %v6270_v14, %v4333_v23  ;;  %v4614_v33 = vadd.f32 %v4613_v47, %v4606_v13  ;;  %v5663_v16 = vld [vmem:[%s8772_s1 + $0x1f] ss:$0 sm:$0xff] }
 0xea3   : > { %v4348_v51 = vsub.f32 0.0, %v4344_v31  ;;  %v4345_v27 = vsub.f32 1.0, %v4343_v59  ;;  %v4639_v59 = vld [vmem:[#allocation3 + $0xd] sm:$0xf] }
 0xea5   : > { %v4350_v4 = vsel %vm4346_vm11, %v4344_v31, %v4348_v51  ;;  %v4349_v57 = vsub.f32 0.0, %v4345_v27  ;;  %v5669_v51 = vld [vmem:[%s8772_s1 + $0x19] ss:$0 sm:$0xff] }
 0xea6   : > { %v4352_v62 = vadd.f32 1.0, %v4350_v4 }
 0xea7   : > { %v4351_v63 = vsel %vm4347_vm12, %v4345_v27, %v4349_v57  ;;  %v5664_v57 = vld [vmem:[%s8772_s1 + $0x26] ss:$0 sm:$0xff] }
 0xea8   : > { %v4353_v17 = vadd.f32 1.0, %v4351_v63  ;;  %v4354_v45 = vmul.f32 %v4352_v62, %v4304_v55 }
 0xeaa   : > { %v4355_v20 = vmul.f32 %v4353_v17, %v4305_v7  ;;  %v4389_v26 = vpack.c.bf16 %v4354_v45, %v4354_v45  ;;  %v5671_v7 = vld [vmem:[%s8772_s1 + $0x27] ss:$0 sm:$0xff]  ;;  %v5657_v45 = vld [vmem:[%s8772_s1 + $0x25] ss:$0 sm:$0xff] }
 0xeab   : > { %v4694_v54 = vmul.f32 %v5671_v7, %v4591_v50  ;;  %v5675_v7 = vld [vmem:[#allocation10] ss:$0 sm:$0xff] }
 0xeac   : > { %v4390_v49 = vpack.c.bf16 %v4355_v20, %v4355_v20  ;;  %v4597_v20 = vmul.f32 %v5658_v29, %v4591_v50 }
 0xeae   : > { %4525 = vmatprep.mubr.bf16.mxu1 %v4390_v49 }
 0xeaf   : > { %4526 = vmatmul.mubr.bf16.vlgmr.msra.gmra.mxu1 %v4389_v26 }
 0xeb0   : > { %5955 = vmatprep.mubr.msk.f32.mxu1 %vm6663_vm0, %v8748_v58 }
 0xf6f   : > { %v5776_v6 = vpop.f32.mrf.mxu1 }
 0xf71   : > { %v5777_v46 = vpop.f32.mrf.mxu1 }
 0xf72   : > { %v5778_v52 = vadd.f32 %v5777_v46, %v5776_v6  ;;  %v5670_v6 = vld [vmem:[%s8772_s1 + $0x20] ss:$0 sm:$0xff] }
 0xf73   : > { %v5779_v44 = vpop.f32.mrf.mxu1 }
 0xf74   : > { %v4528_v8 = vadd.f32 %v5778_v52, %v5634_v0  ;;  %v4647_v52 = vld [vmem:[#allocation3 + $0xf] sm:$0xf] }
 0xf75   : > { %v5780_v41 = vpop.f32.mrf.mxu1  ;;  %v4653_v13 = vmul.f32 %v5665_v30, %v4647_v52 }
 0xf76   : > { %v4540_v24 = vmul.f32 %v5651_v25, %v4528_v8 }
 0xf78   : > { %v8257_v11 = vadd.f32 %v4540_v24, %v8173_v21  ;;  %v4557_v21 = vmul.f32 %v5653_v3, %v4551_v1  ;;  %v4645_v24 = vmul.f32 %v5664_v57, %v4639_v59  ;;  %v4696_v1 = vld [vmem:[#allocation3 + $0x10] sm:$0xf]  ;;  %v5672_v3 = vld [vmem:[%s8772_s1 + $0x2e] ss:$0 sm:$0xff]  ;;  %s8776_s1 = smov %s8775_s18 }
 0xf79   : > { %v4702_v22 = vmul.f32 %v5672_v3, %v4696_v1  ;;  %v6212_v59 = vld [vmem:[%s8774_s2 + $0x4] ss:$8 sps:$4 sm:$0xff]   ;;  %v6224_v30 = vld [vmem:[%s8776_s1 + $0x10] sm:$0xff]  }
 0xf7a   : > { %4543 = vst.msk [vmem:[#allocation3 + $0x9] sm:$0xf] %vm3997_vm8, %v8257_v11  ;;  %v4558_v15 = vadd.f32 %v4557_v21, %v4550_v9  ;;  %v6218_v52 = vld [vmem:[%s8776_s1 + $0x28] sm:$0xff]   ;;  %v6227_v3 = vld [vmem:[%s8776_s1 + $0x40] sm:$0xff]  }
 0xf7b   : > { %v6226_v1 = vld [vmem:[%s8776_s1 + $0x8] sm:$0xff]  }
 0xf81   : > { %v4559_v56 = vld [vmem:[#allocation3 + $0x6] sm:$0xf]  ;;  %v4575_v14 = vld [vmem:[#allocation3 + $0xa] sm:$0xf] }
 0xf82   : > { %v4567_v48 = vld [vmem:[#allocation3 + $0x8] sm:$0xf]  ;;  %v4565_v19 = vmul.f32 %v5654_v42, %v4559_v56  ;;  %v4666_v23 = vmul.f32 %v5667_v10, %v4559_v56  ;;  %v4583_v17 = vld [vmem:[#allocation3 + $0xc] sm:$0xf]  ;;  %v4581_v46 = vmul.f32 %v5656_v40, %v4575_v14  ;;  %v4680_v44 = vmul.f32 %v5669_v51, %v4575_v14  ;;  %v6210_v51 = vld [vmem:[%s8774_s2] ss:$8 sps:$4 sm:$0xff]  }
 0xf83   : > { %v4615_v38 = vld [vmem:[#allocation3 + $0x7] sm:$0xf]  ;;  %v4573_v4 = vmul.f32 %v5655_v28, %v4567_v48  ;;  %v4631_v62 = vld [vmem:[#allocation3 + $0xb] sm:$0xf]  ;;  %v4673_v63 = vmul.f32 %v5668_v34, %v4567_v48  ;;  %v4589_v37 = vmul.f32 %v5657_v45, %v4583_v17  ;;  %v4687_v61 = vmul.f32 %v5670_v6, %v4583_v17 }
 0xf84   : > { %v4623_v18 = vld [vmem:[#allocation3 + $0x9] sm:$0xf]  ;;  %v4621_v31 = vmul.f32 %v5661_v2, %v4615_v38  ;;  %v4566_v27 = vadd.f32 %v4565_v19, %v4558_v15  ;;  %v4667_v55 = vadd.f32 %v4666_v23, %v4660_v12  ;;  %v4637_v41 = vmul.f32 %v5663_v16, %v4631_v62  ;;  %v5673_v12 = vld [vmem:[#allocation7] ss:$0 sm:$0xff]  ;;  %v6206_v16 = vld [vmem:[%s8774_s2 + $0x24] ss:$8 sps:$4 sm:$0xff]  }
 0xf85   : > { %v4629_v26 = vmul.f32 %v5662_v39, %v4623_v18  ;;  %v6203_v18 = vld [vmem:[%s8774_s2 + $0x34] ss:$8 sps:$4 sm:$0xff]   ;;  %v6204_v23 = vld [vmem:[%s8774_s2 + $0x20] ss:$8 sps:$4 sm:$0xff]  }
 0xf86   : > { %v4622_v49 = vadd.f32 %v4621_v31, %v4614_v33  ;;  %v4574_v0 = vadd.f32 %v4573_v4, %v4566_v27  ;;  %v4674_v25 = vadd.f32 %v4673_v63, %v4667_v55  ;;  %4815 = vmatprep.subr.bf16.mxu0 %v6203_v18  ;;  %v6209_v14 = vld [vmem:[%s8774_s2 + $0x14] ss:$8 sps:$4 sm:$0xff]   ;;  %v6207_v31 = vld [vmem:[%s8774_s2 + $0x10] ss:$8 sps:$4 sm:$0xff]   ;;  %v5674_v55 = vld [vmem:[#allocation9] ss:$0 sm:$0xff] }
 0xf87   : > { %v6215_v6 = vld [vmem:[%s8776_s1 + $0x70] sm:$0xff]  }
 0xf88   : > { %v4630_v8 = vadd.f32 %v4629_v26, %v4622_v49  ;;  %v4582_v32 = vadd.f32 %v4581_v46, %v4574_v0  ;;  %v4681_v43 = vadd.f32 %v4680_v44, %v4674_v25  ;;  %v6213_v49 = vld [vmem:[%s8775_s18 + $0x78] sm:$0xff]   ;;  %v6216_v0 = vld [vmem:[%s8776_s1 + $0x30] sm:$0xff]   ;;  %v6217_v46 = vld [vmem:[%s8776_s1 + $0x68] sm:$0xff]   ;;  %s5704_s18 = sshll.u32 %s6947_s0, 4 }
 0xf89   : > { %v6214_v26 = vld [vmem:[%s8776_s1 + $0x38] sm:$0xff]   ;;  %v6219_v25 = vld [vmem:[%s8776_s1 + $0x60] sm:$0xff]   ;;  %s8339_s2 = scalar_lea.hbm %s6924_s14, %s5704_s18 }
 0xf8a   : > { %v4638_v9 = vadd.f32 %v4637_v41, %v4630_v8  ;;  %v4590_v21 = vadd.f32 %v4589_v37, %v4582_v32  ;;  %v4688_v47 = vadd.f32 %v4687_v61, %v4681_v43  ;;  %v6220_v44 = vld [vmem:[%s8776_s1 + $0x20] sm:$0xff]   ;;  %v6221_v8 = vld [vmem:[%s8776_s1 + $0x58] sm:$0xff]  }
 0xf8b   : > { %v6222_v41 = vld [vmem:[%s8776_s1 + $0x18] sm:$0xff]   ;;  %v6228_v32 = vld [vmem:[%s8776_s1] sm:$0xff]  }
 0xf8c   : > { %v4646_v42 = vadd.f32 %v4645_v24, %v4638_v9  ;;  %v4598_v28 = vadd.f32 %v4597_v20, %v4590_v21  ;;  %v4695_v10 = vadd.f32 %v4694_v54, %v4688_v47  ;;  %v6223_v24 = vld [vmem:[%s8776_s1 + $0x50] sm:$0xff]   ;;  %v6225_v54 = vld [vmem:[%s8776_s1 + $0x48] sm:$0xff]   ;;  %v4751_v37 = vld [vmem:[%s8777_s22] sm:$0x3] }
 0xf8d   : > { %v4757_v43 = vrot.slane %v4751_v37, %v4212_v60  ;;  %v4761_v61 = vrot.slane %v4751_v37, %v4216_v36  ;;  %v5685_v37 = vld [vmem:[#allocation12] ss:$0 sm:$0xff] }
 0xf8e   : > { %v4599_v15 = vmul.f32 %v8208_v5, %v4598_v28  ;;  %v4654_v29 = vadd.f32 %v4653_v13, %v4646_v42  ;;  %v4703_v50 = vadd.f32 %v4702_v22, %v4695_v10 }
 0xf90   : > { %v4704_v2 = vmul.f32 %v8211_v35, %v4703_v50  ;;  %v4705_v39 = vadd.f32 %v4654_v29, %v4599_v15  ;;  %v6201_v35 = vld [vmem:[%s8773_s15 + $0x30] ss:$8 sps:$4 sm:$0xff]   ;;  %s1594_s15 = sand.u32 1, %s6593_s16  }
 0xf91   : > { %4816 = vmatpush1.bf16.msra.mxu0 %v6201_v35  ;;  %s1595_s22 = scalar_lea.vmem [#allocation19], %s1594_s15  ;;  %s5196_s3 = scalar_lea.sflag [#allocation6], %s1594_s15 }
 0xf92   : > { %v4706_v56 = vadd.f32 %v4705_v39, %v4704_v2  ;;  %4817 = vmatprep.subr.bf16.mxu0 %v6206_v16  ;;  %s5208_s1 = sshll.u32 %s1595_s22, 4  ;;  %s5209_s1 = int_to_ptr.vmem [resolvable:$true] %s5208_s1 }
 0xf93   : > { %s6521_s4 = scalar_lea.vmem %s5209_s1, 16  ;;  %p6528_p4 = scmp.lt.s32.totalorder %s5209_s1, %s6526_s6 }
 0xf94   : > { %v4713_v48 = vadd.f32 %v5673_v12, %v4706_v56  ;;  %p6522_p1 = scmp.ne.s32.totalorder %s5209_s1, %s6521_s4 }
 0xf95   : > { %4818 = vmatpush1.bf16.msra.mxu0 %v6204_v23 }
 0xf96   : > { %v4716_v40 = vsel %vm3997_vm8, %v4713_v48, 0.0  ;;  %4819 = vmatprep.subr.bf16.mxu0 %v6209_v14  ;;  %p6523_p3 = pnand %p6522_p1, %p8778_p2 }
 0xf97   : > { %4717 = vadd.xlane.f32.xlu0 %v4716_v40 }
 0xf98   : > { %p6524_p9 = pneg %p6523_p3 }
 0xf99   : > { %4820 = vmatpush1.bf16.msra.mxu0 %v6207_v31 }
 0xf9a   : > { %4821 = vmatprep.subr.bf16.mxu0 %v6212_v59 }
 0xf9d   : > { %4822 = vmatpush1.bf16.msra.mxu0 %v6210_v51 }
 0xf9e   : > { %5782 = vmatprep.subr.bf16.mxu0 %v6213_v49 }
0x1020   : > { %v4718_v33 = vpop.xlane.xlu0 %4717 }
0x1021   : > { %v4719_v34 = vmul.f32 0.015625, %v4718_v33 }
0x1023   : > { %v4720_v5 = vsub.f32 %v4713_v48, %v4719_v34 }
0x1025   : > { %v4721_v19 = vmul.f32 %v4720_v5, %v4720_v5 }
0x1027   : > { %v4722_v38 = vsel %vm3997_vm8, %v4721_v19, 0.0 }
0x1028   : > { %4723 = vadd.xlane.f32.xlu1 %v4722_v38 }
0x10b1   : > { %v4724_v27 = vpop.xlane.xlu1 %4723 }
0x10b2   : > { %v4725_v4 = vmul.f32 0.015625, %v4724_v27 }
0x10b4   : > { %v4726_v62 = vadd.f32 1e-06, %v4725_v4 }
0x10b6   : > { %6271 = vrsqrt.f32 %v4726_v62 }
0x10c3   : > { %v6272_v57 = vpop.eup %6271 }
0x10c4   : > { %v4728_v63 = vmul.f32 %v6272_v57, %v4720_v5 }
0x10c6   : > { %v4735_v17 = vmul.f32 %v5674_v55, %v4728_v63 }
0x10c8   : > { %v4742_v45 = vadd.f32 %v5675_v7, %v4735_v17 }
0x10ca   : > { %v4752_v20 = vpack.c.bf16 %v4742_v45, %v4742_v45 }
0x10cc   : > { %5684 = vmatmul.mubr.msk.bf16.vlgmr.msra.gmra.mxu0 %vm1698_vm2, %v4752_v20 }
0x10cd   : > { %5783 = vmatpush3.bf16.msra.mxu0 %v6214_v26 }
0x10ce   : > { %5784 = vmatprep.subr.bf16.mxu0 %v6215_v6 }
0x10d1   : > { %5785 = vmatpush3.bf16.msra.mxu0 %v6216_v0 }
0x10d2   : > { %5786 = vmatprep.subr.bf16.mxu0 %v6217_v46 }
0x10d5   : > { %5787 = vmatpush3.bf16.msra.mxu0 %v6218_v52 }
0x10d6   : > { %5788 = vmatprep.subr.bf16.mxu0 %v6219_v25 }
0x10d9   : > { %5789 = vmatpush3.bf16.msra.mxu0 %v6220_v44 }
0x10da   : > { %5790 = vmatprep.subr.bf16.mxu0 %v6221_v8 }
0x10dd   : > { %5791 = vmatpush3.bf16.msra.mxu0 %v6222_v41 }
0x10de   : > { %5792 = vmatprep.subr.bf16.mxu0 %v6223_v24 }
0x10e1   : > { %5793 = vmatpush3.bf16.msra.mxu0 %v6224_v30 }
0x10e2   : > { %5794 = vmatprep.subr.bf16.mxu0 %v6225_v54 }
0x10e5   : > { %5795 = vmatpush3.bf16.msra.mxu0 %v6226_v1 }
0x10e6   : > { %5796 = vmatprep.subr.bf16.mxu0 %v6227_v3 }
0x10e9   : > { %5797 = vmatpush3.bf16.msra.mxu0 %v6228_v32 }
0x118c   : > { %v4841_v9 = vpop.f32.mrf.mxu0 }
0x118d   : > { %v4842_v21 = vadd.f32 %v4841_v9, %v4757_v43  ;;  %v5702_v9 = vld [vmem:[#allocation13] ss:$0 sm:$0xff] }
0x118e   : > { %v4843_v13 = vpop.f32.mrf.mxu0 }
0x118f   : > { %v4850_v47 = vmul.f32 0.70710677, %v4842_v21  ;;  %v4844_v22 = vadd.f32 %v4843_v13, %v4761_v61  ;;  %v4848_v44 = vmul.f32 0.5, %v4842_v21 }
0x1190   : > { %v4845_v42 = vpop.f32.mrf.mxu0 }
0x1191   : > { %v4852_v28 = vand.u32 2147483647, %v4850_v47  ;;  %v4851_v10 = vmul.f32 0.70710677, %v4844_v22  ;;  %vm4890_vm0 = vcmp.ge.f32.partialorder %v4850_v47, 0.0  ;;  %v4849_v41 = vmul.f32 0.5, %v4844_v22 }
0x1192   : > { %v4846_v15 = vpop.f32.mrf.mxu0 }
0x1193   : > { %v4854_v29 = vmul.f32 0.3275911, %v4852_v28  ;;  %v4853_v50 = vand.u32 2147483647, %v4851_v10  ;;  %v4878_v60 = vsub.f32 0.0, %v4852_v28  ;;  %vm4891_vm13 = vcmp.ge.f32.partialorder %v4851_v10, 0.0 }
0x1195   : > { %v4856_v2 = vadd.f32 1.0, %v4854_v29  ;;  %v4855_v39 = vmul.f32 0.3275911, %v4853_v50  ;;  %v4879_v56 = vsub.f32 0.0, %v4853_v50  ;;  %v4880_v53 = vmul.f32 %v4878_v60, %v4852_v28 }
0x1197   : > { %6273 = vrcp.f32 %v4856_v2  ;;  %v4857_v12 = vadd.f32 1.0, %v4855_v39  ;;  %v4881_v48 = vmul.f32 %v4879_v56, %v4853_v50  ;;  %v4882_v33 = vmul.f32 1.442695, %v4880_v53 }
0x1199   : > { %6275 = vrcp.f32 %v4857_v12  ;;  %v4884_v19 = vmul.f32 1.442695, %v4881_v48 }
0x119a   : > { %6277 = vpow2.f32 %v4882_v33  ;;  %v5118_v33 = vld [vmem:[%s8523_s8 + $0x30] sm:$0xff] }
0x119b   : > { %6279 = vpow2.f32 %v4884_v19  ;;  %v5115_v19 = vld [vmem:[%s8523_s8 + $0x18] sm:$0xff] }
0x11a4   : > { %v6274_v36 = vpop.eup %6273 }
0x11a5   : > { %v4860_v40 = vmul.f32 1.0614054, %v6274_v36 }
0x11a6   : > { %v6276_v34 = vpop.eup %6275 }
0x11a7   : > { %v4862_v5 = vadd.f32 -1.4531521, %v4860_v40  ;;  %v4861_v38 = vmul.f32 1.0614054, %v6276_v34  ;;  %v6278_v63 = vpop.eup %6277  ;;  %v5119_v40 = vld [vmem:[%s8523_s8 + $0x38] sm:$0xff] }
0x11a8   : > { %v6280_v20 = vpop.eup %6279  ;;  %5940 = vmatpush3.msra.mxu1 %v5119_v40 }
0x11a9   : > { %v4864_v35 = vmul.f32 %v6274_v36, %v4862_v5  ;;  %v4863_v18 = vadd.f32 -1.4531521, %v4861_v38  ;;  %5941 = vmatprep.subr.mxu1 %v8748_v58  ;;  %v5116_v5 = vld [vmem:[%s8523_s8 + $0x20] sm:$0xff]  ;;  %v5114_v38 = vld [vmem:[%s8523_s8 + $0x10] sm:$0xff] }
0x11aa   : > { %5942 = vmatpush3.msra.mxu1 %v5118_v33 }
0x11ab   : > { %v4866_v16 = vadd.f32 1.4214138, %v4864_v35  ;;  %v4865_v23 = vmul.f32 %v6276_v34, %v4863_v18  ;;  %5943 = vmatprep.subr.mxu1 %v8748_v58  ;;  %v5113_v35 = vld [vmem:[%s8523_s8 + $0x8] sm:$0xff]  ;;  %v5112_v18 = vld [vmem:[%s8523_s8] sm:$0xff] }
0x11ad   : > { %v4868_v14 = vmul.f32 %v6274_v36, %v4866_v16  ;;  %v4867_v31 = vadd.f32 1.4214138, %v4865_v23 }
0x11af   : > { %v4870_v59 = vadd.f32 -0.28449672, %v4868_v14  ;;  %v4869_v51 = vmul.f32 %v6276_v34, %v4867_v31 }
0x11b1   : > { %v4872_v27 = vmul.f32 %v6274_v36, %v4870_v59  ;;  %v4871_v4 = vadd.f32 -0.28449672, %v4869_v51  ;;  %v5095_v59 = vld [vmem:[#allocation15] sm:$0x1] }
0x11b3   : > { %v4874_v62 = vadd.f32 0.2548296, %v4872_v27  ;;  %v4873_v57 = vmul.f32 %v6276_v34, %v4871_v4  ;;  %v5096_v27 = vld [vmem:[#allocation16] sm:$0x1] }
0x11b5   : > { %v4876_v55 = vmul.f32 %v6274_v36, %v4874_v62  ;;  %v4875_v7 = vadd.f32 0.2548296, %v4873_v57  ;;  %v5120_v57 = vld [vmem:[#allocation18] sm:$0x1] }
0x11b7   : > { %v4886_v17 = vmul.f32 %v6278_v63, %v4876_v55  ;;  %v4877_v45 = vmul.f32 %v6276_v34, %v4875_v7  ;;  %v5117_v34 = vld [vmem:[%s8523_s8 + $0x28] sm:$0xff]  ;;  %s6527_s8 = scalar_lea.vmem %s6526_s6, 32 }
0x11b8   : > { %5944 = vmatpush3.msra.mxu1 %v5117_v34  ;;  %p6529_p13 = scmp.lt.s32.totalorder %s6527_s8, %s6521_s4 }
0x11b9   : > { %v4888_v49 = vsub.f32 1.0, %v4886_v17  ;;  %v4887_v26 = vmul.f32 %v6280_v20, %v4877_v45  ;;  %5945 = vmatprep.subr.mxu1 %v8748_v58 }
0x11ba   : > { %5946 = vmatpush3.msra.mxu1 %v5116_v5  ;;  %p6530_p5 = por %p6529_p13, %p6528_p4 }
0x11bb   : > { %v4892_v6 = vsub.f32 0.0, %v4888_v49  ;;  %v4889_v0 = vsub.f32 1.0, %v4887_v26  ;;  %5947 = vmatprep.subr.mxu1 %v8748_v58 }
0x11bc   : > { %5948 = vmatpush3.msra.mxu1 %v5115_v19  ;;  %p6531_p6 = pnand %p6530_p5, %p6524_p9 }
0x11bd   : > { %v4894_v46 = vsel %vm4890_vm0, %v4888_v49, %v4892_v6  ;;  %v4893_v25 = vsub.f32 0.0, %v4889_v0  ;;  %5949 = vmatprep.subr.mxu1 %v8748_v58 }
0x11be   : > { %v4896_v52 = vadd.f32 1.0, %v4894_v46  ;;  %5950 = vmatpush3.msra.mxu1 %v5114_v38 }
0x11bf   : > { %v4895_v8 = vsel %vm4891_vm13, %v4889_v0, %v4893_v25  ;;  %5951 = vmatprep.subr.mxu1 %v8748_v58 }
0x11c0   : > { %v4897_v24 = vadd.f32 1.0, %v4895_v8  ;;  %v4898_v30 = vmul.f32 %v4896_v52, %v4848_v44  ;;  %5952 = vmatpush3.msra.mxu1 %v5113_v35 }
0x11c1   : > { %5953 = vmatprep.subr.mxu1 %v8748_v58 }
0x11c2   : > { %v4899_v54 = vmul.f32 %v4897_v24, %v4849_v41  ;;  %v4933_v3 = vpack.c.bf16 %v4898_v30, %v4898_v30  ;;  %5954 = vmatpush3.msra.mxu1 %v5112_v18 }
0x11c4   : > { %v4934_v1 = vpack.c.bf16 %v4899_v54, %v4899_v54 }
0x11c6   : > { %5069 = vmatprep.mubr.bf16.mxu0 %v4934_v1 }
0x11c7   : > { %5070 = vmatmul.mubr.bf16.vlgmr.msra.gmra.mxu0 %v4933_v3 }
0x1287   : > { %v5798_v32 = vpop.f32.mrf.mxu0 }
0x1289   : > { %v5799_v43 = vpop.f32.mrf.mxu0 }
0x128a   : > { %v5800_v61 = vadd.f32 %v5799_v43, %v5798_v32 }
0x128b   : > { %v5801_v13 = vpop.f32.mrf.mxu0 }
0x128c   : > { %v5072_v47 = vadd.f32 %v5800_v61, %v5685_v37 }
0x128d   : > { %v5802_v42 = vpop.f32.mrf.mxu0 }
0x128e   : > { %v5084_v28 = vmul.f32 %v5702_v9, %v5072_v47 }
0x1290   : > { %v5085_v21 = vadd.f32 %v5084_v28, %v8257_v11 }
0x1292   : > { %v5086_v22 = vsel %vm3997_vm8, %v5085_v21, 0.0 }
0x1293   : > { %v5087_v10 = vrot.slane %v5086_v22, 4 }
0x1295   : > { %v5088_v15 = vadd.f32 %v5087_v10, %v5086_v22 }
0x1297   : > { %v5089_v29 = vrot.slane %v5088_v15, 2 }
0x1299   : > { %v5090_v50 = vadd.f32 %v5089_v29, %v5088_v15 }
0x129b   : > { %v5091_v2 = vrot.slane %v5090_v50, 1 }
0x129d   : > { %v5092_v39 = vadd.f32 %v5091_v2, %v5090_v50 }
0x129f   : > { %v5094_v12 = vmul.f32 0.25, %v5092_v39 }
0x12a1   : > { %v5097_v60 = vsel %vm1698_vm2, %v5094_v12, 0.0 }
0x12a2   : > { %5098 = vadd.xlane.f32.xlu0 %v5097_v60 }
0x132b   : > { %v5099_v56 = vpop.xlane.xlu0 %5098 }
0x132c   : > { %v5100_v53 = vmul.f32 0.015625, %v5099_v56 }
0x132e   : > { %v5101_v11 = vsub.f32 %v5094_v12, %v5100_v53 }
0x1330   : > { %v5102_v36 = vmul.f32 %v5101_v11, %v5101_v11 }
0x1332   : > { %v5103_v48 = vsel %vm1698_vm2, %v5102_v36, 0.0 }
0x1333   : > { %5104 = vadd.xlane.f32.xlu1 %v5103_v48 }
0x13bc   : > { %v5105_v16 = vpop.xlane.xlu1 %5104 }
0x13bd   : > { %v5106_v23 = vmul.f32 0.015625, %v5105_v16 }
0x13bf   : > { %v5107_v14 = vadd.f32 1e-06, %v5106_v23 }
0x13c1   : > { %6281 = vrsqrt.f32 %v5107_v14 }
0x13ce   : > { %v6282_v31 = vpop.eup %6281 }
0x13cf   : > { %v5109_v51 = vmul.f32 %v6282_v31, %v5101_v11 }
0x13d1   : > { %v5110_v4 = vmul.f32 %v5109_v51, %v5095_v59 }
0x13d3   : > { %v5111_v62 = vadd.f32 %v5110_v4, %v5096_v27 }
0x13d5   : > { %5956 = vmatmul.mubr.msk.f32.vlgmr.msra.gmra.mxu1 %vm1698_vm2, %v5111_v62 }
0x1495   : > { %v5190_v58 = vpop.f32.mrf.mxu1 }
0x1496   : > { %v5191_v55 = vadd.f32 %v5190_v58, %v5120_v57 }
0x1497   : > { %v5957_v63 = vpop.f32.mrf.mxu1 }
0x1498   : > { %5194 = vst [vmem:[%s1595_s22] sm:$0x1] %v5191_v55 }
0x1499   : > { %6534 = shalt.err (!%p6531_p6)
}
0x149a   : > { %s6535_s0 = scalar_lea.hbm %s8339_s2, 16  ;;  %s6539_s15 = scalar_lea.hbm %s6924_s14, 32 }
0x149b   : > { %p6536_p12 = scmp.ne.s32.totalorder %s8339_s2, %s6535_s0  ;;  %p6540_p8 = scmp.lt.s32.totalorder %s8339_s2, %s6924_s14 }
0x149c   : > { %p6541_p11 = scmp.lt.s32.totalorder %s6539_s15, %s6535_s0 }
0x149d   : > { %p6537_p10 = pnand %p6536_p12, %p8778_p2 }
0x149e   : > { %p6542_p0 = por %p6541_p11, %p6540_p8 }
0x149f   : > { %p6538_p7 = pneg %p6537_p10 }
0x14a1   : > { %p6543_p1 = pnand %p6542_p0, %p6538_p7 }
0x14a3   : > { %6546 = shalt.err (!%p6543_p1)
}
0x14a4   : > { %5994 = dma.vmem_to_hbm [thread:$0]  (%p8778_p2), %s5209_s1, 16, %s8339_s2, %s5196_s3  }
0x14a5 PF: > { %s8779_s5 = sld [smem:[#allocation66_spill]] }
0x14a6   : > { %s8780_s8 = sld [smem:[#allocation64_spill]] }
0x14a7   : > { %s8781_s6 = sld [smem:[#allocation69_spill]] }
0x14ab   : > { %p6046_p3 = scmp.ge.s32.totalorder %s8779_s5, 2 }
0x14ac   : > { %s5220_s4 = sand.u32 1, %s8780_s8  }
0x14ad   : > { %p8782_p9 = scmp.ne.s32.totalorder %s8781_s6, 0  ;;  %s5221_s18 = scalar_lea.sflag [#allocation6], %s5220_s4 }
0x14af   : > { %p6025_p4 = pnand %p6046_p3, %p8782_p9 }
0x14b1   : > { %p6026_p13 = pneg %p6025_p4 }
0x14b3   : > { %6584 = dma.done.wait (%p6026_p13), %s5221_s18, 16  }
0x14b4   : > { %6586 = vsyncadd (%p6026_p13), %s5221_s18, 4294967280  ;;  %s8783_s22 = sld [smem:[#allocation67_spill]]  ;;  %s8786_s15 = smov %s6593_s16 }
0x14b5   : > { %s8784_s0 = sld [smem:[#allocation65_spill]] }
0x14b6   : > { %s8785_s18 = sld [smem:[#allocation68_spill]] }
0x14ba   : > { %p116_p5 = scmp.ge.s32.totalorder %s8783_s22, 4  }
0x14bb   : > { %s8787_s16 = smov %s8784_s0 }
0x14bc   :  { %118 = sbr.rel (!%p116_p5) target bundleno = 112 (0x70), region = 345 }
0x14c1   :  { %5225 = vsyncpa [#allocation5], 1 }
0x14c2   :  { %5227 = vsyncpa [#allocation5 + $0x1], 1 }
0x14c3   :  { %5228 = vsyncpa [#allocation8], 1 }
0x14c4   :  { %5229 = vsyncpa [#allocation11], 1 }
0x14c5   :  { %5230 = vsyncpa [#allocation14], 1 }
0x14c6   :  { %5231 = vsyncpa [#allocation17], 1 }
0x14c7   :  { %5232 = vsyncpa [#allocation6], 1 }
0x14c8   :  { %5234 = vsyncpa [#allocation6 + $0x1], 1 }

</bundles_post_ra>
